<compile_context>
chip_gen: v7x
topology: tpu7x:2x2x1
jax: 0.10.0
libtpu: 0.0.40
codegen_flags: <defaults>
</compile_context>

<pallas_src>
import functools

import jax
import jax.numpy as jnp
from jax.experimental import pallas as pl
from jax.experimental.pallas import tpu as pltpu


# ----------------------------------------------------------------------------
# In-kernel helpers
# ----------------------------------------------------------------------------
def _fill_padded(pad_ref, x, H, W):
    """Zero-pad `x` (H, W, C) by one pixel into the VMEM scratch `pad_ref`."""
    pad_ref[...] = jnp.zeros(pad_ref.shape, pad_ref.dtype)
    pad_ref[1:H + 1, 1:W + 1, :] = x.astype(pad_ref.dtype)


def _im2col(xpad, H, W):
    """(H+2, W+2, C) zero-padded tile -> (H*W, 9*C) patch matrix (K-fused)."""
    cols = [xpad[dy:dy + H, dx:dx + W, :]
            for dy in range(3) for dx in range(3)]
    patches = jnp.concatenate(cols, axis=-1)            # (H, W, 9*C)
    return patches.reshape(H * W, patches.shape[-1])


# ----------------------------------------------------------------------------
# Pallas kernels
# ----------------------------------------------------------------------------
def _conv3x3_kernel(x_ref, w_ref, b_ref, o_ref, xpad, *, H, W, relu):
    # x_ref: (H, W, Cin) bf16 | w_ref: (9*Cin, Cout) bf16 | b_ref: (1, Cout) f32
    _fill_padded(xpad, x_ref[...], H, W)
    p = _im2col(xpad[...], H, W)
    acc = jnp.dot(p, w_ref[...], preferred_element_type=jnp.float32)
    acc = acc + b_ref[...]
    if relu:
        acc = jnp.maximum(acc, 0.0)
    o_ref[...] = acc.reshape(H, W, o_ref.shape[-1]).astype(o_ref.dtype)


def _resblock_kernel(x_ref, w1_ref, b1_ref, w2_ref, b2_ref, o_ref,
                     xpad, ypad, *, H, W):
    # Fused residual block: identity + conv2(relu(conv1(x))), all in VMEM.
    C = x_ref.shape[-1]
    x = x_ref[...]
    _fill_padded(xpad, x, H, W)
    p1 = _im2col(xpad[...], H, W)
    y = jnp.dot(p1, w1_ref[...], preferred_element_type=jnp.float32)
    y = jnp.maximum(y + b1_ref[...], 0.0)
    _fill_padded(ypad, y.reshape(H, W, C), H, W)
    p2 = _im2col(ypad[...], H, W)
    z = jnp.dot(p2, w2_ref[...], preferred_element_type=jnp.float32)
    z = z + b2_ref[...]
    out = x.reshape(H * W, C).astype(jnp.float32) + z
    o_ref[...] = out.reshape(H, W, C).astype(o_ref.dtype)


def _conv_ho_kernel(x_ref, w_ref, b_ref, oh_ref, oo_ref, xpad, *, H, W, n_c):
    # conv_h (ReLU) and conv_o fused via Cout-concatenated weights.
    _fill_padded(xpad, x_ref[...], H, W)
    p = _im2col(xpad[...], H, W)
    acc = jnp.dot(p, w_ref[...], preferred_element_type=jnp.float32)
    acc = acc + b_ref[...]
    oh_ref[...] = (jnp.maximum(acc[:, :n_c], 0.0)
                   .reshape(H, W, n_c).astype(oh_ref.dtype))
    oo_ref[...] = (acc[:, n_c:]
                   .reshape(H, W, oo_ref.shape[-1]).astype(oo_ref.dtype))


# ----------------------------------------------------------------------------
# pallas_call wrappers
# ----------------------------------------------------------------------------
def _compiler_params():
    # "parallel" batch axis -> shards across the two TensorCores on v7x,
    # neutral on single-TC v5e/v6e.
    return pltpu.CompilerParams(dimension_semantics=("parallel",))


def conv3x3(x, w_packed, bias, *, relu):
    """3x3 conv, stride 1, pad 1.  x: (B,H,W,Cin); w_packed: (9*Cin, Cout)."""
    x = x.astype(jnp.bfloat16)
    B, H, W, Cin = x.shape
    K, Cout = w_packed.shape
    flops = 2 * B * H * W * K * Cout
    bytes_accessed = (x.size + w_packed.size + B * H * W * Cout) * 2 + bias.size * 4
    return pl.pallas_call(
        functools.partial(_conv3x3_kernel, H=H, W=W, relu=relu),
        out_shape=jax.ShapeDtypeStruct((B, H, W, Cout), jnp.bfloat16),
        grid=(B,),
        in_specs=[
            pl.BlockSpec((None, H, W, Cin), lambda b: (b, 0, 0, 0)),
            pl.BlockSpec((K, Cout), lambda b: (0, 0)),
            pl.BlockSpec((1, Cout), lambda b: (0, 0)),
        ],
        out_specs=pl.BlockSpec((None, H, W, Cout), lambda b: (b, 0, 0, 0)),
        scratch_shapes=[pltpu.VMEM((H + 2, W + 2, Cin), jnp.bfloat16)],
        compiler_params=_compiler_params(),
        cost_estimate=pl.CostEstimate(flops=flops, transcendentals=0,
                                      bytes_accessed=bytes_accessed),
    )(x, w_packed, bias)


def resblock(x, w1, b1, w2, b2):
    """Fused ResidualBlock_noBN: x + conv2(relu(conv1(x)))."""
    x = x.astype(jnp.bfloat16)
    B, H, W, C = x.shape
    K = 9 * C
    flops = 2 * 2 * B * H * W * K * C
    bytes_accessed = (2 * x.size + w1.size + w2.size) * 2 + (b1.size + b2.size) * 4
    return pl.pallas_call(
        functools.partial(_resblock_kernel, H=H, W=W),
        out_shape=jax.ShapeDtypeStruct((B, H, W, C), jnp.bfloat16),
        grid=(B,),
        in_specs=[
            pl.BlockSpec((None, H, W, C), lambda b: (b, 0, 0, 0)),
            pl.BlockSpec((K, C), lambda b: (0, 0)),
            pl.BlockSpec((1, C), lambda b: (0, 0)),
            pl.BlockSpec((K, C), lambda b: (0, 0)),
            pl.BlockSpec((1, C), lambda b: (0, 0)),
        ],
        out_specs=pl.BlockSpec((None, H, W, C), lambda b: (b, 0, 0, 0)),
        scratch_shapes=[pltpu.VMEM((H + 2, W + 2, C), jnp.bfloat16),
                        pltpu.VMEM((H + 2, W + 2, C), jnp.bfloat16)],
        compiler_params=_compiler_params(),
        cost_estimate=pl.CostEstimate(flops=flops, transcendentals=0,
                                      bytes_accessed=bytes_accessed),
    )(x, w1, b1, w2, b2)


def conv_ho(x, w_cat, b_cat, *, n_c):
    """Fused conv_h(+ReLU) / conv_o: one read of the trunk activation."""
    x = x.astype(jnp.bfloat16)
    B, H, W, C = x.shape
    K, Ctot = w_cat.shape
    c_o = Ctot - n_c
    flops = 2 * B * H * W * K * Ctot
    bytes_accessed = (x.size + w_cat.size) * 2 + (b_cat.size + B * H * W * Ctot) * 4
    return pl.pallas_call(
        functools.partial(_conv_ho_kernel, H=H, W=W, n_c=n_c),
        out_shape=(jax.ShapeDtypeStruct((B, H, W, n_c), jnp.float32),
                   jax.ShapeDtypeStruct((B, H, W, c_o), jnp.float32)),
        grid=(B,),
        in_specs=[
            pl.BlockSpec((None, H, W, C), lambda b: (b, 0, 0, 0)),
            pl.BlockSpec((K, Ctot), lambda b: (0, 0)),
            pl.BlockSpec((1, Ctot), lambda b: (0, 0)),
        ],
        out_specs=[
            pl.BlockSpec((None, H, W, n_c), lambda b: (b, 0, 0, 0)),
            pl.BlockSpec((None, H, W, c_o), lambda b: (b, 0, 0, 0)),
        ],
        scratch_shapes=[pltpu.VMEM((H + 2, W + 2, C), jnp.bfloat16)],
        compiler_params=_compiler_params(),
        cost_estimate=pl.CostEstimate(flops=flops, transcendentals=0,
                                      bytes_accessed=bytes_accessed),
    )(x, w_cat, b_cat)


# ----------------------------------------------------------------------------
# Plain-JAX glue (NHWC): pixel (un)shuffle, bilinear upsample, transposes
# ----------------------------------------------------------------------------
def nchw_to_nhwc(x):
    return jnp.transpose(x, (0, 2, 3, 1))


def nhwc_to_nchw(x):
    return jnp.transpose(x, (0, 3, 1, 2))


def pixel_shuffle_nhwc(x, r):
    # channel index = c*r*r + dy*r + dx   (matches torch.nn.functional.pixel_shuffle)
    B, H, W, Crr = x.shape
    C = Crr // (r * r)
    x = x.reshape(B, H, W, C, r, r)
    x = jnp.transpose(x, (0, 1, 4, 2, 5, 3))
    return x.reshape(B, H * r, W * r, C)


def pixel_unshuffle_nhwc(x, r):
    # inverse of the above; matches arch.py's pixel_unshuffle channel ordering
    B, Hs, Ws, C = x.shape
    H, W = Hs // r, Ws // r
    x = x.reshape(B, H, r, W, r, C)
    x = jnp.transpose(x, (0, 1, 3, 5, 2, 4))
    return x.reshape(B, H, W, C * r * r)


def bilinear_upsample_nhwc(x, s):
    # F.interpolate(..., scale_factor=s, mode='bilinear', align_corners=False)
    B, H, W, C = x.shape
    Ho, Wo = H * s, W * s

    def src_idx(out_size, in_size, sc):
        i = jnp.arange(out_size, dtype=jnp.float32)
        src = (i + 0.5) / sc - 0.5
        src = jnp.maximum(src, 0.0)
        i0 = jnp.minimum(jnp.floor(src).astype(jnp.int32), in_size - 1)
        i1 = jnp.minimum(i0 + 1, in_size - 1)
        lam = src - i0.astype(jnp.float32)
        return i0, i1, lam

    y0, y1, wy = src_idx(Ho, H, float(s))
    x0, x1, wx = src_idx(Wo, W, float(s))
    g00 = x[:, y0[:, None], x0[None, :], :]
    g01 = x[:, y0[:, None], x1[None, :], :]
    g10 = x[:, y1[:, None], x0[None, :], :]
    g11 = x[:, y1[:, None], x1[None, :], :]
    wy_ = wy[:, None, None]
    wx_ = wx[None, :, None]
    return (g00 * (1.0 - wy_) * (1.0 - wx_) + g01 * (1.0 - wy_) * wx_ +
            g10 * wy_ * (1.0 - wx_) + g11 * wy_ * wx_)


# ----------------------------------------------------------------------------
# Parameters (kaiming * 0.1, zero bias -- as in arch.py) packed for im2col
# ----------------------------------------------------------------------------
def _kaiming_conv(key, cin, cout, scale=0.1):
    fan_in = cin * 9
    std = (2.0 / fan_in) ** 0.5
    w = jax.random.normal(key, (3, 3, cin, cout), jnp.float32) * std * scale
    b = jnp.zeros((cout,), jnp.float32)
    return w, b


def _pack(w, b):
    kh, kw, cin, cout = w.shape
    wp = w.reshape(kh * kw * cin, cout).astype(jnp.bfloat16)   # (9*Cin, Cout)
    bp = b.reshape(1, cout).astype(jnp.float32)
    return wp, bp


def init_rrn_params(key, scale, n_c, n_b, rgb_type=True):
    chs = 3 if rgb_type else 1
    cin1 = scale ** 2 * chs + n_c + chs * 2
    keys = jax.random.split(key, 3 + 2 * n_b)
    params = {"conv1": _pack(*_kaiming_conv(keys[0], cin1, n_c))}
    trunk = []
    for i in range(n_b):
        w1, b1 = _kaiming_conv(keys[1 + 2 * i], n_c, n_c)
        w2, b2 = _kaiming_conv(keys[2 + 2 * i], n_c, n_c)
        trunk.append(_pack(w1, b1) + _pack(w2, b2))
    params["trunk"] = trunk
    wh, bh = _kaiming_conv(keys[1 + 2 * n_b], n_c, n_c)
    wo, bo = _kaiming_conv(keys[2 + 2 * n_b], n_c, scale ** 2 * chs)
    params["conv_ho"] = _pack(jnp.concatenate([wh, wo], axis=-1),
                              jnp.concatenate([bh, bo], axis=0))
    return params


# ----------------------------------------------------------------------------
# neuro + RRN forward
# ----------------------------------------------------------------------------
def neuro_forward(params, x_nhwc, h_nhwc, o_nhwc):
    n_c = h_nhwc.shape[-1]
    # channel order matches torch.cat((x, h, o), dim=1)
    t = jnp.concatenate([x_nhwc, h_nhwc, o_nhwc], axis=-1)
    w1, b1 = params["conv1"]
    t = conv3x3(t, w1, b1, relu=True)
    for (wa, ba, wb, bb) in params["trunk"]:
        t = resblock(t, wa, ba, wb, bb)
    who, bho = params["conv_ho"]
    x_h, x_o = conv_ho(t, who, bho, n_c=n_c)
    return x_h, x_o


def rrn_forward(params, x, x_h, x_o, init, scale):
    """One recurrent RRN step.

    x:    (B, chs, T, H, W) NCHW input frames (uses t=0, t=1)
    x_h:  (B, H, W, n_c)    NHWC recurrent hidden state (kept NHWC over time)
    x_o:  init=True  -> (B, H, W, scale^2*chs) NHWC low-res state
          init=False -> (B, chs, H*scale, W*scale) previous SR output (NCHW)
    returns (x_h_next NHWC, SR frame NCHW)
    """
    f1 = nchw_to_nhwc(x[:, :, 0])
    f2 = nchw_to_nhwc(x[:, :, 1])
    x_input = jnp.concatenate([f1, f2], axis=-1)
    if init:
        o_lr = x_o
    else:
        o_lr = pixel_unshuffle_nhwc(nchw_to_nhwc(x_o), scale)
    x_h, x_o_lr = neuro_forward(params, x_input, x_h, o_lr)
    sr = pixel_shuffle_nhwc(x_o_lr, scale) + bilinear_upsample_nhwc(f2, scale)
    return x_h, nhwc_to_nchw(sr)


# ----------------------------------------------------------------------------
if __name__ == "__main__":
    key = jax.random.PRNGKey(0)
    scale, n_c, n_b = 2, 32, 2
    B, chs, T, H, W = 2, 3, 2, 16, 16

    kp, kx = jax.random.split(key)
    params = init_rrn_params(kp, scale, n_c, n_b, rgb_type=True)

    x = jax.random.normal(kx, (B, chs, T, H, W), jnp.float32)
    x_h0 = jnp.zeros((B, H, W, n_c), jnp.float32)             # NHWC state
    x_o0 = jnp.zeros((B, H, W, scale ** 2 * chs), jnp.float32)  # NHWC low-res

    step = jax.jit(rrn_forward, static_argnames=("init", "scale"))

    # first (init) step
    x_h1, x_o1 = step(params, x, x_h0, x_o0, init=True, scale=scale)
    # recurrent step: previous high-res output is pixel-unshuffled
    x_h2, x_o2 = step(params, x, x_h1, x_o1, init=False, scale=scale)

    jax.block_until_ready((x_h2, x_o2))
    assert x_h2.shape == (B, H, W, n_c)
    assert x_o2.shape == (B, chs, H * scale, W * scale)
    assert bool(jnp.all(jnp.isfinite(x_o2)))
    print("KERNEL_OK")
</pallas_src>

<mosaic_0001>
module attributes {stable_mosaic.version = 11 : i64} {
  func.func @_conv3x3_kernel(%arg0: i32, %arg1: memref<1x16x16x50xbf16, #tpu.memory_space<vmem>>, %arg2: memref<450x32xbf16, #tpu.memory_space<vmem>>, %arg3: memref<1x32xf32, #tpu.memory_space<vmem>>, %arg4: memref<1x16x16x32xbf16, #tpu.memory_space<vmem>>, %arg5: memref<18x18x50xbf16, #tpu.memory_space<vmem>>) attributes {dimension_semantics = [#tpu.dimension_semantics<parallel>], iteration_bounds = array<i64: 2>, scalar_prefetch = 0 : i64, scratch_operands = 1 : i64, tpu.core_type = #tpu.core_type<tc>, window_params = [{transform_indices = @transform_0, window_bounds = array<i64: 1, 16, 16, 50>}, {pipeline_mode = #tpu.pipeline_mode<synchronous>, transform_indices = @transform_1, window_bounds = array<i64: 450, 32>}, {pipeline_mode = #tpu.pipeline_mode<synchronous>, transform_indices = @transform_2, window_bounds = array<i64: 1, 32>}, {transform_indices = @transform_3, window_bounds = array<i64: 1, 16, 16, 32>}]} {
    %c0 = arith.constant 0 : index
    %c0_0 = arith.constant 0 : index
    %c0_1 = arith.constant 0 : index
    %c0_2 = arith.constant 0 : index
    %0 = vector.load %arg1[%c0, %c0_0, %c0_1, %c0_2] : memref<1x16x16x50xbf16, #tpu.memory_space<vmem>>, vector<1x16x16x50xbf16>
    %1 = vector.shape_cast %0 : vector<1x16x16x50xbf16> to vector<16x16x50xbf16>
    %cst = arith.constant 0.000000e+00 : bf16
    %2 = vector.broadcast %cst : bf16 to vector<18x18x50xbf16>
    %c0_3 = arith.constant 0 : index
    %c0_4 = arith.constant 0 : index
    %c0_5 = arith.constant 0 : index
    %3 = vector.load %arg5[%c0_3, %c0_4, %c0_5] : memref<18x18x50xbf16, #tpu.memory_space<vmem>>, vector<18x18x50xbf16>
    tpu.vector_store %arg5[%c0_3, %c0_4, %c0_5], %2 {strides = array<i32>} : memref<18x18x50xbf16, #tpu.memory_space<vmem>>, vector<18x18x50xbf16>,
    %c1 = arith.constant 1 : index
    %c1_6 = arith.constant 1 : index
    %c0_7 = arith.constant 0 : index
    %4 = vector.load %arg5[%c1, %c1_6, %c0_7] : memref<18x18x50xbf16, #tpu.memory_space<vmem>>, vector<16x16x50xbf16>
    tpu.vector_store %arg5[%c1, %c1_6, %c0_7], %1 {strides = array<i32>} : memref<18x18x50xbf16, #tpu.memory_space<vmem>>, vector<16x16x50xbf16>,
    %c0_8 = arith.constant 0 : index
    %c0_9 = arith.constant 0 : index
    %c0_10 = arith.constant 0 : index
    %5 = vector.load %arg5[%c0_8, %c0_9, %c0_10] : memref<18x18x50xbf16, #tpu.memory_space<vmem>>, vector<18x18x50xbf16>
    %6 = vector.extract_strided_slice %5 {offsets = [0, 0, 0], sizes = [16, 16, 50], strides = [1, 1, 1]} : vector<18x18x50xbf16> to vector<16x16x50xbf16>
    %7 = vector.extract_strided_slice %5 {offsets = [0, 1, 0], sizes = [16, 16, 50], strides = [1, 1, 1]} : vector<18x18x50xbf16> to vector<16x16x50xbf16>
    %8 = vector.extract_strided_slice %5 {offsets = [0, 2, 0], sizes = [16, 16, 50], strides = [1, 1, 1]} : vector<18x18x50xbf16> to vector<16x16x50xbf16>
    %9 = vector.extract_strided_slice %5 {offsets = [1, 0, 0], sizes = [16, 16, 50], strides = [1, 1, 1]} : vector<18x18x50xbf16> to vector<16x16x50xbf16>
    %10 = vector.extract_strided_slice %5 {offsets = [1, 1, 0], sizes = [16, 16, 50], strides = [1, 1, 1]} : vector<18x18x50xbf16> to vector<16x16x50xbf16>
    %11 = vector.extract_strided_slice %5 {offsets = [1, 2, 0], sizes = [16, 16, 50], strides = [1, 1, 1]} : vector<18x18x50xbf16> to vector<16x16x50xbf16>
    %12 = vector.extract_strided_slice %5 {offsets = [2, 0, 0], sizes = [16, 16, 50], strides = [1, 1, 1]} : vector<18x18x50xbf16> to vector<16x16x50xbf16>
    %13 = vector.extract_strided_slice %5 {offsets = [2, 1, 0], sizes = [16, 16, 50], strides = [1, 1, 1]} : vector<18x18x50xbf16> to vector<16x16x50xbf16>
    %14 = vector.extract_strided_slice %5 {offsets = [2, 2, 0], sizes = [16, 16, 50], strides = [1, 1, 1]} : vector<18x18x50xbf16> to vector<16x16x50xbf16>
    %15 = tpu.concatenate %6, %7, %8, %9, %10, %11, %12, %13, %14 in 2 : vector<16x16x50xbf16>, vector<16x16x50xbf16>, vector<16x16x50xbf16>, vector<16x16x50xbf16>, vector<16x16x50xbf16>, vector<16x16x50xbf16>, vector<16x16x50xbf16>, vector<16x16x50xbf16>, vector<16x16x50xbf16> -> vector<16x16x450xbf16>
    %16 = vector.shape_cast %15 : vector<16x16x450xbf16> to vector<256x450xbf16>
    %c0_11 = arith.constant 0 : index
    %c0_12 = arith.constant 0 : index
    %17 = vector.load %arg2[%c0_11, %c0_12] : memref<450x32xbf16, #tpu.memory_space<vmem>>, vector<450x32xbf16>
    %cst_13 = arith.constant dense<0.000000e+00> : vector<256x32xf32>
    %18 = tpu.matmul %16, %17, %cst_13 {dimension_numbers = #tpu.dot_dimension_numbers<[1], [0], [0], [1], [0, 0, 1, 1], [], []>} : vector<256x450xbf16>, vector<450x32xbf16>, vector<256x32xf32> -> vector<256x32xf32>
    %c0_14 = arith.constant 0 : index
    %c0_15 = arith.constant 0 : index
    %19 = vector.load %arg3[%c0_14, %c0_15] : memref<1x32xf32, #tpu.memory_space<vmem>>, vector<1x32xf32>
    %20 = vector.broadcast %19 : vector<1x32xf32> to vector<256x32xf32>
    %21 = arith.addf %18, %20 : vector<256x32xf32>
    %cst_16 = arith.constant 0.000000e+00 : f32
    %22 = vector.broadcast %cst_16 : f32 to vector<256x32xf32>
    %23 = arith.maximumf %21, %22 : vector<256x32xf32>
    %24 = vector.shape_cast %23 : vector<256x32xf32> to vector<16x16x32xf32>
    %25 = arith.truncf %24 : vector<16x16x32xf32> to vector<16x16x32xbf16>
    %c0_17 = arith.constant 0 : index
    %c0_18 = arith.constant 0 : index
    %c0_19 = arith.constant 0 : index
    %c0_20 = arith.constant 0 : index
    %26 = vector.load %arg4[%c0_17, %c0_18, %c0_19, %c0_20] : memref<1x16x16x32xbf16, #tpu.memory_space<vmem>>, vector<1x16x16x32xbf16>
    %27 = vector.shape_cast %26 : vector<1x16x16x32xbf16> to vector<16x16x32xbf16>
    %28 = vector.shape_cast %25 : vector<16x16x32xbf16> to vector<1x16x16x32xbf16>
    tpu.vector_store %arg4[%c0_17, %c0_18, %c0_19, %c0_20], %28 {strides = array<i32>} : memref<1x16x16x32xbf16, #tpu.memory_space<vmem>>, vector<1x16x16x32xbf16>,
    return
  }
  func.func @transform_0(%arg0: i32) -> (i32, i32, i32, i32) {
    %c0_i32 = arith.constant 0 : i32
    %c0_i32_0 = arith.constant 0 : i32
    %c0_i32_1 = arith.constant 0 : i32
    %c0_i32_2 = arith.constant 0 : i32
    return %arg0, %c0_i32, %c0_i32_0, %c0_i32_1 : i32, i32, i32, i32
  }
  func.func @transform_1(%arg0: i32) -> (i32, i32) {
    %c0_i32 = arith.constant 0 : i32
    %c0_i32_0 = arith.constant 0 : i32
    %c0_i32_1 = arith.constant 0 : i32
    return %c0_i32, %c0_i32_0 : i32, i32
  }
  func.func @transform_2(%arg0: i32) -> (i32, i32) {
    %c0_i32 = arith.constant 0 : i32
    %c0_i32_0 = arith.constant 0 : i32
    %c0_i32_1 = arith.constant 0 : i32
    return %c0_i32, %c0_i32_0 : i32, i32
  }
  func.func @transform_3(%arg0: i32) -> (i32, i32, i32, i32) {
    %c0_i32 = arith.constant 0 : i32
    %c0_i32_0 = arith.constant 0 : i32
    %c0_i32_1 = arith.constant 0 : i32
    %c0_i32_2 = arith.constant 0 : i32
    return %arg0, %c0_i32, %c0_i32_0, %c0_i32_1 : i32, i32, i32, i32
  }
}

module attributes {stable_mosaic.version = 11 : i64} {
  func.func @_resblock_kernel(%arg0: i32, %arg1: memref<1x16x16x32xbf16, #tpu.memory_space<vmem>>, %arg2: memref<288x32xbf16, #tpu.memory_space<vmem>>, %arg3: memref<1x32xf32, #tpu.memory_space<vmem>>, %arg4: memref<288x32xbf16, #tpu.memory_space<vmem>>, %arg5: memref<1x32xf32, #tpu.memory_space<vmem>>, %arg6: memref<1x16x16x32xbf16, #tpu.memory_space<vmem>>, %arg7: memref<18x18x32xbf16, #tpu.memory_space<vmem>>, %arg8: memref<18x18x32xbf16, #tpu.memory_space<vmem>>) attributes {dimension_semantics = [#tpu.dimension_semantics<parallel>], iteration_bounds = array<i64: 2>, scalar_prefetch = 0 : i64, scratch_operands = 2 : i64, tpu.core_type = #tpu.core_type<tc>, window_params = [{transform_indices = @transform_0, window_bounds = array<i64: 1, 16, 16, 32>}, {pipeline_mode = #tpu.pipeline_mode<synchronous>, transform_indices = @transform_1, window_bounds = array<i64: 288, 32>}, {pipeline_mode = #tpu.pipeline_mode<synchronous>, transform_indices = @transform_2, window_bounds = array<i64: 1, 32>}, {pipeline_mode = #tpu.pipeline_mode<synchronous>, transform_indices = @transform_3, window_bounds = array<i64: 288, 32>}, {pipeline_mode = #tpu.pipeline_mode<synchronous>, transform_indices = @transform_4, window_bounds = array<i64: 1, 32>}, {transform_indices = @transform_5, window_bounds = array<i64: 1, 16, 16, 32>}]} {
    %c0 = arith.constant 0 : index
    %c0_0 = arith.constant 0 : index
    %c0_1 = arith.constant 0 : index
    %c0_2 = arith.constant 0 : index
    %0 = vector.load %arg1[%c0, %c0_0, %c0_1, %c0_2] : memref<1x16x16x32xbf16, #tpu.memory_space<vmem>>, vector<1x16x16x32xbf16>
    %1 = vector.shape_cast %0 : vector<1x16x16x32xbf16> to vector<16x16x32xbf16>
    %cst = arith.constant 0.000000e+00 : bf16
    %2 = vector.broadcast %cst : bf16 to vector<18x18x32xbf16>
    %c0_3 = arith.constant 0 : index
    %c0_4 = arith.constant 0 : index
    %c0_5 = arith.constant 0 : index
    %3 = vector.load %arg7[%c0_3, %c0_4, %c0_5] : memref<18x18x32xbf16, #tpu.memory_space<vmem>>, vector<18x18x32xbf16>
    tpu.vector_store %arg7[%c0_3, %c0_4, %c0_5], %2 {strides = array<i32>} : memref<18x18x32xbf16, #tpu.memory_space<vmem>>, vector<18x18x32xbf16>,
    %c1 = arith.constant 1 : index
    %c1_6 = arith.constant 1 : index
    %c0_7 = arith.constant 0 : index
    %4 = vector.load %arg7[%c1, %c1_6, %c0_7] : memref<18x18x32xbf16, #tpu.memory_space<vmem>>, vector<16x16x32xbf16>
    tpu.vector_store %arg7[%c1, %c1_6, %c0_7], %1 {strides = array<i32>} : memref<18x18x32xbf16, #tpu.memory_space<vmem>>, vector<16x16x32xbf16>,
    %c0_8 = arith.constant 0 : index
    %c0_9 = arith.constant 0 : index
    %c0_10 = arith.constant 0 : index
    %5 = vector.load %arg7[%c0_8, %c0_9, %c0_10] : memref<18x18x32xbf16, #tpu.memory_space<vmem>>, vector<18x18x32xbf16>
    %6 = vector.extract_strided_slice %5 {offsets = [0, 0, 0], sizes = [16, 16, 32], strides = [1, 1, 1]} : vector<18x18x32xbf16> to vector<16x16x32xbf16>
    %7 = vector.extract_strided_slice %5 {offsets = [0, 1, 0], sizes = [16, 16, 32], strides = [1, 1, 1]} : vector<18x18x32xbf16> to vector<16x16x32xbf16>
    %8 = vector.extract_strided_slice %5 {offsets = [0, 2, 0], sizes = [16, 16, 32], strides = [1, 1, 1]} : vector<18x18x32xbf16> to vector<16x16x32xbf16>
    %9 = vector.extract_strided_slice %5 {offsets = [1, 0, 0], sizes = [16, 16, 32], strides = [1, 1, 1]} : vector<18x18x32xbf16> to vector<16x16x32xbf16>
    %10 = vector.extract_strided_slice %5 {offsets = [1, 1, 0], sizes = [16, 16, 32], strides = [1, 1, 1]} : vector<18x18x32xbf16> to vector<16x16x32xbf16>
    %11 = vector.extract_strided_slice %5 {offsets = [1, 2, 0], sizes = [16, 16, 32], strides = [1, 1, 1]} : vector<18x18x32xbf16> to vector<16x16x32xbf16>
    %12 = vector.extract_strided_slice %5 {offsets = [2, 0, 0], sizes = [16, 16, 32], strides = [1, 1, 1]} : vector<18x18x32xbf16> to vector<16x16x32xbf16>
    %13 = vector.extract_strided_slice %5 {offsets = [2, 1, 0], sizes = [16, 16, 32], strides = [1, 1, 1]} : vector<18x18x32xbf16> to vector<16x16x32xbf16>
    %14 = vector.extract_strided_slice %5 {offsets = [2, 2, 0], sizes = [16, 16, 32], strides = [1, 1, 1]} : vector<18x18x32xbf16> to vector<16x16x32xbf16>
    %15 = tpu.concatenate %6, %7, %8, %9, %10, %11, %12, %13, %14 in 2 : vector<16x16x32xbf16>, vector<16x16x32xbf16>, vector<16x16x32xbf16>, vector<16x16x32xbf16>, vector<16x16x32xbf16>, vector<16x16x32xbf16>, vector<16x16x32xbf16>, vector<16x16x32xbf16>, vector<16x16x32xbf16> -> vector<16x16x288xbf16>
    %16 = vector.shape_cast %15 : vector<16x16x288xbf16> to vector<256x288xbf16>
    %c0_11 = arith.constant 0 : index
    %c0_12 = arith.constant 0 : index
    %17 = vector.load %arg2[%c0_11, %c0_12] : memref<288x32xbf16, #tpu.memory_space<vmem>>, vector<288x32xbf16>
    %cst_13 = arith.constant dense<0.000000e+00> : vector<256x32xf32>
    %18 = tpu.matmul %16, %17, %cst_13 {dimension_numbers = #tpu.dot_dimension_numbers<[1], [0], [0], [1], [0, 0, 1, 1], [], []>} : vector<256x288xbf16>, vector<288x32xbf16>, vector<256x32xf32> -> vector<256x32xf32>
    %c0_14 = arith.constant 0 : index
    %c0_15 = arith.constant 0 : index
    %19 = vector.load %arg3[%c0_14, %c0_15] : memref<1x32xf32, #tpu.memory_space<vmem>>, vector<1x32xf32>
    %20 = vector.broadcast %19 : vector<1x32xf32> to vector<256x32xf32>
    %21 = arith.addf %18, %20 : vector<256x32xf32>
    %cst_16 = arith.constant 0.000000e+00 : f32
    %22 = vector.broadcast %cst_16 : f32 to vector<256x32xf32>
    %23 = arith.maximumf %21, %22 : vector<256x32xf32>
    %24 = vector.shape_cast %23 : vector<256x32xf32> to vector<16x16x32xf32>
    %cst_17 = arith.constant 0.000000e+00 : bf16
    %25 = vector.broadcast %cst_17 : bf16 to vector<18x18x32xbf16>
    %c0_18 = arith.constant 0 : index
    %c0_19 = arith.constant 0 : index
    %c0_20 = arith.constant 0 : index
    %26 = vector.load %arg8[%c0_18, %c0_19, %c0_20] : memref<18x18x32xbf16, #tpu.memory_space<vmem>>, vector<18x18x32xbf16>
    tpu.vector_store %arg8[%c0_18, %c0_19, %c0_20], %25 {strides = array<i32>} : memref<18x18x32xbf16, #tpu.memory_space<vmem>>, vector<18x18x32xbf16>,
    %27 = arith.truncf %24 : vector<16x16x32xf32> to vector<16x16x32xbf16>
    %c1_21 = arith.constant 1 : index
    %c1_22 = arith.constant 1 : index
    %c0_23 = arith.constant 0 : index
    %28 = vector.load %arg8[%c1_21, %c1_22, %c0_23] : memref<18x18x32xbf16, #tpu.memory_space<vmem>>, vector<16x16x32xbf16>
    tpu.vector_store %arg8[%c1_21, %c1_22, %c0_23], %27 {strides = array<i32>} : memref<18x18x32xbf16, #tpu.memory_space<vmem>>, vector<16x16x32xbf16>,
    %c0_24 = arith.constant 0 : index
    %c0_25 = arith.constant 0 : index
    %c0_26 = arith.constant 0 : index
    %29 = vector.load %arg8[%c0_24, %c0_25, %c0_26] : memref<18x18x32xbf16, #tpu.memory_space<vmem>>, vector<18x18x32xbf16>
    %30 = vector.extract_strided_slice %29 {offsets = [0, 0, 0], sizes = [16, 16, 32], strides = [1, 1, 1]} : vector<18x18x32xbf16> to vector<16x16x32xbf16>
    %31 = vector.extract_strided_slice %29 {offsets = [0, 1, 0], sizes = [16, 16, 32], strides = [1, 1, 1]} : vector<18x18x32xbf16> to vector<16x16x32xbf16>
    %32 = vector.extract_strided_slice %29 {offsets = [0, 2, 0], sizes = [16, 16, 32], strides = [1, 1, 1]} : vector<18x18x32xbf16> to vector<16x16x32xbf16>
    %33 = vector.extract_strided_slice %29 {offsets = [1, 0, 0], sizes = [16, 16, 32], strides = [1, 1, 1]} : vector<18x18x32xbf16> to vector<16x16x32xbf16>
    %34 = vector.extract_strided_slice %29 {offsets = [1, 1, 0], sizes = [16, 16, 32], strides = [1, 1, 1]} : vector<18x18x32xbf16> to vector<16x16x32xbf16>
    %35 = vector.extract_strided_slice %29 {offsets = [1, 2, 0], sizes = [16, 16, 32], strides = [1, 1, 1]} : vector<18x18x32xbf16> to vector<16x16x32xbf16>
    %36 = vector.extract_strided_slice %29 {offsets = [2, 0, 0], sizes = [16, 16, 32], strides = [1, 1, 1]} : vector<18x18x32xbf16> to vector<16x16x32xbf16>
    %37 = vector.extract_strided_slice %29 {offsets = [2, 1, 0], sizes = [16, 16, 32], strides = [1, 1, 1]} : vector<18x18x32xbf16> to vector<16x16x32xbf16>
    %38 = vector.extract_strided_slice %29 {offsets = [2, 2, 0], sizes = [16, 16, 32], strides = [1, 1, 1]} : vector<18x18x32xbf16> to vector<16x16x32xbf16>
    %39 = tpu.concatenate %30, %31, %32, %33, %34, %35, %36, %37, %38 in 2 : vector<16x16x32xbf16>, vector<16x16x32xbf16>, vector<16x16x32xbf16>, vector<16x16x32xbf16>, vector<16x16x32xbf16>, vector<16x16x32xbf16>, vector<16x16x32xbf16>, vector<16x16x32xbf16>, vector<16x16x32xbf16> -> vector<16x16x288xbf16>
    %40 = vector.shape_cast %39 : vector<16x16x288xbf16> to vector<256x288xbf16>
    %c0_27 = arith.constant 0 : index
    %c0_28 = arith.constant 0 : index
    %41 = vector.load %arg4[%c0_27, %c0_28] : memref<288x32xbf16, #tpu.memory_space<vmem>>, vector<288x32xbf16>
    %cst_29 = arith.constant dense<0.000000e+00> : vector<256x32xf32>
    %42 = tpu.matmul %40, %41, %cst_29 {dimension_numbers = #tpu.dot_dimension_numbers<[1], [0], [0], [1], [0, 0, 1, 1], [], []>} : vector<256x288xbf16>, vector<288x32xbf16>, vector<256x32xf32> -> vector<256x32xf32>
    %c0_30 = arith.constant 0 : index
    %c0_31 = arith.constant 0 : index
    %43 = vector.load %arg5[%c0_30, %c0_31] : memref<1x32xf32, #tpu.memory_space<vmem>>, vector<1x32xf32>
    %44 = vector.broadcast %43 : vector<1x32xf32> to vector<256x32xf32>
    %45 = arith.addf %42, %44 : vector<256x32xf32>
    %46 = vector.shape_cast %1 : vector<16x16x32xbf16> to vector<256x32xbf16>
    %47 = arith.extf %46 : vector<256x32xbf16> to vector<256x32xf32>
    %48 = arith.addf %47, %45 : vector<256x32xf32>
    %49 = vector.shape_cast %48 : vector<256x32xf32> to vector<16x16x32xf32>
    %50 = arith.truncf %49 : vector<16x16x32xf32> to vector<16x16x32xbf16>
    %c0_32 = arith.constant 0 : index
    %c0_33 = arith.constant 0 : index
    %c0_34 = arith.constant 0 : index
    %c0_35 = arith.constant 0 : index
    %51 = vector.load %arg6[%c0_32, %c0_33, %c0_34, %c0_35] : memref<1x16x16x32xbf16, #tpu.memory_space<vmem>>, vector<1x16x16x32xbf16>
    %52 = vector.shape_cast %51 : vector<1x16x16x32xbf16> to vector<16x16x32xbf16>
    %53 = vector.shape_cast %50 : vector<16x16x32xbf16> to vector<1x16x16x32xbf16>
    tpu.vector_store %arg6[%c0_32, %c0_33, %c0_34, %c0_35], %53 {strides = array<i32>} : memref<1x16x16x32xbf16, #tpu.memory_space<vmem>>, vector<1x16x16x32xbf16>,
    return
  }
  func.func @transform_0(%arg0: i32) -> (i32, i32, i32, i32) {
    %c0_i32 = arith.constant 0 : i32
    %c0_i32_0 = arith.constant 0 : i32
    %c0_i32_1 = arith.constant 0 : i32
    %c0_i32_2 = arith.constant 0 : i32
    return %arg0, %c0_i32, %c0_i32_0, %c0_i32_1 : i32, i32, i32, i32
  }
  func.func @transform_1(%arg0: i32) -> (i32, i32) {
    %c0_i32 = arith.constant 0 : i32
    %c0_i32_0 = arith.constant 0 : i32
    %c0_i32_1 = arith.constant 0 : i32
    return %c0_i32, %c0_i32_0 : i32, i32
  }
  func.func @transform_2(%arg0: i32) -> (i32, i32) {
    %c0_i32 = arith.constant 0 : i32
    %c0_i32_0 = arith.constant 0 : i32
    %c0_i32_1 = arith.constant 0 : i32
    return %c0_i32, %c0_i32_0 : i32, i32
  }
  func.func @transform_3(%arg0: i32) -> (i32, i32) {
    %c0_i32 = arith.constant 0 : i32
    %c0_i32_0 = arith.constant 0 : i32
    %c0_i32_1 = arith.constant 0 : i32
    return %c0_i32, %c0_i32_0 : i32, i32
  }
  func.func @transform_4(%arg0: i32) -> (i32, i32) {
    %c0_i32 = arith.constant 0 : i32
    %c0_i32_0 = arith.constant 0 : i32
    %c0_i32_1 = arith.constant 0 : i32
    return %c0_i32, %c0_i32_0 : i32, i32
  }
  func.func @transform_5(%arg0: i32) -> (i32, i32, i32, i32) {
    %c0_i32 = arith.constant 0 : i32
    %c0_i32_0 = arith.constant 0 : i32
    %c0_i32_1 = arith.constant 0 : i32
    %c0_i32_2 = arith.constant 0 : i32
    return %arg0, %c0_i32, %c0_i32_0, %c0_i32_1 : i32, i32, i32, i32
  }
}

module attributes {stable_mosaic.version = 11 : i64} {
  func.func @_conv_ho_kernel(%arg0: i32, %arg1: memref<1x16x16x32xbf16, #tpu.memory_space<vmem>>, %arg2: memref<288x44xbf16, #tpu.memory_space<vmem>>, %arg3: memref<1x44xf32, #tpu.memory_space<vmem>>, %arg4: memref<1x16x16x32xf32, #tpu.memory_space<vmem>>, %arg5: memref<1x16x16x12xf32, #tpu.memory_space<vmem>>, %arg6: memref<18x18x32xbf16, #tpu.memory_space<vmem>>) attributes {dimension_semantics = [#tpu.dimension_semantics<parallel>], iteration_bounds = array<i64: 2>, scalar_prefetch = 0 : i64, scratch_operands = 1 : i64, tpu.core_type = #tpu.core_type<tc>, window_params = [{transform_indices = @transform_0, window_bounds = array<i64: 1, 16, 16, 32>}, {pipeline_mode = #tpu.pipeline_mode<synchronous>, transform_indices = @transform_1, window_bounds = array<i64: 288, 44>}, {pipeline_mode = #tpu.pipeline_mode<synchronous>, transform_indices = @transform_2, window_bounds = array<i64: 1, 44>}, {transform_indices = @transform_3, window_bounds = array<i64: 1, 16, 16, 32>}, {transform_indices = @transform_4, window_bounds = array<i64: 1, 16, 16, 12>}]} {
    %c0 = arith.constant 0 : index
    %c0_0 = arith.constant 0 : index
    %c0_1 = arith.constant 0 : index
    %c0_2 = arith.constant 0 : index
    %0 = vector.load %arg1[%c0, %c0_0, %c0_1, %c0_2] : memref<1x16x16x32xbf16, #tpu.memory_space<vmem>>, vector<1x16x16x32xbf16>
    %1 = vector.shape_cast %0 : vector<1x16x16x32xbf16> to vector<16x16x32xbf16>
    %cst = arith.constant 0.000000e+00 : bf16
    %2 = vector.broadcast %cst : bf16 to vector<18x18x32xbf16>
    %c0_3 = arith.constant 0 : index
    %c0_4 = arith.constant 0 : index
    %c0_5 = arith.constant 0 : index
    %3 = vector.load %arg6[%c0_3, %c0_4, %c0_5] : memref<18x18x32xbf16, #tpu.memory_space<vmem>>, vector<18x18x32xbf16>
    tpu.vector_store %arg6[%c0_3, %c0_4, %c0_5], %2 {strides = array<i32>} : memref<18x18x32xbf16, #tpu.memory_space<vmem>>, vector<18x18x32xbf16>,
    %c1 = arith.constant 1 : index
    %c1_6 = arith.constant 1 : index
    %c0_7 = arith.constant 0 : index
    %4 = vector.load %arg6[%c1, %c1_6, %c0_7] : memref<18x18x32xbf16, #tpu.memory_space<vmem>>, vector<16x16x32xbf16>
    tpu.vector_store %arg6[%c1, %c1_6, %c0_7], %1 {strides = array<i32>} : memref<18x18x32xbf16, #tpu.memory_space<vmem>>, vector<16x16x32xbf16>,
    %c0_8 = arith.constant 0 : index
    %c0_9 = arith.constant 0 : index
    %c0_10 = arith.constant 0 : index
    %5 = vector.load %arg6[%c0_8, %c0_9, %c0_10] : memref<18x18x32xbf16, #tpu.memory_space<vmem>>, vector<18x18x32xbf16>
    %6 = vector.extract_strided_slice %5 {offsets = [0, 0, 0], sizes = [16, 16, 32], strides = [1, 1, 1]} : vector<18x18x32xbf16> to vector<16x16x32xbf16>
    %7 = vector.extract_strided_slice %5 {offsets = [0, 1, 0], sizes = [16, 16, 32], strides = [1, 1, 1]} : vector<18x18x32xbf16> to vector<16x16x32xbf16>
    %8 = vector.extract_strided_slice %5 {offsets = [0, 2, 0], sizes = [16, 16, 32], strides = [1, 1, 1]} : vector<18x18x32xbf16> to vector<16x16x32xbf16>
    %9 = vector.extract_strided_slice %5 {offsets = [1, 0, 0], sizes = [16, 16, 32], strides = [1, 1, 1]} : vector<18x18x32xbf16> to vector<16x16x32xbf16>
    %10 = vector.extract_strided_slice %5 {offsets = [1, 1, 0], sizes = [16, 16, 32], strides = [1, 1, 1]} : vector<18x18x32xbf16> to vector<16x16x32xbf16>
    %11 = vector.extract_strided_slice %5 {offsets = [1, 2, 0], sizes = [16, 16, 32], strides = [1, 1, 1]} : vector<18x18x32xbf16> to vector<16x16x32xbf16>
    %12 = vector.extract_strided_slice %5 {offsets = [2, 0, 0], sizes = [16, 16, 32], strides = [1, 1, 1]} : vector<18x18x32xbf16> to vector<16x16x32xbf16>
    %13 = vector.extract_strided_slice %5 {offsets = [2, 1, 0], sizes = [16, 16, 32], strides = [1, 1, 1]} : vector<18x18x32xbf16> to vector<16x16x32xbf16>
    %14 = vector.extract_strided_slice %5 {offsets = [2, 2, 0], sizes = [16, 16, 32], strides = [1, 1, 1]} : vector<18x18x32xbf16> to vector<16x16x32xbf16>
    %15 = tpu.concatenate %6, %7, %8, %9, %10, %11, %12, %13, %14 in 2 : vector<16x16x32xbf16>, vector<16x16x32xbf16>, vector<16x16x32xbf16>, vector<16x16x32xbf16>, vector<16x16x32xbf16>, vector<16x16x32xbf16>, vector<16x16x32xbf16>, vector<16x16x32xbf16>, vector<16x16x32xbf16> -> vector<16x16x288xbf16>
    %16 = vector.shape_cast %15 : vector<16x16x288xbf16> to vector<256x288xbf16>
    %c0_11 = arith.constant 0 : index
    %c0_12 = arith.constant 0 : index
    %17 = vector.load %arg2[%c0_11, %c0_12] : memref<288x44xbf16, #tpu.memory_space<vmem>>, vector<288x44xbf16>
    %cst_13 = arith.constant dense<0.000000e+00> : vector<256x44xf32>
    %18 = tpu.matmul %16, %17, %cst_13 {dimension_numbers = #tpu.dot_dimension_numbers<[1], [0], [0], [1], [0, 0, 1, 1], [], []>} : vector<256x288xbf16>, vector<288x44xbf16>, vector<256x44xf32> -> vector<256x44xf32>
    %c0_14 = arith.constant 0 : index
    %c0_15 = arith.constant 0 : index
    %19 = vector.load %arg3[%c0_14, %c0_15] : memref<1x44xf32, #tpu.memory_space<vmem>>, vector<1x44xf32>
    %20 = vector.broadcast %19 : vector<1x44xf32> to vector<256x44xf32>
    %21 = arith.addf %18, %20 : vector<256x44xf32>
    %22 = vector.extract_strided_slice %21 {offsets = [0, 0], sizes = [256, 32], strides = [1, 1]} : vector<256x44xf32> to vector<256x32xf32>
    %cst_16 = arith.constant 0.000000e+00 : f32
    %23 = vector.broadcast %cst_16 : f32 to vector<256x32xf32>
    %24 = arith.maximumf %22, %23 : vector<256x32xf32>
    %25 = vector.shape_cast %24 : vector<256x32xf32> to vector<16x16x32xf32>
    %c0_17 = arith.constant 0 : index
    %c0_18 = arith.constant 0 : index
    %c0_19 = arith.constant 0 : index
    %c0_20 = arith.constant 0 : index
    %26 = vector.load %arg4[%c0_17, %c0_18, %c0_19, %c0_20] : memref<1x16x16x32xf32, #tpu.memory_space<vmem>>, vector<1x16x16x32xf32>
    %27 = vector.shape_cast %26 : vector<1x16x16x32xf32> to vector<16x16x32xf32>
    %28 = vector.shape_cast %25 : vector<16x16x32xf32> to vector<1x16x16x32xf32>
    tpu.vector_store %arg4[%c0_17, %c0_18, %c0_19, %c0_20], %28 {strides = array<i32>} : memref<1x16x16x32xf32, #tpu.memory_space<vmem>>, vector<1x16x16x32xf32>,
    %29 = vector.extract_strided_slice %21 {offsets = [0, 32], sizes = [256, 12], strides = [1, 1]} : vector<256x44xf32> to vector<256x12xf32>
    %30 = vector.shape_cast %29 : vector<256x12xf32> to vector<16x16x12xf32>
    %c0_21 = arith.constant 0 : index
    %c0_22 = arith.constant 0 : index
    %c0_23 = arith.constant 0 : index
    %c0_24 = arith.constant 0 : index
    %31 = vector.load %arg5[%c0_21, %c0_22, %c0_23, %c0_24] : memref<1x16x16x12xf32, #tpu.memory_space<vmem>>, vector<1x16x16x12xf32>
    %32 = vector.shape_cast %31 : vector<1x16x16x12xf32> to vector<16x16x12xf32>
    %33 = vector.shape_cast %30 : vector<16x16x12xf32> to vector<1x16x16x12xf32>
    tpu.vector_store %arg5[%c0_21, %c0_22, %c0_23, %c0_24], %33 {strides = array<i32>} : memref<1x16x16x12xf32, #tpu.memory_space<vmem>>, vector<1x16x16x12xf32>,
    return
  }
  func.func @transform_0(%arg0: i32) -> (i32, i32, i32, i32) {
    %c0_i32 = arith.constant 0 : i32
    %c0_i32_0 = arith.constant 0 : i32
    %c0_i32_1 = arith.constant 0 : i32
    %c0_i32_2 = arith.constant 0 : i32
    return %arg0, %c0_i32, %c0_i32_0, %c0_i32_1 : i32, i32, i32, i32
  }
  func.func @transform_1(%arg0: i32) -> (i32, i32) {
    %c0_i32 = arith.constant 0 : i32
    %c0_i32_0 = arith.constant 0 : i32
    %c0_i32_1 = arith.constant 0 : i32
    return %c0_i32, %c0_i32_0 : i32, i32
  }
  func.func @transform_2(%arg0: i32) -> (i32, i32) {
    %c0_i32 = arith.constant 0 : i32
    %c0_i32_0 = arith.constant 0 : i32
    %c0_i32_1 = arith.constant 0 : i32
    return %c0_i32, %c0_i32_0 : i32, i32
  }
  func.func @transform_3(%arg0: i32) -> (i32, i32, i32, i32) {
    %c0_i32 = arith.constant 0 : i32
    %c0_i32_0 = arith.constant 0 : i32
    %c0_i32_1 = arith.constant 0 : i32
    %c0_i32_2 = arith.constant 0 : i32
    return %arg0, %c0_i32, %c0_i32_0, %c0_i32_1 : i32, i32, i32, i32
  }
  func.func @transform_4(%arg0: i32) -> (i32, i32, i32, i32) {
    %c0_i32 = arith.constant 0 : i32
    %c0_i32_0 = arith.constant 0 : i32
    %c0_i32_1 = arith.constant 0 : i32
    %c0_i32_2 = arith.constant 0 : i32
    return %arg0, %c0_i32, %c0_i32_0, %c0_i32_1 : i32, i32, i32, i32
  }
}

</mosaic_0001>

<bundles_post_ra>
// kernel: rrn_forward.4
= control target key start
LH: loop header
LB: loop body
LE: loop exit
PB: predicated region body
PF: predicated region fallthrough
CT: control target
= control target key end

     0   :  { %s3011_s12 = smov 0   ;;  %s4073_s0 = inlined_call_operand.vmem [shape: bf16[2,16,16,50], index: 0, kind: input, shape index: {}]   ;;  %s4074_s1 = inlined_call_operand.vmem [shape: bf16[450,32], index: 1, kind: input, shape index: {}]   ;;  %s4075_s2 = inlined_call_operand.vmem [shape: f32[1,32], index: 2, kind: input, shape index: {}]   ;;  %s4076_s3 = inlined_call_operand.vmem [shape: bf16[2,16,16,32], index: 3, kind: output, shape index: {}]  }
   0x1 LB: > { %s2581_s13 = sadd.s32 4294967295, %s2980_s12   ;;  %p2585_p0 = scmp.ge.s32.totalorder %s2980_s12, 1  ;;  %s2980_s12 = sphi %s3011_s12, %s13_s12  }
   0x2   : > { %p137_p1 = scmp.lt.s32.totalorder %s2980_s12, 3 }
   0x4   : > { %p138_p2 = pnand %p2585_p0, %p137_p1 }
   0x5   : > { %vm204_vm0 = vcmask (!%p138_p2), 404480   ;;  %vm207_vm1 = vcmask (!%p138_p2), 401408   ;;  %v2982_v0 = vmov (!%p138_p2), 0   ;;  %p161_p3 = scmp.lt.s32.totalorder (!%p138_p2), %s2581_s13, 1  ;;  %v2911_v1 = vld [vmem:[%s4074_s1 + $0x80] sm:$0xff] (!%p138_p2)   ;;  %v2913_v2 = vld [vmem:[%s4074_s1 + $0x88] sm:$0xff] (!%p138_p2)  }
   0x6   : > { %141 = sbr.rel (%p138_p2) target bundleno = 634 (0x27a), region = 32  ;;  %205 = vst.msk [vmem:[#allocation2] sm:$0xf] (!%p138_p2), %vm204_vm0, %v2982_v0  ;;  %206 = vst.msk [vmem:[#allocation2 + $0x4] sm:$0xf] (!%p138_p2), %vm204_vm0, %v2982_v0  ;;  %2852 = vmatprep.subr.bf16.mxu1 (!%p138_p2), %v2982_v0  ;;  %v2915_v3 = vld [vmem:[%s4074_s1 + $0x40] sm:$0xff] (!%p138_p2)  }
   0x7   : > { %208 = vst.msk [vmem:[#allocation2 + $0x8] sm:$0x1] (!%p138_p2), %vm207_vm1, %v2982_v0  ;;  %211 = vst.msk [vmem:[#allocation2 + $0x14] sm:$0x1] (!%p138_p2), %vm207_vm1, %v2982_v0  ;;  %vm260_vm2 = vsmask.f32 (!%p138_p2), 256  ;;  %2865 = vmatpush1.bf16.msra.mxu1 (!%p138_p2), %v2911_v1  ;;  %2740 = vmatprep.subr.bf16.mxu0 (!%p138_p2), %v2915_v3 }
   0x8   : > { %209 = vst.msk [vmem:[#allocation2 + $0xc] sm:$0xf] (!%p138_p2), %vm204_vm0, %v2982_v0  ;;  %210 = vst.msk [vmem:[#allocation2 + $0x10] sm:$0xf] (!%p138_p2), %vm204_vm0, %v2982_v0  ;;  %vm261_vm3 = vsmask.f32 (!%p138_p2), 4368  ;;  %2853 = vmatprep.subr.bf16.mxu1 (!%p138_p2), %v2982_v0 }
   0x9   : > { %212 = vst.msk [vmem:[#allocation2 + $0x18] sm:$0xf] (!%p138_p2), %vm204_vm0, %v2982_v0  ;;  %213 = vst.msk [vmem:[#allocation2 + $0x1c] sm:$0xf] (!%p138_p2), %vm204_vm0, %v2982_v0  ;;  %vm585_vm4 = vsmask.f32 (!%p138_p2), 7938 }
   0xa   : > { %214 = vst.msk [vmem:[#allocation2 + $0x20] sm:$0x1] (!%p138_p2), %vm207_vm1, %v2982_v0  ;;  %217 = vst.msk [vmem:[#allocation2 + $0x2c] sm:$0x1] (!%p138_p2), %vm207_vm1, %v2982_v0  ;;  %vm883_vm5 = vsmask.f32 (!%p138_p2), 7424 }
   0xb   : > { %215 = vst.msk [vmem:[#allocation2 + $0x24] sm:$0xf] (!%p138_p2), %vm204_vm0, %v2982_v0  ;;  %216 = vst.msk [vmem:[#allocation2 + $0x28] sm:$0xf] (!%p138_p2), %vm204_vm0, %v2982_v0  ;;  %v2916_v4 = vld [vmem:[%s4074_s1 + $0x90] sm:$0xff] (!%p138_p2)   ;;  %2866 = vmatpush1.bf16.msra.mxu1 (!%p138_p2), %v2913_v2  ;;  %vm1108_vm6 = vcmask (!%p138_p2), 1046528  }
   0xc   : > { %218 = vst.msk [vmem:[#allocation2 + $0x30] sm:$0xf] (!%p138_p2), %vm204_vm0, %v2982_v0  ;;  %219 = vst.msk [vmem:[#allocation2 + $0x34] sm:$0xf] (!%p138_p2), %vm204_vm0, %v2982_v0  ;;  %2854 = vmatprep.subr.bf16.mxu1 (!%p138_p2), %v2982_v0  ;;  %v2917_v35 = vld [vmem:[%s4074_s1] sm:$0xff] (!%p138_p2)   ;;  %s2983_s28 = smov (!%p138_p2), 100  }
   0xd   : > { %220 = vst.msk [vmem:[#allocation2 + $0x38] sm:$0x1] %vm207_vm1, %v2982_v0  ;;  %223 = vst.msk [vmem:[#allocation2 + $0x44] sm:$0x1] %vm207_vm1, %v2982_v0  ;;  %s4084_s13 = smov (!%p161_p3, %s2581_s13), 1  ;;  %v2895_v8 = vld [vmem:[#allocation2] sm:$0xff]   ;;  %2741 = vmatpush3.bf16.msra.mxu0 %v2917_v35 }
   0xe   : > { %221 = vst.msk [vmem:[#allocation2 + $0x3c] sm:$0xf] %vm204_vm0, %v2982_v0  ;;  %222 = vst.msk [vmem:[#allocation2 + $0x40] sm:$0xf] %vm204_vm0, %v2982_v0  ;;  %s2706_s16 = sshll.u32 %s4084_s13, 7  ;;  %v885_v15 = vshrl.u32 %v2895_v8, 16 }
   0xf   : > { %224 = vst.msk [vmem:[#allocation2 + $0x48] sm:$0xf] %vm204_vm0, %v2982_v0  ;;  %225 = vst.msk [vmem:[#allocation2 + $0x4c] sm:$0xf] %vm204_vm0, %v2982_v0  ;;  %s3150_s23 = scalar_lea.vmem %s4073_s0, %s2706_s16  ;;  %v887_v16 = vshll.u32 %v2895_v8, 16  ;;  %v1109_v18 = vrot.slane %v2895_v8, 1  ;;  %2867 = vmatpush1.bf16.msra.mxu1 %v2916_v4 }
  0x10   : > { %226 = vst.msk [vmem:[#allocation2 + $0x50] sm:$0x1] %vm207_vm1, %v2982_v0  ;;  %229 = vst.msk [vmem:[#allocation2 + $0x5c] sm:$0x1] %vm207_vm1, %v2982_v0  ;;  %v176_v5 = vld [vmem:[%s3150_s23 + $0x10] sm:$0xf]  ;;  %2855 = vmatprep.subr.bf16.mxu1 %v2982_v0 }
  0x11   : > { %227 = vst.msk [vmem:[#allocation2 + $0x54] sm:$0xf] %vm204_vm0, %v2982_v0  ;;  %228 = vst.msk [vmem:[#allocation2 + $0x58] sm:$0xf] %vm204_vm0, %v2982_v0  ;;  %v177_v6 = vld [vmem:[%s3150_s23 + $0x14] sm:$0xf] }
  0x12   : > { %230 = vst.msk [vmem:[#allocation2 + $0x60] sm:$0xf] %vm204_vm0, %v2982_v0  ;;  %231 = vst.msk [vmem:[#allocation2 + $0x64] sm:$0xf] %vm204_vm0, %v2982_v0  ;;  %v172_v7 = vld [vmem:[%s3150_s23] sm:$0xf] }
  0x13   : > { %232 = vst.msk [vmem:[#allocation2 + $0x68] sm:$0x1] %vm207_vm1, %v2982_v0  ;;  %235 = vst.msk [vmem:[#allocation2 + $0x74] sm:$0x1] %vm207_vm1, %v2982_v0  ;;  %v298_v10 = vshrl.u32 %v176_v5, 16  ;;  %v301_v11 = vshll.u32 %v176_v5, 16 }
  0x14   : > { %233 = vst.msk [vmem:[#allocation2 + $0x6c] sm:$0xf] %vm204_vm0, %v2982_v0  ;;  %234 = vst.msk [vmem:[#allocation2 + $0x70] sm:$0xf] %vm204_vm0, %v2982_v0  ;;  %v306_v12 = vshrl.u32 %v177_v6, 16  ;;  %v309_v13 = vshll.u32 %v177_v6, 16 }
  0x15   : > { %236 = vst.msk [vmem:[#allocation2 + $0x78] sm:$0xf] %vm204_vm0, %v2982_v0  ;;  %237 = vst.msk [vmem:[#allocation2 + $0x7c] sm:$0xf] %vm204_vm0, %v2982_v0  ;;  %v173_v14 = vld [vmem:[%s3150_s23 + $0x4] sm:$0xf] }
  0x16   : > { %238 = vst.msk [vmem:[#allocation2 + $0x80] sm:$0x1] %vm207_vm1, %v2982_v0  ;;  %241 = vst.msk [vmem:[#allocation2 + $0x8c] sm:$0x1] %vm207_vm1, %v2982_v0  ;;  %v300_v21 = vrot.slane %v298_v10, 7  ;;  %v3166_v22 = vrot.slane %v306_v12, 7 }
  0x17   : > { %239 = vst.msk [vmem:[#allocation2 + $0x84] sm:$0xf] %vm204_vm0, %v2982_v0  ;;  %240 = vst.msk [vmem:[#allocation2 + $0x88] sm:$0xf] %vm204_vm0, %v2982_v0  ;;  %v603_v23 = vld [vmem:[#allocation2 + $0x24] sm:$0xf] }
  0x18   : > { %242 = vst.msk [vmem:[#allocation2 + $0x90] sm:$0xf] %vm204_vm0, %v2982_v0  ;;  %243 = vst.msk [vmem:[#allocation2 + $0x94] sm:$0xf] %vm204_vm0, %v2982_v0  ;;  %v264_v24 = vshrl.u32 %v172_v7, 16  ;;  %v889_v25 = vrot.slane %v887_v16, 1  ;;  %v303_v32 = vor.u32 %v301_v11, %v300_v21  ;;  %v311_v34 = vor.u32 %v309_v13, %v3166_v22 }
  0x19   : > { %244 = vst.msk [vmem:[#allocation2 + $0x98] sm:$0x1] %vm207_vm1, %v2982_v0  ;;  %247 = vst.msk [vmem:[#allocation2 + $0xa4] sm:$0x1] %vm207_vm1, %v2982_v0  ;;  %v267_v28 = vshll.u32 %v172_v7, 16  ;;  %v272_v29 = vshrl.u32 %v173_v14, 16 }
  0x1a   : > { %245 = vst.msk [vmem:[#allocation2 + $0x9c] sm:$0xf] %vm204_vm0, %v2982_v0  ;;  %246 = vst.msk [vmem:[#allocation2 + $0xa0] sm:$0xf] %vm204_vm0, %v2982_v0  ;;  %v174_v30 = vld [vmem:[%s3150_s23 + $0x8] sm:$0xf]  ;;  %v890_v36 = vor.u32 %v889_v25, %v885_v15 }
  0x1b   : > { %248 = vst.msk [vmem:[#allocation2 + $0xa8] sm:$0xf] %vm204_vm0, %v2982_v0  ;;  %249 = vst.msk [vmem:[#allocation2 + $0xac] sm:$0xf] %vm204_vm0, %v2982_v0  ;;  %v304_v33 = vrot.slane %v300_v21, 4  ;;  %v266_v37 = vrot.slane %v264_v24, 7 }
  0x1c   : > { %250 = vst.msk [vmem:[#allocation2 + $0xb0] sm:$0x1] %vm207_vm1, %v2982_v0  ;;  %253 = vst.msk [vmem:[#allocation2 + $0xbc] sm:$0x1] %vm207_vm1, %v2982_v0  ;;  %v274_v38 = vrot.slane %v272_v29, 7  ;;  %v275_v39 = vshll.u32 %v173_v14, 16 }
  0x1d   : > { %251 = vst.msk [vmem:[#allocation2 + $0xb4] sm:$0xf] %vm204_vm0, %v2982_v0  ;;  %252 = vst.msk [vmem:[#allocation2 + $0xb8] sm:$0xf] %vm204_vm0, %v2982_v0  ;;  %v175_v40 = vld [vmem:[%s3150_s23 + $0xc] sm:$0xf]  ;;  %v269_v50 = vor.u32 %v267_v28, %v266_v37 }
  0x1e   : > { %254 = vst.msk [vmem:[#allocation2 + $0xc0] sm:$0xf] %vm204_vm0, %v2982_v0  ;;  %255 = vst.msk [vmem:[#allocation2 + $0xc4] sm:$0xf] %vm204_vm0, %v2982_v0  ;;  %v2918_v41 = vld [vmem:[%s4074_s1 + $0x48] sm:$0xff]   ;;  %v281_v45 = vshrl.u32 %v174_v30, 16  ;;  %v277_v52 = vor.u32 %v275_v39, %v274_v38 }
  0x1f   : > { %256 = vst.msk [vmem:[#allocation2 + $0xc8] sm:$0x1] %vm207_vm1, %v2982_v0  ;;  %259 = vst.msk [vmem:[#allocation2 + $0xd4] sm:$0x1] %vm207_vm1, %v2982_v0  ;;  %v587_v44 = vld [vmem:[#allocation2 + $0xc] sm:$0xf]  ;;  %2742 = vmatprep.subr.bf16.mxu0 %v2918_v41 }
  0x20   : > { %257 = vst.msk [vmem:[#allocation2 + $0xcc] sm:$0xf] %vm204_vm0, %v2982_v0  ;;  %258 = vst.msk [vmem:[#allocation2 + $0xd0] sm:$0xf] %vm204_vm0, %v2982_v0  ;;  %v284_v46 = vshll.u32 %v174_v30, 16  ;;  %v270_v51 = vrot.slane %v266_v37, 4 }
  0x21   : > { %v2896_v9 = vld [vmem:[#allocation2 + $0x8] ss:$0 sps:$4 sm:$0x11]   ;;  %vm3162_vm7 = vmor %vm260_vm2, %vm261_vm3  ;;  %v178_v48 = vld [vmem:[%s3150_s23 + $0x18] sm:$0xf]  ;;  %s2984_s6 = smov 50  }
  0x22   : > { %v892_v17 = vshll.u32 %v2896_v9, 16  ;;  %v1110_v19 = vrot.slane %v2896_v9, 1  ;;  %vm3171_vm8 = vmand %vm204_vm0, %vm585_vm4  ;;  %v312_v42 = vsel %vm3162_vm7, %v304_v33, %v311_v34  ;;  %v593_v53 = vld [vmem:[#allocation2 + $0x14] sm:$0x1]  ;;  %v607_v54 = vld [vmem:[#allocation2 + $0x2c] sm:$0x1]  ;;  %v278_v61 = vsel %vm3162_vm7, %v270_v51, %v277_v52 }
  0x23   : > { %v604_v43 = vsel %vm3171_vm8, %v303_v32, %v603_v23  ;;  %vm3192_vm9 = vmand %vm207_vm1, %vm260_vm2  ;;  %606 = vst.msk [vmem:[#allocation2 + $0x28] sm:$0xf] %vm204_vm0, %v312_v42  ;;  %v2919_v55 = vld [vmem:[%s4074_s1 + $0x98] sm:$0xff]   ;;  %v283_v56 = vrot.slane %v281_v45, 7  ;;  %v289_v57 = vshrl.u32 %v175_v40, 16  ;;  %v292_v58 = vshll.u32 %v175_v40, 16 }
  0x24   : > { %v894_v26 = vrot.slane %v892_v17, 1  ;;  %v1111_v31 = vsel %vm1108_vm6, %v1109_v18, %v1110_v19  ;;  %605 = vst [vmem:[#allocation2 + $0x24] sm:$0xf] %v604_v43  ;;  %v279_v59 = vrot.slane %v274_v38, 4  ;;  %v179_v60 = vld [vmem:[%s3150_s23 + $0x1c] sm:$0xf]  ;;  %v588_v62 = vsel %vm3171_vm8, %v269_v50, %v587_v44  ;;  %2868 = vmatpush1.bf16.msra.mxu1 %v2919_v55 }
  0x25   : > { %1157 = vrot.lane.b32.xlu0 %v1111_v31, %s2983_s28  ;;  %v596_v63 = vld [vmem:[#allocation2 + $0x18] sm:$0xf]  ;;  %v313_v1 = vrot.slane %v3166_v22, 4  ;;  %v315_v2 = vshrl.u32 %v178_v48, 16  ;;  %589 = vst [vmem:[#allocation2 + $0xc] sm:$0xf] %v588_v62  ;;  %v286_v3 = vor.u32 %v284_v46, %v283_v56  ;;  %2856 = vmatprep.subr.bf16.mxu1 %v2982_v0 }
  0x26   : > { %v895_v49 = vsel %vm883_vm5, %v890_v36, %v894_v26  ;;  %590 = vst.msk [vmem:[#allocation2 + $0x10] sm:$0xf] %vm204_vm0, %v278_v61  ;;  %v287_v4 = vrot.slane %v283_v56, 4  ;;  %v291_v5 = vrot.slane %v289_v57, 7  ;;  %v594_v6 = vsel %vm3192_vm9, %v279_v59, %v593_v53  ;;  %v180_v7 = vld [vmem:[%s3150_s23 + $0x20] sm:$0xf] }
  0x27   : > { %1076 = vrot.lane.b32.xlu1 %v895_v49, %s2984_s6  ;;  %595 = vst [vmem:[#allocation2 + $0x14] sm:$0x1] %v594_v6  ;;  %v600_v8 = vld [vmem:[#allocation2 + $0x20] sm:$0x1]  ;;  %v608_v9 = vsel %vm3192_vm9, %v313_v1, %v607_v54  ;;  %v317_v10 = vrot.slane %v315_v2, 7  ;;  %v318_v11 = vshll.u32 %v178_v48, 16  ;;  %v597_v15 = vsel %vm3171_vm8, %v286_v3, %v596_v63 }
  0x28   : > { %v323_v12 = vshrl.u32 %v179_v60, 16  ;;  %v2920_v13 = vld [vmem:[%s4074_s1 + $0x8] sm:$0xff]   ;;  %v294_v14 = vor.u32 %v292_v58, %v291_v5  ;;  %v296_v16 = vrot.slane %v291_v5, 4  ;;  %609 = vst [vmem:[#allocation2 + $0x2c] sm:$0x1] %v608_v9  ;;  %v326_v17 = vshll.u32 %v179_v60, 16 }
  0x29   : > { %v610_v18 = vld [vmem:[#allocation2 + $0x30] sm:$0xf]  ;;  %v614_v19 = vld [vmem:[#allocation2 + $0x38] sm:$0x1]  ;;  %598 = vst [vmem:[#allocation2 + $0x18] sm:$0xf] %v597_v15  ;;  %v320_v21 = vor.u32 %v318_v11, %v317_v10  ;;  %2743 = vmatpush3.bf16.msra.mxu0 %v2920_v13 }
  0x2a   : > { %v321_v22 = vrot.slane %v317_v10, 4  ;;  %v325_v23 = vrot.slane %v323_v12, 7  ;;  %v181_v24 = vld [vmem:[%s3150_s23 + $0x24] sm:$0xf]  ;;  %v332_v25 = vshrl.u32 %v180_v7, 16  ;;  %v2921_v26 = vld [vmem:[%s4074_s1 + $0x50] sm:$0xff]   ;;  %v295_v29 = vsel %vm3162_vm7, %v287_v4, %v294_v14 }
  0x2b   : > { %v3225_v28 = vld [vmem:[#allocation2 + $0x24] sm:$0xff]   ;;  %v601_v30 = vsel %vm3192_vm9, %v296_v16, %v600_v8  ;;  %v335_v31 = vshll.u32 %v180_v7, 16  ;;  %599 = vst.msk [vmem:[#allocation2 + $0x1c] sm:$0xf] %vm204_vm0, %v295_v29  ;;  %v611_v33 = vsel %vm3171_vm8, %v320_v21, %v610_v18  ;;  %2744 = vmatprep.subr.bf16.mxu0 %v2921_v26  ;;  %s2985_s11 = smov 22   ;;  %v340_v41 = vshrl.u32 %v181_v24, 16 }
  0x2c   : > { %602 = vst [vmem:[#allocation2 + $0x20] sm:$0x1] %v601_v30  ;;  %v328_v32 = vor.u32 %v326_v17, %v325_v23  ;;  %v330_v34 = vrot.slane %v325_v23, 4  ;;  %v3234_v35 = vrot.slane %v332_v25, 7  ;;  %1198 = vrot.lane.b32.xlu1 %v3225_v28, %s2985_s11  ;;  %612 = vst [vmem:[#allocation2 + $0x30] sm:$0xf] %v611_v33 }
  0x2d   : > { %v617_v36 = vld [vmem:[#allocation2 + $0x3c] sm:$0xf]  ;;  %v2898_v37 = vld [vmem:[#allocation2 + $0xc] sm:$0xff]   ;;  %s2986_s14 = smov 44   ;;  %v923_v51 = vshll.u32 %v3225_v28, 16  ;;  %v342_v52 = vrot.slane %v340_v41, 7 }
  0x2e   : > { %v329_v38 = vsel %vm3162_vm7, %v321_v22, %v328_v32  ;;  %v615_v39 = vsel %vm3192_vm9, %v330_v34, %v614_v19  ;;  %v337_v40 = vor.u32 %v335_v31, %v3234_v35  ;;  %v2900_v42 = vld [vmem:[#allocation2 + $0x14] ss:$0 sps:$4 sm:$0x11]   ;;  %1194 = vrot.lane.b32.xlu0 %v2898_v37, %s2985_s11  ;;  %v1112_v43 = vrot.slane %v2898_v37, 1  ;;  %v2922_v53 = vld [vmem:[%s4074_s1 + $0xa0] sm:$0xff]   ;;  %v2925_v7 = vld [vmem:[%s4074_s1 + $0x58] sm:$0xff]  }
  0x2f   : > { %613 = vst.msk [vmem:[#allocation2 + $0x34] sm:$0xf] %vm204_vm0, %v329_v38  ;;  %616 = vst [vmem:[#allocation2 + $0x38] sm:$0x1] %v615_v39  ;;  %v1113_v45 = vrot.slane %v2900_v42, 1  ;;  %v897_v46 = vshrl.u32 %v2898_v37, 16  ;;  %2869 = vmatpush1.bf16.msra.mxu1 %v2922_v53 }
  0x30   : > { %v618_v44 = vsel %vm3171_vm8, %v337_v40, %v617_v36  ;;  %1315 = vrot.lane.b32.xlu1 %v3225_v28, %s2986_s14  ;;  %v899_v48 = vshll.u32 %v2898_v37, 16  ;;  %v904_v49 = vshll.u32 %v2900_v42, 16  ;;  %v2902_v50 = vld [vmem:[#allocation2 + $0x2c] ss:$0 sps:$4 sm:$0x11]   ;;  %v338_v58 = vrot.slane %v3234_v35, 4  ;;  %2857 = vmatprep.subr.bf16.mxu1 %v2982_v0 }
  0x31   : > { %619 = vst [vmem:[#allocation2 + $0x3c] sm:$0xf] %v618_v44  ;;  %v1114_v55 = vsel %vm1108_vm6, %v1112_v43, %v1113_v45  ;;  %v343_v59 = vshll.u32 %v181_v24, 16  ;;  %v182_v1 = vld [vmem:[%s3150_s23 + $0x28] sm:$0xf]  ;;  %v2923_v2 = vld [vmem:[%s4074_s1 + $0x10] sm:$0xff]  }
  0x32   : > { %v2899_v54 = vld [vmem:[#allocation2 + $0x18] sm:$0xff]   ;;  %v901_v56 = vrot.slane %v899_v48, 1  ;;  %v906_v62 = vrot.slane %v904_v49, 1  ;;  %v921_v9 = vshrl.u32 %v3225_v28, 16  ;;  %v925_v10 = vrot.slane %v923_v51, 1  ;;  %2745 = vmatpush3.bf16.msra.mxu0 %v2923_v2  ;;  %v2926_v16 = vld [vmem:[%s4074_s1 + $0xa8] sm:$0xff]  }
  0x33   : > { %v2901_v57 = vld [vmem:[#allocation2 + $0x20] ss:$0 sps:$4 sm:$0x11]   ;;  %1196 = vrot.lane.b32.xlu0 %v2899_v54, %s2985_s11  ;;  %v1115_v60 = vrot.slane %v2899_v54, 1  ;;  %v911_v63 = vshll.u32 %v2899_v54, 16  ;;  %v909_v4 = vshrl.u32 %v2899_v54, 16  ;;  %v345_v6 = vor.u32 %v343_v59, %v342_v52  ;;  %2746 = vmatprep.subr.bf16.mxu0 %v2925_v7 }
  0x34   : > { %1159 = vrot.lane.b32.xlu1 %v1114_v55, %s2983_s28  ;;  %v902_v61 = vor.u32 %v901_v56, %v897_v46  ;;  %v1116_v3 = vrot.slane %v2901_v57, 1  ;;  %v916_v5 = vshll.u32 %v2901_v57, 16  ;;  %v928_v11 = vshll.u32 %v2902_v50, 16  ;;  %v183_v12 = vld [vmem:[%s3150_s23 + $0x2c] sm:$0xf]  ;;  %s2987_s25 = smov 122   ;;  %2870 = vmatpush1.bf16.msra.mxu1 %v2926_v16 }
  0x35   : > { %v913_v8 = vrot.slane %v911_v63, 1  ;;  %v1118_v14 = vrot.slane %v3225_v28, 1  ;;  %v1119_v15 = vrot.slane %v2902_v50, 1  ;;  %v621_v19 = vld [vmem:[#allocation2 + $0x44] sm:$0x1]  ;;  %v2927_v22 = vld [vmem:[%s4074_s1 + $0x18] sm:$0xff]   ;;  %v346_v24 = vsel %vm3162_vm7, %v338_v58, %v345_v6  ;;  %2858 = vmatprep.subr.bf16.mxu1 %v2982_v0 }
  0x36   : > { %v3268_v13 = vsel %vm1108_vm6, %v1115_v60, %v1116_v3  ;;  %v3278_v17 = vsel %vm883_vm5, %v902_v61, %v906_v62  ;;  %v918_v18 = vrot.slane %v916_v5, 1  ;;  %v184_v21 = vld [vmem:[%s3150_s23 + $0x30] sm:$0xf]  ;;  %v347_v25 = vrot.slane %v342_v52, 4  ;;  %v185_v28 = vld [vmem:[%s3150_s23 + $0x34] sm:$0xf]  ;;  %2747 = vmatpush3.bf16.msra.mxu0 %v2927_v22 }
  0x37   : > { %1276 = vrot.lane.b32.xlu0 %v1114_v55, %s2987_s25  ;;  %v914_v23 = vor.u32 %v913_v8, %v909_v4  ;;  %v349_v26 = vshrl.u32 %v182_v1, 16  ;;  %v2929_v29 = vld [vmem:[%s4074_s1 + $0x60] sm:$0xff]   ;;  %v3290_v30 = vor.u32 %v925_v10, %v921_v9  ;;  %v3292_v31 = vrot.slane %v928_v11, 1  ;;  %620 = vst.msk [vmem:[#allocation2 + $0x40] sm:$0xf] %vm204_vm0, %v346_v24  ;;  %s2988_s4 = smov 72  }
  0x38   : > { %1278 = vrot.lane.b32.xlu1 %v3268_v13, %s2987_s25  ;;  %v352_v32 = vshll.u32 %v182_v1, 16  ;;  %v624_v33 = vld [vmem:[#allocation2 + $0x48] sm:$0xf]  ;;  %v186_v34 = vld [vmem:[%s3150_s23 + $0x38] sm:$0xf]  ;;  %v3298_v35 = vsel %vm1108_vm6, %v1118_v14, %v1119_v15  ;;  %v622_v36 = vsel %vm3192_vm9, %v347_v25, %v621_v19  ;;  %v357_v38 = vshrl.u32 %v183_v12, 16  ;;  %2748 = vmatprep.subr.bf16.mxu0 %v2929_v29 }
  0x39   : > { %v351_v37 = vrot.slane %v349_v26, 7  ;;  %623 = vst [vmem:[#allocation2 + $0x44] sm:$0x1] %v622_v36  ;;  %v360_v39 = vshll.u32 %v183_v12, 16  ;;  %v628_v40 = vld [vmem:[#allocation2 + $0x50] sm:$0x1]  ;;  %v3308_v45 = vsel %vm883_vm5, %v914_v23, %v918_v18  ;;  %v931_v19 = vsel %vm883_vm5, %v3290_v30, %v3292_v31 }
  0x3a   : > { %v366_v41 = vshrl.u32 %v184_v21, 16  ;;  %v369_v42 = vshll.u32 %v184_v21, 16  ;;  %v374_v43 = vshrl.u32 %v185_v28, 16  ;;  %v187_v44 = vld [vmem:[%s3150_s23 + $0x3c] sm:$0xf]  ;;  %v359_v49 = vrot.slane %v357_v38, 7 }
  0x3b   : > { %1161 = vrot.lane.b32.xlu0 %v3268_v13, %s2983_s28  ;;  %v354_v46 = vor.u32 %v352_v32, %v351_v37  ;;  %v355_v48 = vrot.slane %v351_v37, 4  ;;  %v631_v50 = vld [vmem:[#allocation2 + $0x54] sm:$0xf]  ;;  %v635_v51 = vld [vmem:[#allocation2 + $0x5c] sm:$0x1]  ;;  %v377_v54 = vshll.u32 %v185_v28, 16 }
  0x3c   : > { %1241 = vrot.lane.b32.xlu1 %v3278_v17, %s2988_s4  ;;  %v368_v52 = vrot.slane %v366_v41, 7  ;;  %v376_v53 = vrot.slane %v374_v43, 7  ;;  %v383_v55 = vshrl.u32 %v186_v34, 16  ;;  %v362_v56 = vor.u32 %v360_v39, %v359_v49  ;;  %v638_v1 = vld [vmem:[#allocation2 + $0x60] sm:$0xf]  ;;  %v3316_v2 = vld [vmem:[#allocation2 + $0x30] sm:$0xff]  }
  0x3d   : > { %v625_v57 = vsel %vm3171_vm8, %v354_v46, %v624_v33  ;;  %v364_v58 = vrot.slane %v359_v49, 4  ;;  %v386_v59 = vshll.u32 %v186_v34, 16  ;;  %v391_v6 = vshrl.u32 %v187_v44, 16  ;;  %v2930_v7 = vld [vmem:[%s4074_s1 + $0xb0] sm:$0xff]   ;;  %v2931_v12 = vld [vmem:[%s4074_s1 + $0x20] sm:$0xff]   ;;  %s2989_s17 = smov 16  }
  0x3e   : > { %626 = vst [vmem:[#allocation2 + $0x48] sm:$0xf] %v625_v57  ;;  %v371_v60 = vor.u32 %v369_v42, %v368_v52  ;;  %v372_v61 = vrot.slane %v368_v52, 4  ;;  %v379_v62 = vor.u32 %v377_v54, %v376_v53  ;;  %v381_v63 = vrot.slane %v376_v53, 4  ;;  %2871 = vmatpush1.bf16.msra.mxu1 %v2930_v7  ;;  %v642_v23 = vld [vmem:[#allocation2 + $0x68] sm:$0x1]  ;;  %2749 = vmatpush3.bf16.msra.mxu0 %v2931_v12 }
  0x3f   : > { %1280 = vrot.lane.b32.xlu0 %v3298_v35, %s2987_s25  ;;  %v363_v3 = vsel %vm3162_vm7, %v355_v48, %v362_v56  ;;  %v629_v4 = vsel %vm3192_vm9, %v364_v58, %v628_v40  ;;  %v385_v5 = vrot.slane %v383_v55, 7  ;;  %v394_v11 = vshll.u32 %v187_v44, 16  ;;  %v3335_v14 = vld [vmem:[#allocation2 + $0x38] ss:$0 sps:$4 sm:$0x11]   ;;  %2859 = vmatprep.subr.bf16.mxu1 %v2982_v0  ;;  %v2934_v41 = vld [vmem:[%s4074_s1 + $0x28] sm:$0xff]  }
  0x40   : > { %1243 = vrot.lane.b32.xlu1 %v3308_v45, %s2988_s4  ;;  %627 = vst.msk [vmem:[#allocation2 + $0x4c] sm:$0xf] %vm204_vm0, %v363_v3  ;;  %630 = vst [vmem:[#allocation2 + $0x50] sm:$0x1] %v629_v4  ;;  %v380_v8 = vsel %vm3162_vm7, %v372_v61, %v379_v62  ;;  %v632_v9 = vsel %vm3171_vm8, %v371_v60, %v631_v50  ;;  %v636_v10 = vsel %vm3192_vm9, %v381_v63, %v635_v51  ;;  %v188_v26 = vld [vmem:[%s3150_s23 + $0x40] sm:$0xf] }
  0x41   : > { %633 = vst [vmem:[#allocation2 + $0x54] sm:$0xf] %v632_v9  ;;  %634 = vst.msk [vmem:[#allocation2 + $0x58] sm:$0xf] %vm204_vm0, %v380_v8  ;;  %v388_v15 = vor.u32 %v386_v59, %v385_v5  ;;  %v389_v16 = vrot.slane %v385_v5, 4  ;;  %v393_v18 = vrot.slane %v391_v6, 7 }
  0x42   : > { %637 = vst [vmem:[#allocation2 + $0x5c] sm:$0x1] %v636_v10  ;;  %v935_v21 = vshll.u32 %v3316_v2, 16  ;;  %v933_v28 = vshrl.u32 %v3316_v2, 16  ;;  %v400_v29 = vshrl.u32 %v188_v26, 16  ;;  %v940_v30 = vshll.u32 %v3335_v14, 16 }
  0x43   : > { %1078 = vrot.lane.b32.xlu0 %v3278_v17, %s2984_s6  ;;  %v639_v22 = vsel %vm3171_vm8, %v388_v15, %v638_v1  ;;  %v2932_v17 = vld [vmem:[%s4074_s1 + $0x68] sm:$0xff]   ;;  %v396_v24 = vor.u32 %v394_v11, %v393_v18  ;;  %v398_v25 = vrot.slane %v393_v18, 4  ;;  %v403_v33 = vshll.u32 %v188_v26, 16  ;;  %v3365_v34 = vld [vmem:[%s4074_s1 + $0xb8] sm:$0xff]   ;;  %v189_v39 = vld [vmem:[%s3150_s23 + $0x44] sm:$0xf] }
  0x44   : > { %1080 = vrot.lane.b32.xlu1 %v3308_v45, %s2984_s6  ;;  %640 = vst [vmem:[#allocation2 + $0x60] sm:$0xf] %v639_v22  ;;  %2750 = vmatprep.subr.bf16.mxu0 %v2932_v17  ;;  %v937_v36 = vrot.slane %v935_v21, 1  ;;  %v402_v37 = vrot.slane %v400_v29, 7  ;;  %v645_v38 = vld [vmem:[#allocation2 + $0x6c] sm:$0xf] }
  0x45   : > { %v397_v31 = vsel %vm3162_vm7, %v389_v16, %v396_v24  ;;  %v643_v32 = vsel %vm3192_vm9, %v398_v25, %v642_v23  ;;  %2872 = vmatpush1.bf16.msra.mxu1 %v3365_v34  ;;  %s2990_s22 = smov 94   ;;  %v942_v43 = vrot.slane %v940_v30, 1  ;;  %2751 = vmatpush3.bf16.msra.mxu0 %v2934_v41  ;;  %v408_v46 = vshrl.u32 %v189_v39, 16  ;;  %v2935_v48 = vld [vmem:[%s4074_s1 + $0x70] sm:$0xff]   ;;  %v3382_v49 = vld [vmem:[#allocation2 + $0x3c] sm:$0xff]   ;;  %v3429_v22 = vld [vmem:[%s4074_s1 + $0xc8] sm:$0xff]  }
  0x46   : > { %641 = vst.msk [vmem:[#allocation2 + $0x64] sm:$0xf] %vm204_vm0, %v397_v31  ;;  %644 = vst [vmem:[#allocation2 + $0x68] sm:$0x1] %v643_v32  ;;  %v405_v40 = vor.u32 %v403_v33, %v402_v37  ;;  %2860 = vmatprep.subr.bf16.mxu1 %v2982_v0  ;;  %v938_v42 = vor.u32 %v937_v36, %v933_v28  ;;  %v411_v50 = vshll.u32 %v189_v39, 16  ;;  %v3387_v51 = vld [vmem:[%s4074_s1 + $0xc0] sm:$0xff]   ;;  %2752 = vmatprep.subr.bf16.mxu0 %v2935_v48 }
  0x47   : > { %1245 = vrot.lane.b32.xlu0 %v931_v19, %s2988_s4  ;;  %v406_v52 = vrot.slane %v402_v37, 4  ;;  %v410_v53 = vrot.slane %v408_v46, 7  ;;  %v1121_v55 = vrot.slane %v3316_v2, 1  ;;  %v1122_v56 = vrot.slane %v3335_v14, 1  ;;  %v2937_v58 = vld [vmem:[%s4074_s1 + $0x30] sm:$0xff]   ;;  %v2939_v59 = vld [vmem:[%s4074_s1 + $0x78] sm:$0xff]  }
  0x48   : > { %1397 = vrot.lane.b32.xlu1 %v3298_v35, %s2989_s17  ;;  %v646_v44 = vsel %vm3171_vm8, %v405_v40, %v645_v38  ;;  %v943_v54 = vsel %vm883_vm5, %v938_v42, %v942_v43  ;;  %v947_v60 = vshll.u32 %v3382_v49, 16  ;;  %v649_v63 = vld [vmem:[#allocation2 + $0x74] sm:$0x1]  ;;  %v945_v3 = vshrl.u32 %v3382_v49, 16  ;;  %v190_v7 = vld [vmem:[%s3150_s23 + $0x48] sm:$0xf] }
  0x49   : > { %647 = vst [vmem:[#allocation2 + $0x6c] sm:$0xf] %v646_v44  ;;  %2873 = vmatpush1.bf16.msra.mxu1 %v3387_v51  ;;  %v413_v57 = vor.u32 %v411_v50, %v410_v53  ;;  %v415_v62 = vrot.slane %v410_v53, 4  ;;  %v1123_v1 = vsel %vm1108_vm6, %v1121_v55, %v1122_v56  ;;  %2753 = vmatpush3.bf16.msra.mxu0 %v2937_v58  ;;  %v191_v9 = vld [vmem:[%s3150_s23 + $0x4c] sm:$0xf]  ;;  %v417_v10 = vshrl.u32 %v190_v7, 16 }
  0x4a   : > { %2861 = vmatprep.subr.bf16.mxu1 %v2982_v0  ;;  %2754 = vmatprep.subr.bf16.mxu0 %v2939_v59  ;;  %v420_v11 = vshll.u32 %v190_v7, 16  ;;  %v1124_v12 = vrot.slane %v3382_v49, 1  ;;  %v3422_v15 = vld [vmem:[#allocation2 + $0x48] sm:$0xff]   ;;  %v425_v18 = vshrl.u32 %v191_v9, 16  ;;  %v652_v21 = vld [vmem:[#allocation2 + $0x78] sm:$0xf] }
  0x4b   : > { %1362 = vrot.lane.b32.xlu0 %v931_v19, %s2990_s22  ;;  %v414_v61 = vsel %vm3162_vm7, %v406_v52, %v413_v57  ;;  %v650_v4 = vsel %vm3192_vm9, %v415_v62, %v649_v63  ;;  %v419_v16 = vrot.slane %v417_v10, 7  ;;  %v2941_v26 = vld [vmem:[%s4074_s1 + $0x38] sm:$0xff]   ;;  %v3437_v28 = vld [vmem:[#allocation2 + $0x50] ss:$0 sps:$4 sm:$0x11]   ;;  %v959_v36 = vshll.u32 %v3422_v15, 16 }
  0x4c   : > { %1200 = vrot.lane.b32.xlu1 %v3316_v2, %s2985_s11  ;;  %648 = vst.msk [vmem:[#allocation2 + $0x70] sm:$0xf] %vm204_vm0, %v414_v61  ;;  %651 = vst [vmem:[#allocation2 + $0x74] sm:$0x1] %v650_v4  ;;  %v427_v25 = vrot.slane %v425_v18, 7  ;;  %v3446_v33 = vld [vmem:[%s4074_s1 + $0xd0] sm:$0xff]  }
  0x4d   : > { %v422_v17 = vor.u32 %v420_v11, %v419_v16  ;;  %v423_v24 = vrot.slane %v419_v16, 4  ;;  %2874 = vmatpush1.bf16.msra.mxu1 %v3429_v22  ;;  %2755 = vmatpush3.bf16.msra.mxu0 %v2941_v26  ;;  %v656_v32 = vld [vmem:[#allocation2 + $0x80] sm:$0x1]  ;;  %vm2007_vm10 = vcmask 1040384   ;;  %v3464_v40 = vld [vmem:[%s4074_s1 + $0xd8] sm:$0xff]   ;;  %v957_v43 = vshrl.u32 %v3422_v15, 16 }
  0x4e   : > { %v432_v31 = vrot.slane %v427_v25, 4  ;;  %2862 = vmatprep.subr.bf16.mxu1 %v2982_v0  ;;  %2172 = vmatprep.subr.bf16.mxu0 %v2982_v0  ;;  %v2945_v41 = vld [vmem:[%s4074_s1 + $0xe0] ss:$0 sps:$4 sm:$0x11]   ;;  %v192_v42 = vld [vmem:[%s3150_s23 + $0x50] sm:$0xf] }
  0x4f   : > { %1163 = vrot.lane.b32.xlu0 %v3298_v35, %s2983_s28  ;;  %v2906_v35 = vld [vmem:[#allocation2 + $0x44] ss:$0 sps:$4 sm:$0x11]   ;;  %v653_v30 = vsel %vm3171_vm8, %v422_v17, %v652_v21  ;;  %v193_v44 = vld [vmem:[%s3150_s23 + $0x54] sm:$0xf]  ;;  %v434_v46 = vshrl.u32 %v192_v42, 16 }
  0x50   : > { %1082 = vrot.lane.b32.xlu1 %v931_v19, %s2984_s6  ;;  %v952_v5 = vshll.u32 %v2906_v35, 16  ;;  %v1125_v14 = vrot.slane %v2906_v35, 1  ;;  %v428_v19 = vshll.u32 %v191_v9, 16  ;;  %654 = vst [vmem:[#allocation2 + $0x78] sm:$0xf] %v653_v30  ;;  %v657_v39 = vsel %vm3192_vm9, %v432_v31, %v656_v32  ;;  %v3507_v32 = vld [vmem:[#allocation2 + $0x54] sm:$0xff]  }
  0x51   : > { %658 = vst [vmem:[#allocation2 + $0x80] sm:$0x1] %v657_v39  ;;  %2875 = vmatpush1.bf16.msra.mxu1 %v3446_v33  ;;  %v437_v48 = vshll.u32 %v192_v42, 16  ;;  %v964_v50 = vshll.u32 %v3437_v28, 16  ;;  %v442_v52 = vshrl.u32 %v193_v44, 16  ;;  %v445_v53 = vshll.u32 %v193_v44, 16 }
  0x52   : > { %v954_v6 = vrot.slane %v952_v5, 1  ;;  %v430_v29 = vor.u32 %v428_v19, %v427_v25  ;;  %v1126_v37 = vsel %vm1108_vm6, %v1124_v12, %v1125_v14  ;;  %2863 = vmatprep.subr.bf16.mxu1 %v2982_v0  ;;  %v3477_v55 = vsel %vm2007_vm10, %v2945_v41, 0  ;;  %v194_v57 = vld [vmem:[%s3150_s23 + $0x58] sm:$0xf]  ;;  %v195_v58 = vld [vmem:[%s3150_s23 + $0x5c] sm:$0xf] }
  0x53   : > { %1247 = vrot.lane.b32.xlu0 %v943_v54, %s2988_s4  ;;  %v436_v56 = vrot.slane %v434_v46, 7  ;;  %v444_v35 = vrot.slane %v442_v52, 7  ;;  %v663_v59 = vld [vmem:[#allocation2 + $0x8c] sm:$0x1]  ;;  %v454_v61 = vshll.u32 %v194_v57, 16  ;;  %v459_v62 = vshrl.u32 %v195_v58, 16 }
  0x54   : > { %1317 = vrot.lane.b32.xlu1 %v3316_v2, %s2986_s14  ;;  %v949_v2 = vrot.slane %v947_v60, 1  ;;  %v431_v38 = vsel %vm3162_vm7, %v423_v24, %v430_v29  ;;  %v451_v60 = vshrl.u32 %v194_v57, 16  ;;  %v666_v4 = vld [vmem:[#allocation2 + $0x90] sm:$0xf]  ;;  %v966_v10 = vrot.slane %v964_v50, 1 }
  0x55   : > { %655 = vst.msk [vmem:[#allocation2 + $0x7c] sm:$0xf] %vm204_vm0, %v431_v38  ;;  %2876 = vmatpush1.bf16.msra.mxu1 %v3464_v40  ;;  %v439_v63 = vor.u32 %v437_v48, %v436_v56  ;;  %v449_v5 = vrot.slane %v444_v35, 4  ;;  %v461_v7 = vrot.slane %v459_v62, 7  ;;  %v670_v17 = vld [vmem:[#allocation2 + $0x98] sm:$0x1] }
  0x56   : > { %v950_v8 = vor.u32 %v949_v2, %v945_v3  ;;  %2864 = vmatprep.subr.bf16.mxu1 %v2982_v0  ;;  %v462_v3 = vshll.u32 %v195_v58, 16  ;;  %v447_v2 = vor.u32 %v445_v53, %v444_v35  ;;  %v197_v24 = vld [vmem:[%s3150_s23 + $0x64] sm:$0xf]  ;;  %v1127_v25 = vrot.slane %v3422_v15, 1  ;;  %v198_v38 = vld [vmem:[%s3150_s23 + $0x68] sm:$0xf] }
  0x57   : > { %1282 = vrot.lane.b32.xlu0 %v1123_v1, %s2987_s25  ;;  %v664_v16 = vsel %vm3192_vm9, %v449_v5, %v663_v59  ;;  %v1128_v26 = vrot.slane %v3437_v28, 1  ;;  %v466_v30 = vrot.slane %v461_v7, 4  ;;  %v476_v39 = vshrl.u32 %v197_v24, 16  ;;  %v673_v41 = vld [vmem:[#allocation2 + $0x9c] sm:$0xf] }
  0x58   : > { %1399 = vrot.lane.b32.xlu1 %v1123_v1, %s2989_s17  ;;  %v3432_v23 = vsel %vm883_vm5, %v950_v8, %v954_v6  ;;  %v453_v6 = vrot.slane %v451_v60, 7  ;;  %v196_v8 = vld [vmem:[%s3150_s23 + $0x60] sm:$0xf]  ;;  %665 = vst [vmem:[#allocation2 + $0x8c] sm:$0x1] %v664_v16  ;;  %v464_v21 = vor.u32 %v462_v3, %v461_v7  ;;  %v479_v46 = vshll.u32 %v197_v24, 16 }
  0x59   : > { %v468_v12 = vshrl.u32 %v196_v8, 16  ;;  %2877 = vmatpush1.bf16.msra.mxu1 %v3477_v55  ;;  %v671_v28 = vsel %vm3192_vm9, %v466_v30, %v670_v17  ;;  %v199_v42 = vld [vmem:[%s3150_s23 + $0x6c] sm:$0xf]  ;;  %v677_v50 = vld [vmem:[#allocation2 + $0xa4] sm:$0x1]  ;;  %v485_v52 = vshrl.u32 %v198_v38, 16 }
  0x5a   : > { %v456_v18 = vor.u32 %v454_v61, %v453_v6  ;;  %v457_v19 = vrot.slane %v453_v6, 4  ;;  %672 = vst [vmem:[#allocation2 + $0x98] sm:$0x1] %v671_v28  ;;  %v493_v53 = vshrl.u32 %v199_v42, 16  ;;  %v488_v58 = vshll.u32 %v198_v38, 16 }
  0x5b   : > { %1364 = vrot.lane.b32.xlu0 %v943_v54, %s2990_s22  ;;  %v200_v35 = vld [vmem:[%s3150_s23 + $0x70] sm:$0xf]  ;;  %v487_v61 = vrot.slane %v485_v52, 7  ;;  %v680_v7 = vld [vmem:[#allocation2 + $0xa8] sm:$0xf]  ;;  %v1130_v17 = vrot.slane %v3507_v32, 1 }
  0x5c   : > { %1202 = vrot.lane.b32.xlu1 %v3382_v49, %s2985_s11  ;;  %v667_v29 = vsel %vm3171_vm8, %v456_v18, %v666_v4  ;;  %v495_v62 = vrot.slane %v493_v53, 7  ;;  %v502_v3 = vshrl.u32 %v200_v35, 16  ;;  %v969_v4 = vshrl.u32 %v3507_v32, 16  ;;  %v687_v30 = vld [vmem:[#allocation2 + $0xb4] sm:$0xf] }
  0x5d   : > { %668 = vst [vmem:[#allocation2 + $0x90] sm:$0xf] %v667_v29  ;;  %v490_v6 = vor.u32 %v488_v58, %v487_v61  ;;  %v491_v16 = vrot.slane %v487_v61, 4  ;;  %v694_v53 = vld [vmem:[#allocation2 + $0xc0] sm:$0xf]  ;;  %vm1427_vm11 = vcmask 408576  }
  0x5e   : > { %v698_v61 = vld [vmem:[#allocation2 + $0xc8] sm:$0x1]  ;;  %vm1509_vm12 = vcmask 179200   ;;  %vm1542_vm13 = vcmask 588800   ;;  %vm1575_vm14 = vcmask 998400   ;;  %vm1460_vm15 = vcmask 818176  }
  0x5f   : > { %1165 = vrot.lane.b32.xlu0 %v1123_v1, %s2983_s28  ;;  %v440_v1 = vrot.slane %v436_v56, 4  ;;  %v971_v56 = vshll.u32 %v3507_v32, 16  ;;  %v681_v18 = vsel %vm3171_vm8, %v490_v6, %v680_v7  ;;  %vm1706_vm1 = vcmask 130048  }
  0x60   : > { %1084 = vrot.lane.b32.xlu1 %v943_v54, %s2984_s6  ;;  %v659_v54 = vld [vmem:[#allocation2 + $0x84] sm:$0xf]  ;;  %682 = vst [vmem:[#allocation2 + $0xa8] sm:$0xf] %v681_v18  ;;  %vm1657_vm2 = vcmask 769024   ;;  %vm1974_vm3 = vcmask 539648  }
  0x61   : > { %v660_v11 = vsel %vm3171_vm8, %v439_v63, %v659_v54  ;;  %v448_v14 = vsel %vm3162_vm7, %v440_v1, %v447_v2  ;;  %v1129_v54 = vsel %vm1108_vm6, %v1127_v25, %v1128_v26  ;;  %v973_v2 = vrot.slane %v971_v56, 1  ;;  %v2914_v56 = vld [vmem:[#allocation2 + $0x68] ss:$0 sps:$4 sm:$0x11]  }
  0x62   : > { %661 = vst [vmem:[#allocation2 + $0x84] sm:$0xf] %v660_v11  ;;  %662 = vst.msk [vmem:[#allocation2 + $0x88] sm:$0xf] %vm204_vm0, %v448_v14  ;;  %v201_v11 = vld [vmem:[%s3150_s23 + $0x74] sm:$0xf] }
  0x63   : > { %1249 = vrot.lane.b32.xlu0 %v3432_v23, %s2988_s4  ;;  %v974_v14 = vor.u32 %v973_v2, %v969_v4  ;;  %v505_v25 = vshll.u32 %v200_v35, 16  ;;  %v988_v2 = vshll.u32 %v2914_v56, 16  ;;  %v1134_v20 = vrot.slane %v2914_v56, 1 }
  0x64   : > { %1319 = vrot.lane.b32.xlu1 %v3382_v49, %s2986_s14  ;;  %v961_v49 = vrot.slane %v959_v36, 1  ;;  %v465_v36 = vsel %vm3162_vm7, %v457_v19, %v464_v21  ;;  %v500_v19 = vrot.slane %v495_v62, 4  ;;  %v202_v21 = vld [vmem:[%s3150_s23 + $0x78] sm:$0xf]  ;;  %vm2493_vm4 = vcmask 257024  }
  0x65   : > { %669 = vst.msk [vmem:[#allocation2 + $0x94] sm:$0xf] %vm204_vm0, %v465_v36  ;;  %v519_v38 = vshrl.u32 %v202_v21, 16 }
  0x66   : > { %v962_v9 = vor.u32 %v961_v49, %v957_v43  ;;  %v3516_v43 = vld [vmem:[#allocation2 + $0x5c] ss:$0 sps:$4 sm:$0x11]   ;;  %v478_v49 = vrot.slane %v476_v39, 7  ;;  %v3555_v39 = vld [vmem:[#allocation2 + $0x60] sm:$0xff]  }
  0x67   : > { %1284 = vrot.lane.b32.xlu0 %v1126_v37, %s2987_s25  ;;  %v976_v63 = vshll.u32 %v3516_v43, 16  ;;  %v1131_v24 = vrot.slane %v3516_v43, 1 }
  0x68   : > { %1401 = vrot.lane.b32.xlu1 %v1126_v37, %s2989_s17  ;;  %v3505_v31 = vsel %vm883_vm5, %v962_v9, %v966_v10  ;;  %v481_v59 = vor.u32 %v479_v46, %v478_v49  ;;  %v483_v60 = vrot.slane %v478_v49, 4  ;;  %v684_v10 = vld [vmem:[#allocation2 + $0xb0] sm:$0x1] }
  0x69   : > { %v978_v9 = vrot.slane %v976_v63, 1  ;;  %v685_v29 = vsel %vm3192_vm9, %v500_v19, %v684_v10  ;;  %v3587_v10 = vld [vmem:[#allocation2 + $0x6c] sm:$0xff]  }
  0x6a   : > { %v678_v5 = vsel %vm3192_vm9, %v483_v60, %v677_v50  ;;  %686 = vst [vmem:[#allocation2 + $0xb0] sm:$0x1] %v685_v29  ;;  %v993_v18 = vshrl.u32 %v3587_v10, 16 }
  0x6b   : > { %1366 = vrot.lane.b32.xlu0 %v3432_v23, %s2990_s22  ;;  %679 = vst [vmem:[#allocation2 + $0xa4] sm:$0x1] %v678_v5  ;;  %v979_v28 = vsel %vm883_vm5, %v974_v14, %v978_v9  ;;  %v1133_v9 = vrot.slane %v3555_v39, 1  ;;  %v995_v14 = vshll.u32 %v3587_v10, 16 }
  0x6c   : > { %1204 = vrot.lane.b32.xlu1 %v3422_v15, %s2985_s11 }
  0x6d   : > { %v997_v19 = vrot.slane %v995_v14, 1  ;;  %v2963_v14 = vld [vmem:[%s4074_s1 + $0x88] sm:$0xff]  }
  0x6f   : > { %1167 = vrot.lane.b32.xlu0 %v1126_v37, %s2983_s28  ;;  %v470_v37 = vrot.slane %v468_v12, 7  ;;  %v504_v12 = vrot.slane %v502_v3, 7  ;;  %v981_v3 = vshrl.u32 %v3555_v39, 16 }
  0x70   : > { %1086 = vrot.lane.b32.xlu1 %v3432_v23, %s2984_s6  ;;  %v471_v23 = vshll.u32 %v196_v8, 16 }
  0x71   : > { %v474_v48 = vrot.slane %v470_v37, 4  ;;  %v507_v36 = vor.u32 %v505_v25, %v504_v12  ;;  %v508_v43 = vrot.slane %v504_v12, 4  ;;  %v2928_v12 = vld [vmem:[#allocation2 + $0x74] ss:$0 sps:$4 sm:$0x11]  }
  0x72   : > { %v473_v44 = vor.u32 %v471_v23, %v470_v37  ;;  %v510_v37 = vshrl.u32 %v201_v11, 16  ;;  %v513_v23 = vshll.u32 %v201_v11, 16  ;;  %v1135_v11 = vsel %vm1108_vm6, %v1133_v9, %v1134_v20 }
  0x73   : > { %1251 = vrot.lane.b32.xlu0 %v3505_v31, %s2988_s4  ;;  %v482_v1 = vsel %vm3162_vm7, %v474_v48, %v481_v59  ;;  %v688_v46 = vsel %vm3171_vm8, %v507_v36, %v687_v30  ;;  %v691_v48 = vld [vmem:[#allocation2 + $0xbc] sm:$0x1]  ;;  %v1136_v36 = vrot.slane %v3587_v10, 1 }
  0x74   : > { %1321 = vrot.lane.b32.xlu1 %v3422_v15, %s2986_s14  ;;  %v674_v57 = vsel %vm3171_vm8, %v473_v44, %v673_v41  ;;  %v496_v15 = vshll.u32 %v199_v42, 16  ;;  %676 = vst.msk [vmem:[#allocation2 + $0xa0] sm:$0xf] %vm204_vm0, %v482_v1  ;;  %v203_v41 = vld [vmem:[%s3150_s23 + $0x7c] sm:$0xf]  ;;  %v522_v42 = vshll.u32 %v202_v21, 16 }
  0x75   : > { %675 = vst [vmem:[#allocation2 + $0x9c] sm:$0xf] %v674_v57  ;;  %v512_v44 = vrot.slane %v510_v37, 7  ;;  %689 = vst [vmem:[#allocation2 + $0xb4] sm:$0xf] %v688_v46  ;;  %v527_v52 = vshrl.u32 %v203_v41, 16 }
  0x76   : > { %v498_v8 = vor.u32 %v496_v15, %v495_v62  ;;  %v983_v57 = vshll.u32 %v3555_v39, 16  ;;  %v530_v15 = vshll.u32 %v203_v41, 16  ;;  %v1000_v21 = vshll.u32 %v2928_v12, 16  ;;  %v2942_v41 = vld [vmem:[#allocation2 + $0x80] ss:$0 sps:$4 sm:$0x11]  }
  0x77   : > { %1286 = vrot.lane.b32.xlu0 %v1129_v54, %s2987_s25  ;;  %v515_v49 = vor.u32 %v513_v23, %v512_v44  ;;  %v517_v50 = vrot.slane %v512_v44, 4  ;;  %v529_v60 = vrot.slane %v527_v52, 7  ;;  %v1137_v37 = vrot.slane %v2928_v12, 1  ;;  %v3606_v23 = vld [vmem:[#allocation2 + $0x78] sm:$0xff]  }
  0x78   : > { %1403 = vrot.lane.b32.xlu1 %v1129_v54, %s2989_s17  ;;  %v499_v26 = vsel %vm3162_vm7, %v491_v16, %v498_v8  ;;  %v985_v4 = vrot.slane %v983_v57, 1  ;;  %v990_v8 = vrot.slane %v988_v2, 1  ;;  %v1002_v25 = vrot.slane %v1000_v21, 1 }
  0x79   : > { %683 = vst.msk [vmem:[#allocation2 + $0xac] sm:$0xf] %vm204_vm0, %v499_v26  ;;  %v516_v35 = vsel %vm3162_vm7, %v508_v43, %v515_v49  ;;  %v692_v59 = vsel %vm3192_vm9, %v517_v50, %v691_v48  ;;  %v534_v1 = vrot.slane %v529_v60, 4  ;;  %v532_v5 = vor.u32 %v530_v15, %v529_v60 }
  0x7a   : > { %690 = vst.msk [vmem:[#allocation2 + $0xb8] sm:$0xf] %vm204_vm0, %v516_v35  ;;  %693 = vst [vmem:[#allocation2 + $0xbc] sm:$0x1] %v692_v59  ;;  %v986_v27 = vor.u32 %v985_v4, %v981_v3  ;;  %v1005_v46 = vshrl.u32 %v3606_v23, 16  ;;  %v1139_v15 = vrot.slane %v3606_v23, 1 }
  0x7b   : > { %1368 = vrot.lane.b32.xlu0 %v3505_v31, %s2990_s22  ;;  %v699_v6 = vsel %vm3192_vm9, %v534_v1, %v698_v61  ;;  %v3639_v1 = vld [vmem:[#allocation2 + $0x84] sm:$0xff]  }
  0x7c   : > { %1206 = vrot.lane.b32.xlu1 %v3507_v32, %s2985_s11  ;;  %700 = vst [vmem:[#allocation2 + $0xc8] sm:$0x1] %v699_v6  ;;  %v991_v47 = vsel %vm883_vm5, %v986_v27, %v990_v8  ;;  %v2961_v6 = vld [vmem:[%s4074_s1 + $0x80] sm:$0xff]   ;;  %v2947_v8 = vld [vmem:[#allocation2 + $0x8c] ss:$0 sps:$4 sm:$0x11]  }
  0x7d   : > { %v1024_v21 = vshll.u32 %v2947_v8, 16 }
  0x7f   : > { %1169 = vrot.lane.b32.xlu0 %v1129_v54, %s2983_s28  ;;  %v1132_v54 = vsel %vm1108_vm6, %v1130_v17, %v1131_v24  ;;  %v998_v24 = vor.u32 %v997_v19, %v993_v18  ;;  %v1017_v18 = vshrl.u32 %v3639_v1, 16 }
  0x80   : > { %1088 = vrot.lane.b32.xlu1 %v3505_v31, %s2984_s6  ;;  %v521_v31 = vrot.slane %v519_v38, 7 }
  0x81   : > { %v1003_v30 = vsel %vm883_vm5, %v998_v24, %v1002_v25 }
  0x82   : > { %v524_v58 = vor.u32 %v522_v42, %v521_v31  ;;  %v525_v62 = vrot.slane %v521_v31, 4  ;;  %v1007_v42 = vshll.u32 %v3606_v23, 16  ;;  %v1012_v31 = vshll.u32 %v2942_v41, 16 }
  0x83   : > { %1253 = vrot.lane.b32.xlu0 %v979_v28, %s2988_s4 }
  0x84   : > { %1323 = vrot.lane.b32.xlu1 %v3507_v32, %s2986_s14  ;;  %v695_v63 = vsel %vm3171_vm8, %v524_v58, %v694_v53  ;;  %v533_v7 = vsel %vm3162_vm7, %v525_v62, %v532_v5  ;;  %v1009_v48 = vrot.slane %v1007_v42, 1  ;;  %v1014_v53 = vrot.slane %v1012_v31, 1  ;;  %v2966_v31 = vld [vmem:[%s4074_s1 + $0x98] sm:$0xff]  }
  0x85   : > { %696 = vst [vmem:[#allocation2 + $0xc0] sm:$0xf] %v695_v63  ;;  %697 = vst.msk [vmem:[#allocation2 + $0xc4] sm:$0xf] %vm204_vm0, %v533_v7  ;;  %v1140_v63 = vrot.slane %v2942_v41, 1  ;;  %vm1624_vm0 = vcmask 359424  }
  0x86   : > { %v1010_v52 = vor.u32 %v1009_v48, %v1005_v46  ;;  %v3683_v41 = vld [vmem:[#allocation2 + $0x18] sm:$0xff]  }
  0x87   : > { %1288 = vrot.lane.b32.xlu0 %v1132_v54, %s2987_s25  ;;  %v1141_v27 = vsel %vm1108_vm6, %v1139_v15, %v1140_v63  ;;  %v2968_v15 = vld [vmem:[%s4074_s1 + $0xa8] sm:$0xff]  }
  0x88   : > { %1405 = vrot.lane.b32.xlu1 %v1132_v54, %s2989_s17  ;;  %v3635_v61 = vsel %vm883_vm5, %v1010_v52, %v1014_v53  ;;  %v1142_v52 = vrot.slane %v3639_v1, 1  ;;  %v1143_v53 = vrot.slane %v2947_v8, 1 }
  0x8b   : > { %1370 = vrot.lane.b32.xlu0 %v979_v28, %s2990_s22 }
  0x8c   : > { %1208 = vrot.lane.b32.xlu1 %v3555_v39, %s2985_s11 }
  0x8f   : > { %1171 = vrot.lane.b32.xlu0 %v1132_v54, %s2983_s28  ;;  %v2960_v54 = vld [vmem:[#allocation2] sm:$0xff]  }
  0x90   : > { %1090 = vrot.lane.b32.xlu1 %v979_v28, %s2984_s6  ;;  %v1138_v28 = vsel %vm1108_vm6, %v1136_v36, %v1137_v37  ;;  %v1026_v37 = vrot.slane %v1024_v21, 1 }
  0x93   : > { %1255 = vrot.lane.b32.xlu0 %v991_v47, %s2988_s4 }
  0x94   : > { %1325 = vrot.lane.b32.xlu1 %v3555_v39, %s2986_s14 }
  0x97   : > { %1290 = vrot.lane.b32.xlu0 %v1135_v11, %s2987_s25  ;;  %v1158_v17 = vpop.permute.xlu0 %1157 }
  0x98   : > { %1407 = vrot.lane.b32.xlu1 %v1135_v11, %s2989_s17 }
  0x99   : > { %v1077_v16 = vpop.permute.xlu1 %1076 }
  0x9a   : > { %v1429_v56 = vsel %vm1427_vm11, %v2960_v54, %v1077_v16  ;;  %v3700_v54 = vld [vmem:[#allocation2 + $0x90] sm:$0xff]  }
  0x9b   : > { %1372 = vrot.lane.b32.xlu0 %v991_v47, %s2990_s22  ;;  %v1462_v62 = vsel %vm1460_vm15, %v1429_v56, %v1158_v17  ;;  %v1029_v63 = vshrl.u32 %v3700_v54, 16 }
  0x9c   : > { %1210 = vrot.lane.b32.xlu1 %v3587_v10, %s2985_s11 }
  0x9e   : > { %v3600_v26 = vpop.permute.xlu1 %1198 }
  0x9f   : > { %1173 = vrot.lane.b32.xlu0 %v1135_v11, %s2983_s28  ;;  %v2962_v11 = vld [vmem:[#allocation2 + $0xc] sm:$0xff]  }
  0xa0   : > { %1092 = vrot.lane.b32.xlu1 %v991_v47, %s2984_s6  ;;  %v1195_v29 = vpop.permute.xlu0 %1194  ;;  %v1019_v47 = vshll.u32 %v3639_v1, 16 }
  0xa1   : > { %v1511_v57 = vsel %vm1509_vm12, %v1158_v17, %v1195_v29 }
  0xa2   : > { %v3608_v38 = vpop.permute.xlu1 %1315  ;;  %v1021_v19 = vrot.slane %v1019_v47, 1 }
  0xa3   : > { %1257 = vrot.lane.b32.xlu0 %v1003_v30, %s2988_s4 }
  0xa4   : > { %1327 = vrot.lane.b32.xlu1 %v3587_v10, %s2986_s14 }
  0xa5   : > { %v1197_v43 = vpop.permute.xlu0 %1196 }
  0xa6   : > { %v1160_v44 = vpop.permute.xlu1 %1159 }
  0xa7   : > { %1292 = vrot.lane.b32.xlu0 %v1138_v28, %s2987_s25  ;;  %v1513_v3 = vsel %vm1509_vm12, %v1160_v44, %v1197_v43 }
  0xa8   : > { %1409 = vrot.lane.b32.xlu1 %v1138_v28, %s2989_s17 }
  0xa9   : > { %v3618_v49 = vpop.permute.xlu0 %1276 }
  0xaa   : > { %v3620_v50 = vpop.permute.xlu1 %1278 }
  0xab   : > { %1374 = vrot.lane.b32.xlu0 %v1003_v30, %s2990_s22 }
  0xac   : > { %1212 = vrot.lane.b32.xlu1 %v3606_v23, %s2985_s11 }
  0xad   : > { %v3627_v58 = vpop.permute.xlu0 %1161 }
  0xae   : > { %v1242_v35 = vpop.permute.xlu1 %1241  ;;  %v1515_v17 = vsel %vm1509_vm12, %v3627_v58, %v3600_v26  ;;  %v1022_v26 = vor.u32 %v1021_v19, %v1017_v18 }
  0xaf   : > { %v1544_v59 = vsel %vm1542_vm13, %v1511_v57, %v1242_v35  ;;  %1175 = vrot.lane.b32.xlu0 %v1138_v28, %s2983_s28  ;;  %v1628_v28 = vsel %vm1624_vm0, %v3620_v50, %v3608_v38  ;;  %v2967_v35 = vld [vmem:[%s4074_s1 + $0xa0] sm:$0xff]  }
  0xb0   : > { %1094 = vrot.lane.b32.xlu1 %v1003_v30, %s2984_s6  ;;  %v1577_v60 = vsel %vm1575_vm14, %v1544_v59, %v3618_v49  ;;  %v2964_v30 = vld [vmem:[%s4074_s1 + $0x90] sm:$0xff]   ;;  %v1027_v38 = vsel %vm883_vm5, %v1022_v26, %v1026_v37  ;;  %v2949_v59 = vld [vmem:[#allocation2 + $0x98] ss:$0 sps:$4 sm:$0x11]  }
  0xb1   : > { %2043 = vmatprep.mubr.bf16.mxu0 %v1577_v60  ;;  %v3642_v4 = vpop.permute.xlu0 %1280  ;;  %v1031_v60 = vshll.u32 %v3700_v54, 16  ;;  %v2951_v26 = vld [vmem:[#allocation2 + $0xa4] ss:$0 sps:$4 sm:$0x11]  }
  0xb2   : > { %2044 = vmatmul.mubr.bf16.vlgmr.msra.gmra.mrb[0].mxu0 %v1462_v62  ;;  %v1244_v2 = vpop.permute.xlu1 %1243 }
  0xb3   : > { %v1546_v5 = vsel %vm1542_vm13, %v1513_v3, %v1244_v2  ;;  %2173 = vmatpush1.bf16.msra.mxu0 %v2961_v6  ;;  %1259 = vrot.lane.b32.xlu0 %v3635_v61, %s2988_s4  ;;  %v2969_v2 = vld [vmem:[#allocation2 + $0x24] sm:$0xff]   ;;  %v1033_v6 = vrot.slane %v1031_v60, 1 }
  0xb4   : > { %1329 = vrot.lane.b32.xlu1 %v3606_v23, %s2986_s14  ;;  %v1580_v7 = vsel %vm1575_vm14, %v1546_v5, %v3620_v50  ;;  %2174 = vmatprep.subr.bf16.mxu0 %v2982_v0 }
  0xb5   : > { %2051 = vmatprep.mubr.bf16.mxu0 %v1580_v7  ;;  %v1079_v9 = vpop.permute.xlu0 %1078  ;;  %v1036_v7 = vshll.u32 %v2949_v59, 16 }
  0xb6   : > { %v1081_v20 = vpop.permute.xlu1 %1080  ;;  %v1431_v12 = vsel %vm1427_vm11, %v2962_v11, %v1079_v9 }
  0xb7   : > { %2175 = vmatpush1.bf16.msra.mxu0 %v2963_v14  ;;  %1294 = vrot.lane.b32.xlu0 %v1141_v27, %s2987_s25  ;;  %v1465_v16 = vsel %vm1460_vm15, %v1431_v12, %v1160_v44  ;;  %v1433_v42 = vsel %vm1427_vm11, %v3683_v41, %v1081_v20  ;;  %v2970_v20 = vld [vmem:[%s4074_s1 + $0xb0] sm:$0xff]   ;;  %v1034_v12 = vor.u32 %v1033_v6, %v1029_v63  ;;  %v1038_v14 = vrot.slane %v1036_v7, 1  ;;  %v3775_v63 = vld [vmem:[#allocation2 + $0xa8] sm:$0xff]  }
  0xb8   : > { %1411 = vrot.lane.b32.xlu1 %v1141_v27, %s2989_s17  ;;  %2176 = vmatprep.subr.bf16.mxu0 %v2982_v0  ;;  %v1468_v50 = vsel %vm1460_vm15, %v1433_v42, %v3627_v58  ;;  %v1144_v58 = vsel %vm1108_vm6, %v1142_v52, %v1143_v53  ;;  %v1055_v6 = vshll.u32 %v3775_v63, 16 }
  0xb9   : > { %v1246_v24 = vpop.permute.xlu0 %1245 }
  0xba   : > { %2052 = vmatmul.mubr.bf16.gmra.mrb[4].mxu0 %v1465_v16  ;;  %v1398_v25 = vpop.permute.xlu1 %1397  ;;  %v1548_v29 = vsel %vm1542_vm13, %v1515_v17, %v1246_v24  ;;  %v1039_v24 = vsel %vm883_vm5, %v1034_v12, %v1038_v14 }
  0xbb   : > { %2177 = vmatpush1.bf16.msra.mxu0 %v2964_v30  ;;  %1376 = vrot.lane.b32.xlu0 %v3635_v61, %s2990_s22  ;;  %v1583_v36 = vsel %vm1575_vm14, %v1548_v29, %v3642_v4  ;;  %v3741_v29 = vld [vmem:[#allocation2 + $0x9c] sm:$0xff]  }
  0xbc   : > { %1214 = vrot.lane.b32.xlu1 %v3639_v1, %s2985_s11  ;;  %2059 = vmatprep.mubr.bf16.mxu0 %v1583_v36  ;;  %v1043_v37 = vshll.u32 %v3741_v29, 16 }
  0xbd   : > { %2178 = vmatprep.subr.bf16.mxu0 %v2982_v0  ;;  %v1363_v43 = vpop.permute.xlu0 %1362 }
  0xbe   : > { %v1201_v44 = vpop.permute.xlu1 %1200  ;;  %v1710_v46 = vsel %vm1706_vm1, %v1363_v43, %v1398_v25  ;;  %v1662_v48 = vsel %vm1657_vm2, %v1628_v28, %v1363_v43  ;;  %v1146_v25 = vrot.slane %v2949_v59, 1 }
  0xbf   : > { %2179 = vmatpush1.bf16.msra.mxu0 %v2966_v31  ;;  %1177 = vrot.lane.b32.xlu0 %v1141_v27, %s2983_s28  ;;  %v1048_v31 = vshll.u32 %v2951_v26, 16 }
  0xc0   : > { %2657 = vmatprep.mubr.msk.bf16.mxu1 %vm1974_vm3, %v1710_v46  ;;  %1096 = vrot.lane.b32.xlu1 %v3635_v61, %s2984_s6 }
  0xc1   : > { %2213 = vmatmul.mubr.bf16.vlgmr.msra.gmra.mrb[0].mxu1 %v1662_v48  ;;  %v1164_v56 = vpop.permute.xlu0 %1163  ;;  %2180 = vmatprep.subr.bf16.mxu0 %v2982_v0  ;;  %v1045_v48 = vrot.slane %v1043_v37, 1  ;;  %v3803_v37 = vld [vmem:[#allocation2 + $0xb4] sm:$0xff]  }
  0xc2   : > { %2060 = vmatmul.mubr.bf16.gmra.mrb[8].mxu0 %v1468_v50  ;;  %v1083_v57 = vpop.permute.xlu1 %1082  ;;  %v1517_v3 = vsel %vm1509_vm12, %v1164_v56, %v1201_v44  ;;  %v2971_v44 = vld [vmem:[#allocation2 + $0x30] sm:$0xff]  }
  0xc3   : > { %2181 = vmatpush1.bf16.msra.mxu0 %v2967_v35  ;;  %1261 = vrot.lane.b32.xlu0 %v1027_v38, %s2988_s4  ;;  %v1435_v5 = vsel %vm1427_vm11, %v2969_v2, %v1083_v57  ;;  %v1050_v57 = vrot.slane %v1048_v31, 1  ;;  %v1065_v31 = vshrl.u32 %v3803_v37, 16 }
  0xc4   : > { %2182 = vmatprep.subr.bf16.mxu0 %v2982_v0  ;;  %1331 = vrot.lane.b32.xlu1 %v3639_v1, %s2986_s14  ;;  %v1471_v11 = vsel %vm1460_vm15, %v1435_v5, %v1164_v56  ;;  %v2953_v5 = vld [vmem:[#allocation2 + $0xb0] ss:$0 sps:$4 sm:$0x11]  }
  0xc5   : > { %v1248_v61 = vpop.permute.xlu0 %1247 }
  0xc6   : > { %v1318_v62 = vpop.permute.xlu1 %1317  ;;  %v1550_v27 = vsel %vm1542_vm13, %v1517_v3, %v1248_v61 }
  0xc7   : > { %2183 = vmatpush1.bf16.msra.mxu0 %v2968_v15  ;;  %1296 = vrot.lane.b32.xlu0 %v1144_v58, %s2987_s25  ;;  %v1630_v16 = vsel %vm1624_vm0, %v3642_v4, %v1318_v62  ;;  %v1145_v4 = vrot.slane %v3700_v54, 1  ;;  %v1148_v62 = vrot.slane %v3741_v29, 1  ;;  %v1149_v15 = vrot.slane %v2951_v26, 1 }
  0xc8   : > { %2184 = vmatprep.subr.bf16.mxu0 %v2982_v0  ;;  %1413 = vrot.lane.b32.xlu1 %v1144_v58, %s2989_s17  ;;  %v1152_v26 = vrot.slane %v2953_v5, 1 }
  0xc9   : > { %v1283_v8 = vpop.permute.xlu0 %1282 }
  0xca   : > { %v1400_v47 = vpop.permute.xlu1 %1399  ;;  %v1586_v9 = vsel %vm1575_vm14, %v1550_v27, %v1283_v8 }
  0xcb   : > { %2185 = vmatpush1.bf16.msra.mxu0 %v2970_v20  ;;  %1378 = vrot.lane.b32.xlu0 %v1027_v38, %s2990_s22  ;;  %v1060_v20 = vshll.u32 %v2953_v5, 16  ;;  %v1154_v5 = vrot.slane %v3803_v37, 1 }
  0xcc   : > { %2067 = vmatprep.mubr.bf16.mxu0 %v1586_v9  ;;  %1216 = vrot.lane.b32.xlu1 %v3700_v54, %s2985_s11  ;;  %v1057_v9 = vrot.slane %v1055_v6, 1 }
  0xcd   : > { %2068 = vmatmul.mubr.bf16.gmra.mrb[12].mxu0 %v1471_v11  ;;  %v1365_v18 = vpop.permute.xlu0 %1364  ;;  %2186 = vmatprep.subr.bf16.mxu0 %v2982_v0 }
  0xce   : > { %v1203_v19 = vpop.permute.xlu1 %1202  ;;  %v1712_v21 = vsel %vm1706_vm1, %v1365_v18, %v1400_v47  ;;  %v1665_v17 = vsel %vm1657_vm2, %v1630_v16, %v1365_v18  ;;  %v2972_v47 = vld [vmem:[#allocation2 + $0x3c] sm:$0xff]  }
  0xcf   : > { %2187 = vmatpush1.bf16.msra.mxu0 %v3365_v34  ;;  %1179 = vrot.lane.b32.xlu0 %v1144_v58, %s2983_s28  ;;  %v1147_v34 = vsel %vm1108_vm6, %v1145_v4, %v1146_v25 }
  0xd0   : > { %2658 = vmatprep.mubr.msk.bf16.mxu1 %vm1974_vm3, %v1712_v21  ;;  %1098 = vrot.lane.b32.xlu1 %v1027_v38, %s2984_s6  ;;  %v1062_v21 = vrot.slane %v1060_v20, 1 }
  0xd1   : > { %2221 = vmatmul.mubr.bf16.gmra.mrb[4].mxu1 %v1665_v17  ;;  %v1166_v30 = vpop.permute.xlu0 %1165  ;;  %2188 = vmatprep.subr.bf16.mxu0 %v2982_v0 }
  0xd2   : > { %v1085_v36 = vpop.permute.xlu1 %1084  ;;  %v1519_v43 = vsel %vm1509_vm12, %v1166_v30, %v1203_v19 }
  0xd3   : > { %2189 = vmatpush1.bf16.msra.mxu0 %v3387_v51  ;;  %1263 = vrot.lane.b32.xlu0 %v1039_v24, %s2988_s4  ;;  %v1041_v51 = vshrl.u32 %v3741_v29, 16  ;;  %v1437_v46 = vsel %vm1427_vm11, %v2971_v44, %v1085_v36  ;;  %v1067_v44 = vshll.u32 %v3803_v37, 16 }
  0xd4   : > { %2190 = vmatprep.subr.bf16.mxu0 %v2982_v0  ;;  %1333 = vrot.lane.b32.xlu1 %v3700_v54, %s2986_s14  ;;  %v1474_v53 = vsel %vm1460_vm15, %v1437_v46, %v1166_v30 }
  0xd5   : > { %v1250_v28 = vpop.permute.xlu0 %1249  ;;  %v1046_v56 = vor.u32 %v1045_v48, %v1041_v51 }
  0xd6   : > { %v1320_v42 = vpop.permute.xlu1 %1319  ;;  %v1552_v38 = vsel %vm1542_vm13, %v1519_v43, %v1250_v28  ;;  %v2955_v43 = vld [vmem:[#allocation2 + $0xbc] ss:$0 sps:$4 sm:$0x11]  }
  0xd7   : > { %2191 = vmatpush1.bf16.msra.mxu0 %v3429_v22  ;;  %1298 = vrot.lane.b32.xlu0 %v1147_v34, %s2987_s25  ;;  %v1632_v35 = vsel %vm1624_vm0, %v1283_v8, %v1320_v42  ;;  %v1051_v61 = vsel %vm883_vm5, %v1046_v56, %v1050_v57  ;;  %v1053_v8 = vshrl.u32 %v3775_v63, 16  ;;  %v1155_v6 = vrot.slane %v2955_v43, 1 }
  0xd8   : > { %2192 = vmatprep.subr.bf16.mxu0 %v2982_v0  ;;  %1415 = vrot.lane.b32.xlu1 %v1147_v34, %s2989_s17 }
  0xd9   : > { %v1285_v50 = vpop.permute.xlu0 %1284  ;;  %v1058_v19 = vor.u32 %v1057_v9, %v1053_v8 }
  0xda   : > { %v1402_v52 = vpop.permute.xlu1 %1401  ;;  %v1589_v22 = vsel %vm1575_vm14, %v1552_v38, %v1285_v50 }
  0xdb   : > { %2193 = vmatpush1.bf16.msra.mxu0 %v3446_v33  ;;  %1380 = vrot.lane.b32.xlu0 %v1039_v24, %s2990_s22  ;;  %v1063_v36 = vsel %vm883_vm5, %v1058_v19, %v1062_v21 }
  0xdc   : > { %2075 = vmatprep.mubr.bf16.mxu0 %v1589_v22  ;;  %1218 = vrot.lane.b32.xlu1 %v3741_v29, %s2985_s11  ;;  %v1069_v22 = vrot.slane %v1067_v44, 1 }
  0xdd   : > { %2076 = vmatmul.mubr.bf16.gmra.mrb[16].mxu0 %v1474_v53  ;;  %v1367_v58 = vpop.permute.xlu0 %1366  ;;  %2194 = vmatprep.subr.bf16.mxu0 %v2982_v0  ;;  %v1072_v53 = vshll.u32 %v2955_v43, 16 }
  0xde   : > { %v1205_v59 = vpop.permute.xlu1 %1204  ;;  %v1714_v60 = vsel %vm1706_vm1, %v1367_v58, %v1402_v52  ;;  %v1668_v33 = vsel %vm1657_vm2, %v1632_v35, %v1367_v58 }
  0xdf   : > { %2195 = vmatpush1.bf16.msra.mxu0 %v3464_v40  ;;  %1181 = vrot.lane.b32.xlu0 %v1147_v34, %s2983_s28  ;;  %v1150_v40 = vsel %vm1108_vm6, %v1148_v62, %v1149_v15  ;;  %v1151_v34 = vrot.slane %v3775_v63, 1 }
  0xe0   : > { %2659 = vmatprep.mubr.msk.bf16.mxu1 %vm1974_vm3, %v1714_v60  ;;  %1100 = vrot.lane.b32.xlu1 %v1039_v24, %s2984_s6  ;;  %v1070_v60 = vor.u32 %v1069_v22, %v1065_v31  ;;  %v2959_v31 = vld [vmem:[#allocation2 + $0xd4] ss:$0 sps:$4 sm:$0x11]  }
  0xe1   : > { %2229 = vmatmul.mubr.bf16.gmra.mrb[8].mxu1 %v1668_v33  ;;  %v1168_v3 = vpop.permute.xlu0 %1167  ;;  %2196 = vmatprep.subr.bf16.mxu0 %v2982_v0  ;;  %v1153_v51 = vsel %vm1108_vm6, %v1151_v34, %v1152_v26  ;;  %v1074_v33 = vrot.slane %v1072_v53, 1  ;;  %v2958_v26 = vld [vmem:[#allocation2 + $0xcc] sm:$0xff]  }
  0xe2   : > { %v1087_v2 = vpop.permute.xlu1 %1086  ;;  %v1521_v0 = vsel %vm1509_vm12, %v1168_v3, %v1205_v59  ;;  %v1349_v53 = vshrl.u32 %v2958_v26, 16 }
  0xe3   : > { %2197 = vmatpush1.bf16.msra.mxu0 %v3477_v55  ;;  %1265 = vrot.lane.b32.xlu0 %v1051_v61, %s2988_s4  ;;  %v1439_v55 = vsel %vm1427_vm11, %v2972_v47, %v1087_v2  ;;  %v1156_v47 = vsel %vm1108_vm6, %v1154_v5, %v1155_v6  ;;  %v1392_v6 = vrot.slane %v2958_v26, 1 }
  0xe4   : > { %1335 = vrot.lane.b32.xlu1 %v3741_v29, %s2986_s14  ;;  %v1477_v18 = vsel %vm1460_vm15, %v1439_v55, %v1168_v3 }
  0xe5   : > { %v1252_v7 = vpop.permute.xlu0 %1251 }
  0xe6   : > { %v1322_v27 = vpop.permute.xlu1 %1321  ;;  %v1554_v11 = vsel %vm1542_vm13, %v1521_v0, %v1252_v7  ;;  %v2956_v7 = vld [vmem:[#allocation2 + $0xc0] sm:$0xff]   ;;  %v2957_v0 = vld [vmem:[#allocation2 + $0xc8] ss:$0 sps:$4 sm:$0x11]  }
  0xe7   : > { %1300 = vrot.lane.b32.xlu0 %v1150_v40, %s2987_s25  ;;  %v1634_v17 = vsel %vm1624_vm0, %v1285_v50, %v1322_v27  ;;  %v2973_v50 = vld [vmem:[#allocation2 + $0x48] sm:$0xff]   ;;  %v1232_v55 = vshll.u32 %v2956_v7, 16  ;;  %v1273_v43 = vrot.slane %v2956_v7, 1  ;;  %v1274_v44 = vrot.slane %v2957_v0, 1 }
  0xe8   : > { %1417 = vrot.lane.b32.xlu1 %v1150_v40, %s2989_s17 }
  0xe9   : > { %v1287_v12 = vpop.permute.xlu0 %1286 }
  0xea   : > { %v1404_v14 = vpop.permute.xlu1 %1403  ;;  %v1592_v16 = vsel %vm1575_vm14, %v1554_v11, %v1287_v12  ;;  %v1237_v11 = vshll.u32 %v2957_v0, 16 }
  0xeb   : > { %1382 = vrot.lane.b32.xlu0 %v1051_v61, %s2990_s22  ;;  %2083 = vmatprep.mubr.bf16.mxu0 %v1592_v16  ;;  %v1230_v16 = vshrl.u32 %v2956_v7, 16 }
  0xec   : > { %2084 = vmatmul.mubr.bf16.gmra.mrb[20].mxu0 %v1477_v18  ;;  %1220 = vrot.lane.b32.xlu1 %v3775_v63, %s2985_s11  ;;  %v1234_v18 = vrot.slane %v1232_v55, 1 }
  0xed   : > { %v1369_v24 = vpop.permute.xlu0 %1368 }
  0xee   : > { %v1207_v4 = vpop.permute.xlu1 %1206  ;;  %v1716_v25 = vsel %vm1706_vm1, %v1369_v24, %v1404_v14  ;;  %v1671_v30 = vsel %vm1657_vm2, %v1634_v17, %v1369_v24 }
  0xef   : > { %1183 = vrot.lane.b32.xlu0 %v1150_v40, %s2983_s28  ;;  %2660 = vmatprep.mubr.msk.bf16.mxu1 %vm1974_vm3, %v1716_v25  ;;  %v1075_v40 = vsel %vm883_vm5, %v1070_v60, %v1074_v33  ;;  %v1235_v25 = vor.u32 %v1234_v18, %v1230_v16 }
  0xf0   : > { %2237 = vmatmul.mubr.bf16.gmra.mrb[12].mxu1 %v1671_v30  ;;  %1102 = vrot.lane.b32.xlu1 %v1051_v61, %s2984_s6 }
  0xf1   : > { %v1170_v28 = vpop.permute.xlu0 %1169 }
  0xf2   : > { %v1089_v42 = vpop.permute.xlu1 %1088  ;;  %v1523_v38 = vsel %vm1509_vm12, %v1170_v28, %v1207_v4 }
  0xf3   : > { %1267 = vrot.lane.b32.xlu0 %v1063_v36, %s2988_s4  ;;  %v1441_v52 = vsel %vm1427_vm11, %v2973_v50, %v1089_v42  ;;  %v1275_v50 = vsel %vm1108_vm6, %v1273_v43, %v1274_v44 }
  0xf4   : > { %1337 = vrot.lane.b32.xlu1 %v3775_v63, %s2986_s14  ;;  %v1480_v59 = vsel %vm1460_vm15, %v1441_v52, %v1170_v28 }
  0xf5   : > { %v1254_v46 = vpop.permute.xlu0 %1253 }
  0xf6   : > { %v1324_v48 = vpop.permute.xlu1 %1323  ;;  %v1556_v56 = vsel %vm1542_vm13, %v1523_v38, %v1254_v46  ;;  %v1351_v38 = vshll.u32 %v2958_v26, 16 }
  0xf7   : > { %1302 = vrot.lane.b32.xlu0 %v1153_v51, %s2987_s25  ;;  %v1636_v61 = vsel %vm1624_vm0, %v1287_v12, %v1324_v48 }
  0xf8   : > { %1419 = vrot.lane.b32.xlu1 %v1153_v51, %s2989_s17 }
  0xf9   : > { %v1289_v57 = vpop.permute.xlu0 %1288 }
  0xfa   : > { %v1406_v35 = vpop.permute.xlu1 %1405  ;;  %v1595_v58 = vsel %vm1575_vm14, %v1556_v56, %v1289_v57  ;;  %v1353_v56 = vrot.slane %v1351_v38, 1 }
  0xfb   : > { %1384 = vrot.lane.b32.xlu0 %v1063_v36, %s2990_s22  ;;  %2091 = vmatprep.mubr.bf16.mxu0 %v1595_v58 }
  0xfc   : > { %2092 = vmatmul.mubr.bf16.gmra.mrb[24].mxu0 %v1480_v59  ;;  %1222 = vrot.lane.b32.xlu1 %v3803_v37, %s2985_s11 }
  0xfd   : > { %v1371_v62 = vpop.permute.xlu0 %1370 }
  0xfe   : > { %v1209_v15 = vpop.permute.xlu1 %1208  ;;  %v1718_v3 = vsel %vm1706_vm1, %v1371_v62, %v1406_v35  ;;  %v1674_v2 = vsel %vm1657_vm2, %v1636_v61, %v1371_v62  ;;  %v1354_v61 = vor.u32 %v1353_v56, %v1349_v53 }
  0xff   : > { %1185 = vrot.lane.b32.xlu0 %v1153_v51, %s2983_s28  ;;  %2661 = vmatprep.mubr.msk.bf16.mxu1 %vm1974_vm3, %v1718_v3 }
 0x100   : > { %2245 = vmatmul.mubr.bf16.gmra.mrb[16].mxu1 %v1674_v2  ;;  %1104 = vrot.lane.b32.xlu1 %v1063_v36, %s2984_s6 }
 0x101   : > { %v1172_v27 = vpop.permute.xlu0 %1171 }
 0x102   : > { %v1091_v8 = vpop.permute.xlu1 %1090  ;;  %v1525_v12 = vsel %vm1509_vm12, %v1172_v27, %v1209_v15 }
 0x103   : > { %1269 = vrot.lane.b32.xlu0 %v1075_v40, %s2988_s4  ;;  %v1443_v14 = vsel %vm1427_vm11, %v3507_v32, %v1091_v8  ;;  %v1239_v32 = vrot.slane %v1237_v11, 1 }
 0x104   : > { %1339 = vrot.lane.b32.xlu1 %v3803_v37, %s2986_s14  ;;  %v1483_v4 = vsel %vm1460_vm15, %v1443_v14, %v1172_v27 }
 0x105   : > { %v1256_v9 = vpop.permute.xlu0 %1255  ;;  %v1240_v51 = vsel %vm883_vm5, %v1235_v25, %v1239_v32 }
 0x106   : > { %v1326_v20 = vpop.permute.xlu1 %1325  ;;  %v1558_v19 = vsel %vm1542_vm13, %v1525_v12, %v1256_v9 }
 0x107   : > { %1304 = vrot.lane.b32.xlu0 %v1156_v47, %s2987_s25  ;;  %v1638_v30 = vsel %vm1624_vm0, %v1289_v57, %v1326_v20  ;;  %v1356_v57 = vshll.u32 %v2959_v31, 16 }
 0x108   : > { %1421 = vrot.lane.b32.xlu1 %v1156_v47, %s2989_s17 }
 0x109   : > { %v1291_v21 = vpop.permute.xlu0 %1290  ;;  %v1358_v62 = vrot.slane %v1356_v57, 1 }
 0x10a   : > { %v1408_v17 = vpop.permute.xlu1 %1407  ;;  %v1598_v24 = vsel %vm1575_vm14, %v1558_v19, %v1291_v21 }
 0x10b   : > { %1386 = vrot.lane.b32.xlu0 %v1075_v40, %s2990_s22  ;;  %2099 = vmatprep.mubr.bf16.mxu0 %v1598_v24  ;;  %v1359_v5 = vsel %vm883_vm5, %v1354_v61, %v1358_v62 }
 0x10c   : > { %2100 = vmatmul.mubr.bf16.gmra.mrb[28].mxu0 %v1483_v4  ;;  %1224 = vrot.lane.b32.xlu1 %v2956_v7, %s2985_s11 }
 0x10d   : > { %v1373_v36 = vpop.permute.xlu0 %1372 }
 0x10e   : > { %v1211_v34 = vpop.permute.xlu1 %1210  ;;  %v1720_v28 = vsel %vm1706_vm1, %v1373_v36, %v1408_v17  ;;  %v1677_v42 = vsel %vm1657_vm2, %v1638_v30, %v1373_v36 }
 0x10f   : > { %1187 = vrot.lane.b32.xlu0 %v1156_v47, %s2983_s28  ;;  %2662 = vmatprep.mubr.msk.bf16.mxu1 %vm1974_vm3, %v1720_v28 }
 0x110   : > { %2253 = vmatmul.mubr.bf16.gmra.mrb[20].mxu1 %v1677_v42  ;;  %1106 = vrot.lane.b32.xlu1 %v1075_v40, %s2984_s6 }
 0x111   : > { %v1174_v46 = vpop.permute.xlu0 %1173 }
 0x112   : > { %v1093_v48 = vpop.permute.xlu1 %1092  ;;  %v1527_v35 = vsel %vm1509_vm12, %v1174_v46, %v1211_v34 }
 0x113   : > { %1271 = vrot.lane.b32.xlu0 %v1240_v51, %s2988_s4  ;;  %v1445_v58 = vsel %vm1427_vm11, %v3555_v39, %v1093_v48 }
 0x114   : > { %1341 = vrot.lane.b32.xlu1 %v2956_v7, %s2986_s14  ;;  %v1486_v3 = vsel %vm1460_vm15, %v1445_v58, %v1174_v46  ;;  %v1393_v7 = vrot.slane %v2959_v31, 1 }
 0x115   : > { %v1258_v52 = vpop.permute.xlu0 %1257 }
 0x116   : > { %v1328_v22 = vpop.permute.xlu1 %1327  ;;  %v1560_v59 = vsel %vm1542_vm13, %v1527_v35, %v1258_v52  ;;  %v1394_v55 = vsel %vm1108_vm6, %v1392_v6, %v1393_v7 }
 0x117   : > { %1306 = vrot.lane.b32.xlu0 %v1275_v50, %s2987_s25  ;;  %v1640_v39 = vsel %vm1624_vm0, %v1291_v21, %v1328_v22  ;;  %s3963_s25 = scalar_lea.vmem %s4076_s3, %s2706_s16 }
 0x118   : > { %1423 = vrot.lane.b32.xlu1 %v1275_v50, %s2989_s17 }
 0x119   : > { %v1293_v60 = vpop.permute.xlu0 %1292 }
 0x11a   : > { %v1410_v33 = vpop.permute.xlu1 %1409  ;;  %v1601_v15 = vsel %vm1575_vm14, %v1560_v59, %v1293_v60 }
 0x11b   : > { %1388 = vrot.lane.b32.xlu0 %v1240_v51, %s2990_s22  ;;  %2107 = vmatprep.mubr.bf16.mxu0 %v1601_v15 }
 0x11c   : > { %2108 = vmatmul.mubr.bf16.gmra.mrb[32].mxu0 %v1486_v3  ;;  %1343 = vrot.lane.b32.xlu1 %v2958_v26, %s2986_s14 }
 0x11d   : > { %v1375_v2 = vpop.permute.xlu0 %1374 }
 0x11e   : > { %v1213_v40 = vpop.permute.xlu1 %1212  ;;  %v1722_v27 = vsel %vm1706_vm1, %v1375_v2, %v1410_v33  ;;  %v1680_v8 = vsel %vm1657_vm2, %v1640_v39, %v1375_v2 }
 0x11f   : > { %1313 = vrot.lane.b32.xlu0 %v3683_v41, %s2986_s14  ;;  %2663 = vmatprep.mubr.msk.bf16.mxu1 %vm1974_vm3, %v1722_v27 }
 0x120   : > { %2261 = vmatmul.mubr.bf16.gmra.mrb[24].mxu1 %v1680_v8  ;;  %1390 = vrot.lane.b32.xlu1 %v1359_v5, %s2990_s22 }
 0x121   : > { %v1176_v0 = vpop.permute.xlu0 %1175 }
 0x122   : > { %v1095_v47 = vpop.permute.xlu1 %1094  ;;  %v1529_v41 = vsel %vm1509_vm12, %v1176_v0, %v1213_v40 }
 0x123   : > { %1360 = vrot.lane.b32.xlu0 %v3308_v45, %s2990_s22  ;;  %v1447_v11 = vsel %vm1427_vm11, %v3587_v10, %v1095_v47 }
 0x124   : > { %1425 = vrot.lane.b32.xlu1 %v1394_v55, %s2989_s17  ;;  %v1489_v45 = vsel %vm1460_vm15, %v1447_v11, %v1176_v0 }
 0x125   : > { %v1260_v9 = vpop.permute.xlu0 %1259 }
 0x126   : > { %v1330_v20 = vpop.permute.xlu1 %1329  ;;  %v1562_v12 = vsel %vm1542_vm13, %v1529_v41, %v1260_v9 }
 0x127   : > { %1395 = vrot.lane.b32.xlu0 %v3268_v13, %s2989_s17  ;;  %v1642_v19 = vsel %vm1624_vm0, %v1293_v60, %v1330_v20 }
 0x129   : > { %v1295_v14 = vpop.permute.xlu0 %1294 }
 0x12a   : > { %v1412_v16 = vpop.permute.xlu1 %1411  ;;  %v1604_v18 = vsel %vm1575_vm14, %v1562_v12, %v1295_v14 }
 0x12b   : > { %2115 = vmatprep.mubr.bf16.mxu0 %v1604_v18 }
 0x12c   : > { %2116 = vmatmul.mubr.bf16.gmra.mrb[36].mxu0 %v1489_v45 }
 0x12d   : > { %v1377_v21 = vpop.permute.xlu0 %1376 }
 0x12e   : > { %v1215_v17 = vpop.permute.xlu1 %1214  ;;  %v1724_v13 = vsel %vm1706_vm1, %v1377_v21, %v1412_v16  ;;  %v1683_v24 = vsel %vm1657_vm2, %v1642_v19, %v1377_v21 }
 0x12f   : > { %2664 = vmatprep.mubr.msk.bf16.mxu1 %vm1974_vm3, %v1724_v13 }
 0x130   : > { %2269 = vmatmul.mubr.bf16.gmra.mrb[28].mxu1 %v1683_v24 }
 0x131   : > { %v1178_v10 = vpop.permute.xlu0 %1177 }
 0x132   : > { %v1097_v4 = vpop.permute.xlu1 %1096  ;;  %v1531_v30 = vsel %vm1509_vm12, %v1178_v10, %v1215_v17 }
 0x133   : > { %v1449_v36 = vsel %vm1427_vm11, %v3606_v23, %v1097_v4 }
 0x134   : > { %v1492_v51 = vsel %vm1460_vm15, %v1449_v36, %v1178_v10 }
 0x135   : > { %v1262_v25 = vpop.permute.xlu0 %1261 }
 0x136   : > { %v1332_v32 = vpop.permute.xlu1 %1331  ;;  %v1564_v34 = vsel %vm1542_vm13, %v1531_v30, %v1262_v25 }
 0x137   : > { %v1644_v43 = vsel %vm1624_vm0, %v1295_v14, %v1332_v32 }
 0x139   : > { %v1297_v26 = vpop.permute.xlu0 %1296 }
 0x13a   : > { %v1607_v28 = vsel %vm1575_vm14, %v1564_v34, %v1297_v26  ;;  %v1414_v42 = vpop.permute.xlu1 %1413 }
 0x13b   : > { %2123 = vmatprep.mubr.bf16.mxu0 %v1607_v28 }
 0x13c   : > { %2124 = vmatmul.mubr.bf16.gmra.mrb[40].mxu0 %v1492_v51 }
 0x13d   : > { %v1379_v44 = vpop.permute.xlu0 %1378 }
 0x13e   : > { %v1726_v46 = vsel %vm1706_vm1, %v1379_v44, %v1414_v42  ;;  %v1686_v48 = vsel %vm1657_vm2, %v1644_v43, %v1379_v44  ;;  %v1217_v31 = vpop.permute.xlu1 %1216 }
 0x13f   : > { %2665 = vmatprep.mubr.msk.bf16.mxu1 %vm1974_vm3, %v1726_v46 }
 0x140   : > { %2277 = vmatmul.mubr.bf16.gmra.mrb[32].mxu1 %v1686_v48 }
 0x141   : > { %v1180_v23 = vpop.permute.xlu0 %1179 }
 0x142   : > { %v1099_v38 = vpop.permute.xlu1 %1098  ;;  %v1533_v22 = vsel %vm1509_vm12, %v1180_v23, %v1217_v31 }
 0x143   : > { %v1451_v53 = vsel %vm1427_vm11, %v3639_v1, %v1099_v38 }
 0x144   : > { %v1495_v59 = vsel %vm1460_vm15, %v1451_v53, %v1180_v23 }
 0x145   : > { %v1264_v50 = vpop.permute.xlu0 %1263 }
 0x146   : > { %v1334_v52 = vpop.permute.xlu1 %1333  ;;  %v1566_v56 = vsel %vm1542_vm13, %v1533_v22, %v1264_v50 }
 0x147   : > { %v1646_v60 = vsel %vm1624_vm0, %v1297_v26, %v1334_v52 }
 0x149   : > { %v1299_v57 = vpop.permute.xlu0 %1298 }
 0x14a   : > { %v1610_v35 = vsel %vm1575_vm14, %v1566_v56, %v1299_v57  ;;  %v1416_v58 = vpop.permute.xlu1 %1415 }
 0x14b   : > { %2131 = vmatprep.mubr.bf16.mxu0 %v1610_v35 }
 0x14c   : > { %2132 = vmatmul.mubr.bf16.gmra.mrb[44].mxu0 %v1495_v59 }
 0x14d   : > { %v1381_v33 = vpop.permute.xlu0 %1380 }
 0x14e   : > { %v1728_v61 = vsel %vm1706_vm1, %v1381_v33, %v1416_v58  ;;  %v1689_v62 = vsel %vm1657_vm2, %v1646_v60, %v1381_v33  ;;  %v1219_v15 = vpop.permute.xlu1 %1218 }
 0x14f   : > { %2666 = vmatprep.mubr.msk.bf16.mxu1 %vm1974_vm3, %v1728_v61 }
 0x150   : > { %2285 = vmatmul.mubr.bf16.gmra.mrb[36].mxu1 %v1689_v62 }
 0x151   : > { %v1182_v1 = vpop.permute.xlu0 %1181 }
 0x152   : > { %v1101_v3 = vpop.permute.xlu1 %1100  ;;  %v1535_v40 = vsel %vm1509_vm12, %v1182_v1, %v1219_v15 }
 0x153   : > { %v1453_v5 = vsel %vm1427_vm11, %v3700_v54, %v1101_v3 }
 0x154   : > { %v1498_v0 = vsel %vm1460_vm15, %v1453_v5, %v1182_v1 }
 0x155   : > { %v1266_v39 = vpop.permute.xlu0 %1265 }
 0x156   : > { %v1336_v2 = vpop.permute.xlu1 %1335  ;;  %v1568_v6 = vsel %vm1542_vm13, %v1535_v40, %v1266_v39 }
 0x157   : > { %v1648_v47 = vsel %vm1624_vm0, %v1299_v57, %v1336_v2 }
 0x159   : > { %v1301_v7 = vpop.permute.xlu0 %1300 }
 0x15a   : > { %v1613_v27 = vsel %vm1575_vm14, %v1568_v6, %v1301_v7  ;;  %v1418_v8 = vpop.permute.xlu1 %1417 }
 0x15b   : > { %2139 = vmatprep.mubr.bf16.mxu0 %v1613_v27 }
 0x15c   : > { %2140 = vmatmul.mubr.bf16.gmra.mrb[48].mxu0 %v1498_v0 }
 0x15d   : > { %v1383_v55 = vpop.permute.xlu0 %1382 }
 0x15e   : > { %v1730_v9 = vsel %vm1706_vm1, %v1383_v55, %v1418_v8  ;;  %v1692_v20 = vsel %vm1657_vm2, %v1648_v47, %v1383_v55  ;;  %v1221_v41 = vpop.permute.xlu1 %1220  ;;  %v3954_v55 = vld [vmem:[%s4075_s2] ss:$0 sm:$0xff] }
 0x15f   : > { %2667 = vmatprep.mubr.msk.bf16.mxu1 %vm1974_vm3, %v1730_v9 }
 0x160   : > { %2293 = vmatmul.mubr.bf16.gmra.mrb[40].mxu1 %v1692_v20 }
 0x161   : > { %v1184_v54 = vpop.permute.xlu0 %1183 }
 0x162   : > { %v1103_v11 = vpop.permute.xlu1 %1102  ;;  %v1537_v16 = vsel %vm1509_vm12, %v1184_v54, %v1221_v41 }
 0x163   : > { %v1455_v18 = vsel %vm1427_vm11, %v3741_v29, %v1103_v11 }
 0x164   : > { %v1501_v13 = vsel %vm1460_vm15, %v1455_v18, %v1184_v54 }
 0x165   : > { %v1268_v12 = vpop.permute.xlu0 %1267 }
 0x166   : > { %v1338_v14 = vpop.permute.xlu1 %1337  ;;  %v1570_v45 = vsel %vm1542_vm13, %v1537_v16, %v1268_v12 }
 0x167   : > { %v1650_v24 = vsel %vm1624_vm0, %v1301_v7, %v1338_v14 }
 0x169   : > { %v1303_v19 = vpop.permute.xlu0 %1302 }
 0x16a   : > { %v1616_v21 = vsel %vm1575_vm14, %v1570_v45, %v1303_v19  ;;  %v1420_v17 = vpop.permute.xlu1 %1419 }
 0x16b   : > { %2147 = vmatprep.mubr.bf16.mxu0 %v1616_v21 }
 0x16c   : > { %2148 = vmatmul.mubr.bf16.gmra.mrb[52].mxu0 %v1501_v13 }
 0x16d   : > { %v1385_v10 = vpop.permute.xlu0 %1384 }
 0x16e   : > { %v1732_v4 = vsel %vm1706_vm1, %v1385_v10, %v1420_v17  ;;  %v1695_v25 = vsel %vm1657_vm2, %v1650_v24, %v1385_v10  ;;  %v1223_v32 = vpop.permute.xlu1 %1222 }
 0x16f   : > { %2668 = vmatprep.mubr.msk.bf16.mxu1 %vm1974_vm3, %v1732_v4 }
 0x170   : > { %2301 = vmatmul.mubr.bf16.gmra.mrb[44].mxu1 %v1695_v25 }
 0x171   : > { %v1186_v29 = vpop.permute.xlu0 %1185 }
 0x172   : > { %v1105_v30 = vpop.permute.xlu1 %1104  ;;  %v1539_v26 = vsel %vm1509_vm12, %v1186_v29, %v1223_v32 }
 0x173   : > { %v1457_v28 = vsel %vm1427_vm11, %v3775_v63, %v1105_v30 }
 0x174   : > { %v1504_v46 = vsel %vm1460_vm15, %v1457_v28, %v1186_v29 }
 0x175   : > { %v1270_v36 = vpop.permute.xlu0 %1269 }
 0x176   : > { %v1340_v34 = vpop.permute.xlu1 %1339  ;;  %v1572_v42 = vsel %vm1542_vm13, %v1539_v26, %v1270_v36 }
 0x177   : > { %v1652_v48 = vsel %vm1624_vm0, %v1303_v19, %v1340_v34 }
 0x179   : > { %v1305_v51 = vpop.permute.xlu0 %1304 }
 0x17a   : > { %v1619_v43 = vsel %vm1575_vm14, %v1572_v42, %v1305_v51  ;;  %v1422_v44 = vpop.permute.xlu1 %1421 }
 0x17b   : > { %2155 = vmatprep.mubr.bf16.mxu0 %v1619_v43 }
 0x17c   : > { %2156 = vmatmul.mubr.bf16.gmra.mrb[56].mxu0 %v1504_v46 }
 0x17d   : > { %v1387_v31 = vpop.permute.xlu0 %1386 }
 0x17e   : > { %v1734_v23 = vsel %vm1706_vm1, %v1387_v31, %v1422_v44  ;;  %v1698_v38 = vsel %vm1657_vm2, %v1652_v48, %v1387_v31  ;;  %v1225_v50 = vpop.permute.xlu1 %1224 }
 0x17f   : > { %2669 = vmatprep.mubr.msk.bf16.mxu1 %vm1974_vm3, %v1734_v23 }
 0x180   : > { %2309 = vmatmul.mubr.bf16.gmra.mrb[48].mxu1 %v1698_v38 }
 0x181   : > { %v1188_v63 = vpop.permute.xlu0 %1187 }
 0x182   : > { %v1107_v52 = vpop.permute.xlu1 %1106  ;;  %v1541_v60 = vsel %vm1509_vm12, %v1188_v63, %v1225_v50 }
 0x183   : > { %v1459_v33 = vsel %vm1427_vm11, %v3803_v37, %v1107_v52 }
 0x184   : > { %v1507_v39 = vsel %vm1460_vm15, %v1459_v33, %v1188_v63 }
 0x185   : > { %v2756_v22 = vpop.f32.mrb[0].mxu0  ;;  %v1272_v53 = vpop.permute.xlu0 %1271 }
 0x186   : > { %v2757_v56 = vpop.f32.mrb[1].mxu0  ;;  %v1342_v35 = vpop.permute.xlu1 %1341  ;;  %v1574_v62 = vsel %vm1542_vm13, %v1541_v60, %v1272_v53 }
 0x187   : > { %v3937_v57 = vadd.f32 %v2757_v56, %v2756_v22  ;;  %v2759_v58 = vpop.f32.mrb[2].mxu0  ;;  %v1654_v40 = vsel %vm1624_vm0, %v1305_v51, %v1342_v35 }
 0x188   : > { %v2760_v59 = vpop.f32.mrb[3].mxu0 }
 0x189   : > { %v3942_v61 = vadd.f32 %v2760_v59, %v2759_v58  ;;  %v1307_v15 = vpop.permute.xlu0 %1306 }
 0x18a   : > { %v1622_v1 = vsel %vm1575_vm14, %v1574_v62, %v1307_v15  ;;  %v1424_v3 = vpop.permute.xlu1 %1423 }
 0x18b   : > { %2163 = vmatprep.mubr.bf16.mxu0 %v1622_v1 }
 0x18c   : > { %2164 = vmatmul.mubr.bf16.gmra.mrb[60].mxu0 %v1507_v39 }
 0x18d   : > { %v2762_v2 = vpop.f32.mrb[4].mxu0  ;;  %v1389_v5 = vpop.permute.xlu0 %1388 }
 0x18e   : > { %v2763_v6 = vpop.f32.mrb[5].mxu0  ;;  %v1736_v7 = vsel %vm1706_vm1, %v1389_v5, %v1424_v3  ;;  %v1701_v37 = vsel %vm1657_vm2, %v1654_v40, %v1389_v5  ;;  %v1344_v8 = vpop.permute.xlu1 %1343 }
 0x18f   : > { %v2764_v27 = vadd.f32 %v2763_v6, %v2762_v2  ;;  %v2765_v0 = vpop.f32.mrb[6].mxu0  ;;  %2670 = vmatprep.mubr.msk.bf16.mxu1 %vm1974_vm3, %v1736_v7  ;;  %v1656_v32 = vsel %vm1624_vm0, %v1307_v15, %v1344_v8 }
 0x190   : > { %v2766_v47 = vpop.f32.mrb[7].mxu0  ;;  %2317 = vmatmul.mubr.bf16.gmra.mrb[52].mxu1 %v1701_v37 }
 0x191   : > { %v2767_v9 = vadd.f32 %v2766_v47, %v2765_v0  ;;  %v2054_v20 = vadd.f32 %v2764_v27, %v3954_v55  ;;  %v1314_v41 = vpop.permute.xlu0 %1313 }
 0x192   : > { %v1391_v11 = vpop.permute.xlu1 %1390  ;;  %v1626_v51 = vsel %vm1624_vm0, %v3618_v49, %v1314_v41 }
 0x193   : > { %v2057_v54 = vadd.f32 %v2767_v9, %v3954_v55  ;;  %v1704_v42 = vsel %vm1657_vm2, %v1656_v32, %v1391_v11 }
 0x194   : > { %v2214_v12 = vpop.f32.mrb[0].mxu1 }
 0x195   : > { %v2215_v14 = vadd.f32 %v2214_v12, %v2054_v20  ;;  %v2216_v16 = vpop.f32.mrb[1].mxu1  ;;  %v2768_v18 = vpop.f32.mrb[8].mxu0 }
 0x196   : > { %v1361_v45 = vpop.permute.xlu0 %1360  ;;  %v2217_v19 = vpop.f32.mrb[2].mxu1 }
 0x197   : > { %v2335_v21 = vmax.f32 %v2215_v14, 0.0  ;;  %v2218_v17 = vadd.f32 %v2217_v19, %v2057_v54  ;;  %v2219_v13 = vpop.f32.mrb[3].mxu1  ;;  %v2769_v24 = vpop.f32.mrb[9].mxu0  ;;  %v1659_v46 = vsel %vm1657_vm2, %v1626_v51, %v1361_v45 }
 0x198   : > { %v2770_v10 = vadd.f32 %v2769_v24, %v2768_v18  ;;  %v1426_v4 = vpop.permute.xlu1 %1425  ;;  %v2771_v25 = vpop.f32.mrb[10].mxu0 }
 0x199   : > { %v2710_v29 = vpack.c.bf16 %v2335_v21, %v2335_v21  ;;  %v2336_v30 = vmax.f32 %v2218_v17, 0.0  ;;  %v1738_v36 = vsel %vm1706_vm1, %v1391_v11, %v1426_v4  ;;  %v2772_v34 = vpop.f32.mrb[11].mxu0 }
 0x19a   : > { %v1396_v26 = vpop.permute.xlu0 %1395  ;;  %v2773_v28 = vadd.f32 %v2772_v34, %v2771_v25  ;;  %2671 = vmatprep.mubr.msk.bf16.mxu1 %vm1974_vm3, %v1738_v36  ;;  %v2062_v50 = vadd.f32 %v2770_v10, %v3954_v55 }
 0x19b   : > { %2496 = vst.msk [vmem:[%s3963_s25 + $0x8] sm:$0xf] %vm2493_vm4, %v2710_v29  ;;  %v2711_v43 = vpack.c.bf16 %v2336_v30, %v2336_v30  ;;  %v1708_v44 = vsel %vm1706_vm1, %v1361_v45, %v1396_v26  ;;  %2325 = vmatmul.mubr.bf16.gmra.mrb[56].mxu1 %v1704_v42 }
 0x19c   : > { %2656 = vmatprep.mubr.msk.bf16.mxu0 %vm1974_vm3, %v1708_v44  ;;  %v2065_v56 = vadd.f32 %v2773_v28, %v3954_v55 }
 0x19d   : > { %2497 = vst.msk [vmem:[%s3963_s25 + $0xc] sm:$0xf] %vm2493_vm4, %v2711_v43  ;;  %2205 = vmatmul.mubr.bf16.vlgmr.msra.gmra.mrb[64].mxu0 %v1659_v46 }
 0x1a0   : > { %v2774_v48 = vpop.f32.mrb[12].mxu0 }
 0x1a1   : > { %v2775_v31 = vpop.f32.mrb[13].mxu0 }
 0x1a2   : > { %v2776_v23 = vadd.f32 %v2775_v31, %v2774_v48  ;;  %v2777_v38 = vpop.f32.mrb[14].mxu0 }
 0x1a3   : > { %v2778_v49 = vpop.f32.mrb[15].mxu0 }
 0x1a4   : > { %v2779_v63 = vadd.f32 %v2778_v49, %v2777_v38  ;;  %v2222_v52 = vpop.f32.mrb[4].mxu1  ;;  %v2070_v5 = vadd.f32 %v2776_v23, %v3954_v55 }
 0x1a5   : > { %v2223_v22 = vadd.f32 %v2222_v52, %v2062_v50  ;;  %v2224_v53 = vpop.f32.mrb[5].mxu1 }
 0x1a6   : > { %v2225_v35 = vpop.f32.mrb[6].mxu1  ;;  %v2073_v8 = vadd.f32 %v2779_v63, %v3954_v55 }
 0x1a7   : > { %v2337_v58 = vmax.f32 %v2223_v22, 0.0  ;;  %v2226_v59 = vadd.f32 %v2225_v35, %v2065_v56  ;;  %v2227_v60 = vpop.f32.mrb[7].mxu1 }
 0x1a9   : > { %v2712_v33 = vpack.c.bf16 %v2337_v58, %v2337_v58  ;;  %v2338_v62 = vmax.f32 %v2226_v59, 0.0 }
 0x1ab   : > { %2498 = vst.msk [vmem:[%s3963_s25 + $0x10] sm:$0xf] %vm2493_vm4, %v2712_v33  ;;  %v2713_v15 = vpack.c.bf16 %v2338_v62, %v2338_v62 }
 0x1ad   : > { %2499 = vst.msk [vmem:[%s3963_s25 + $0x14] sm:$0xf] %vm2493_vm4, %v2713_v15 }
 0x1b0   : > { %v2780_v1 = vpop.f32.mrb[16].mxu0 }
 0x1b1   : > { %v2781_v3 = vpop.f32.mrb[17].mxu0 }
 0x1b2   : > { %v2782_v39 = vadd.f32 %v2781_v3, %v2780_v1  ;;  %v2783_v2 = vpop.f32.mrb[18].mxu0 }
 0x1b3   : > { %v2784_v40 = vpop.f32.mrb[19].mxu0 }
 0x1b4   : > { %v2785_v6 = vadd.f32 %v2784_v40, %v2783_v2  ;;  %v2230_v7 = vpop.f32.mrb[8].mxu1  ;;  %v2078_v19 = vadd.f32 %v2782_v39, %v3954_v55 }
 0x1b5   : > { %v2231_v37 = vadd.f32 %v2230_v7, %v2070_v5  ;;  %v2232_v27 = vpop.f32.mrb[9].mxu1 }
 0x1b6   : > { %v2233_v0 = vpop.f32.mrb[10].mxu1  ;;  %v2081_v10 = vadd.f32 %v2785_v6, %v3954_v55 }
 0x1b7   : > { %v2339_v47 = vmax.f32 %v2231_v37, 0.0  ;;  %v2234_v9 = vadd.f32 %v2233_v0, %v2073_v8  ;;  %v2235_v20 = vpop.f32.mrb[11].mxu1 }
 0x1b9   : > { %v2714_v41 = vpack.c.bf16 %v2339_v47, %v2339_v47  ;;  %v2340_v54 = vmax.f32 %v2234_v9, 0.0 }
 0x1bb   : > { %2500 = vst.msk [vmem:[%s3963_s25 + $0x18] sm:$0xf] %vm2493_vm4, %v2714_v41  ;;  %v2715_v11 = vpack.c.bf16 %v2340_v54, %v2340_v54 }
 0x1bd   : > { %2501 = vst.msk [vmem:[%s3963_s25 + $0x1c] sm:$0xf] %vm2493_vm4, %v2715_v11 }
 0x1bf   : > { %v2786_v12 = vpop.f32.mrb[20].mxu0 }
 0x1c0   : > { %v2787_v14 = vpop.f32.mrb[21].mxu0 }
 0x1c1   : > { %v2788_v16 = vadd.f32 %v2787_v14, %v2786_v12  ;;  %v2789_v18 = vpop.f32.mrb[22].mxu0 }
 0x1c2   : > { %v2790_v45 = vpop.f32.mrb[23].mxu0 }
 0x1c3   : > { %v2791_v21 = vadd.f32 %v2790_v45, %v2789_v18  ;;  %v2238_v17 = vpop.f32.mrb[12].mxu1  ;;  %v2086_v44 = vadd.f32 %v2788_v16, %v3954_v55 }
 0x1c4   : > { %v2239_v13 = vadd.f32 %v2238_v17, %v2078_v19  ;;  %v2240_v24 = vpop.f32.mrb[13].mxu1 }
 0x1c5   : > { %v2241_v4 = vpop.f32.mrb[14].mxu1  ;;  %v2089_v38 = vadd.f32 %v2791_v21, %v3954_v55 }
 0x1c6   : > { %v2341_v25 = vmax.f32 %v2239_v13, 0.0  ;;  %v2242_v32 = vadd.f32 %v2241_v4, %v2081_v10  ;;  %v2243_v29 = vpop.f32.mrb[15].mxu1 }
 0x1c8   : > { %v2716_v30 = vpack.c.bf16 %v2341_v25, %v2341_v25  ;;  %v2342_v36 = vmax.f32 %v2242_v32, 0.0 }
 0x1ca   : > { %2502 = vst.msk [vmem:[%s3963_s25 + $0x20] sm:$0xf] %vm2493_vm4, %v2716_v30  ;;  %v2717_v34 = vpack.c.bf16 %v2342_v36, %v2342_v36 }
 0x1cc   : > { %2503 = vst.msk [vmem:[%s3963_s25 + $0x24] sm:$0xf] %vm2493_vm4, %v2717_v34 }
 0x1cf   : > { %v2792_v26 = vpop.f32.mrb[24].mxu0 }
 0x1d0   : > { %v2793_v28 = vpop.f32.mrb[25].mxu0 }
 0x1d1   : > { %v2794_v42 = vadd.f32 %v2793_v28, %v2792_v26  ;;  %v2795_v51 = vpop.f32.mrb[26].mxu0 }
 0x1d2   : > { %v2796_v43 = vpop.f32.mrb[27].mxu0 }
 0x1d3   : > { %v2797_v46 = vadd.f32 %v2796_v43, %v2795_v51  ;;  %v2246_v48 = vpop.f32.mrb[16].mxu1  ;;  %v2094_v62 = vadd.f32 %v2794_v42, %v3954_v55 }
 0x1d4   : > { %v2247_v31 = vadd.f32 %v2246_v48, %v2086_v44  ;;  %v2248_v23 = vpop.f32.mrb[17].mxu1 }
 0x1d5   : > { %v2249_v49 = vpop.f32.mrb[18].mxu1  ;;  %v2097_v2 = vadd.f32 %v2797_v46, %v3954_v55 }
 0x1d6   : > { %v2343_v50 = vmax.f32 %v2247_v31, 0.0  ;;  %v2250_v63 = vadd.f32 %v2249_v49, %v2089_v38  ;;  %v2251_v52 = vpop.f32.mrb[19].mxu1 }
 0x1d8   : > { %v2718_v22 = vpack.c.bf16 %v2343_v50, %v2343_v50  ;;  %v2344_v53 = vmax.f32 %v2250_v63, 0.0 }
 0x1da   : > { %2504 = vst.msk [vmem:[%s3963_s25 + $0x28] sm:$0xf] %vm2493_vm4, %v2718_v22  ;;  %v2719_v56 = vpack.c.bf16 %v2344_v53, %v2344_v53 }
 0x1dc   : > { %2505 = vst.msk [vmem:[%s3963_s25 + $0x2c] sm:$0xf] %vm2493_vm4, %v2719_v56 }
 0x1df   : > { %v2798_v35 = vpop.f32.mrb[28].mxu0 }
 0x1e0   : > { %v2799_v58 = vpop.f32.mrb[29].mxu0 }
 0x1e1   : > { %v2800_v59 = vadd.f32 %v2799_v58, %v2798_v35  ;;  %v2801_v60 = vpop.f32.mrb[30].mxu0 }
 0x1e2   : > { %v2802_v33 = vpop.f32.mrb[31].mxu0 }
 0x1e3   : > { %v2803_v15 = vadd.f32 %v2802_v33, %v2801_v60  ;;  %v2254_v1 = vpop.f32.mrb[20].mxu1  ;;  %v2102_v54 = vadd.f32 %v2800_v59, %v3954_v55 }
 0x1e4   : > { %v2255_v3 = vadd.f32 %v2254_v1, %v2094_v62  ;;  %v2256_v39 = vpop.f32.mrb[21].mxu1 }
 0x1e5   : > { %v2257_v40 = vpop.f32.mrb[22].mxu1  ;;  %v2105_v18 = vadd.f32 %v2803_v15, %v3954_v55 }
 0x1e6   : > { %v2345_v5 = vmax.f32 %v2255_v3, 0.0  ;;  %v2258_v6 = vadd.f32 %v2257_v40, %v2097_v2  ;;  %v2259_v7 = vpop.f32.mrb[23].mxu1 }
 0x1e8   : > { %v2720_v37 = vpack.c.bf16 %v2345_v5, %v2345_v5  ;;  %v2346_v27 = vmax.f32 %v2258_v6, 0.0 }
 0x1ea   : > { %2506 = vst.msk [vmem:[%s3963_s25 + $0x30] sm:$0xf] %vm2493_vm4, %v2720_v37  ;;  %v2721_v8 = vpack.c.bf16 %v2346_v27, %v2346_v27 }
 0x1ec   : > { %2507 = vst.msk [vmem:[%s3963_s25 + $0x34] sm:$0xf] %vm2493_vm4, %v2721_v8 }
 0x1ef   : > { %v2804_v0 = vpop.f32.mrb[32].mxu0 }
 0x1f0   : > { %v2805_v47 = vpop.f32.mrb[33].mxu0 }
 0x1f1   : > { %v2806_v9 = vadd.f32 %v2805_v47, %v2804_v0  ;;  %v2807_v20 = vpop.f32.mrb[34].mxu0 }
 0x1f2   : > { %v2808_v41 = vpop.f32.mrb[35].mxu0 }
 0x1f3   : > { %v2809_v11 = vadd.f32 %v2808_v41, %v2807_v20  ;;  %v2262_v12 = vpop.f32.mrb[24].mxu1  ;;  %v2110_v36 = vadd.f32 %v2806_v9, %v3954_v55 }
 0x1f4   : > { %v2263_v14 = vadd.f32 %v2262_v12, %v2102_v54  ;;  %v2264_v16 = vpop.f32.mrb[25].mxu1 }
 0x1f5   : > { %v2265_v45 = vpop.f32.mrb[26].mxu1  ;;  %v2113_v51 = vadd.f32 %v2809_v11, %v3954_v55 }
 0x1f6   : > { %v2347_v19 = vmax.f32 %v2263_v14, 0.0  ;;  %v2266_v21 = vadd.f32 %v2265_v45, %v2105_v18  ;;  %v2267_v17 = vpop.f32.mrb[27].mxu1 }
 0x1f8   : > { %v2722_v13 = vpack.c.bf16 %v2347_v19, %v2347_v19  ;;  %v2348_v24 = vmax.f32 %v2266_v21, 0.0 }
 0x1fa   : > { %2508 = vst.msk [vmem:[%s3963_s25 + $0x38] sm:$0xf] %vm2493_vm4, %v2722_v13  ;;  %v2723_v10 = vpack.c.bf16 %v2348_v24, %v2348_v24 }
 0x1fc   : > { %2509 = vst.msk [vmem:[%s3963_s25 + $0x3c] sm:$0xf] %vm2493_vm4, %v2723_v10 }
 0x1ff   : > { %v2810_v4 = vpop.f32.mrb[36].mxu0 }
 0x200   : > { %v2811_v25 = vpop.f32.mrb[37].mxu0 }
 0x201   : > { %v2812_v32 = vadd.f32 %v2811_v25, %v2810_v4  ;;  %v2813_v29 = vpop.f32.mrb[38].mxu0 }
 0x202   : > { %v2814_v30 = vpop.f32.mrb[39].mxu0 }
 0x203   : > { %v2815_v34 = vadd.f32 %v2814_v30, %v2813_v29  ;;  %v2270_v26 = vpop.f32.mrb[28].mxu1  ;;  %v2118_v53 = vadd.f32 %v2812_v32, %v3954_v55 }
 0x204   : > { %v2271_v28 = vadd.f32 %v2270_v26, %v2110_v36  ;;  %v2272_v42 = vpop.f32.mrb[29].mxu1 }
 0x205   : > { %v2273_v43 = vpop.f32.mrb[30].mxu1  ;;  %v2121_v60 = vadd.f32 %v2815_v34, %v3954_v55 }
 0x206   : > { %v2349_v44 = vmax.f32 %v2271_v28, 0.0  ;;  %v2274_v46 = vadd.f32 %v2273_v43, %v2113_v51  ;;  %v2275_v48 = vpop.f32.mrb[31].mxu1 }
 0x208   : > { %v2724_v31 = vpack.c.bf16 %v2349_v44, %v2349_v44  ;;  %v2350_v23 = vmax.f32 %v2274_v46, 0.0 }
 0x20a   : > { %2510 = vst.msk [vmem:[%s3963_s25 + $0x40] sm:$0xf] %vm2493_vm4, %v2724_v31  ;;  %v2725_v38 = vpack.c.bf16 %v2350_v23, %v2350_v23 }
 0x20c   : > { %2511 = vst.msk [vmem:[%s3963_s25 + $0x44] sm:$0xf] %vm2493_vm4, %v2725_v38 }
 0x20f   : > { %v2816_v49 = vpop.f32.mrb[40].mxu0 }
 0x210   : > { %v2817_v50 = vpop.f32.mrb[41].mxu0 }
 0x211   : > { %v2818_v63 = vadd.f32 %v2817_v50, %v2816_v49  ;;  %v2819_v52 = vpop.f32.mrb[42].mxu0 }
 0x212   : > { %v2820_v22 = vpop.f32.mrb[43].mxu0 }
 0x213   : > { %v2821_v56 = vadd.f32 %v2820_v22, %v2819_v52  ;;  %v2278_v35 = vpop.f32.mrb[32].mxu1  ;;  %v2126_v27 = vadd.f32 %v2818_v63, %v3954_v55 }
 0x214   : > { %v2279_v58 = vadd.f32 %v2278_v35, %v2118_v53  ;;  %v2280_v59 = vpop.f32.mrb[33].mxu1 }
 0x215   : > { %v2281_v33 = vpop.f32.mrb[34].mxu1  ;;  %v2129_v20 = vadd.f32 %v2821_v56, %v3954_v55 }
 0x216   : > { %v2351_v62 = vmax.f32 %v2279_v58, 0.0  ;;  %v2282_v15 = vadd.f32 %v2281_v33, %v2121_v60  ;;  %v2283_v1 = vpop.f32.mrb[35].mxu1 }
 0x218   : > { %v2726_v3 = vpack.c.bf16 %v2351_v62, %v2351_v62  ;;  %v2352_v39 = vmax.f32 %v2282_v15, 0.0 }
 0x21a   : > { %2512 = vst.msk [vmem:[%s3963_s25 + $0x48] sm:$0xf] %vm2493_vm4, %v2726_v3  ;;  %v2727_v2 = vpack.c.bf16 %v2352_v39, %v2352_v39 }
 0x21c   : > { %2513 = vst.msk [vmem:[%s3963_s25 + $0x4c] sm:$0xf] %vm2493_vm4, %v2727_v2 }
 0x21f   : > { %v2822_v40 = vpop.f32.mrb[44].mxu0 }
 0x220   : > { %v2823_v5 = vpop.f32.mrb[45].mxu0 }
 0x221   : > { %v2824_v6 = vadd.f32 %v2823_v5, %v2822_v40  ;;  %v2825_v7 = vpop.f32.mrb[46].mxu0 }
 0x222   : > { %v2826_v37 = vpop.f32.mrb[47].mxu0 }
 0x223   : > { %v2827_v8 = vadd.f32 %v2826_v37, %v2825_v7  ;;  %v2286_v0 = vpop.f32.mrb[36].mxu1  ;;  %v2134_v24 = vadd.f32 %v2824_v6, %v3954_v55 }
 0x224   : > { %v2287_v47 = vadd.f32 %v2286_v0, %v2126_v27  ;;  %v2288_v9 = vpop.f32.mrb[37].mxu1 }
 0x225   : > { %v2289_v41 = vpop.f32.mrb[38].mxu1  ;;  %v2137_v29 = vadd.f32 %v2827_v8, %v3954_v55 }
 0x226   : > { %v2353_v54 = vmax.f32 %v2287_v47, 0.0  ;;  %v2290_v11 = vadd.f32 %v2289_v41, %v2129_v20  ;;  %v2291_v12 = vpop.f32.mrb[39].mxu1 }
 0x228   : > { %v2728_v14 = vpack.c.bf16 %v2353_v54, %v2353_v54  ;;  %v2354_v16 = vmax.f32 %v2290_v11, 0.0 }
 0x22a   : > { %2514 = vst.msk [vmem:[%s3963_s25 + $0x50] sm:$0xf] %vm2493_vm4, %v2728_v14  ;;  %v2729_v18 = vpack.c.bf16 %v2354_v16, %v2354_v16 }
 0x22c   : > { %2515 = vst.msk [vmem:[%s3963_s25 + $0x54] sm:$0xf] %vm2493_vm4, %v2729_v18 }
 0x22f   : > { %v2828_v45 = vpop.f32.mrb[48].mxu0 }
 0x230   : > { %v2829_v19 = vpop.f32.mrb[49].mxu0 }
 0x231   : > { %v2830_v21 = vadd.f32 %v2829_v19, %v2828_v45  ;;  %v2831_v17 = vpop.f32.mrb[50].mxu0 }
 0x232   : > { %v2832_v13 = vpop.f32.mrb[51].mxu0 }
 0x233   : > { %v2833_v10 = vadd.f32 %v2832_v13, %v2831_v17  ;;  %v2294_v4 = vpop.f32.mrb[40].mxu1  ;;  %v2142_v23 = vadd.f32 %v2830_v21, %v3954_v55 }
 0x234   : > { %v2295_v25 = vadd.f32 %v2294_v4, %v2134_v24  ;;  %v2296_v32 = vpop.f32.mrb[41].mxu1 }
 0x235   : > { %v2297_v30 = vpop.f32.mrb[42].mxu1  ;;  %v2145_v52 = vadd.f32 %v2833_v10, %v3954_v55 }
 0x236   : > { %v2355_v36 = vmax.f32 %v2295_v25, 0.0  ;;  %v2298_v34 = vadd.f32 %v2297_v30, %v2137_v29  ;;  %v2299_v26 = vpop.f32.mrb[43].mxu1 }
 0x238   : > { %v2730_v28 = vpack.c.bf16 %v2355_v36, %v2355_v36  ;;  %v2356_v42 = vmax.f32 %v2298_v34, 0.0  ;;  %v2046_v34 = vadd.f32 %v3937_v57, %v3954_v55 }
 0x23a   : > { %2516 = vst.msk [vmem:[%s3963_s25 + $0x58] sm:$0xf] %vm2493_vm4, %v2730_v28  ;;  %v2731_v51 = vpack.c.bf16 %v2356_v42, %v2356_v42 }
 0x23c   : > { %2517 = vst.msk [vmem:[%s3963_s25 + $0x5c] sm:$0xf] %vm2493_vm4, %v2731_v51 }
 0x23f   : > { %v2834_v43 = vpop.f32.mrb[52].mxu0 }
 0x240   : > { %v2835_v44 = vpop.f32.mrb[53].mxu0 }
 0x241   : > { %v2836_v46 = vadd.f32 %v2835_v44, %v2834_v43  ;;  %v2837_v48 = vpop.f32.mrb[54].mxu0 }
 0x242   : > { %v2838_v31 = vpop.f32.mrb[55].mxu0 }
 0x243   : > { %v2839_v38 = vadd.f32 %v2838_v31, %v2837_v48  ;;  %v2302_v49 = vpop.f32.mrb[44].mxu1  ;;  %v2150_v39 = vadd.f32 %v2836_v46, %v3954_v55  ;;  %v2049_v31 = vadd.f32 %v3942_v61, %v3954_v55 }
 0x244   : > { %v2303_v50 = vadd.f32 %v2302_v49, %v2142_v23  ;;  %v2304_v63 = vpop.f32.mrb[45].mxu1 }
 0x245   : > { %v2305_v22 = vpop.f32.mrb[46].mxu1  ;;  %v2153_v7 = vadd.f32 %v2839_v38, %v3954_v55 }
 0x246   : > { %v2357_v53 = vmax.f32 %v2303_v50, 0.0  ;;  %v2306_v56 = vadd.f32 %v2305_v22, %v2145_v52  ;;  %v2307_v35 = vpop.f32.mrb[47].mxu1 }
 0x248   : > { %v2732_v58 = vpack.c.bf16 %v2357_v53, %v2357_v53  ;;  %v2358_v59 = vmax.f32 %v2306_v56, 0.0 }
 0x24a   : > { %2518 = vst.msk [vmem:[%s3963_s25 + $0x60] sm:$0xf] %vm2493_vm4, %v2732_v58  ;;  %v2733_v60 = vpack.c.bf16 %v2358_v59, %v2358_v59 }
 0x24c   : > { %2519 = vst.msk [vmem:[%s3963_s25 + $0x64] sm:$0xf] %vm2493_vm4, %v2733_v60 }
 0x24f   : > { %v2840_v33 = vpop.f32.mrb[56].mxu0 }
 0x250   : > { %v2841_v62 = vpop.f32.mrb[57].mxu0 }
 0x251   : > { %v2842_v15 = vadd.f32 %v2841_v62, %v2840_v33  ;;  %v2843_v1 = vpop.f32.mrb[58].mxu0 }
 0x252   : > { %v2844_v3 = vpop.f32.mrb[59].mxu0 }
 0x253   : > { %v2845_v2 = vadd.f32 %v2844_v3, %v2843_v1  ;;  %v2310_v40 = vpop.f32.mrb[48].mxu1  ;;  %v2158_v16 = vadd.f32 %v2842_v15, %v3954_v55 }
 0x254   : > { %v2311_v5 = vadd.f32 %v2310_v40, %v2150_v39  ;;  %v2312_v6 = vpop.f32.mrb[49].mxu1 }
 0x255   : > { %v2313_v37 = vpop.f32.mrb[50].mxu1  ;;  %v2161_v17 = vadd.f32 %v2845_v2, %v3954_v55 }
 0x256   : > { %v2359_v27 = vmax.f32 %v2311_v5, 0.0  ;;  %v2314_v8 = vadd.f32 %v2313_v37, %v2153_v7  ;;  %v2315_v0 = vpop.f32.mrb[51].mxu1 }
 0x258   : > { %v2734_v47 = vpack.c.bf16 %v2359_v27, %v2359_v27  ;;  %v2360_v9 = vmax.f32 %v2314_v8, 0.0 }
 0x25a   : > { %2520 = vst.msk [vmem:[%s3963_s25 + $0x68] sm:$0xf] %vm2493_vm4, %v2734_v47  ;;  %v2735_v20 = vpack.c.bf16 %v2360_v9, %v2360_v9 }
 0x25c   : > { %2521 = vst.msk [vmem:[%s3963_s25 + $0x6c] sm:$0xf] %vm2493_vm4, %v2735_v20 }
 0x25f   : > { %v2846_v41 = vpop.f32.mrb[60].mxu0 }
 0x260   : > { %v2847_v54 = vpop.f32.mrb[61].mxu0 }
 0x261   : > { %v2848_v11 = vadd.f32 %v2847_v54, %v2846_v41  ;;  %v2849_v12 = vpop.f32.mrb[62].mxu0 }
 0x262   : > { %v2850_v14 = vpop.f32.mrb[63].mxu0 }
 0x263   : > { %v2851_v18 = vadd.f32 %v2850_v14, %v2849_v12  ;;  %v2318_v45 = vpop.f32.mrb[52].mxu1  ;;  %v2166_v30 = vadd.f32 %v2848_v11, %v3954_v55 }
 0x264   : > { %v2319_v19 = vadd.f32 %v2318_v45, %v2158_v16  ;;  %v2320_v21 = vpop.f32.mrb[53].mxu1 }
 0x265   : > { %v2321_v13 = vpop.f32.mrb[54].mxu1  ;;  %v2169_v42 = vadd.f32 %v2851_v18, %v3954_v55 }
 0x266   : > { %v2361_v24 = vmax.f32 %v2319_v19, 0.0  ;;  %v2322_v10 = vadd.f32 %v2321_v13, %v2161_v17  ;;  %v2323_v4 = vpop.f32.mrb[55].mxu1 }
 0x268   : > { %v2736_v25 = vpack.c.bf16 %v2361_v24, %v2361_v24  ;;  %v2362_v32 = vmax.f32 %v2322_v10, 0.0 }
 0x26a   : > { %2522 = vst.msk [vmem:[%s3963_s25 + $0x70] sm:$0xf] %vm2493_vm4, %v2736_v25  ;;  %v2737_v29 = vpack.c.bf16 %v2362_v32, %v2362_v32 }
 0x26c   : > { %2523 = vst.msk [vmem:[%s3963_s25 + $0x74] sm:$0xf] %vm2493_vm4, %v2737_v29 }
 0x26e   : > { %v2326_v36 = vpop.f32.mrb[56].mxu1 }
 0x26f   : > { %v2327_v26 = vadd.f32 %v2326_v36, %v2166_v30  ;;  %v2328_v28 = vpop.f32.mrb[57].mxu1 }
 0x270   : > { %v2206_v51 = vpop.f32.mrb[64].mxu0  ;;  %v2329_v43 = vpop.f32.mrb[58].mxu1 }
 0x271   : > { %v2207_v44 = vadd.f32 %v2206_v51, %v2046_v34  ;;  %v2363_v46 = vmax.f32 %v2327_v26, 0.0  ;;  %v2208_v48 = vpop.f32.mrb[65].mxu0  ;;  %v2330_v23 = vadd.f32 %v2329_v43, %v2169_v42  ;;  %v2331_v38 = vpop.f32.mrb[59].mxu1 }
 0x272   : > { %v2209_v49 = vpop.f32.mrb[66].mxu0 }
 0x273   : > { %v2333_v57 = vmax.f32 %v2207_v44, 0.0  ;;  %v2738_v50 = vpack.c.bf16 %v2363_v46, %v2363_v46  ;;  %v2210_v63 = vadd.f32 %v2209_v49, %v2049_v31  ;;  %v2364_v52 = vmax.f32 %v2330_v23, 0.0  ;;  %v2211_v22 = vpop.f32.mrb[67].mxu0 }
 0x275   : > { %v2708_v53 = vpack.c.bf16 %v2333_v57, %v2333_v57  ;;  %2524 = vst.msk [vmem:[%s3963_s25 + $0x78] sm:$0xf] %vm2493_vm4, %v2738_v50  ;;  %v2334_v56 = vmax.f32 %v2210_v63, 0.0  ;;  %v2739_v35 = vpack.c.bf16 %v2364_v52, %v2364_v52 }
 0x277   : > { %2494 = vst.msk [vmem:[%s3963_s25] sm:$0xf] %vm2493_vm4, %v2708_v53  ;;  %v2709_v58 = vpack.c.bf16 %v2334_v56, %v2334_v56  ;;  %2525 = vst.msk [vmem:[%s3963_s25 + $0x7c] sm:$0xf] %vm2493_vm4, %v2739_v35 }
 0x279   : > { %2495 = vst.msk [vmem:[%s3963_s25 + $0x4] sm:$0xf] %vm2493_vm4, %v2709_v58 }
 0x27a PF: > { %s13_s12 = sadd.s32 1, %s2980_s12  }
 0x27b   : > { %p10_p4 = scmp.ge.s32.totalorder %s13_s12, 4  }
 0x27d   :  { %12 = sbr.rel (!%p10_p4) target bundleno = 1 (0x1), region = 63 }

// kernel: rrn_forward.7
= control target key start
LH: loop header
LB: loop body
LE: loop exit
PB: predicated region body
PF: predicated region fallthrough
CT: control target
= control target key end

     0   :  { %10 = vsyncpa [#allocation4], 0  ;;  %s4233_s0 = inlined_call_operand.vmem [shape: bf16[2,16,16,32], index: 0, kind: input, shape index: {}]   ;;  %s4234_s1 = inlined_call_operand.vmem [shape: bf16[288,44], index: 1, kind: input, shape index: {}]   ;;  %s4235_s2 = inlined_call_operand.vmem [shape: f32[1,44], index: 2, kind: input, shape index: {}]   ;;  %s4236_s3 = inlined_call_operand.hbm [shape: f32[2,16,16,32], index: 3, kind: output, shape index: {0}]   ;;  %s4237_s4 = inlined_call_operand.vmem [shape: f32[2,16,16,12], index: 4, kind: output, shape index: {1}]  }
   0x1   :  { %12 = vsyncpa [#allocation4 + $0x1], 0  ;;  %s2971_s15 = smov 0   ;;  %s2973_s16 = smov 0  }
   0x2   :  { %s2975_s17 = smov 0   ;;  %s2977_s18 = smov 0  }
   0x3 LB: > { %s2992_s19 = sadd.s32 4294967295, %s2937_s18   ;;  %s2499_s20 = sadd.s32 4294967294, %s2937_s18   ;;  %s2937_s18 = sphi %s2977_s18, %s4249_s18   ;;  %s2933_s17 = sphi %s2975_s17, %s4248_s17   ;;  %s2929_s16 = sphi %s2973_s16, %s4247_s16   ;;  %s2925_s15 = sphi %s2971_s15, %s4246_s15  }
   0x4   : > { %s2996_s21 = sadd.s32 1, %s2937_s18   ;;  %s93_s22 = sadd.s32 1, %s2933_s17 }
   0x5   : > { %s90_s23 = ssub.s32 %s2937_s18, %s2996_s21  ;;  %p103_p0 = scmp.ne.s32.totalorder %s2933_s17, %s2929_s16 }
   0x6   : > { %p91_p1 = scmp.eq.s32.totalorder %s90_s23, 0  ;;  %p104_p2 = scmp.eq.s32.totalorder %s2992_s19, 1 }
   0x7   : > { %p109_p3 = scmp.ne.s32.totalorder %s2929_s16, %s2925_s15  ;;  %p110_p4 = scmp.eq.s32.totalorder %s2499_s20, 1 }
   0x8   : > { %s3007_s24 = scalar_select %p91_p1, %s2933_s17, %s93_s22  }
   0x9   : > { %p3009_p5 = por %p104_p2, %p103_p0  ;;  %p3013_p6 = por %p110_p4, %p109_p3 }
   0xa   : > { %p2502_p7 = scmp.ge.s32.totalorder %s2937_s18, 1  ;;  %p168_p8 = scmp.lt.s32.totalorder %s2937_s18, 3 }
   0xc   : > { %p169_p9 = pnand %p2502_p7, %p168_p8 }
   0xd   : > { %vm242_vm0 = vcmask (!%p169_p9), 257024   ;;  %vm245_vm1 = vcmask (!%p169_p9), 253952   ;;  %v2939_v0 = vmov (!%p169_p9), 0   ;;  %p199_p10 = scmp.lt.s32.totalorder (!%p169_p9), %s2992_s19, 1  ;;  %vm298_vm2 = vsmask.f32 (!%p169_p9), 256 }
   0xe   : > { %172 = sbr.rel (%p169_p9) target bundleno = 711 (0x2c7), region = 32  ;;  %243 = vst.msk [vmem:[#allocation2] sm:$0xf] (!%p169_p9), %vm242_vm0, %v2939_v0  ;;  %244 = vst.msk [vmem:[#allocation2 + $0x4] sm:$0xf] (!%p169_p9), %vm242_vm0, %v2939_v0  ;;  %vm1146_vm6 = vcmask (!%p169_p9), 1046528  }
   0xf   : > { %246 = vst.msk [vmem:[#allocation2 + $0x8] sm:$0x1] (!%p169_p9), %vm245_vm1, %v2939_v0  ;;  %249 = vst.msk [vmem:[#allocation2 + $0x14] sm:$0x1] (!%p169_p9), %vm245_vm1, %v2939_v0  ;;  %vm299_vm3 = vsmask.f32 (!%p169_p9), 4368 }
  0x10   : > { %247 = vst.msk [vmem:[#allocation2 + $0xc] sm:$0xf] (!%p169_p9), %vm242_vm0, %v2939_v0  ;;  %248 = vst.msk [vmem:[#allocation2 + $0x10] sm:$0xf] (!%p169_p9), %vm242_vm0, %v2939_v0  ;;  %vm623_vm4 = vsmask.f32 (!%p169_p9), 7938 }
  0x11   : > { %250 = vst.msk [vmem:[#allocation2 + $0x18] sm:$0xf] (!%p169_p9), %vm242_vm0, %v2939_v0  ;;  %251 = vst.msk [vmem:[#allocation2 + $0x1c] sm:$0xf] (!%p169_p9), %vm242_vm0, %v2939_v0  ;;  %vm921_vm5 = vsmask.f32 (!%p169_p9), 7424 }
  0x12   : > { %252 = vst.msk [vmem:[#allocation2 + $0x20] sm:$0x1] (!%p169_p9), %vm245_vm1, %v2939_v0  ;;  %255 = vst.msk [vmem:[#allocation2 + $0x2c] sm:$0x1] (!%p169_p9), %vm245_vm1, %v2939_v0  ;;  %s2940_s6 = smov (!%p169_p9), 64   ;;  %v2840_v37 = vld [vmem:[%s4234_s1 + $0x40] sm:$0xff] (!%p169_p9)  }
  0x13   : > { %253 = vst.msk [vmem:[#allocation2 + $0x24] sm:$0xf] (!%p169_p9), %vm242_vm0, %v2939_v0  ;;  %254 = vst.msk [vmem:[#allocation2 + $0x28] sm:$0xf] (!%p169_p9), %vm242_vm0, %v2939_v0  ;;  %2587 = vmatprep.subr.bf16.mxu0 (!%p169_p9), %v2840_v37  ;;  %v2841_v48 = vld [vmem:[%s4234_s1] sm:$0xff] (!%p169_p9)   ;;  %2753 = vmatprep.subr.bf16.mxu1 (!%p169_p9), %v2840_v37  ;;  %s2941_s11 = smov (!%p169_p9), 32  }
  0x14   : > { %256 = vst.msk [vmem:[#allocation2 + $0x30] sm:$0xf] (!%p169_p9), %vm242_vm0, %v2939_v0  ;;  %257 = vst.msk [vmem:[#allocation2 + $0x34] sm:$0xf] (!%p169_p9), %vm242_vm0, %v2939_v0  ;;  %2588 = vmatpush3.bf16.msra.mxu0 (!%p169_p9), %v2841_v48  ;;  %2761 = vmatpush3.bf16.msra.mxu1 (!%p169_p9), %v2841_v48  ;;  %s2942_s10 = smov (!%p169_p9), 96   ;;  %vm1401_vm10 = vcmask (!%p169_p9), 261120  }
  0x15   : > { %258 = vst.msk [vmem:[#allocation2 + $0x38] sm:$0x1] %vm245_vm1, %v2939_v0  ;;  %261 = vst.msk [vmem:[#allocation2 + $0x44] sm:$0x1] %vm245_vm1, %v2939_v0  ;;  %s3075_s27 = scalar_select %p199_p10, %s2992_s19, 1  ;;  %v2814_v4 = vld [vmem:[#allocation2] sm:$0xff]  }
  0x16   : > { %259 = vst.msk [vmem:[#allocation2 + $0x3c] sm:$0xf] %vm242_vm0, %v2939_v0  ;;  %260 = vst.msk [vmem:[#allocation2 + $0x40] sm:$0xf] %vm242_vm0, %v2939_v0  ;;  %v1147_v11 = vrot.slane %v2814_v4, 1  ;;  %v923_v13 = vshrl.u32 %v2814_v4, 16 }
  0x17   : > { %262 = vst.msk [vmem:[#allocation2 + $0x48] sm:$0xf] %vm242_vm0, %v2939_v0  ;;  %263 = vst.msk [vmem:[#allocation2 + $0x4c] sm:$0xf] %vm242_vm0, %v2939_v0  ;;  %s2584_s28 = sshll.u32 %s3075_s27, 7  ;;  %v925_v14 = vshll.u32 %v2814_v4, 16 }
  0x18   : > { %264 = vst.msk [vmem:[#allocation2 + $0x50] sm:$0x1] %vm245_vm1, %v2939_v0  ;;  %267 = vst.msk [vmem:[#allocation2 + $0x5c] sm:$0x1] %vm245_vm1, %v2939_v0  ;;  %s3081_s5 = scalar_lea.vmem %s4233_s0, %s2584_s28  ;;  %v634_v40 = vld [vmem:[#allocation2 + $0x18] sm:$0xf] }
  0x19   : > { %265 = vst.msk [vmem:[#allocation2 + $0x54] sm:$0xf] %vm242_vm0, %v2939_v0  ;;  %266 = vst.msk [vmem:[#allocation2 + $0x58] sm:$0xf] %vm242_vm0, %v2939_v0  ;;  %v236_v1 = vld [vmem:[%s3081_s5 + $0x68] sm:$0xf] }
  0x1a   : > { %268 = vst.msk [vmem:[#allocation2 + $0x60] sm:$0xf] %vm242_vm0, %v2939_v0  ;;  %269 = vst.msk [vmem:[#allocation2 + $0x64] sm:$0xf] %vm242_vm0, %v2939_v0  ;;  %v237_v2 = vld [vmem:[%s3081_s5 + $0x6c] sm:$0xf] }
  0x1b   : > { %270 = vst.msk [vmem:[#allocation2 + $0x68] sm:$0x1] %vm245_vm1, %v2939_v0  ;;  %273 = vst.msk [vmem:[#allocation2 + $0x74] sm:$0x1] %vm245_vm1, %v2939_v0  ;;  %v212_v3 = vld [vmem:[%s3081_s5 + $0x8] sm:$0xf] }
  0x1c   : > { %271 = vst.msk [vmem:[#allocation2 + $0x6c] sm:$0xf] %vm242_vm0, %v2939_v0  ;;  %272 = vst.msk [vmem:[#allocation2 + $0x70] sm:$0xf] %vm242_vm0, %v2939_v0  ;;  %v523_v6 = vshrl.u32 %v236_v1, 16  ;;  %v526_v7 = vshll.u32 %v236_v1, 16 }
  0x1d   : > { %274 = vst.msk [vmem:[#allocation2 + $0x78] sm:$0xf] %vm242_vm0, %v2939_v0  ;;  %275 = vst.msk [vmem:[#allocation2 + $0x7c] sm:$0xf] %vm242_vm0, %v2939_v0  ;;  %v531_v8 = vshrl.u32 %v237_v2, 16  ;;  %v534_v9 = vshll.u32 %v237_v2, 16 }
  0x1e   : > { %276 = vst.msk [vmem:[#allocation2 + $0x80] sm:$0x1] %vm245_vm1, %v2939_v0  ;;  %279 = vst.msk [vmem:[#allocation2 + $0x8c] sm:$0x1] %vm245_vm1, %v2939_v0  ;;  %v213_v10 = vld [vmem:[%s3081_s5 + $0xc] sm:$0xf] }
  0x1f   : > { %277 = vst.msk [vmem:[#allocation2 + $0x84] sm:$0xf] %vm242_vm0, %v2939_v0  ;;  %278 = vst.msk [vmem:[#allocation2 + $0x88] sm:$0xf] %vm242_vm0, %v2939_v0  ;;  %v525_v17 = vrot.slane %v523_v6, 7  ;;  %v3093_v18 = vrot.slane %v531_v8, 7 }
  0x20   : > { %280 = vst.msk [vmem:[#allocation2 + $0x90] sm:$0xf] %vm242_vm0, %v2939_v0  ;;  %281 = vst.msk [vmem:[#allocation2 + $0x94] sm:$0xf] %vm242_vm0, %v2939_v0  ;;  %v319_v20 = vshrl.u32 %v212_v3, 16  ;;  %v927_v22 = vrot.slane %v925_v14, 1 }
  0x21   : > { %282 = vst.msk [vmem:[#allocation2 + $0x98] sm:$0x1] %vm245_vm1, %v2939_v0  ;;  %285 = vst.msk [vmem:[#allocation2 + $0xa4] sm:$0x1] %vm245_vm1, %v2939_v0  ;;  %v322_v24 = vshll.u32 %v212_v3, 16  ;;  %v327_v25 = vshrl.u32 %v213_v10, 16  ;;  %v528_v28 = vor.u32 %v526_v7, %v525_v17  ;;  %v536_v30 = vor.u32 %v534_v9, %v3093_v18 }
  0x22   : > { %283 = vst.msk [vmem:[#allocation2 + $0x9c] sm:$0xf] %vm242_vm0, %v2939_v0  ;;  %284 = vst.msk [vmem:[#allocation2 + $0xa0] sm:$0xf] %vm242_vm0, %v2939_v0  ;;  %v214_v26 = vld [vmem:[%s3081_s5 + $0x10] sm:$0xf]  ;;  %v928_v32 = vor.u32 %v927_v22, %v923_v13 }
  0x23   : > { %286 = vst.msk [vmem:[#allocation2 + $0xa8] sm:$0xf] %vm242_vm0, %v2939_v0  ;;  %287 = vst.msk [vmem:[#allocation2 + $0xac] sm:$0xf] %vm242_vm0, %v2939_v0  ;;  %v529_v29 = vrot.slane %v525_v17, 4  ;;  %v321_v33 = vrot.slane %v319_v20, 7 }
  0x24   : > { %288 = vst.msk [vmem:[#allocation2 + $0xb0] sm:$0x1] %vm245_vm1, %v2939_v0  ;;  %291 = vst.msk [vmem:[#allocation2 + $0xbc] sm:$0x1] %vm245_vm1, %v2939_v0  ;;  %v215_v31 = vld [vmem:[%s3081_s5 + $0x14] sm:$0xf] }
  0x25   : > { %289 = vst.msk [vmem:[#allocation2 + $0xb4] sm:$0xf] %vm242_vm0, %v2939_v0  ;;  %290 = vst.msk [vmem:[#allocation2 + $0xb8] sm:$0xf] %vm242_vm0, %v2939_v0  ;;  %v3106_v34 = vrot.slane %v327_v25, 7  ;;  %v330_v35 = vshll.u32 %v213_v10, 16  ;;  %v324_v45 = vor.u32 %v322_v24, %v321_v33 }
  0x26   : > { %292 = vst.msk [vmem:[#allocation2 + $0xc0] sm:$0xf] %vm242_vm0, %v2939_v0  ;;  %293 = vst.msk [vmem:[#allocation2 + $0xc4] sm:$0xf] %vm242_vm0, %v2939_v0  ;;  %v210_v36 = vld [vmem:[%s3081_s5] sm:$0xf] }
  0x27   : > { %294 = vst.msk [vmem:[#allocation2 + $0xc8] sm:$0x1] %vm245_vm1, %v2939_v0  ;;  %297 = vst.msk [vmem:[#allocation2 + $0xd4] sm:$0x1] %vm245_vm1, %v2939_v0  ;;  %v336_v41 = vshrl.u32 %v214_v26, 16  ;;  %v339_v42 = vshll.u32 %v214_v26, 16  ;;  %v332_v47 = vor.u32 %v330_v35, %v3106_v34 }
  0x28   : > { %295 = vst.msk [vmem:[#allocation2 + $0xcc] sm:$0xf] %vm242_vm0, %v2939_v0  ;;  %296 = vst.msk [vmem:[#allocation2 + $0xd0] sm:$0xf] %vm242_vm0, %v2939_v0  ;;  %v211_v43 = vld [vmem:[%s3081_s5 + $0x4] sm:$0xf] }
  0x29   : > { %v2815_v5 = vld [vmem:[#allocation2 + $0x8] ss:$0 sps:$4 sm:$0x11]   ;;  %vm3089_vm7 = vmor %vm298_vm2, %vm299_vm3  ;;  %v325_v46 = vrot.slane %v321_v33, 4  ;;  %v338_v49 = vrot.slane %v336_v41, 7  ;;  %v344_v50 = vshrl.u32 %v215_v31, 16 }
  0x2a   : > { %v1148_v12 = vrot.slane %v2815_v5, 1  ;;  %v930_v15 = vshll.u32 %v2815_v5, 16  ;;  %v718_v19 = vld [vmem:[#allocation2 + $0xa8] sm:$0xf]  ;;  %vm3098_vm8 = vmand %vm242_vm0, %vm623_vm4  ;;  %v537_v38 = vsel %vm3089_vm7, %v529_v29, %v536_v30  ;;  %v347_v51 = vshll.u32 %v215_v31, 16  ;;  %v2846_v22 = vld [vmem:[%s4234_s1 + $0x50] sm:$0xff]  }
  0x2b   : > { %v719_v39 = vsel %vm3098_vm8, %v528_v28, %v718_v19  ;;  %721 = vst.msk [vmem:[#allocation2 + $0xac] sm:$0xf] %vm242_vm0, %v537_v38  ;;  %v302_v52 = vshrl.u32 %v210_v36, 16  ;;  %v234_v53 = vld [vmem:[%s3081_s5 + $0x60] sm:$0xf]  ;;  %v333_v54 = vsel %vm3089_vm7, %v325_v46, %v332_v47  ;;  %v635_v55 = vsel %vm3098_vm8, %v324_v45, %v634_v40  ;;  %v2843_v0 = vld [vmem:[%s4234_s1 + $0x48] sm:$0xff]   ;;  %vm3145_vm9 = vmand %vm245_vm1, %vm298_vm2 }
  0x2c   : > { %v1149_v21 = vsel %vm1146_vm6, %v1147_v11, %v1148_v12  ;;  %v932_v27 = vrot.slane %v930_v15, 1  ;;  %720 = vst [vmem:[#allocation2 + $0xa8] sm:$0xf] %v719_v39  ;;  %v641_v56 = vld [vmem:[#allocation2 + $0x24] sm:$0xf]  ;;  %v305_v57 = vshll.u32 %v210_v36, 16  ;;  %v341_v59 = vor.u32 %v339_v42, %v338_v49  ;;  %2589 = vmatprep.subr.bf16.mxu0 %v2843_v0  ;;  %2754 = vmatprep.subr.bf16.mxu1 %v2843_v0 }
  0x2d   : > { %1195 = vrot.lane.b32.xlu1 %v1149_v21, %s2940_s6  ;;  %v310_v58 = vshrl.u32 %v211_v43, 16  ;;  %636 = vst [vmem:[#allocation2 + $0x18] sm:$0xf] %v635_v55  ;;  %637 = vst.msk [vmem:[#allocation2 + $0x1c] sm:$0xf] %vm242_vm0, %v333_v54  ;;  %v342_v60 = vrot.slane %v338_v49, 4 }
  0x2e   : > { %v933_v44 = vsel %vm921_vm5, %v928_v32, %v932_v27  ;;  %v3130_v61 = vrot.slane %v344_v50, 7  ;;  %v304_v62 = vrot.slane %v302_v52, 7  ;;  %v235_v63 = vld [vmem:[%s3081_s5 + $0x64] sm:$0xf]  ;;  %v313_v2 = vshll.u32 %v211_v43, 16  ;;  %v2844_v13 = vld [vmem:[%s4234_s1 + $0x8] sm:$0xff]  }
  0x2f   : > { %1114 = vrot.lane.b32.xlu0 %v933_v44, %s2941_s11  ;;  %v312_v1 = vrot.slane %v310_v58, 7  ;;  %v625_v3 = vld [vmem:[#allocation2 + $0xc] sm:$0xf]  ;;  %v506_v4 = vshrl.u32 %v234_v53, 16  ;;  %v509_v5 = vshll.u32 %v234_v53, 16  ;;  %v642_v7 = vsel %vm3098_vm8, %v341_v59, %v641_v56  ;;  %2590 = vmatpush3.bf16.msra.mxu0 %v2844_v13  ;;  %v2847_v38 = vld [vmem:[%s4234_s1 + $0x10] sm:$0xff]  }
  0x30   : > { %v349_v6 = vor.u32 %v347_v51, %v3130_v61  ;;  %v307_v8 = vor.u32 %v305_v57, %v304_v62  ;;  %v308_v9 = vrot.slane %v304_v62, 4  ;;  %v711_v10 = vld [vmem:[#allocation2 + $0x9c] sm:$0xf]  ;;  %v631_v11 = vld [vmem:[#allocation2 + $0x14] sm:$0x1]  ;;  %v514_v17 = vshrl.u32 %v235_v63, 16  ;;  %2762 = vmatpush3.bf16.msra.mxu1 %v2844_v13  ;;  %2591 = vmatprep.subr.bf16.mxu0 %v2846_v22 }
  0x31   : > { %v232_v12 = vld [vmem:[%s3081_s5 + $0x58] sm:$0xf]  ;;  %643 = vst [vmem:[#allocation2 + $0x24] sm:$0xf] %v642_v7  ;;  %v315_v14 = vor.u32 %v313_v2, %v312_v1  ;;  %v508_v15 = vrot.slane %v506_v4, 7  ;;  %v517_v19 = vshll.u32 %v235_v63, 16  ;;  %2755 = vmatprep.subr.bf16.mxu1 %v2846_v22 }
  0x32   : > { %v233_v21 = vld [vmem:[%s3081_s5 + $0x5c] sm:$0xf]  ;;  %v350_v25 = vsel %vm3089_vm7, %v342_v60, %v349_v6  ;;  %v626_v26 = vsel %vm3098_vm8, %v307_v8, %v625_v3  ;;  %v317_v27 = vrot.slane %v312_v1, 4  ;;  %v516_v31 = vrot.slane %v514_v17, 7  ;;  %v715_v37 = vld [vmem:[#allocation2 + $0xa4] sm:$0x1] }
  0x33   : > { %v3153_v24 = vld [vmem:[#allocation2 + $0xa8] sm:$0xff]   ;;  %644 = vst.msk [vmem:[#allocation2 + $0x28] sm:$0xf] %vm242_vm0, %v350_v25  ;;  %v316_v28 = vsel %vm3089_vm7, %v308_v9, %v315_v14  ;;  %627 = vst [vmem:[#allocation2 + $0xc] sm:$0xf] %v626_v26  ;;  %v511_v29 = vor.u32 %v509_v5, %v508_v15  ;;  %v512_v30 = vrot.slane %v508_v15, 4  ;;  %2592 = vmatpush3.bf16.msra.mxu0 %v2847_v38 }
  0x34   : > { %1343 = vrot.lane.b32.xlu0 %v3153_v24, %s2940_s6  ;;  %628 = vst.msk [vmem:[#allocation2 + $0x10] sm:$0xf] %vm242_vm0, %v316_v28  ;;  %v632_v32 = vsel %vm3145_vm9, %v317_v27, %v631_v11  ;;  %v489_v33 = vshrl.u32 %v232_v12, 16  ;;  %v492_v35 = vshll.u32 %v232_v12, 16  ;;  %v497_v36 = vshrl.u32 %v233_v21, 16  ;;  %v3170_v39 = vld [vmem:[#allocation2 + $0x18] sm:$0xff]   ;;  %2763 = vmatpush3.bf16.msra.mxu1 %v2847_v38 }
  0x35   : > { %v519_v40 = vor.u32 %v517_v19, %v516_v31  ;;  %v712_v41 = vsel %vm3098_vm8, %v511_v29, %v711_v10  ;;  %633 = vst [vmem:[#allocation2 + $0x14] sm:$0x1] %v632_v32  ;;  %v500_v42 = vshll.u32 %v233_v21, 16  ;;  %v521_v45 = vrot.slane %v516_v31, 4  ;;  %v638_v47 = vld [vmem:[#allocation2 + $0x20] sm:$0x1]  ;;  %1319 = vrot.lane.b32.xlu1 %v3170_v39, %s2940_s6 }
  0x36   : > { %713 = vst [vmem:[#allocation2 + $0x9c] sm:$0xf] %v712_v41  ;;  %v491_v43 = vrot.slane %v489_v33, 7  ;;  %v499_v44 = vrot.slane %v497_v36, 7  ;;  %v334_v46 = vrot.slane %v3106_v34, 4  ;;  %v949_v51 = vshll.u32 %v3170_v39, 16 }
  0x37   : > { %v520_v48 = vsel %vm3089_vm7, %v512_v30, %v519_v40  ;;  %v704_v49 = vld [vmem:[#allocation2 + $0x90] sm:$0xf]  ;;  %v708_v50 = vld [vmem:[#allocation2 + $0x98] sm:$0x1]  ;;  %v716_v57 = vsel %vm3145_vm9, %v521_v45, %v715_v37  ;;  %v1153_v59 = vrot.slane %v3170_v39, 1  ;;  %v538_v60 = vrot.slane %v3093_v18, 4 }
  0x38   : > { %v2848_v52 = vld [vmem:[%s4234_s1 + $0x58] sm:$0xff]   ;;  %714 = vst.msk [vmem:[#allocation2 + $0xa0] sm:$0xf] %vm242_vm0, %v520_v48  ;;  %v494_v34 = vor.u32 %v492_v35, %v491_v43  ;;  %v495_v53 = vrot.slane %v491_v43, 4  ;;  %v502_v54 = vor.u32 %v500_v42, %v499_v44  ;;  %v504_v55 = vrot.slane %v499_v44, 4  ;;  %v2851_v21 = vld [vmem:[%s4234_s1 + $0x60] sm:$0xff]  }
  0x39   : > { %v722_v56 = vld [vmem:[#allocation2 + $0xb0] sm:$0x1]  ;;  %v639_v58 = vsel %vm3145_vm9, %v334_v46, %v638_v47  ;;  %v645_v62 = vld [vmem:[#allocation2 + $0x2c] sm:$0x1]  ;;  %2593 = vmatprep.subr.bf16.mxu0 %v2848_v52  ;;  %2756 = vmatprep.subr.bf16.mxu1 %v2848_v52  ;;  %717 = vst [vmem:[#allocation2 + $0xa4] sm:$0x1] %v716_v57 }
  0x3a   : > { %v3190_v63 = vld [vmem:[#allocation2 + $0x24] sm:$0xff]   ;;  %v503_v0 = vsel %vm3089_vm7, %v495_v53, %v502_v54  ;;  %v705_v1 = vsel %vm3098_vm8, %v494_v34, %v704_v49  ;;  %v709_v2 = vsel %vm3145_vm9, %v504_v55, %v708_v50  ;;  %640 = vst [vmem:[#allocation2 + $0x20] sm:$0x1] %v639_v58  ;;  %v947_v3 = vshrl.u32 %v3170_v39, 16  ;;  %v3207_v7 = vld [vmem:[%s3081_s5 + $0x70] sm:$0xf] }
  0x3b   : > { %v3199_v18 = vld [vmem:[#allocation2 + $0xc] sm:$0xff]   ;;  %706 = vst [vmem:[#allocation2 + $0x90] sm:$0xf] %v705_v1  ;;  %707 = vst.msk [vmem:[#allocation2 + $0x94] sm:$0xf] %vm242_vm0, %v503_v0  ;;  %v723_v4 = vsel %vm3145_vm9, %v538_v60, %v722_v56  ;;  %v1093_v5 = vshll.u32 %v3153_v24, 16  ;;  %1321 = vrot.lane.b32.xlu0 %v3190_v63, %s2940_s6 }
  0x3c   : > { %710 = vst [vmem:[#allocation2 + $0x98] sm:$0x1] %v709_v2  ;;  %v351_v6 = vrot.slane %v3130_v61, 4  ;;  %v2849_v8 = vld [vmem:[%s4234_s1 + $0x18] sm:$0xff]   ;;  %v951_v10 = vrot.slane %v949_v51, 1  ;;  %1232 = vrot.lane.b32.xlu1 %v3199_v18, %s2942_s10  ;;  %v1150_v11 = vrot.slane %v3199_v18, 1 }
  0x3d   : > { %v2821_v9 = vld [vmem:[#allocation2 + $0x14] ss:$0 sps:$4 sm:$0x11]   ;;  %724 = vst [vmem:[#allocation2 + $0xb0] sm:$0x1] %v723_v4  ;;  %v1091_v61 = vshrl.u32 %v3153_v24, 16  ;;  %2594 = vmatpush3.bf16.msra.mxu0 %v2849_v8  ;;  %2764 = vmatpush3.bf16.msra.mxu1 %v2849_v8 }
  0x3e   : > { %v937_v12 = vshll.u32 %v3199_v18, 16  ;;  %v959_v13 = vshrl.u32 %v3190_v63, 16  ;;  %v1151_v14 = vrot.slane %v2821_v9, 1  ;;  %v942_v15 = vshll.u32 %v2821_v9, 16  ;;  %2595 = vmatprep.subr.bf16.mxu0 %v2851_v21  ;;  %v2852_v32 = vld [vmem:[%s4234_s1 + $0x20] sm:$0xff]   ;;  %2757 = vmatprep.subr.bf16.mxu1 %v2851_v21  ;;  %v2854_v47 = vld [vmem:[%s4234_s1 + $0x68] sm:$0xff]  }
  0x3f   : > { %v646_v17 = vsel %vm3145_vm9, %v351_v6, %v645_v62  ;;  %v961_v19 = vshll.u32 %v3190_v63, 16  ;;  %v3226_v22 = vld [vmem:[#allocation2 + $0x9c] sm:$0xff]   ;;  %v1095_v25 = vrot.slane %v1093_v5, 1  ;;  %v935_v26 = vshrl.u32 %v3199_v18, 16  ;;  %v2855_v62 = vld [vmem:[%s4234_s1 + $0x28] sm:$0xff]   ;;  %s2586_s8 = sshll.u32 %s2992_s19, 12 }
  0x40   : > { %v939_v27 = vrot.slane %v937_v12, 1  ;;  %647 = vst [vmem:[#allocation2 + $0x2c] sm:$0x1] %v646_v17  ;;  %v1152_v28 = vsel %vm1146_vm6, %v1150_v11, %v1151_v14  ;;  %v944_v29 = vrot.slane %v942_v15, 1  ;;  %v540_v31 = vshrl.u32 %v3207_v7, 16  ;;  %1256 = vrot.lane.b32.xlu1 %v3226_v22, %s2942_s10  ;;  %s4107_s14 = scalar_lea.hbm %s4236_s3, %s2586_s8 }
  0x41   : > { %v963_v30 = vrot.slane %v961_v19, 1  ;;  %1282 = vrot.lane.b32.xlu0 %v1152_v28, %s2941_s11  ;;  %v3237_v33 = vld [vmem:[#allocation2 + $0xa4] ss:$0 sps:$4 sm:$0x11]   ;;  %v1186_v35 = vrot.slane %v3226_v22, 1  ;;  %2596 = vmatpush3.bf16.msra.mxu0 %v2852_v32  ;;  %v543_v40 = vshll.u32 %v3207_v7, 16  ;;  %v952_v34 = vor.u32 %v951_v10, %v947_v3 }
  0x42   : > { %2765 = vmatpush3.bf16.msra.mxu1 %v2852_v32  ;;  %v2822_v36 = vld [vmem:[#allocation2 + $0x90] sm:$0xff]   ;;  %v1187_v38 = vrot.slane %v3237_v33, 1  ;;  %v2825_v41 = vld [vmem:[#allocation2 + $0x20] ss:$0 sps:$4 sm:$0x11]   ;;  %v1081_v42 = vshll.u32 %v3226_v22, 16  ;;  %v940_v54 = vor.u32 %v939_v27, %v935_v26  ;;  %2597 = vmatprep.subr.bf16.mxu0 %v2854_v47  ;;  %v1096_v18 = vor.u32 %v1095_v25, %v1091_v61 }
  0x43   : > { %v2823_v37 = vld [vmem:[#allocation2 + $0x98] ss:$0 sps:$4 sm:$0x11]   ;;  %v1183_v43 = vrot.slane %v2822_v36, 1  ;;  %v1067_v46 = vshrl.u32 %v2822_v36, 16  ;;  %v1154_v48 = vrot.slane %v2825_v41, 1  ;;  %2758 = vmatprep.subr.bf16.mxu1 %v2854_v47  ;;  %v964_v10 = vor.u32 %v963_v30, %v959_v13 }
  0x44   : > { %v1184_v44 = vrot.slane %v2823_v37, 1  ;;  %v3244_v45 = vsel %vm1146_vm6, %v1186_v35, %v1187_v38  ;;  %v1069_v49 = vshll.u32 %v2822_v36, 16  ;;  %v1074_v50 = vshll.u32 %v2823_v37, 16  ;;  %v3256_v53 = vld [vmem:[#allocation2 + $0xb0] ss:$0 sps:$4 sm:$0x11]  }
  0x45   : > { %1306 = vrot.lane.b32.xlu0 %v3244_v45, %s2941_s11  ;;  %v954_v51 = vshll.u32 %v2825_v41, 16  ;;  %v3265_v56 = vsel %vm1146_vm6, %v1153_v59, %v1154_v48  ;;  %v1079_v60 = vshrl.u32 %v3226_v22, 16  ;;  %v1098_v1 = vshll.u32 %v3256_v53, 16  ;;  %v239_v5 = vld [vmem:[%s3081_s5 + $0x74] sm:$0xf]  ;;  %2598 = vmatpush3.bf16.msra.mxu0 %v2855_v62 }
  0x46   : > { %v3252_v52 = vsel %vm1146_vm6, %v1183_v43, %v1184_v44  ;;  %v1071_v57 = vrot.slane %v1069_v49, 1  ;;  %v1076_v0 = vrot.slane %v1074_v50, 1  ;;  %v1083_v3 = vrot.slane %v1081_v42, 1  ;;  %v725_v7 = vld [vmem:[#allocation2 + $0xb4] sm:$0xf]  ;;  %2766 = vmatpush3.bf16.msra.mxu1 %v2855_v62 }
  0x47   : > { %v3258_v55 = vld [vmem:[#allocation2 + $0x2c] ss:$0 sps:$4 sm:$0x11]   ;;  %1219 = vrot.lane.b32.xlu1 %v3252_v52, %s2940_s6  ;;  %v956_v58 = vrot.slane %v954_v51, 1  ;;  %v1086_v4 = vshll.u32 %v3237_v33, 16  ;;  %v542_v6 = vrot.slane %v540_v31, 7  ;;  %v3289_v61 = vsel %vm921_vm5, %v940_v54, %v944_v29 }
  0x48   : > { %v966_v2 = vshll.u32 %v3258_v55, 16  ;;  %v1072_v59 = vor.u32 %v1071_v57, %v1067_v46  ;;  %v1100_v9 = vrot.slane %v1098_v1, 1  ;;  %v1189_v11 = vrot.slane %v3153_v24, 1  ;;  %v216_v12 = vld [vmem:[%s3081_s5 + $0x18] sm:$0xf]  ;;  %v2856_v32 = vld [vmem:[%s4234_s1 + $0x70] sm:$0xff]  }
  0x49   : > { %1284 = vrot.lane.b32.xlu0 %v3265_v56, %s2941_s11  ;;  %v3280_v8 = vsel %vm921_vm5, %v952_v34, %v956_v58  ;;  %v217_v14 = vld [vmem:[%s3081_s5 + $0x1c] sm:$0xf]  ;;  %v1190_v17 = vrot.slane %v3256_v53, 1  ;;  %v545_v19 = vor.u32 %v543_v40, %v542_v6  ;;  %v240_v21 = vld [vmem:[%s3081_s5 + $0x78] sm:$0xf]  ;;  %v3296_v13 = vor.u32 %v1083_v3, %v1079_v60  ;;  %2599 = vmatprep.subr.bf16.mxu0 %v2856_v32  ;;  %v2857_v46 = vld [vmem:[%s4234_s1 + $0x30] sm:$0xff]  }
  0x4a   : > { %v968_v15 = vrot.slane %v966_v2, 1  ;;  %v3294_v22 = vsel %vm921_vm5, %v1072_v59, %v1076_v0  ;;  %v548_v25 = vshrl.u32 %v239_v5, 16  ;;  %v551_v26 = vshll.u32 %v239_v5, 16  ;;  %v3308_v31 = vld [vmem:[%s3081_s5 + $0x7c] sm:$0xf]  ;;  %2759 = vmatprep.subr.bf16.mxu1 %v2856_v32  ;;  %2600 = vmatpush3.bf16.msra.mxu0 %v2857_v46 }
  0x4b   : > { %1197 = vrot.lane.b32.xlu1 %v1152_v28, %s2940_s6  ;;  %v3301_v27 = vsel %vm921_vm5, %v1096_v18, %v1100_v9  ;;  %v3303_v28 = vrot.slane %v1086_v4, 1  ;;  %v546_v29 = vrot.slane %v542_v6, 4  ;;  %v726_v30 = vsel %vm3098_vm8, %v545_v19, %v725_v7  ;;  %v218_v38 = vld [vmem:[%s3081_s5 + $0x20] sm:$0xf]  ;;  %v729_v41 = vld [vmem:[#allocation2 + $0xbc] sm:$0x1]  ;;  %2767 = vmatpush3.bf16.msra.mxu1 %v2857_v46 }
  0x4c   : > { %v550_v33 = vrot.slane %v548_v25, 7  ;;  %727 = vst [vmem:[#allocation2 + $0xb4] sm:$0xf] %v726_v30  ;;  %v353_v35 = vshrl.u32 %v216_v12, 16  ;;  %v356_v36 = vshll.u32 %v216_v12, 16  ;;  %v361_v37 = vshrl.u32 %v217_v14, 16 }
  0x4d   : > { %1366 = vrot.lane.b32.xlu0 %v3280_v8, %s2942_s10  ;;  %v3317_v40 = vsel %vm921_vm5, %v964_v10, %v968_v15  ;;  %v364_v42 = vshll.u32 %v217_v14, 16  ;;  %v557_v43 = vshrl.u32 %v240_v21, 16  ;;  %v560_v44 = vshll.u32 %v240_v21, 16  ;;  %v648_v51 = vld [vmem:[#allocation2 + $0x30] sm:$0xf]  ;;  %v2859_v34 = vld [vmem:[%s4234_s1 + $0x78] sm:$0xff]  }
  0x4e   : > { %v553_v47 = vor.u32 %v551_v26, %v550_v33  ;;  %v555_v48 = vrot.slane %v550_v33, 4  ;;  %v355_v49 = vrot.slane %v353_v35, 7  ;;  %v363_v50 = vrot.slane %v361_v37, 7  ;;  %v652_v54 = vld [vmem:[#allocation2 + $0x38] sm:$0x1]  ;;  %2601 = vmatprep.subr.bf16.mxu0 %v2859_v34  ;;  %2760 = vmatprep.subr.bf16.mxu1 %v2859_v34 }
  0x4f   : > { %1138 = vrot.lane.b32.xlu1 %v3294_v22, %s2941_s11  ;;  %v559_v57 = vrot.slane %v557_v43, 7  ;;  %v565_v58 = vshrl.u32 %v3308_v31, 16  ;;  %v568_v60 = vshll.u32 %v3308_v31, 16  ;;  %v370_v62 = vshrl.u32 %v218_v38, 16  ;;  %v732_v59 = vld [vmem:[#allocation2 + $0xc0] sm:$0xf] }
  0x50   : > { %v554_v0 = vsel %vm3089_vm7, %v546_v29, %v553_v47  ;;  %v730_v1 = vsel %vm3145_vm9, %v555_v48, %v729_v41  ;;  %v358_v2 = vor.u32 %v356_v36, %v355_v49  ;;  %v359_v3 = vrot.slane %v355_v49, 4  ;;  %v219_v18 = vld [vmem:[%s3081_s5 + $0x24] sm:$0xf]  ;;  %v2860_v4 = vld [vmem:[%s4234_s1 + $0x38] sm:$0xff]   ;;  %v736_v10 = vld [vmem:[#allocation2 + $0xc8] sm:$0x1] }
  0x51   : > { %1390 = vrot.lane.b32.xlu0 %v3301_v27, %s2942_s10  ;;  %728 = vst.msk [vmem:[#allocation2 + $0xb8] sm:$0xf] %vm242_vm0, %v554_v0  ;;  %731 = vst [vmem:[#allocation2 + $0xbc] sm:$0x1] %v730_v1  ;;  %v366_v5 = vor.u32 %v364_v42, %v363_v50  ;;  %v368_v6 = vrot.slane %v363_v50, 4  ;;  %v562_v7 = vor.u32 %v560_v44, %v559_v57  ;;  %v563_v9 = vrot.slane %v559_v57, 4 }
  0x52   : > { %v655_v12 = vld [vmem:[#allocation2 + $0x3c] sm:$0xf]  ;;  %v649_v14 = vsel %vm3098_vm8, %v358_v2, %v648_v51  ;;  %v567_v15 = vrot.slane %v565_v58, 7  ;;  %v372_v19 = vrot.slane %v370_v62, 7  ;;  %v373_v21 = vshll.u32 %v218_v38, 16  ;;  %2602 = vmatpush3.bf16.msra.mxu0 %v2860_v4  ;;  %2768 = vmatpush3.bf16.msra.mxu1 %v2860_v4 }
  0x53   : > { %1116 = vrot.lane.b32.xlu1 %v3289_v61, %s2941_s11  ;;  %v220_v25 = vld [vmem:[%s3081_s5 + $0x28] sm:$0xf]  ;;  %v367_v26 = vsel %vm3089_vm7, %v359_v3, %v366_v5  ;;  %650 = vst [vmem:[#allocation2 + $0x30] sm:$0xf] %v649_v14  ;;  %v653_v29 = vsel %vm3145_vm9, %v368_v6, %v652_v54  ;;  %v733_v30 = vsel %vm3098_vm8, %v562_v7, %v732_v59  ;;  %v378_v31 = vshrl.u32 %v219_v18, 16 }
  0x54   : > { %v3356_v32 = vsel %vm1146_vm6, %v1189_v11, %v1190_v17  ;;  %651 = vst.msk [vmem:[#allocation2 + $0x34] sm:$0xf] %vm242_vm0, %v367_v26  ;;  %654 = vst [vmem:[#allocation2 + $0x38] sm:$0x1] %v653_v29  ;;  %v570_v33 = vor.u32 %v568_v60, %v567_v15  ;;  %v572_v35 = vrot.slane %v567_v15, 4  ;;  %v375_v36 = vor.u32 %v373_v21, %v372_v19 }
  0x55   : > { %1368 = vrot.lane.b32.xlu0 %v3317_v40, %s2942_s10  ;;  %734 = vst [vmem:[#allocation2 + $0xc0] sm:$0xf] %v733_v30  ;;  %v376_v37 = vrot.slane %v372_v19, 4  ;;  %v380_v38 = vrot.slane %v378_v31, 7  ;;  %v381_v41 = vshll.u32 %v219_v18, 16  ;;  %v3364_v53 = vsel %vm921_vm5, %v3296_v13, %v3303_v28 }
  0x56   : > { %v571_v11 = vsel %vm3089_vm7, %v563_v9, %v570_v33  ;;  %v737_v17 = vsel %vm3145_vm9, %v572_v35, %v736_v10  ;;  %v656_v42 = vsel %vm3098_vm8, %v375_v36, %v655_v12  ;;  %v659_v43 = vld [vmem:[#allocation2 + $0x44] sm:$0x1]  ;;  %v387_v28 = vshrl.u32 %v220_v25, 16  ;;  %v662_v50 = vld [vmem:[#allocation2 + $0x48] sm:$0xf] }
  0x57   : > { %1234 = vrot.lane.b32.xlu1 %v3170_v39, %s2942_s10  ;;  %735 = vst.msk [vmem:[#allocation2 + $0xc4] sm:$0xf] %vm242_vm0, %v571_v11  ;;  %738 = vst [vmem:[#allocation2 + $0xc8] sm:$0x1] %v737_v17  ;;  %v383_v39 = vor.u32 %v381_v41, %v380_v38  ;;  %v385_v13 = vrot.slane %v380_v38, 4  ;;  %v390_v54 = vshll.u32 %v220_v25, 16 }
  0x58   : > { %657 = vst [vmem:[#allocation2 + $0x3c] sm:$0xf] %v656_v42  ;;  %v3375_v44 = vld [vmem:[#allocation2 + $0xb4] sm:$0xff]   ;;  %v3379_v46 = vld [vmem:[#allocation2 + $0xbc] ss:$0 sps:$4 sm:$0x11]  }
  0x59   : > { %1308 = vrot.lane.b32.xlu0 %v3356_v32, %s2941_s11  ;;  %v384_v47 = vsel %vm3089_vm7, %v376_v37, %v383_v39  ;;  %v660_v48 = vsel %vm3145_vm9, %v385_v13, %v659_v43  ;;  %v389_v49 = vrot.slane %v387_v28, 7  ;;  %v1103_v51 = vshrl.u32 %v3375_v44, 16  ;;  %v221_v4 = vld [vmem:[%s3081_s5 + $0x2c] sm:$0xf]  ;;  %v222_v14 = vld [vmem:[%s3081_s5 + $0x30] sm:$0xf] }
  0x5a   : > { %v1105_v34 = vshll.u32 %v3375_v44, 16  ;;  %658 = vst.msk [vmem:[#allocation2 + $0x40] sm:$0xf] %vm242_vm0, %v384_v47  ;;  %661 = vst [vmem:[#allocation2 + $0x44] sm:$0x1] %v660_v48  ;;  %v1110_v57 = vshll.u32 %v3379_v46, 16 }
  0x5b   : > { %1140 = vrot.lane.b32.xlu1 %v3364_v53, %s2941_s11  ;;  %v3391_v58 = vld [vmem:[#allocation2 + $0x30] sm:$0xff]   ;;  %v3393_v62 = vld [vmem:[#allocation2 + $0x38] ss:$0 sps:$4 sm:$0x11]   ;;  %v392_v0 = vor.u32 %v390_v54, %v389_v49  ;;  %v1156_v2 = vrot.slane %v3190_v63, 1  ;;  %v1157_v3 = vrot.slane %v3258_v55, 1 }
  0x5c   : > { %v1107_v60 = vrot.slane %v1105_v34, 1  ;;  %v1112_v1 = vrot.slane %v1110_v57, 1  ;;  %v973_v59 = vshll.u32 %v3391_v58, 16  ;;  %v971_v7 = vshrl.u32 %v3391_v58, 16  ;;  %v223_v15 = vld [vmem:[%s3081_s5 + $0x34] sm:$0xf] }
  0x5d   : > { %1345 = vrot.lane.b32.xlu0 %v3375_v44, %s2940_s6  ;;  %v663_v5 = vsel %vm3098_vm8, %v392_v0, %v662_v50  ;;  %v978_v9 = vshll.u32 %v3393_v62, 16  ;;  %v395_v10 = vshrl.u32 %v221_v4, 16  ;;  %v3413_v12 = vsel %vm1146_vm6, %v1156_v2, %v1157_v3  ;;  %v666_v25 = vld [vmem:[#allocation2 + $0x50] sm:$0x1]  ;;  %v224_v26 = vld [vmem:[%s3081_s5 + $0x38] sm:$0xf] }
  0x5e   : > { %v1108_v18 = vor.u32 %v1107_v60, %v1103_v51  ;;  %664 = vst [vmem:[#allocation2 + $0x48] sm:$0xf] %v663_v5  ;;  %v975_v55 = vrot.slane %v973_v59, 1  ;;  %v3417_v19 = vld [vmem:[#allocation2 + $0xc0] sm:$0xff]   ;;  %v393_v21 = vrot.slane %v389_v49, 4  ;;  %v398_v33 = vshll.u32 %v221_v4, 16 }
  0x5f   : > { %1221 = vrot.lane.b32.xlu1 %v3244_v45, %s2940_s6  ;;  %v980_v29 = vrot.slane %v978_v9, 1  ;;  %v3424_v30 = vld [vmem:[#allocation2 + $0xc8] ss:$0 sps:$4 sm:$0x11]   ;;  %v397_v31 = vrot.slane %v395_v10, 7  ;;  %v1192_v35 = vrot.slane %v3375_v44, 1 }
  0x60   : > { %v3404_v6 = vsel %vm921_vm5, %v1108_v18, %v1112_v1  ;;  %v404_v36 = vshrl.u32 %v222_v14, 16  ;;  %v407_v37 = vshll.u32 %v222_v14, 16  ;;  %v225_v38 = vld [vmem:[%s3081_s5 + $0x3c] sm:$0xf]  ;;  %v1193_v41 = vrot.slane %v3379_v46, 1 }
  0x61   : > { %1392 = vrot.lane.b32.xlu0 %v3404_v6, %s2942_s10  ;;  %v1268_v11 = vshrl.u32 %v3417_v19, 16  ;;  %v400_v17 = vor.u32 %v398_v33, %v397_v31  ;;  %v402_v42 = vrot.slane %v397_v31, 4  ;;  %v669_v43 = vld [vmem:[#allocation2 + $0x54] sm:$0xf]  ;;  %v1270_v39 = vshll.u32 %v3417_v19, 16 }
  0x62   : > { %v406_v13 = vrot.slane %v404_v36, 7  ;;  %v412_v28 = vshrl.u32 %v223_v15, 16  ;;  %v415_v47 = vshll.u32 %v223_v15, 16  ;;  %v673_v50 = vld [vmem:[#allocation2 + $0x5c] sm:$0x1]  ;;  %v421_v51 = vshrl.u32 %v224_v26, 16 }
  0x63   : > { %1258 = vrot.lane.b32.xlu1 %v3153_v24, %s2942_s10  ;;  %v976_v24 = vor.u32 %v975_v55, %v971_v7  ;;  %v401_v46 = vsel %vm3089_vm7, %v393_v21, %v400_v17  ;;  %v667_v49 = vsel %vm3145_vm9, %v402_v42, %v666_v25  ;;  %v424_v60 = vshll.u32 %v224_v26, 16  ;;  %v676_v0 = vld [vmem:[#allocation2 + $0x60] sm:$0xf]  ;;  %v227_v21 = vld [vmem:[%s3081_s5 + $0x44] sm:$0xf] }
  0x64   : > { %665 = vst.msk [vmem:[#allocation2 + $0x4c] sm:$0xf] %vm242_vm0, %v401_v46  ;;  %668 = vst [vmem:[#allocation2 + $0x50] sm:$0x1] %v667_v49  ;;  %v409_v34 = vor.u32 %v407_v37, %v406_v13  ;;  %v410_v54 = vrot.slane %v406_v13, 4  ;;  %v414_v57 = vrot.slane %v412_v28, 7  ;;  %v3451_v9 = vsel %vm1146_vm6, %v1192_v35, %v1193_v41 }
  0x65   : > { %1286 = vrot.lane.b32.xlu0 %v3413_v12, %s2941_s11  ;;  %v3436_v48 = vsel %vm921_vm5, %v976_v24, %v980_v29  ;;  %v1275_v1 = vshll.u32 %v3424_v30, 16  ;;  %v423_v2 = vrot.slane %v421_v51, 7  ;;  %v429_v3 = vshrl.u32 %v225_v38, 16  ;;  %v226_v15 = vld [vmem:[%s3081_s5 + $0x40] sm:$0xf] }
  0x66   : > { %v432_v59 = vshll.u32 %v225_v38, 16  ;;  %v1272_v18 = vrot.slane %v1270_v39, 1  ;;  %v417_v4 = vor.u32 %v415_v47, %v414_v57  ;;  %v670_v5 = vsel %vm3098_vm8, %v409_v34, %v669_v43  ;;  %v680_v24 = vld [vmem:[#allocation2 + $0x68] sm:$0x1]  ;;  %v683_v41 = vld [vmem:[#allocation2 + $0x6c] sm:$0xf] }
  0x67   : > { %1118 = vrot.lane.b32.xlu1 %v3280_v8, %s2941_s11  ;;  %v419_v7 = vrot.slane %v414_v57, 4  ;;  %671 = vst [vmem:[#allocation2 + $0x54] sm:$0xf] %v670_v5  ;;  %v426_v55 = vor.u32 %v424_v60, %v423_v2  ;;  %v427_v10 = vrot.slane %v423_v2, 4  ;;  %v431_v14 = vrot.slane %v429_v3, 7  ;;  %v3470_v28 = vld [vmem:[#allocation2 + $0x3c] sm:$0xff]  }
  0x68   : > { %v418_v25 = vsel %vm3089_vm7, %v410_v54, %v417_v4  ;;  %v438_v29 = vshrl.u32 %v226_v15, 16  ;;  %v441_v31 = vshll.u32 %v226_v15, 16  ;;  %v446_v36 = vshrl.u32 %v227_v21, 16  ;;  %v228_v49 = vld [vmem:[%s3081_s5 + $0x48] sm:$0xf] }
  0x69   : > { %1323 = vrot.lane.b32.xlu0 %v3391_v58, %s2940_s6  ;;  %v674_v26 = vsel %vm3145_vm9, %v419_v7, %v673_v50  ;;  %672 = vst.msk [vmem:[#allocation2 + $0x58] sm:$0xf] %vm242_vm0, %v418_v25  ;;  %v677_v33 = vsel %vm3098_vm8, %v426_v55, %v676_v0  ;;  %v436_v35 = vrot.slane %v431_v14, 4  ;;  %v449_v38 = vshll.u32 %v227_v21, 16  ;;  %v687_v51 = vld [vmem:[#allocation2 + $0x74] sm:$0x1] }
  0x6a   : > { %675 = vst [vmem:[#allocation2 + $0x5c] sm:$0x1] %v674_v26  ;;  %678 = vst [vmem:[#allocation2 + $0x60] sm:$0xf] %v677_v33  ;;  %v440_v37 = vrot.slane %v438_v29, 7  ;;  %v448_v43 = vrot.slane %v446_v36, 7  ;;  %v1273_v39 = vor.u32 %v1272_v18, %v1268_v11 }
  0x6b   : > { %1199 = vrot.lane.b32.xlu1 %v3265_v56, %s2940_s6  ;;  %v681_v42 = vsel %vm3145_vm9, %v436_v35, %v680_v24  ;;  %v1277_v13 = vrot.slane %v1275_v1, 1  ;;  %v1159_v11 = vrot.slane %v3391_v58, 1  ;;  %v3481_v57 = vld [vmem:[#allocation2 + $0x44] ss:$0 sps:$4 sm:$0x11]   ;;  %v455_v0 = vshrl.u32 %v228_v49, 16 }
  0x6c   : > { %682 = vst [vmem:[#allocation2 + $0x68] sm:$0x1] %v681_v42  ;;  %v443_v47 = vor.u32 %v441_v31, %v440_v37  ;;  %v444_v46 = vrot.slane %v440_v37, 4  ;;  %v451_v50 = vor.u32 %v449_v38, %v448_v43  ;;  %v453_v54 = vrot.slane %v448_v43, 4  ;;  %v229_v4 = vld [vmem:[%s3081_s5 + $0x4c] sm:$0xf] }
  0x6d   : > { %1370 = vrot.lane.b32.xlu0 %v3436_v48, %s2942_s10  ;;  %v458_v1 = vshll.u32 %v228_v49, 16  ;;  %v3486_v2 = vsel %vm921_vm5, %v1273_v39, %v1277_v13  ;;  %v1160_v3 = vrot.slane %v3393_v62, 1  ;;  %v457_v5 = vrot.slane %v455_v0, 7  ;;  %v690_v21 = vld [vmem:[#allocation2 + $0x78] sm:$0xf]  ;;  %v3507_v25 = vld [vmem:[#allocation2 + $0xcc] sm:$0xff]  }
  0x6e   : > { %v684_v34 = vsel %vm3098_vm8, %v443_v47, %v683_v41  ;;  %v452_v60 = vsel %vm3089_vm7, %v444_v46, %v451_v50  ;;  %v688_v18 = vsel %vm3145_vm9, %v453_v54, %v687_v51  ;;  %v983_v7 = vshrl.u32 %v3470_v28, 16  ;;  %v694_v33 = vld [vmem:[#allocation2 + $0x80] sm:$0x1]  ;;  %v3512_v35 = vld [vmem:[#allocation2 + $0xd4] ss:$0 sps:$4 sm:$0x11]  }
  0x6f   : > { %1236 = vrot.lane.b32.xlu1 %v3190_v63, %s2942_s10  ;;  %v434_v63 = vor.u32 %v432_v59, %v431_v14  ;;  %685 = vst [vmem:[#allocation2 + $0x6c] sm:$0xf] %v684_v34  ;;  %v985_v59 = vshll.u32 %v3470_v28, 16  ;;  %686 = vst.msk [vmem:[#allocation2 + $0x70] sm:$0xf] %vm242_vm0, %v452_v60  ;;  %v990_v62 = vshll.u32 %v3481_v57, 16  ;;  %v460_v55 = vor.u32 %v458_v1, %v457_v5 }
  0x70   : > { %689 = vst [vmem:[#allocation2 + $0x74] sm:$0x1] %v688_v18  ;;  %v463_v15 = vshrl.u32 %v229_v4, 16  ;;  %v461_v36 = vrot.slane %v457_v5, 4  ;;  %v466_v37 = vshll.u32 %v229_v4, 16  ;;  %v1357_v42 = vshll.u32 %v3507_v25, 16 }
  0x71   : > { %1310 = vrot.lane.b32.xlu0 %v3451_v9, %s2941_s11  ;;  %v435_v17 = vsel %vm3089_vm7, %v427_v10, %v434_v63  ;;  %v3501_v10 = vsel %vm1146_vm6, %v1159_v11, %v1160_v3  ;;  %v987_v14 = vrot.slane %v985_v59, 1  ;;  %v691_v26 = vsel %vm3098_vm8, %v460_v55, %v690_v21  ;;  %v230_v63 = vld [vmem:[%s3081_s5 + $0x50] sm:$0xf]  ;;  %v231_v41 = vld [vmem:[%s3081_s5 + $0x54] sm:$0xf]  ;;  %v3537_v1 = vld [vmem:[%s4234_s1 + $0x80] sm:$0xff]  }
  0x72   : > { %679 = vst.msk [vmem:[#allocation2 + $0x64] sm:$0xf] %vm242_vm0, %v435_v17  ;;  %v992_v29 = vrot.slane %v990_v62, 1  ;;  %v465_v31 = vrot.slane %v463_v15, 7  ;;  %692 = vst [vmem:[#allocation2 + $0x78] sm:$0xf] %v691_v26  ;;  %2717 = vmatprep.subr.bf16.mxu1 %v3537_v1 }
  0x73   : > { %1142 = vrot.lane.b32.xlu1 %v3301_v27, %s2941_s11  ;;  %v988_v24 = vor.u32 %v987_v14, %v983_v7  ;;  %v1279_v17 = vrot.slane %v3417_v19, 1  ;;  %v472_v43 = vshrl.u32 %v230_v63, 16  ;;  %v475_v39 = vshll.u32 %v230_v63, 16  ;;  %v697_v11 = vld [vmem:[#allocation2 + $0x84] sm:$0xf]  ;;  %v3555_v23 = vld [vmem:[#allocation2 + $0x48] sm:$0xff]  }
  0x74   : > { %v470_v38 = vrot.slane %v465_v31, 4  ;;  %v1280_v47 = vrot.slane %v3424_v30, 1  ;;  %v468_v46 = vor.u32 %v466_v37, %v465_v31  ;;  %v480_v51 = vshrl.u32 %v231_v41, 16  ;;  %v701_v5 = vld [vmem:[#allocation2 + $0x8c] sm:$0x1]  ;;  %s2943_s5 = smov [#allocation3]  }
  0x75   : > { %1347 = vrot.lane.b32.xlu0 %v3417_v19, %s2940_s6  ;;  %v3522_v13 = vsel %vm921_vm5, %v988_v24, %v992_v29  ;;  %v474_v50 = vrot.slane %v472_v43, 7  ;;  %v483_v34 = vshll.u32 %v231_v41, 16  ;;  %v1355_v59 = vshrl.u32 %v3507_v25, 16  ;;  %v2839_v29 = vld [vmem:[#allocation2 + $0x50] ss:$0 sps:$4 sm:$0x11]  }
  0x76   : > { %v695_v49 = vsel %vm3145_vm9, %v470_v38, %v694_v33  ;;  %v469_v54 = vsel %vm3089_vm7, %v461_v36, %v468_v46  ;;  %v482_v0 = vrot.slane %v480_v51, 7  ;;  %v3540_v3 = vsel %vm1146_vm6, %v1279_v17, %v1280_v47  ;;  %v3577_v41 = vld [vmem:[#allocation2 + $0x54] sm:$0xff]   ;;  %v2845_v43 = vld [vmem:[#allocation2 + $0x5c] ss:$0 sps:$4 sm:$0x11]   ;;  %s2879_s22 = sshll.u32 %s2943_s5, 4  ;;  %s2880_s22 = int_to_ptr.vmem [resolvable:$false] %s2879_s22 }
  0x77   : > { %1223 = vrot.lane.b32.xlu1 %v3356_v32, %s2940_s6  ;;  %696 = vst [vmem:[#allocation2 + $0x80] sm:$0x1] %v695_v49  ;;  %693 = vst.msk [vmem:[#allocation2 + $0x7c] sm:$0xf] %vm242_vm0, %v469_v54  ;;  %v477_v30 = vor.u32 %v475_v39, %v474_v50  ;;  %v478_v60 = vrot.slane %v474_v50, 4  ;;  %v1359_v18 = vrot.slane %v1357_v42, 1 }
  0x78   : > { %v1362_v4 = vshll.u32 %v3512_v35, 16  ;;  %v485_v7 = vor.u32 %v483_v34, %v482_v0  ;;  %v487_v55 = vrot.slane %v482_v0, 4  ;;  %v1162_v16 = vrot.slane %v3470_v28, 1  ;;  %s2881_s23 = scalar_lea.vmem %s2880_s22, 8192 }
  0x79   : > { %1394 = vrot.lane.b32.xlu0 %v3486_v2, %s2942_s10  ;;  %v698_v62 = vsel %vm3098_vm8, %v477_v30, %v697_v11  ;;  %v1360_v21 = vor.u32 %v1359_v18, %v1355_v59  ;;  %v1163_v20 = vrot.slane %v3481_v57, 1  ;;  %v997_v31 = vshll.u32 %v3555_v23, 16  ;;  %v3602_v30 = vld [vmem:[#allocation2 + $0x60] sm:$0xff]  }
  0x7a   : > { %699 = vst [vmem:[#allocation2 + $0x84] sm:$0xf] %v698_v62  ;;  %v486_v14 = vsel %vm3089_vm7, %v478_v60, %v485_v7  ;;  %v702_v15 = vsel %vm3145_vm9, %v487_v55, %v701_v5  ;;  %v1364_v26 = vrot.slane %v1362_v4, 1  ;;  %v995_v33 = vshrl.u32 %v3555_v23, 16 }
  0x7b   : > { %1260 = vrot.lane.b32.xlu1 %v3375_v44, %s2942_s10  ;;  %700 = vst.msk [vmem:[#allocation2 + $0x88] sm:$0xf] %vm242_vm0, %v486_v14  ;;  %703 = vst [vmem:[#allocation2 + $0x8c] sm:$0x1] %v702_v15  ;;  %v3570_v63 = vsel %vm1146_vm6, %v1162_v16, %v1163_v20  ;;  %v999_v36 = vrot.slane %v997_v31, 1  ;;  %v1002_v37 = vshll.u32 %v2839_v29, 16 }
  0x7c   : > { %v1365_v24 = vsel %vm921_vm5, %v1360_v21, %v1364_v26  ;;  %v1165_v17 = vrot.slane %v3555_v23, 1  ;;  %v1166_v42 = vrot.slane %v2839_v29, 1  ;;  %v1009_v39 = vshll.u32 %v3577_v41, 16  ;;  %v2853_v5 = vld [vmem:[#allocation2 + $0x68] ss:$0 sps:$4 sm:$0x11]  }
  0x7d   : > { %1288 = vrot.lane.b32.xlu0 %v3501_v10, %s2941_s11  ;;  %v1000_v57 = vor.u32 %v999_v36, %v995_v33  ;;  %v1004_v38 = vrot.slane %v1002_v37, 1  ;;  %v1007_v46 = vshrl.u32 %v3577_v41, 16  ;;  %v1014_v50 = vshll.u32 %v2845_v43, 16  ;;  %v2861_v33 = vld [vmem:[#allocation2 + $0x74] ss:$0 sps:$4 sm:$0x11]  }
  0x7e   : > { %v3593_v47 = vsel %vm1146_vm6, %v1165_v17, %v1166_v42  ;;  %v1011_v49 = vrot.slane %v1009_v39, 1  ;;  %v1168_v18 = vrot.slane %v3577_v41, 1  ;;  %v1169_v4 = vrot.slane %v2845_v43, 1 }
  0x7f   : > { %1120 = vrot.lane.b32.xlu1 %v3317_v40, %s2941_s11  ;;  %v1016_v11 = vrot.slane %v1014_v50, 1  ;;  %v1021_v7 = vshll.u32 %v3602_v30, 16  ;;  %v1019_v55 = vshrl.u32 %v3602_v30, 16  ;;  %v1026_v15 = vshll.u32 %v2853_v5, 16 }
  0x80   : > { %v1012_v54 = vor.u32 %v1011_v49, %v1007_v46  ;;  %v3620_v62 = vsel %vm1146_vm6, %v1168_v18, %v1169_v4  ;;  %v1038_v39 = vshll.u32 %v2861_v33, 16  ;;  %v3654_v4 = vld [vmem:[#allocation2 + $0x78] sm:$0xff]   ;;  %vm1434_vm11 = vcmask 523264  }
  0x81   : > { %1325 = vrot.lane.b32.xlu0 %v3470_v28, %s2940_s6  ;;  %v1023_v14 = vrot.slane %v1021_v7, 1  ;;  %v1028_v20 = vrot.slane %v1026_v15, 1  ;;  %vm1467_vm12 = vcmask 785408  }
  0x82   : > { %v3611_v0 = vsel %vm921_vm5, %v1012_v54, %v1016_v11  ;;  %v1040_v11 = vrot.slane %v1038_v39, 1  ;;  %v3673_v39 = vld [vmem:[#allocation2 + $0x90] sm:$0xff]  }
  0x83   : > { %1201 = vrot.lane.b32.xlu1 %v3413_v12, %s2940_s6  ;;  %v1024_v16 = vor.u32 %v1023_v14, %v1019_v55 }
  0x85   : > { %1372 = vrot.lane.b32.xlu0 %v3522_v13, %s2942_s10  ;;  %v3637_v37 = vsel %vm921_vm5, %v1024_v16, %v1028_v20  ;;  %v1175_v20 = vrot.slane %v2861_v33, 1 }
  0x87   : > { %1238 = vrot.lane.b32.xlu1 %v3391_v58, %s2942_s10 }
  0x89   : > { %1312 = vrot.lane.b32.xlu0 %v3540_v3, %s2941_s11 }
  0x8b   : > { %1144 = vrot.lane.b32.xlu1 %v3404_v6, %s2941_s11 }
  0x8d   : > { %1349 = vrot.lane.b32.xlu0 %v3507_v25, %s2940_s6 }
  0x8f   : > { %1225 = vrot.lane.b32.xlu1 %v3451_v9, %s2940_s6 }
  0x91   : > { %1396 = vrot.lane.b32.xlu0 %v1365_v24, %s2942_s10  ;;  %v3629_v24 = vld [vmem:[#allocation2 + $0x6c] sm:$0xff]  }
  0x92   : > { %v1033_v36 = vshll.u32 %v3629_v24, 16  ;;  %v1031_v42 = vshrl.u32 %v3629_v24, 16  ;;  %v1174_v16 = vrot.slane %v3629_v24, 1 }
  0x93   : > { %1262 = vrot.lane.b32.xlu1 %v3417_v19, %s2942_s10  ;;  %v3584_v19 = vsel %vm921_vm5, %v1000_v57, %v1004_v38  ;;  %v1171_v57 = vrot.slane %v3602_v30, 1  ;;  %v1172_v38 = vrot.slane %v2853_v5, 1  ;;  %v2868_v5 = vld [vmem:[#allocation2] sm:$0xff]  }
  0x94   : > { %v1035_v43 = vrot.slane %v1033_v36, 1 }
  0x95   : > { %1290 = vrot.lane.b32.xlu0 %v3570_v63, %s2941_s11  ;;  %v3646_v46 = vsel %vm1146_vm6, %v1171_v57, %v1172_v38  ;;  %v1045_v38 = vshll.u32 %v3654_v4, 16 }
  0x96   : > { %v1036_v54 = vor.u32 %v1035_v43, %v1031_v42 }
  0x97   : > { %1122 = vrot.lane.b32.xlu1 %v3436_v48, %s2941_s11 }
  0x98   : > { %v3662_v15 = vsel %vm921_vm5, %v1036_v54, %v1040_v11 }
  0x99   : > { %1327 = vrot.lane.b32.xlu0 %v3555_v23, %s2940_s6 }
  0x9b   : > { %1203 = vrot.lane.b32.xlu1 %v3501_v10, %s2940_s6 }
  0x9d   : > { %1374 = vrot.lane.b32.xlu0 %v3584_v19, %s2942_s10 }
  0x9f   : > { %1240 = vrot.lane.b32.xlu1 %v3470_v28, %s2942_s10  ;;  %v3596_v34 = vpop.permute.xlu1 %1195 }
  0xa1   : > { %v1115_v51 = vpop.permute.xlu0 %1114  ;;  %1292 = vrot.lane.b32.xlu0 %v3593_v47, %s2941_s11 }
  0xa2   : > { %v1403_v7 = vsel %vm1401_vm10, %v2868_v5, %v1115_v51  ;;  %v1043_v5 = vshrl.u32 %v3654_v4, 16 }
  0xa3   : > { %1124 = vrot.lane.b32.xlu1 %v3522_v13, %s2941_s11  ;;  %v1436_v57 = vsel %vm1434_vm11, %v1403_v7, %v3596_v34  ;;  %v3682_v34 = vsel %vm1146_vm6, %v1174_v16, %v1175_v20  ;;  %v1047_v7 = vrot.slane %v1045_v38, 1  ;;  %v2867_v16 = vld [vmem:[%s4234_s1 + $0x88] sm:$0xff]  }
  0xa5   : > { %1329 = vrot.lane.b32.xlu0 %v3577_v41, %s2940_s6  ;;  %v1048_v20 = vor.u32 %v1047_v7, %v1043_v5 }
  0xa6   : > { %v3608_v60 = vpop.permute.xlu0 %1343 }
  0xa7   : > { %1205 = vrot.lane.b32.xlu1 %v3570_v63, %s2940_s6  ;;  %v1320_v59 = vpop.permute.xlu1 %1319 }
  0xa9   : > { %1376 = vrot.lane.b32.xlu0 %v3611_v0, %s2942_s10 }
  0xab   : > { %1242 = vrot.lane.b32.xlu1 %v3555_v23, %s2942_s10 }
  0xad   : > { %v3623_v21 = vpop.permute.xlu0 %1321  ;;  %1294 = vrot.lane.b32.xlu0 %v3620_v62, %s2941_s11 }
  0xae   : > { %v1233_v26 = vpop.permute.xlu1 %1232 }
  0xaf   : > { %1126 = vrot.lane.b32.xlu1 %v3584_v19, %s2941_s11  ;;  %v1469_v43 = vsel %vm1467_vm12, %v1436_v57, %v1233_v26 }
  0xb1   : > { %1331 = vrot.lane.b32.xlu0 %v3602_v30, %s2940_s6 }
  0xb2   : > { %v1257_v31 = vpop.permute.xlu1 %1256 }
  0xb3   : > { %v1283_v29 = vpop.permute.xlu0 %1282  ;;  %1207 = vrot.lane.b32.xlu1 %v3593_v47, %s2940_s6 }
  0xb4   : > { %v1518_v18 = vsel %vm1401_vm10, %v3289_v61, %v1283_v29  ;;  %v2863_v29 = vld [vmem:[#allocation2 + $0x80] ss:$0 sps:$4 sm:$0x11]  }
  0xb5   : > { %1378 = vrot.lane.b32.xlu0 %v3637_v37, %s2942_s10  ;;  %v1565_v61 = vsel %vm1434_vm11, %v1518_v18, %v1320_v59  ;;  %v1050_v54 = vshll.u32 %v2863_v29, 16 }
  0xb7   : > { %1244 = vrot.lane.b32.xlu1 %v3577_v41, %s2942_s10  ;;  %v1307_v17 = vpop.permute.xlu0 %1306 }
  0xb8   : > { %v1554_v51 = vsel %vm1401_vm10, %v3364_v53, %v1307_v17 }
  0xb9   : > { %v1220_v49 = vpop.permute.xlu1 %1219  ;;  %1296 = vrot.lane.b32.xlu0 %v3646_v46, %s2941_s11  ;;  %v1589_v17 = vsel %vm1434_vm11, %v1554_v51, %v3608_v60  ;;  %v2870_v60 = vld [vmem:[#allocation2 + $0xc] sm:$0xff]   ;;  %v1052_v51 = vrot.slane %v1050_v54, 1 }
  0xbb   : > { %1128 = vrot.lane.b32.xlu1 %v3611_v0, %s2941_s11  ;;  %v1285_v50 = vpop.permute.xlu0 %1284 }
  0xbc   : > { %v1521_v11 = vsel %vm1401_vm10, %v3280_v8, %v1285_v50 }
  0xbd   : > { %v1198_v55 = vpop.permute.xlu1 %1197  ;;  %1333 = vrot.lane.b32.xlu0 %v3629_v24, %s2940_s6  ;;  %v1567_v50 = vsel %vm1434_vm11, %v1521_v11, %v3623_v21 }
  0xbf   : > { %1209 = vrot.lane.b32.xlu1 %v3620_v62, %s2940_s6  ;;  %v1367_v14 = vpop.permute.xlu0 %1366 }
  0xc0   : > { %v1597_v36 = vsel %vm1467_vm12, %v1565_v61, %v1367_v14 }
  0xc1   : > { %v1139_v42 = vpop.permute.xlu1 %1138  ;;  %1875 = vmatprep.mubr.bf16.mxu0 %v1597_v36  ;;  %1380 = vrot.lane.b32.xlu0 %v3662_v15, %s2942_s10  ;;  %v3703_v36 = vld [vmem:[#allocation2 + $0x84] sm:$0xff]  }
  0xc2   : > { %v1427_v59 = vsel %vm1401_vm10, %v3673_v39, %v1139_v42  ;;  %1876 = vmatmul.mubr.bf16.vlgmr.msra.gmra.mrb[0].mxu0 %v1469_v43  ;;  %v3713_v43 = vsel %vm921_vm5, %v1048_v20, %v1052_v51  ;;  %v1055_v11 = vshrl.u32 %v3703_v36, 16 }
  0xc3   : > { %1246 = vrot.lane.b32.xlu1 %v3602_v30, %s2942_s10  ;;  %v1391_v33 = vpop.permute.xlu0 %1390  ;;  %v1460_v26 = vsel %vm1434_vm11, %v1427_v59, %v1220_v49  ;;  %v1178_v59 = vrot.slane %v2863_v29, 1 }
  0xc4   : > { %v1633_v18 = vsel %vm1467_vm12, %v1589_v17, %v1391_v33  ;;  %v1505_v61 = vsel %vm1467_vm12, %v1460_v26, %v1257_v31  ;;  %v2865_v33 = vld [vmem:[#allocation2 + $0x8c] ss:$0 sps:$4 sm:$0x11]  }
  0xc5   : > { %v1117_v14 = vpop.permute.xlu1 %1116  ;;  %1971 = vmatprep.mubr.bf16.mxu1 %v1633_v18  ;;  %1298 = vrot.lane.b32.xlu0 %v3682_v34, %s2941_s11  ;;  %v1062_v5 = vshll.u32 %v2865_v33, 16 }
  0xc6   : > { %v1405_v49 = vsel %vm1401_vm10, %v2870_v60, %v1117_v14  ;;  %1972 = vmatmul.mubr.bf16.vlgmr.msra.gmra.mrb[0].mxu1 %v1505_v61  ;;  %v2871_v14 = vld [vmem:[#allocation2 + $0x9c] sm:$0xff]  }
  0xc7   : > { %1130 = vrot.lane.b32.xlu1 %v3637_v37, %s2941_s11  ;;  %v1369_v8 = vpop.permute.xlu0 %1368  ;;  %2718 = vmatpush3.bf16.msra.mxu1 %v3537_v1  ;;  %v1438_v38 = vsel %vm1434_vm11, %v1405_v49, %v1198_v55  ;;  %v1177_v1 = vrot.slane %v3654_v4, 1  ;;  %v1057_v55 = vshll.u32 %v3703_v36, 16  ;;  %v1064_v60 = vrot.slane %v1062_v5, 1 }
  0xc8   : > { %v1600_v31 = vsel %vm1467_vm12, %v1567_v50, %v1369_v8  ;;  %2719 = vmatprep.subr.bf16.mxu1 %v2867_v16 }
  0xc9   : > { %v1235_v57 = vpop.permute.xlu1 %1234  ;;  %1883 = vmatprep.mubr.bf16.mxu0 %v1600_v31  ;;  %1335 = vrot.lane.b32.xlu0 %v3654_v4, %s2940_s6  ;;  %v3722_v54 = vsel %vm1146_vm6, %v1177_v1, %v1178_v59  ;;  %v1059_v18 = vrot.slane %v1057_v55, 1 }
  0xca   : > { %v1472_v42 = vsel %vm1467_vm12, %v1438_v38, %v1235_v57  ;;  %v1180_v57 = vrot.slane %v3703_v36, 1  ;;  %v1181_v38 = vrot.slane %v2865_v33, 1  ;;  %v2872_v33 = vld [vmem:[#allocation2 + $0x18] sm:$0xff]  }
  0xcb   : > { %1211 = vrot.lane.b32.xlu1 %v3646_v46, %s2940_s6  ;;  %v1309_v21 = vpop.permute.xlu0 %1308  ;;  %1884 = vmatmul.mubr.bf16.gmra.mrb[4].mxu0 %v1472_v42 }
  0xcc   : > { %2720 = vmatpush3.bf16.msra.mxu1 %v2867_v16  ;;  %v1557_v7 = vsel %vm1401_vm10, %v3301_v27, %v1309_v21  ;;  %v1060_v16 = vor.u32 %v1059_v18, %v1055_v11  ;;  %v3749_v1 = vsel %vm1146_vm6, %v1180_v57, %v1181_v38 }
  0xcd   : > { %v1141_v17 = vpop.permute.xlu1 %1140  ;;  %1382 = vrot.lane.b32.xlu0 %v3713_v43, %s2942_s10 }
  0xce   : > { %v1429_v61 = vsel %vm1401_vm10, %v2871_v14, %v1141_v17  ;;  %v3741_v27 = vsel %vm921_vm5, %v1060_v16, %v1064_v60 }
  0xcf   : > { %1248 = vrot.lane.b32.xlu1 %v3629_v24, %s2942_s10  ;;  %v1346_v26 = vpop.permute.xlu0 %1345 }
  0xd0   : > { %v1591_v49 = vsel %vm1434_vm11, %v1557_v7, %v1346_v26 }
  0xd1   : > { %v1222_v29 = vpop.permute.xlu1 %1221  ;;  %1300 = vrot.lane.b32.xlu0 %v3722_v54, %s2941_s11 }
  0xd2   : > { %v1462_v8 = vsel %vm1434_vm11, %v1429_v61, %v1222_v29 }
  0xd3   : > { %1132 = vrot.lane.b32.xlu1 %v3662_v15, %s2941_s11  ;;  %v1393_v50 = vpop.permute.xlu0 %1392 }
  0xd4   : > { %v1636_v20 = vsel %vm1467_vm12, %v1591_v49, %v1393_v50  ;;  %v2873_v50 = vld [vmem:[#allocation2 + $0xa8] sm:$0xff]  }
  0xd5   : > { %v1259_v31 = vpop.permute.xlu1 %1258  ;;  %1337 = vrot.lane.b32.xlu0 %v3703_v36, %s2940_s6  ;;  %1979 = vmatprep.mubr.bf16.mxu1 %v1636_v20 }
  0xd6   : > { %v1508_v51 = vsel %vm1467_vm12, %v1462_v8, %v1259_v31 }
  0xd7   : > { %1213 = vrot.lane.b32.xlu1 %v3682_v34, %s2940_s6  ;;  %1980 = vmatmul.mubr.bf16.gmra.mrb[4].mxu1 %v1508_v51  ;;  %v1287_v42 = vpop.permute.xlu0 %1286 }
  0xd8   : > { %v1524_v17 = vsel %vm1401_vm10, %v3317_v40, %v1287_v42 }
  0xd9   : > { %v1119_v21 = vpop.permute.xlu1 %1118  ;;  %1384 = vrot.lane.b32.xlu0 %v3741_v27, %s2942_s10 }
  0xda   : > { %v1407_v26 = vsel %vm1401_vm10, %v2872_v33, %v1119_v21 }
  0xdb   : > { %1250 = vrot.lane.b32.xlu1 %v3654_v4, %s2942_s10  ;;  %v1324_v59 = vpop.permute.xlu0 %1323 }
  0xdc   : > { %v1569_v11 = vsel %vm1434_vm11, %v1524_v17, %v1324_v59 }
  0xdd   : > { %v1200_v55 = vpop.permute.xlu1 %1199  ;;  %1302 = vrot.lane.b32.xlu0 %v3749_v1, %s2941_s11 }
  0xde   : > { %v1440_v18 = vsel %vm1434_vm11, %v1407_v26, %v1200_v55  ;;  %v2874_v26 = vld [vmem:[#allocation2 + $0x24] sm:$0xff]  }
  0xdf   : > { %1134 = vrot.lane.b32.xlu1 %v3713_v43, %s2941_s11  ;;  %v1371_v5 = vpop.permute.xlu0 %1370 }
  0xe0   : > { %v1603_v7 = vsel %vm1467_vm12, %v1569_v11, %v1371_v5 }
  0xe1   : > { %v1237_v29 = vpop.permute.xlu1 %1236  ;;  %1339 = vrot.lane.b32.xlu0 %v3673_v39, %s2940_s6  ;;  %1891 = vmatprep.mubr.bf16.mxu0 %v1603_v7 }
  0xe2   : > { %v1475_v61 = vsel %vm1467_vm12, %v1440_v18, %v1237_v29 }
  0xe3   : > { %1215 = vrot.lane.b32.xlu1 %v3722_v54, %s2940_s6  ;;  %1892 = vmatmul.mubr.bf16.gmra.mrb[8].mxu0 %v1475_v61  ;;  %v1311_v40 = vpop.permute.xlu0 %1310 }
  0xe4   : > { %v1560_v8 = vsel %vm1401_vm10, %v3404_v6, %v1311_v40 }
  0xe5   : > { %v1143_v16 = vpop.permute.xlu1 %1142  ;;  %1386 = vrot.lane.b32.xlu0 %v3294_v22, %s2942_s10 }
  0xe6   : > { %v1431_v31 = vsel %vm1401_vm10, %v2873_v50, %v1143_v16 }
  0xe7   : > { %1252 = vrot.lane.b32.xlu1 %v3703_v36, %s2942_s10  ;;  %v1348_v60 = vpop.permute.xlu0 %1347 }
  0xe8   : > { %v1593_v20 = vsel %vm1434_vm11, %v1560_v8, %v1348_v60 }
  0xe9   : > { %v1224_v49 = vpop.permute.xlu1 %1223  ;;  %1304 = vrot.lane.b32.xlu0 %v3252_v52, %s2941_s11 }
  0xea   : > { %v1464_v51 = vsel %vm1434_vm11, %v1431_v31, %v1224_v49 }
  0xeb   : > { %1136 = vrot.lane.b32.xlu1 %v3741_v27, %s2941_s11  ;;  %v1395_v57 = vpop.permute.xlu0 %1394 }
  0xec   : > { %v1639_v42 = vsel %vm1467_vm12, %v1593_v20, %v1395_v57 }
  0xed   : > { %v1261_v38 = vpop.permute.xlu1 %1260  ;;  %1341 = vrot.lane.b32.xlu0 %v2871_v14, %s2940_s6  ;;  %1987 = vmatprep.mubr.bf16.mxu1 %v1639_v42 }
  0xee   : > { %v1511_v21 = vsel %vm1467_vm12, %v1464_v51, %v1261_v38 }
  0xef   : > { %1217 = vrot.lane.b32.xlu1 %v3749_v1, %s2940_s6  ;;  %1988 = vmatmul.mubr.bf16.gmra.mrb[8].mxu1 %v1511_v21  ;;  %v1289_v6 = vpop.permute.xlu0 %1288  ;;  %s189_s6 = sand.u32 1, %s2929_s16  }
  0xf0   : > { %v1527_v33 = vsel %vm1401_vm10, %v3436_v48, %v1289_v6  ;;  %s2503_s30 = sshll.u32 %s189_s6, 8  ;;  %s4120_s19 = scalar_lea.sflag [#allocation4], %s189_s6 }
  0xf1   : > { %v1121_v59 = vpop.permute.xlu1 %1120  ;;  %1388 = vrot.lane.b32.xlu0 %v3364_v53, %s2942_s10  ;;  %s3930_s7 = scalar_lea.vmem [#allocation3], %s2503_s30 }
  0xf2   : > { %v1409_v14 = vsel %vm1401_vm10, %v2874_v26, %v1121_v59  ;;  %s2409_s9 = sshll.u32 %s3930_s7, 4  ;;  %s4109_s9 = int_to_ptr.vmem [resolvable:$true] %s2409_s9 }
  0xf3   : > { %1254 = vrot.lane.b32.xlu1 %v3673_v39, %s2942_s10  ;;  %v1326_v55 = vpop.permute.xlu0 %1325  ;;  %s2875_s20 = scalar_lea.vmem %s4109_s9, 4096  ;;  %p2882_p0 = scmp.lt.s32.totalorder %s4109_s9, %s2880_s22 }
  0xf4   : > { %v1571_v11 = vsel %vm1434_vm11, %v1527_v33, %v1326_v55  ;;  %p2876_p11 = scmp.ne.s32.totalorder %s4109_s9, %s2875_s20  ;;  %p2883_p1 = scmp.lt.s32.totalorder %s2881_s23, %s2875_s20 }
  0xf5   : > { %v1202_v17 = vpop.permute.xlu1 %1201 }
  0xf6   : > { %v1442_v18 = vsel %vm1434_vm11, %v1409_v14, %v1202_v17  ;;  %p2877_p12 = pnand %p2876_p11, %p3009_p5  ;;  %p2884_p2 = por %p2883_p1, %p2882_p0 }
  0xf7   : > { %v1373_v5 = vpop.permute.xlu0 %1372 }
  0xf8   : > { %v1606_v7 = vsel %vm1467_vm12, %v1571_v11, %v1373_v5  ;;  %p2878_p13 = pneg %p2877_p12 }
  0xf9   : > { %v1239_v29 = vpop.permute.xlu1 %1238  ;;  %1899 = vmatprep.mubr.bf16.mxu0 %v1606_v7 }
  0xfa   : > { %v1478_v53 = vsel %vm1467_vm12, %v1442_v18, %v1239_v29  ;;  %p2885_p3 = pnand %p2884_p2, %p2878_p13 }
  0xfb   : > { %1900 = vmatmul.mubr.bf16.gmra.mrb[12].mxu0 %v1478_v53  ;;  %v1313_v39 = vpop.permute.xlu0 %1312 }
  0xfc   : > { %v1563_v48 = vsel %vm1401_vm10, %v3486_v2, %v1313_v39 }
  0xfd   : > { %v1145_v61 = vpop.permute.xlu1 %1144 }
  0xfe   : > { %v1433_v60 = vsel %vm1401_vm10, %v3375_v44, %v1145_v61 }
  0xff   : > { %v1350_v40 = vpop.permute.xlu0 %1349 }
 0x100   : > { %v1595_v49 = vsel %vm1434_vm11, %v1563_v48, %v1350_v40 }
 0x101   : > { %v1226_v16 = vpop.permute.xlu1 %1225 }
 0x102   : > { %v1466_v8 = vsel %vm1434_vm11, %v1433_v60, %v1226_v16 }
 0x103   : > { %v1397_v50 = vpop.permute.xlu0 %1396 }
 0x104   : > { %v1642_v20 = vsel %vm1467_vm12, %v1595_v49, %v1397_v50 }
 0x105   : > { %v1263_v31 = vpop.permute.xlu1 %1262  ;;  %1995 = vmatprep.mubr.bf16.mxu1 %v1642_v20 }
 0x106   : > { %v1514_v51 = vsel %vm1467_vm12, %v1466_v8, %v1263_v31 }
 0x107   : > { %1996 = vmatmul.mubr.bf16.gmra.mrb[12].mxu1 %v1514_v51  ;;  %v1291_v57 = vpop.permute.xlu0 %1290 }
 0x108   : > { %2721 = vmatprep.mubr.msk.bf16.mxu1 %vm1401_vm10, %v3265_v56  ;;  %v1530_v44 = vsel %vm1401_vm10, %v3522_v13, %v1291_v57 }
 0x109   : > { %v1123_v38 = vpop.permute.xlu1 %1122 }
 0x10a   : > { %v1411_v21 = vsel %vm1401_vm10, %v3391_v58, %v1123_v38 }
 0x10b   : > { %v1328_v2 = vpop.permute.xlu0 %1327 }
 0x10c   : > { %v1573_v6 = vsel %vm1434_vm11, %v1530_v44, %v1328_v2 }
 0x10d   : > { %v1204_v42 = vpop.permute.xlu1 %1203 }
 0x10e   : > { %v1444_v59 = vsel %vm1434_vm11, %v1411_v21, %v1204_v42 }
 0x10f   : > { %2722 = vmatmul.mubr.msk.bf16.vlgmr.msra.gmra.mrb[16].mxu1 %vm1401_vm10, %v3413_v12  ;;  %v1375_v55 = vpop.permute.xlu0 %1374 }
 0x110   : > { %2725 = vmatprep.mubr.msk.bf16.mxu1 %vm1401_vm10, %v3501_v10  ;;  %v1609_v56 = vsel %vm1467_vm12, %v1573_v6, %v1375_v55 }
 0x111   : > { %v1241_v17 = vpop.permute.xlu1 %1240  ;;  %1907 = vmatprep.mubr.bf16.mxu0 %v1609_v56 }
 0x112   : > { %v1481_v33 = vsel %vm1467_vm12, %v1444_v59, %v1241_v17  ;;  %v1399_v59 = vrot.slane %v3512_v35, 1 }
 0x113   : > { %1908 = vmatmul.mubr.bf16.gmra.mrb[16].mxu0 %v1481_v33  ;;  %v1293_v13 = vpop.permute.xlu0 %1292 }
 0x114   : > { %v1533_v14 = vsel %vm1401_vm10, %v3584_v19, %v1293_v13 }
 0x115   : > { %v1125_v58 = vpop.permute.xlu1 %1124 }
 0x116   : > { %v1413_v10 = vsel %vm1401_vm10, %v3470_v28, %v1125_v58 }
 0x117   : > { %2726 = vmatmul.mubr.msk.bf16.gmra.mrb[20].mxu1 %vm1401_vm10, %v3570_v63  ;;  %v1330_v12 = vpop.permute.xlu0 %1329 }
 0x118   : > { %2729 = vmatprep.mubr.msk.bf16.mxu1 %vm1401_vm10, %v3593_v47  ;;  %v1575_v11 = vsel %vm1434_vm11, %v1533_v14, %v1330_v12 }
 0x119   : > { %v1206_v26 = vpop.permute.xlu1 %1205 }
 0x11a   : > { %v1446_v18 = vsel %vm1434_vm11, %v1413_v10, %v1206_v26 }
 0x11b   : > { %v1377_v5 = vpop.permute.xlu0 %1376 }
 0x11c   : > { %v1612_v7 = vsel %vm1467_vm12, %v1575_v11, %v1377_v5 }
 0x11d   : > { %v1243_v29 = vpop.permute.xlu1 %1242  ;;  %1915 = vmatprep.mubr.bf16.mxu0 %v1612_v7 }
 0x11e   : > { %v1484_v63 = vsel %vm1467_vm12, %v1446_v18, %v1243_v29 }
 0x11f   : > { %1916 = vmatmul.mubr.bf16.gmra.mrb[20].mxu0 %v1484_v63  ;;  %2730 = vmatmul.mubr.msk.bf16.gmra.mrb[24].mxu1 %vm1401_vm10, %v3620_v62  ;;  %v1295_v47 = vpop.permute.xlu0 %1294 }
 0x120   : > { %2733 = vmatprep.mubr.msk.bf16.mxu1 %vm1401_vm10, %v3646_v46  ;;  %v1536_v39 = vsel %vm1401_vm10, %v3611_v0, %v1295_v47 }
 0x121   : > { %v1127_v19 = vpop.permute.xlu1 %1126 }
 0x122   : > { %v1415_v61 = vsel %vm1401_vm10, %v3555_v23, %v1127_v19 }
 0x123   : > { %v1332_v28 = vpop.permute.xlu0 %1331 }
 0x124   : > { %v1577_v40 = vsel %vm1434_vm11, %v1536_v39, %v1332_v28 }
 0x125   : > { %v1208_v53 = vpop.permute.xlu1 %1207 }
 0x126   : > { %v1448_v62 = vsel %vm1434_vm11, %v1415_v61, %v1208_v53 }
 0x127   : > { %2734 = vmatmul.mubr.msk.bf16.gmra.mrb[28].mxu1 %vm1401_vm10, %v3682_v34  ;;  %v1379_v16 = vpop.permute.xlu0 %1378 }
 0x128   : > { %2737 = vmatprep.mubr.msk.bf16.mxu1 %vm1401_vm10, %v3722_v54  ;;  %v1615_v46 = vsel %vm1467_vm12, %v1577_v40, %v1379_v16 }
 0x129   : > { %v1245_v48 = vpop.permute.xlu1 %1244  ;;  %1923 = vmatprep.mubr.bf16.mxu0 %v1615_v46 }
 0x12a   : > { %v1487_v60 = vsel %vm1467_vm12, %v1448_v62, %v1245_v48 }
 0x12b   : > { %1924 = vmatmul.mubr.bf16.gmra.mrb[24].mxu0 %v1487_v60  ;;  %v1297_v0 = vpop.permute.xlu0 %1296 }
 0x12c   : > { %v1539_v8 = vsel %vm1401_vm10, %v3637_v37, %v1297_v0 }
 0x12d   : > { %v1129_v23 = vpop.permute.xlu1 %1128 }
 0x12e   : > { %v1417_v54 = vsel %vm1401_vm10, %v3577_v41, %v1129_v23 }
 0x12f   : > { %2738 = vmatmul.mubr.msk.bf16.gmra.mrb[32].mxu1 %vm1401_vm10, %v3749_v1  ;;  %v1334_v34 = vpop.permute.xlu0 %1333 }
 0x130   : > { %2741 = vmatprep.mubr.msk.bf16.mxu1 %vm1401_vm10, %v3252_v52  ;;  %v1579_v50 = vsel %vm1434_vm11, %v1539_v8, %v1334_v34 }
 0x131   : > { %v1210_v49 = vpop.permute.xlu1 %1209 }
 0x132   : > { %v1450_v31 = vsel %vm1434_vm11, %v1417_v54, %v1210_v49 }
 0x133   : > { %v1381_v20 = vpop.permute.xlu0 %1380 }
 0x134   : > { %v1618_v57 = vsel %vm1467_vm12, %v1579_v50, %v1381_v20 }
 0x135   : > { %v1247_v51 = vpop.permute.xlu1 %1246  ;;  %1931 = vmatprep.mubr.bf16.mxu0 %v1618_v57 }
 0x136   : > { %v1490_v1 = vsel %vm1467_vm12, %v1450_v31, %v1247_v51 }
 0x137   : > { %1932 = vmatmul.mubr.bf16.gmra.mrb[28].mxu0 %v1490_v1  ;;  %2742 = vmatmul.mubr.msk.bf16.gmra.mrb[36].mxu1 %vm1401_vm10, %v3244_v45  ;;  %v1299_v52 = vpop.permute.xlu0 %1298 }
 0x138   : > { %2745 = vmatprep.mubr.msk.bf16.mxu1 %vm1401_vm10, %v3356_v32  ;;  %v1542_v2 = vsel %vm1401_vm10, %v3662_v15, %v1299_v52  ;;  %v1398_v32 = vrot.slane %v3507_v25, 1 }
 0x139   : > { %v1131_v37 = vpop.permute.xlu1 %1130 }
 0x13a   : > { %v1419_v42 = vsel %vm1401_vm10, %v3602_v30, %v1131_v37  ;;  %v1400_v17 = vsel %vm1146_vm6, %v1398_v32, %v1399_v59 }
 0x13b   : > { %v1336_v41 = vpop.permute.xlu0 %1335 }
 0x13c   : > { %v1581_v44 = vsel %vm1434_vm11, %v1542_v2, %v1336_v41 }
 0x13d   : > { %v1212_v38 = vpop.permute.xlu1 %1211 }
 0x13e   : > { %v1452_v45 = vsel %vm1434_vm11, %v1419_v42, %v1212_v38 }
 0x13f   : > { %2746 = vmatmul.mubr.msk.bf16.gmra.mrb[40].mxu1 %vm1401_vm10, %v3451_v9  ;;  %v1383_v21 = vpop.permute.xlu0 %1382 }
 0x140   : > { %2749 = vmatprep.mubr.msk.bf16.mxu1 %vm1401_vm10, %v3540_v3  ;;  %v1621_v15 = vsel %vm1467_vm12, %v1581_v44, %v1383_v21 }
 0x141   : > { %v1249_v6 = vpop.permute.xlu1 %1248  ;;  %1939 = vmatprep.mubr.bf16.mxu0 %v1621_v15 }
 0x142   : > { %v1493_v30 = vsel %vm1467_vm12, %v1452_v45, %v1249_v6 }
 0x143   : > { %1940 = vmatmul.mubr.bf16.gmra.mrb[32].mxu0 %v1493_v30  ;;  %v1301_v9 = vpop.permute.xlu0 %1300 }
 0x144   : > { %v1545_v3 = vsel %vm1401_vm10, %v3713_v43, %v1301_v9 }
 0x145   : > { %v1133_v55 = vpop.permute.xlu1 %1132 }
 0x146   : > { %v1421_v25 = vsel %vm1401_vm10, %v3629_v24, %v1133_v55 }
 0x147   : > { %2750 = vmatmul.mubr.msk.bf16.gmra.mrb[44].mxu1 %vm1401_vm10, %v1400_v17  ;;  %v1338_v56 = vpop.permute.xlu0 %1337 }
 0x148   : > { %v1583_v35 = vsel %vm1434_vm11, %v1545_v3, %v1338_v56 }
 0x149   : > { %v1214_v33 = vpop.permute.xlu1 %1213 }
 0x14a   : > { %v1454_v58 = vsel %vm1434_vm11, %v1421_v25, %v1214_v33 }
 0x14b   : > { %v1385_v13 = vpop.permute.xlu0 %1384 }
 0x14c   : > { %v1624_v26 = vsel %vm1467_vm12, %v1583_v35, %v1385_v13 }
 0x14d   : > { %v1251_v12 = vpop.permute.xlu1 %1250  ;;  %1947 = vmatprep.mubr.bf16.mxu0 %v1624_v26 }
 0x14e   : > { %v1496_v14 = vsel %vm1467_vm12, %v1454_v58, %v1251_v12 }
 0x14f   : > { %1948 = vmatmul.mubr.bf16.gmra.mrb[36].mxu0 %v1496_v14  ;;  %v1303_v10 = vpop.permute.xlu0 %1302 }
 0x150   : > { %v1548_v43 = vsel %vm1401_vm10, %v3741_v27, %v1303_v10 }
 0x151   : > { %v1135_v11 = vpop.permute.xlu1 %1134 }
 0x152   : > { %v1423_v24 = vsel %vm1401_vm10, %v3654_v4, %v1135_v11 }
 0x153   : > { %v1340_v18 = vpop.permute.xlu0 %1339 }
 0x154   : > { %v1585_v29 = vsel %vm1434_vm11, %v1548_v43, %v1340_v18 }
 0x155   : > { %v1216_v5 = vpop.permute.xlu1 %1215 }
 0x156   : > { %v1456_v63 = vsel %vm1434_vm11, %v1423_v24, %v1216_v5 }
 0x157   : > { %v1387_v7 = vpop.permute.xlu0 %1386 }
 0x158   : > { %v1627_v19 = vsel %vm1467_vm12, %v1585_v29, %v1387_v7 }
 0x159   : > { %v1253_v47 = vpop.permute.xlu1 %1252  ;;  %1955 = vmatprep.mubr.bf16.mxu0 %v1627_v19 }
 0x15a   : > { %v1499_v28 = vsel %vm1467_vm12, %v1456_v63, %v1253_v47  ;;  %v3921_v63 = vld [vmem:[%s4235_s2] ss:$0 sm:$0xff] }
 0x15b   : > { %1956 = vmatmul.mubr.bf16.gmra.mrb[40].mxu0 %v1499_v28  ;;  %v1305_v53 = vpop.permute.xlu0 %1304 }
 0x15c   : > { %v1551_v27 = vsel %vm1401_vm10, %v3294_v22, %v1305_v53 }
 0x15d   : > { %v1137_v39 = vpop.permute.xlu1 %1136 }
 0x15e   : > { %v1425_v4 = vsel %vm1401_vm10, %v3703_v36, %v1137_v39 }
 0x15f   : > { %v1342_v61 = vpop.permute.xlu0 %1341 }
 0x160   : > { %v1587_v62 = vsel %vm1434_vm11, %v1551_v27, %v1342_v61 }
 0x161   : > { %v1218_v40 = vpop.permute.xlu1 %1217 }
 0x162   : > { %v1458_v48 = vsel %vm1434_vm11, %v1425_v4, %v1218_v40 }
 0x163   : > { %v1389_v16 = vpop.permute.xlu0 %1388 }
 0x164   : > { %v1630_v60 = vsel %vm1467_vm12, %v1587_v62, %v1389_v16 }
 0x165   : > { %v1255_v46 = vpop.permute.xlu1 %1254  ;;  %1963 = vmatprep.mubr.bf16.mxu0 %v1630_v60 }
 0x166   : > { %v1502_v0 = vsel %vm1467_vm12, %v1458_v48, %v1255_v46 }
 0x167   : > { %1964 = vmatmul.mubr.bf16.gmra.mrb[44].mxu0 %v1502_v0 }
 0x195   : > { %v2603_v23 = vpop.f32.mrb[0].mxu0 }
 0x196   : > { %v2604_v34 = vpop.f32.mrb[1].mxu0 }
 0x197   : > { %v2605_v49 = vadd.f32 %v2604_v34, %v2603_v23  ;;  %v2606_v8 = vpop.f32.mrb[2].mxu0 }
 0x198   : > { %v2607_v22 = vpop.f32.mrb[3].mxu0 }
 0x199   : > { %v2608_v54 = vadd.f32 %v2607_v22, %v2606_v8  ;;  %v2675_v50 = vpop.f32.mrb[0].mxu1  ;;  %v1878_v28 = vadd.f32 %v2605_v49, %v3921_v63 }
 0x19a   : > { %v2676_v36 = vpop.f32.mrb[1].mxu1 }
 0x19b   : > { %v3901_v31 = vadd.f32 %v2676_v36, %v2675_v50  ;;  %v2678_v20 = vpop.f32.mrb[2].mxu1  ;;  %v1881_v4 = vadd.f32 %v2608_v54, %v3921_v63 }
 0x19c   : > { %v2679_v51 = vpop.f32.mrb[3].mxu1 }
 0x19d   : > { %v3903_v57 = vadd.f32 %v2679_v51, %v2678_v20 }
 0x19e   : > { %v2609_v1 = vpop.f32.mrb[4].mxu0 }
 0x19f   : > { %v2610_v52 = vpop.f32.mrb[5].mxu0 }
 0x1a0   : > { %v2611_v37 = vadd.f32 %v2610_v52, %v2609_v1  ;;  %v2612_v41 = vpop.f32.mrb[6].mxu0 }
 0x1a1   : > { %v2613_v38 = vpop.f32.mrb[7].mxu0 }
 0x1a2   : > { %v2614_v2 = vadd.f32 %v2613_v38, %v2612_v41  ;;  %v1886_v47 = vadd.f32 %v2611_v37, %v3921_v63 }
 0x1a4   : > { %v1889_v61 = vadd.f32 %v2614_v2, %v3921_v63 }
 0x1aa   : > { %v2681_v42 = vpop.f32.mrb[4].mxu1 }
 0x1ab   : > { %v2682_v44 = vpop.f32.mrb[5].mxu1 }
 0x1ac   : > { %v3905_v45 = vadd.f32 %v2682_v44, %v2681_v42  ;;  %v2684_v21 = vpop.f32.mrb[6].mxu1 }
 0x1ad   : > { %v2685_v6 = vpop.f32.mrb[7].mxu1 }
 0x1ae   : > { %v3907_v32 = vadd.f32 %v2685_v6, %v2684_v21 }
 0x1b6   : > { %v2615_v59 = vpop.f32.mrb[8].mxu0 }
 0x1b7   : > { %v2616_v15 = vpop.f32.mrb[9].mxu0 }
 0x1b8   : > { %v2617_v30 = vadd.f32 %v2616_v15, %v2615_v59  ;;  %v2618_v9 = vpop.f32.mrb[10].mxu0 }
 0x1b9   : > { %v2619_v55 = vpop.f32.mrb[11].mxu0 }
 0x1ba   : > { %v2620_v17 = vadd.f32 %v2619_v55, %v2618_v9  ;;  %v1894_v51 = vadd.f32 %v2617_v30, %v3921_v63 }
 0x1bc   : > { %v1897_v2 = vadd.f32 %v2620_v17, %v3921_v63 }
 0x1c2   : > { %v2687_v56 = vpop.f32.mrb[8].mxu1 }
 0x1c3   : > { %v2688_v33 = vpop.f32.mrb[9].mxu1 }
 0x1c4   : > { %v3909_v3 = vadd.f32 %v2688_v33, %v2687_v56  ;;  %v2690_v25 = vpop.f32.mrb[10].mxu1 }
 0x1c5   : > { %v2691_v35 = vpop.f32.mrb[11].mxu1 }
 0x1c6   : > { %v3911_v13 = vadd.f32 %v2691_v35, %v2690_v25 }
 0x1ce   : > { %v2621_v58 = vpop.f32.mrb[12].mxu0 }
 0x1cf   : > { %v2622_v12 = vpop.f32.mrb[13].mxu0 }
 0x1d0   : > { %v2623_v26 = vadd.f32 %v2622_v12, %v2621_v58  ;;  %v2624_v14 = vpop.f32.mrb[14].mxu0 }
 0x1d1   : > { %v2625_v10 = vpop.f32.mrb[15].mxu0 }
 0x1d2   : > { %v2626_v11 = vadd.f32 %v2625_v10, %v2624_v14  ;;  %v1902_v50 = vadd.f32 %v2623_v26, %v3921_v63 }
 0x1d4   : > { %v1905_v37 = vadd.f32 %v2626_v11, %v3921_v63 }
 0x1da   : > { %v2693_v18 = vpop.f32.mrb[12].mxu1 }
 0x1db   : > { %v2694_v5 = vpop.f32.mrb[13].mxu1 }
 0x1dc   : > { %v3913_v43 = vadd.f32 %v2694_v5, %v2693_v18  ;;  %v2696_v24 = vpop.f32.mrb[14].mxu1 }
 0x1dd   : > { %v2697_v29 = vpop.f32.mrb[15].mxu1 }
 0x1de   : > { %v3915_v7 = vadd.f32 %v2697_v29, %v2696_v24 }
 0x1e2   : > { %v2723_v19 = vpop.f32.mrb[16].mxu1 }
 0x1e3   : > { %v2047_v53 = vadd.f32 %v2723_v19, %v1886_v47  ;;  %v2038_v39 = vpop.f32.mrb[17].mxu1 }
 0x1e4   : > { %v2039_v40 = vadd.f32 %v2038_v39, %v1878_v28  ;;  %v2724_v27 = vpop.f32.mrb[18].mxu1 }
 0x1e5   : > { %v2167_v62 = vmax.f32 %v2047_v53, 0.0  ;;  %v2050_v16 = vadd.f32 %v2724_v27, %v1889_v61  ;;  %v2041_v48 = vpop.f32.mrb[19].mxu1  ;;  %2265 = vrot.lane.b32.xlu0 %v2047_v53, %s2942_s10 }
 0x1e6   : > { %v2165_v46 = vmax.f32 %v2039_v40, 0.0  ;;  %v2042_v60 = vadd.f32 %v2041_v48, %v1881_v4  ;;  %v2627_v0 = vpop.f32.mrb[16].mxu0 }
 0x1e7   : > { %2199 = vst.msk [vmem:[%s3930_s7 + $0x10] sm:$0xff] %vm1401_vm10, %v2167_v62  ;;  %v2168_v23 = vmax.f32 %v2050_v16, 0.0  ;;  %v2628_v34 = vpop.f32.mrb[17].mxu0  ;;  %2267 = vrot.lane.b32.xlu1 %v2050_v16, %s2942_s10 }
 0x1e8   : > { %2197 = vst.msk [vmem:[%s3930_s7] sm:$0xff] %vm1401_vm10, %v2165_v46  ;;  %v2166_v49 = vmax.f32 %v2042_v60, 0.0  ;;  %v2629_v8 = vadd.f32 %v2628_v34, %v2627_v0  ;;  %v2630_v22 = vpop.f32.mrb[18].mxu0 }
 0x1e9   : > { %2200 = vst.msk [vmem:[%s3930_s7 + $0x18] sm:$0xff] %vm1401_vm10, %v2168_v23  ;;  %v2631_v54 = vpop.f32.mrb[19].mxu0  ;;  %2261 = vrot.lane.b32.xlu0 %v2039_v40, %s2942_s10 }
 0x1ea   : > { %2198 = vst.msk [vmem:[%s3930_s7 + $0x8] sm:$0xff] %vm1401_vm10, %v2166_v49  ;;  %v2632_v36 = vadd.f32 %v2631_v54, %v2630_v22  ;;  %v2727_v20 = vpop.f32.mrb[20].mxu1  ;;  %v1910_v17 = vadd.f32 %v2629_v8, %v3921_v63 }
 0x1eb   : > { %v2063_v1 = vadd.f32 %v2727_v20, %v1902_v50  ;;  %v2054_v52 = vpop.f32.mrb[21].mxu1  ;;  %2263 = vrot.lane.b32.xlu1 %v2042_v60, %s2942_s10 }
 0x1ec   : > { %v2055_v41 = vadd.f32 %v2054_v52, %v1894_v51  ;;  %v2728_v38 = vpop.f32.mrb[22].mxu1  ;;  %v1913_v26 = vadd.f32 %v2632_v36, %v3921_v63 }
 0x1ed   : > { %v2171_v42 = vmax.f32 %v2063_v1, 0.0  ;;  %v2066_v44 = vadd.f32 %v2728_v38, %v1905_v37  ;;  %v2057_v21 = vpop.f32.mrb[23].mxu1  ;;  %2273 = vrot.lane.b32.xlu0 %v2063_v1, %s2942_s10 }
 0x1ee   : > { %v2169_v6 = vmax.f32 %v2055_v41, 0.0  ;;  %v2058_v59 = vadd.f32 %v2057_v21, %v1897_v2 }
 0x1ef   : > { %2203 = vst.msk [vmem:[%s3930_s7 + $0x30] sm:$0xff] %vm1401_vm10, %v2171_v42  ;;  %v2172_v15 = vmax.f32 %v2066_v44, 0.0  ;;  %2275 = vrot.lane.b32.xlu1 %v2066_v44, %s2942_s10 }
 0x1f0   : > { %2201 = vst.msk [vmem:[%s3930_s7 + $0x20] sm:$0xff] %vm1401_vm10, %v2169_v6  ;;  %v2170_v30 = vmax.f32 %v2058_v59, 0.0 }
 0x1f1   : > { %2204 = vst.msk [vmem:[%s3930_s7 + $0x38] sm:$0xff] %vm1401_vm10, %v2172_v15  ;;  %2269 = vrot.lane.b32.xlu0 %v2055_v41, %s2942_s10 }
 0x1f2   : > { %2202 = vst.msk [vmem:[%s3930_s7 + $0x28] sm:$0xff] %vm1401_vm10, %v2170_v30  ;;  %v2633_v9 = vpop.f32.mrb[20].mxu0  ;;  %v2731_v55 = vpop.f32.mrb[24].mxu1 }
 0x1f3   : > { %v2634_v56 = vpop.f32.mrb[21].mxu0  ;;  %v2070_v33 = vpop.f32.mrb[25].mxu1  ;;  %2271 = vrot.lane.b32.xlu1 %v2058_v59, %s2942_s10 }
 0x1f4   : > { %v2635_v25 = vadd.f32 %v2634_v56, %v2633_v9  ;;  %v2071_v35 = vadd.f32 %v2070_v33, %v1910_v17  ;;  %v2636_v58 = vpop.f32.mrb[22].mxu0  ;;  %v2732_v12 = vpop.f32.mrb[26].mxu1  ;;  %v1982_v9 = vadd.f32 %v3905_v45, %v3921_v63  ;;  %v1974_v33 = vadd.f32 %v3901_v31, %v3921_v63 }
 0x1f5   : > { %v2637_v14 = vpop.f32.mrb[23].mxu0  ;;  %v2073_v10 = vpop.f32.mrb[27].mxu1  ;;  %v1977_v31 = vadd.f32 %v3903_v57, %v3921_v63 }
 0x1f6   : > { %v1918_v11 = vadd.f32 %v2635_v25, %v3921_v63  ;;  %v2173_v18 = vmax.f32 %v2071_v35, 0.0  ;;  %v2638_v5 = vadd.f32 %v2637_v14, %v2636_v58  ;;  %v2074_v24 = vadd.f32 %v2073_v10, %v1913_v26 }
 0x1f7   : > { %v1985_v58 = vadd.f32 %v3907_v32, %v3921_v63 }
 0x1f8   : > { %v2079_v29 = vadd.f32 %v2731_v55, %v1918_v11  ;;  %2205 = vst.msk [vmem:[%s3930_s7 + $0x40] sm:$0xff] %vm1401_vm10, %v2173_v18  ;;  %v1921_v47 = vadd.f32 %v2638_v5, %v3921_v63  ;;  %v2174_v19 = vmax.f32 %v2074_v24, 0.0 }
 0x1fa   : > { %v2175_v28 = vmax.f32 %v2079_v29, 0.0  ;;  %v2082_v53 = vadd.f32 %v2732_v12, %v1921_v47  ;;  %2206 = vst.msk [vmem:[%s3930_s7 + $0x48] sm:$0xff] %vm1401_vm10, %v2174_v19  ;;  %2281 = vrot.lane.b32.xlu0 %v2079_v29, %s2942_s10  ;;  %v2735_v39 = vpop.f32.mrb[28].mxu1 }
 0x1fb   : > { %v2086_v61 = vpop.f32.mrb[29].mxu1 }
 0x1fc   : > { %2207 = vst.msk [vmem:[%s3930_s7 + $0x50] sm:$0xff] %vm1401_vm10, %v2175_v28  ;;  %v2176_v40 = vmax.f32 %v2082_v53, 0.0  ;;  %2283 = vrot.lane.b32.xlu1 %v2082_v53, %s2942_s10  ;;  %v2736_v27 = vpop.f32.mrb[30].mxu1  ;;  %v1998_v53 = vadd.f32 %v3913_v43, %v3921_v63 }
 0x1fd   : > { %v2089_v4 = vpop.f32.mrb[31].mxu1 }
 0x1fe   : > { %2208 = vst.msk [vmem:[%s3930_s7 + $0x58] sm:$0xff] %vm1401_vm10, %v2176_v40  ;;  %v2639_v62 = vpop.f32.mrb[24].mxu0  ;;  %2277 = vrot.lane.b32.xlu0 %v2071_v35, %s2942_s10 }
 0x1ff   : > { %v2640_v16 = vpop.f32.mrb[25].mxu0 }
 0x200   : > { %v2641_v48 = vadd.f32 %v2640_v16, %v2639_v62  ;;  %v2642_v46 = vpop.f32.mrb[26].mxu0  ;;  %2279 = vrot.lane.b32.xlu1 %v2074_v24, %s2942_s10  ;;  %v2001_v16 = vadd.f32 %v3915_v7, %v3921_v63 }
 0x201   : > { %v2643_v60 = vpop.f32.mrb[27].mxu0 }
 0x202   : > { %v2644_v0 = vadd.f32 %v2643_v60, %v2642_v46  ;;  %v1926_v23 = vadd.f32 %v2641_v48, %v3921_v63  ;;  %v3976_v34 = vpop.f32.mrb[32].mxu1 }
 0x203   : > { %v3978_v49 = vpop.f32.mrb[33].mxu1 }
 0x204   : > { %v2087_v8 = vadd.f32 %v2086_v61, %v1926_v23  ;;  %v1929_v22 = vadd.f32 %v2644_v0, %v3921_v63  ;;  %v3981_v54 = vpop.f32.mrb[34].mxu1  ;;  %v1993_v0 = vadd.f32 %v3911_v13, %v3921_v63 }
 0x205   : > { %v3983_v50 = vpop.f32.mrb[35].mxu1 }
 0x206   : > { %v2177_v36 = vmax.f32 %v2087_v8, 0.0  ;;  %v2090_v20 = vadd.f32 %v2089_v4, %v1929_v22  ;;  %2285 = vrot.lane.b32.xlu0 %v2087_v8, %s2942_s10 }
 0x208   : > { %2209 = vst.msk [vmem:[%s3930_s7 + $0x60] sm:$0xff] %vm1401_vm10, %v2177_v36  ;;  %v2178_v51 = vmax.f32 %v2090_v20, 0.0  ;;  %2287 = vrot.lane.b32.xlu1 %v2090_v20, %s2942_s10 }
 0x20a   : > { %2210 = vst.msk [vmem:[%s3930_s7 + $0x68] sm:$0xff] %vm1401_vm10, %v2178_v51  ;;  %v2645_v1 = vpop.f32.mrb[28].mxu0  ;;  %v3991_v52 = vpop.f32.mrb[36].mxu1 }
 0x20b   : > { %v2646_v37 = vpop.f32.mrb[29].mxu0  ;;  %v3993_v41 = vpop.f32.mrb[37].mxu1 }
 0x20c   : > { %v2647_v38 = vadd.f32 %v2646_v37, %v2645_v1  ;;  %v2648_v2 = vpop.f32.mrb[30].mxu0  ;;  %v3995_v42 = vpop.f32.mrb[38].mxu1 }
 0x20d   : > { %v2649_v44 = vpop.f32.mrb[31].mxu0  ;;  %v3997_v21 = vpop.f32.mrb[39].mxu1 }
 0x20e   : > { %v1934_v6 = vadd.f32 %v2647_v38, %v3921_v63  ;;  %v2650_v59 = vadd.f32 %v2649_v44, %v2648_v2 }
 0x210   : > { %v2095_v15 = vadd.f32 %v2735_v39, %v1934_v6  ;;  %v1937_v30 = vadd.f32 %v2650_v59, %v3921_v63 }
 0x212   : > { %v2179_v55 = vmax.f32 %v2095_v15, 0.0  ;;  %v2098_v17 = vadd.f32 %v2736_v27, %v1937_v30  ;;  %v2747_v56 = vpop.f32.mrb[40].mxu1  ;;  %2289 = vrot.lane.b32.xlu0 %v2095_v15, %s2942_s10  ;;  %v1990_v27 = vadd.f32 %v3909_v3, %v3921_v63 }
 0x213   : > { %v4006_v25 = vadd.f32 %v2747_v56, %v1982_v9  ;;  %v2134_v35 = vpop.f32.mrb[41].mxu1 }
 0x214   : > { %2211 = vst.msk [vmem:[%s3930_s7 + $0x70] sm:$0xff] %vm1401_vm10, %v2179_v55  ;;  %v2180_v45 = vmax.f32 %v2098_v17, 0.0  ;;  %v4012_v12 = vadd.f32 %v2134_v35, %v1974_v33  ;;  %v2748_v26 = vpop.f32.mrb[42].mxu1  ;;  %2291 = vrot.lane.b32.xlu1 %v2098_v17, %s2942_s10 }
 0x215   : > { %v2191_v14 = vmax.f32 %v4006_v25, 0.0  ;;  %v4018_v10 = vadd.f32 %v2748_v26, %v1985_v58  ;;  %v2137_v11 = vpop.f32.mrb[43].mxu1 }
 0x216   : > { %2212 = vst.msk [vmem:[%s3930_s7 + $0x78] sm:$0xff] %vm1401_vm10, %v2180_v45  ;;  %v2189_v32 = vmax.f32 %v4012_v12, 0.0  ;;  %v4023_v18 = vadd.f32 %v2137_v11, %v1977_v31  ;;  %v2651_v5 = vpop.f32.mrb[32].mxu0 }
 0x217   : > { %2223 = vst.msk [vmem:[%s3930_s7 + $0xd0] sm:$0xff] %vm1401_vm10, %v2191_v14  ;;  %v2192_v24 = vmax.f32 %v4018_v10, 0.0  ;;  %v2652_v29 = vpop.f32.mrb[33].mxu0 }
 0x218   : > { %2221 = vst.msk [vmem:[%s3930_s7 + $0xc0] sm:$0xff] %vm1401_vm10, %v2189_v32  ;;  %v2190_v57 = vmax.f32 %v4023_v18, 0.0  ;;  %v2653_v47 = vadd.f32 %v2652_v29, %v2651_v5  ;;  %v2654_v19 = vpop.f32.mrb[34].mxu0 }
 0x219   : > { %2224 = vst.msk [vmem:[%s3930_s7 + $0xd8] sm:$0xff] %vm1401_vm10, %v2192_v24  ;;  %v2655_v28 = vpop.f32.mrb[35].mxu0 }
 0x21a   : > { %2222 = vst.msk [vmem:[%s3930_s7 + $0xc8] sm:$0xff] %vm1401_vm10, %v2190_v57  ;;  %v1942_v39 = vadd.f32 %v2653_v47, %v3921_v63  ;;  %v2656_v61 = vadd.f32 %v2655_v28, %v2654_v19  ;;  %v2751_v40 = vpop.f32.mrb[44].mxu1 }
 0x21b   : > { %v4040_v4 = vadd.f32 %v2751_v40, %v1998_v53  ;;  %v2150_v62 = vpop.f32.mrb[45].mxu1 }
 0x21c   : > { %v2103_v48 = vadd.f32 %v3978_v49, %v1942_v39  ;;  %v1945_v43 = vadd.f32 %v2656_v61, %v3921_v63  ;;  %v2151_v46 = vadd.f32 %v2150_v62, %v1990_v27  ;;  %v2752_v60 = vpop.f32.mrb[46].mxu1 }
 0x21d   : > { %v2195_v3 = vmax.f32 %v4040_v4, 0.0  ;;  %v4049_v23 = vadd.f32 %v2752_v60, %v2001_v16  ;;  %v2153_v8 = vpop.f32.mrb[47].mxu1 }
 0x21e   : > { %v2181_v7 = vmax.f32 %v2103_v48, 0.0  ;;  %v2106_v22 = vadd.f32 %v3983_v50, %v1945_v43  ;;  %v2193_v49 = vmax.f32 %v2151_v46, 0.0  ;;  %v2154_v36 = vadd.f32 %v2153_v8, %v1993_v0  ;;  %2293 = vrot.lane.b32.xlu0 %v2103_v48, %s2942_s10 }
 0x21f   : > { %2227 = vst.msk [vmem:[%s3930_s7 + $0xf0] sm:$0xff] %vm1401_vm10, %v2195_v3  ;;  %v2196_v20 = vmax.f32 %v4049_v23, 0.0 }
 0x220   : > { %2213 = vst.msk [vmem:[%s3930_s7 + $0x80] sm:$0xff] %vm1401_vm10, %v2181_v7  ;;  %v2182_v13 = vmax.f32 %v2106_v22, 0.0  ;;  %2225 = vst.msk [vmem:[%s3930_s7 + $0xe0] sm:$0xff] %vm1401_vm10, %v2193_v49  ;;  %v2194_v51 = vmax.f32 %v2154_v36, 0.0  ;;  %2295 = vrot.lane.b32.xlu1 %v2106_v22, %s2942_s10 }
 0x221   : > { %2228 = vst.msk [vmem:[%s3930_s7 + $0xf8] sm:$0xff] %vm1401_vm10, %v2196_v20 }
 0x222   : > { %2214 = vst.msk [vmem:[%s3930_s7 + $0x88] sm:$0xff] %vm1401_vm10, %v2182_v13  ;;  %2226 = vst.msk [vmem:[%s3930_s7 + $0xe8] sm:$0xff] %vm1401_vm10, %v2194_v51  ;;  %v2657_v50 = vpop.f32.mrb[36].mxu0 }
 0x223   : > { %v2658_v1 = vpop.f32.mrb[37].mxu0 }
 0x224   : > { %v2659_v37 = vadd.f32 %v2658_v1, %v2657_v50  ;;  %v2660_v38 = vpop.f32.mrb[38].mxu0 }
 0x225   : > { %v2661_v2 = vpop.f32.mrb[39].mxu0 }
 0x226   : > { %v1950_v44 = vadd.f32 %v2659_v37, %v3921_v63  ;;  %v2662_v6 = vadd.f32 %v2661_v2, %v2660_v38 }
 0x228   : > { %v2111_v59 = vadd.f32 %v3976_v34, %v1950_v44  ;;  %v1953_v15 = vadd.f32 %v2662_v6, %v3921_v63 }
 0x22a   : > { %v2183_v30 = vmax.f32 %v2111_v59, 0.0  ;;  %v2114_v9 = vadd.f32 %v3981_v54, %v1953_v15  ;;  %2297 = vrot.lane.b32.xlu0 %v2111_v59, %s2942_s10 }
 0x22c   : > { %2215 = vst.msk [vmem:[%s3930_s7 + $0x90] sm:$0xff] %vm1401_vm10, %v2183_v30  ;;  %v2184_v55 = vmax.f32 %v2114_v9, 0.0  ;;  %2299 = vrot.lane.b32.xlu1 %v2114_v9, %s2942_s10 }
 0x22e   : > { %2216 = vst.msk [vmem:[%s3930_s7 + $0x98] sm:$0xff] %vm1401_vm10, %v2184_v55  ;;  %v2663_v17 = vpop.f32.mrb[40].mxu0  ;;  %2313 = vrot.lane.b32.xlu0 %v4006_v25, %s2942_s10 }
 0x22f   : > { %v2664_v34 = vpop.f32.mrb[41].mxu0 }
 0x230   : > { %v2665_v56 = vadd.f32 %v2664_v34, %v2663_v17  ;;  %v2666_v33 = vpop.f32.mrb[42].mxu0  ;;  %2315 = vrot.lane.b32.xlu1 %v4018_v10, %s2942_s10 }
 0x231   : > { %v2667_v54 = vpop.f32.mrb[43].mxu0 }
 0x232   : > { %v1958_v35 = vadd.f32 %v2665_v56, %v3921_v63  ;;  %v2668_v58 = vadd.f32 %v2667_v54, %v2666_v33  ;;  %2309 = vrot.lane.b32.xlu0 %v4012_v12, %s2942_s10 }
 0x234   : > { %v2119_v45 = vadd.f32 %v3993_v41, %v1958_v35  ;;  %v1961_v26 = vadd.f32 %v2668_v58, %v3921_v63  ;;  %2311 = vrot.lane.b32.xlu1 %v4023_v18, %s2942_s10 }
 0x236   : > { %v2185_v25 = vmax.f32 %v2119_v45, 0.0  ;;  %v2122_v31 = vadd.f32 %v3997_v21, %v1961_v26  ;;  %2301 = vrot.lane.b32.xlu0 %v2119_v45, %s2942_s10 }
 0x238   : > { %2217 = vst.msk [vmem:[%s3930_s7 + $0xa0] sm:$0xff] %vm1401_vm10, %v2185_v25  ;;  %v2186_v14 = vmax.f32 %v2122_v31, 0.0  ;;  %2303 = vrot.lane.b32.xlu1 %v2122_v31, %s2942_s10 }
 0x23a   : > { %2218 = vst.msk [vmem:[%s3930_s7 + $0xa8] sm:$0xff] %vm1401_vm10, %v2186_v14  ;;  %v2669_v41 = vpop.f32.mrb[44].mxu0  ;;  %2317 = vrot.lane.b32.xlu0 %v2151_v46, %s2942_s10 }
 0x23b   : > { %v2670_v12 = vpop.f32.mrb[45].mxu0 }
 0x23c   : > { %v2671_v10 = vadd.f32 %v2670_v12, %v2669_v41  ;;  %v2672_v11 = vpop.f32.mrb[46].mxu0  ;;  %2319 = vrot.lane.b32.xlu1 %v2154_v36, %s2942_s10 }
 0x23d   : > { %v2673_v21 = vpop.f32.mrb[47].mxu0 }
 0x23e   : > { %v1966_v32 = vadd.f32 %v2671_v10, %v3921_v63  ;;  %v2674_v18 = vadd.f32 %v2673_v21, %v2672_v11 }
 0x240   : > { %v2127_v5 = vadd.f32 %v3991_v52, %v1966_v32  ;;  %v1969_v24 = vadd.f32 %v2674_v18, %v3921_v63 }
 0x242   : > { %v2187_v29 = vmax.f32 %v2127_v5, 0.0  ;;  %v2130_v57 = vadd.f32 %v3995_v42, %v1969_v24  ;;  %2305 = vrot.lane.b32.xlu0 %v2127_v5, %s2942_s10 }
 0x244   : > { %2219 = vst.msk [vmem:[%s3930_s7 + $0xb0] sm:$0xff] %vm1401_vm10, %v2187_v29  ;;  %v2188_v63 = vmax.f32 %v2130_v57, 0.0  ;;  %2307 = vrot.lane.b32.xlu1 %v2130_v57, %s2942_s10 }
 0x246   : > { %2220 = vst.msk [vmem:[%s3930_s7 + $0xb8] sm:$0xff] %vm1401_vm10, %v2188_v63  ;;  %2321 = vrot.lane.b32.xlu0 %v4040_v4, %s2942_s10 }
 0x247   : > { %2888 = shalt.err (!%p2885_p3)
}
 0x248   : > { %s2889_s28 = scalar_lea.hbm %s4107_s14, 4096  ;;  %s2893_s29 = scalar_lea.hbm %s4236_s3, 8192 }
 0x249   : > { %p2890_p4 = scmp.ne.s32.totalorder %s4107_s14, %s2889_s28  ;;  %p2894_p9 = scmp.lt.u32.totalorder %s4107_s14, %s4236_s3 }
 0x24a   : > { %p2895_p10 = scmp.lt.u32.totalorder %s2893_s29, %s2889_s28  ;;  %p2897_p12 = scmp.lt.u32.totalorder %s2889_s28, %s4107_s14 }
 0x24b   : > { %p2891_p7 = pnand %p2890_p4, %p3009_p5 }
 0x24c   : > { %p2896_p11 = por %p2895_p10, %p2894_p9 }
 0x24d   : > { %p2892_p8 = pneg %p2891_p7 }
 0x24e   : > { %p2898_p13 = por %p2897_p12, %p2896_p11 }
 0x250   : > { %p2899_p0 = pnand %p2898_p13, %p2892_p8 }
 0x252   : > { %2902 = shalt.err (!%p2899_p0)
}
 0x253   : > { %s2944_s8 = smov 128   ;;  %s2945_s12 = smov 8   ;;  %2323 = vrot.lane.b32.xlu1 %v4049_v23, %s2942_s10  ;;  %vm2357_vm13 = vcmask 97280  }
 0x254   : > { %2769 = dma.vmem_to_hbm [thread:$0]  (%p3009_p5), %s4109_s9, 4096, %s4107_s14, %s4120_s19, %s2944_s8, %s2944_s8, %s2945_s12  }
 0x255   : > { %s2585_s13 = sshll.u32 %s3075_s27, 8 }
 0x256   : > { %s4150_s22 = scalar_lea.vmem %s4237_s4, %s2585_s13 }
 0x257   : > { %v2266_v52 = vpop.permute.xlu0 %2265 }
 0x258   : > { %2360 = vst.msk [vmem:[%s4150_s22 + $0x10] sm:$0xff] %vm2357_vm13, %v2266_v52 }
 0x259   : > { %v2268_v42 = vpop.permute.xlu1 %2267 }
 0x25a   : > { %2361 = vst.msk [vmem:[%s4150_s22 + $0x18] sm:$0xff] %vm2357_vm13, %v2268_v42 }
 0x25b   : > { %v2262_v47 = vpop.permute.xlu0 %2261 }
 0x25c   : > { %2358 = vst.msk [vmem:[%s4150_s22] sm:$0xff] %vm2357_vm13, %v2262_v47 }
 0x25d   : > { %v2264_v19 = vpop.permute.xlu1 %2263 }
 0x25e   : > { %2359 = vst.msk [vmem:[%s4150_s22 + $0x8] sm:$0xff] %vm2357_vm13, %v2264_v19 }
 0x25f   : > { %v2274_v28 = vpop.permute.xlu0 %2273 }
 0x260   : > { %2364 = vst.msk [vmem:[%s4150_s22 + $0x30] sm:$0xff] %vm2357_vm13, %v2274_v28 }
 0x261   : > { %v2276_v53 = vpop.permute.xlu1 %2275 }
 0x262   : > { %2365 = vst.msk [vmem:[%s4150_s22 + $0x38] sm:$0xff] %vm2357_vm13, %v2276_v53 }
 0x263   : > { %v2270_v39 = vpop.permute.xlu0 %2269 }
 0x264   : > { %2362 = vst.msk [vmem:[%s4150_s22 + $0x20] sm:$0xff] %vm2357_vm13, %v2270_v39 }
 0x265   : > { %v2272_v61 = vpop.permute.xlu1 %2271 }
 0x266   : > { %2363 = vst.msk [vmem:[%s4150_s22 + $0x28] sm:$0xff] %vm2357_vm13, %v2272_v61 }
 0x26c   : > { %v2282_v40 = vpop.permute.xlu0 %2281 }
 0x26d   : > { %2368 = vst.msk [vmem:[%s4150_s22 + $0x50] sm:$0xff] %vm2357_vm13, %v2282_v40 }
 0x26e   : > { %v2284_v27 = vpop.permute.xlu1 %2283 }
 0x26f   : > { %2369 = vst.msk [vmem:[%s4150_s22 + $0x58] sm:$0xff] %vm2357_vm13, %v2284_v27 }
 0x270   : > { %v2278_v4 = vpop.permute.xlu0 %2277 }
 0x271   : > { %2366 = vst.msk [vmem:[%s4150_s22 + $0x40] sm:$0xff] %vm2357_vm13, %v2278_v4 }
 0x272   : > { %v2280_v62 = vpop.permute.xlu1 %2279 }
 0x273   : > { %2367 = vst.msk [vmem:[%s4150_s22 + $0x48] sm:$0xff] %vm2357_vm13, %v2280_v62 }
 0x278   : > { %v2286_v16 = vpop.permute.xlu0 %2285 }
 0x279   : > { %2370 = vst.msk [vmem:[%s4150_s22 + $0x60] sm:$0xff] %vm2357_vm13, %v2286_v16 }
 0x27a   : > { %v2288_v48 = vpop.permute.xlu1 %2287 }
 0x27b   : > { %2371 = vst.msk [vmem:[%s4150_s22 + $0x68] sm:$0xff] %vm2357_vm13, %v2288_v48 }
 0x284   : > { %v2290_v43 = vpop.permute.xlu0 %2289 }
 0x285   : > { %2372 = vst.msk [vmem:[%s4150_s22 + $0x70] sm:$0xff] %vm2357_vm13, %v2290_v43 }
 0x286   : > { %v2292_v46 = vpop.permute.xlu1 %2291 }
 0x287   : > { %2373 = vst.msk [vmem:[%s4150_s22 + $0x78] sm:$0xff] %vm2357_vm13, %v2292_v46 }
 0x290   : > { %v2294_v60 = vpop.permute.xlu0 %2293 }
 0x291   : > { %2374 = vst.msk [vmem:[%s4150_s22 + $0x80] sm:$0xff] %vm2357_vm13, %v2294_v60 }
 0x292   : > { %v2296_v0 = vpop.permute.xlu1 %2295 }
 0x293   : > { %2375 = vst.msk [vmem:[%s4150_s22 + $0x88] sm:$0xff] %vm2357_vm13, %v2296_v0 }
 0x29c   : > { %v2298_v3 = vpop.permute.xlu0 %2297 }
 0x29d   : > { %2376 = vst.msk [vmem:[%s4150_s22 + $0x90] sm:$0xff] %vm2357_vm13, %v2298_v3 }
 0x29e   : > { %v2300_v23 = vpop.permute.xlu1 %2299 }
 0x29f   : > { %2377 = vst.msk [vmem:[%s4150_s22 + $0x98] sm:$0xff] %vm2357_vm13, %v2300_v23 }
 0x2a0   : > { %v2314_v8 = vpop.permute.xlu0 %2313 }
 0x2a1   : > { %2384 = vst.msk [vmem:[%s4150_s22 + $0xd0] sm:$0xff] %vm2357_vm13, %v2314_v8 }
 0x2a2   : > { %v2316_v7 = vpop.permute.xlu1 %2315 }
 0x2a3   : > { %2385 = vst.msk [vmem:[%s4150_s22 + $0xd8] sm:$0xff] %vm2357_vm13, %v2316_v7 }
 0x2a4   : > { %v2310_v22 = vpop.permute.xlu0 %2309 }
 0x2a5   : > { %2382 = vst.msk [vmem:[%s4150_s22 + $0xc0] sm:$0xff] %vm2357_vm13, %v2310_v22 }
 0x2a6   : > { %v2312_v49 = vpop.permute.xlu1 %2311 }
 0x2a7   : > { %2383 = vst.msk [vmem:[%s4150_s22 + $0xc8] sm:$0xff] %vm2357_vm13, %v2312_v49 }
 0x2a8   : > { %v2302_v36 = vpop.permute.xlu0 %2301 }
 0x2a9   : > { %2378 = vst.msk [vmem:[%s4150_s22 + $0xa0] sm:$0xff] %vm2357_vm13, %v2302_v36 }
 0x2aa   : > { %v2304_v20 = vpop.permute.xlu1 %2303 }
 0x2ab   : > { %2379 = vst.msk [vmem:[%s4150_s22 + $0xa8] sm:$0xff] %vm2357_vm13, %v2304_v20 }
 0x2ac   : > { %v2318_v13 = vpop.permute.xlu0 %2317 }
 0x2ad   : > { %2386 = vst.msk [vmem:[%s4150_s22 + $0xe0] sm:$0xff] %vm2357_vm13, %v2318_v13 }
 0x2ae   : > { %v2320_v51 = vpop.permute.xlu1 %2319 }
 0x2af   : > { %2387 = vst.msk [vmem:[%s4150_s22 + $0xe8] sm:$0xff] %vm2357_vm13, %v2320_v51 }
 0x2b4   : > { %v2306_v50 = vpop.permute.xlu0 %2305 }
 0x2b5   : > { %2380 = vst.msk [vmem:[%s4150_s22 + $0xb0] sm:$0xff] %vm2357_vm13, %v2306_v50 }
 0x2b6   : > { %v2308_v1 = vpop.permute.xlu1 %2307 }
 0x2b7   : > { %2381 = vst.msk [vmem:[%s4150_s22 + $0xb8] sm:$0xff] %vm2357_vm13, %v2308_v1 }
 0x2b8   : > { %v2322_v37 = vpop.permute.xlu0 %2321 }
 0x2b9   : > { %2388 = vst.msk [vmem:[%s4150_s22 + $0xf0] sm:$0xff] %vm2357_vm13, %v2322_v37 }
 0x2c5   : > { %v2324_v38 = vpop.permute.xlu1 %2323 }
 0x2c6   : > { %2389 = vst.msk [vmem:[%s4150_s22 + $0xf8] sm:$0xff] %vm2357_vm13, %v2324_v38 }
 0x2c7 PF: > { %p2775_p5 = scmp.ge.s32.totalorder %s2937_s18, 2  ;;  %s2427_s25 = sand.u32 1, %s2925_s15  }
 0x2c8   : > { %s2428_s27 = scalar_lea.sflag [#allocation4], %s2427_s25 }
 0x2c9   : > { %p2772_p1 = pnand %p2775_p5, %p3013_p6 }
 0x2cb   : > { %2920 = dma.done.wait (!%p2772_p1), %s2428_s27, 4096  }
 0x2cc   : > { %2922 = vsyncadd (!%p2772_p1), %s2428_s27, 4294963200  ;;  %p15_p2 = scmp.ge.s32.totalorder %s2996_s21, 4   ;;  %s4246_s15 = smov %s2929_s16 }
 0x2cd   : > { %s4247_s16 = smov %s2933_s17  ;;  %s4248_s17 = smov %s3007_s24 }
 0x2ce   : > { %s4249_s18 = smov %s2996_s21  ;;  %17 = sbr.rel (!%p15_p2) target bundleno = 3 (0x3), region = 80 }
 0x2d5   :  { %2441 = vsyncpa [#allocation4], 1 }
 0x2d6   :  { %2443 = vsyncpa [#allocation4 + $0x1], 1 }

// kernel: rrn_forward.5
= control target key start
LH: loop header
LB: loop body
LE: loop exit
PB: predicated region body
PF: predicated region fallthrough
CT: control target
= control target key end

     0   :  { %s5330_s18 = smov 0   ;;  %s7480_s0 = inlined_call_operand.vmem [shape: bf16[2,16,16,32], index: 0, kind: input, shape index: {}]   ;;  %s7481_s1 = inlined_call_operand.vmem [shape: bf16[288,32], index: 1, kind: input, shape index: {}]   ;;  %s7482_s2 = inlined_call_operand.vmem [shape: f32[1,32], index: 2, kind: input, shape index: {}]   ;;  %s7483_s3 = inlined_call_operand.vmem [shape: bf16[288,32], index: 3, kind: input, shape index: {}]   ;;  %s7484_s4 = inlined_call_operand.vmem [shape: f32[1,32], index: 4, kind: input, shape index: {}]   ;;  %s7485_s5 = inlined_call_operand.vmem [shape: bf16[2,16,16,32], index: 5, kind: output, shape index: {}]  }
   0x1 LB: > { %s4496_s19 = sadd.s32 4294967295, %s5294_s18   ;;  %p4500_p0 = scmp.ge.s32.totalorder %s5294_s18, 1  ;;  %s5294_s18 = sphi %s5330_s18, %s15_s18  }
   0x2   : > { %p187_p1 = scmp.lt.s32.totalorder %s5294_s18, 3 }
   0x4   : > { %p188_p2 = pnand %p4500_p0, %p187_p1 }
   0x5   : > { %vm258_vm0 = vcmask (!%p188_p2), 257024   ;;  %vm261_vm1 = vcmask (!%p188_p2), 253952   ;;  %v5296_v0 = vmov (!%p188_p2), 0   ;;  %p215_p3 = scmp.lt.s32.totalorder (!%p188_p2), %s4496_s19, 1  ;;  %vm314_vm2 = vsmask.f32 (!%p188_p2), 256 }
   0x6   : > { %191 = sbr.rel (%p188_p2) target bundleno = 990 (0x3de), region = 40  ;;  %259 = vst.msk [vmem:[#allocation2] sm:$0xf] (!%p188_p2), %vm258_vm0, %v5296_v0  ;;  %260 = vst.msk [vmem:[#allocation2 + $0x4] sm:$0xf] (!%p188_p2), %vm258_vm0, %v5296_v0  ;;  %v5149_v1 = vld [vmem:[%s7481_s1 + $0x40] sm:$0xff] (!%p188_p2)  }
   0x7   : > { %262 = vst.msk [vmem:[#allocation2 + $0x8] sm:$0x1] (!%p188_p2), %vm261_vm1, %v5296_v0  ;;  %265 = vst.msk [vmem:[#allocation2 + $0x14] sm:$0x1] (!%p188_p2), %vm261_vm1, %v5296_v0  ;;  %vm315_vm3 = vsmask.f32 (!%p188_p2), 4368  ;;  %4779 = vmatprep.subr.bf16.mxu0 (!%p188_p2), %v5149_v1 }
   0x8   : > { %263 = vst.msk [vmem:[#allocation2 + $0xc] sm:$0xf] (!%p188_p2), %vm258_vm0, %v5296_v0  ;;  %264 = vst.msk [vmem:[#allocation2 + $0x10] sm:$0xf] (!%p188_p2), %vm258_vm0, %v5296_v0  ;;  %vm639_vm4 = vsmask.f32 (!%p188_p2), 7938 }
   0x9   : > { %266 = vst.msk [vmem:[#allocation2 + $0x18] sm:$0xf] (!%p188_p2), %vm258_vm0, %v5296_v0  ;;  %267 = vst.msk [vmem:[#allocation2 + $0x1c] sm:$0xf] (!%p188_p2), %vm258_vm0, %v5296_v0  ;;  %vm937_vm5 = vsmask.f32 (!%p188_p2), 7424 }
   0xa   : > { %268 = vst.msk [vmem:[#allocation2 + $0x20] sm:$0x1] (!%p188_p2), %vm261_vm1, %v5296_v0  ;;  %271 = vst.msk [vmem:[#allocation2 + $0x2c] sm:$0x1] (!%p188_p2), %vm261_vm1, %v5296_v0  ;;  %vm1162_vm6 = vcmask (!%p188_p2), 1046528   ;;  %v5150_v28 = vld [vmem:[%s7481_s1] sm:$0xff] (!%p188_p2)  }
   0xb   : > { %269 = vst.msk [vmem:[#allocation2 + $0x24] sm:$0xf] (!%p188_p2), %vm258_vm0, %v5296_v0  ;;  %270 = vst.msk [vmem:[#allocation2 + $0x28] sm:$0xf] (!%p188_p2), %vm258_vm0, %v5296_v0  ;;  %s5297_s28 = smov (!%p188_p2), 64   ;;  %4780 = vmatpush3.bf16.msra.mxu0 (!%p188_p2), %v5150_v28  ;;  %v5152_v39 = vld [vmem:[%s7481_s1 + $0x48] sm:$0xff] (!%p188_p2)  }
   0xc   : > { %272 = vst.msk [vmem:[#allocation2 + $0x30] sm:$0xf] (!%p188_p2), %vm258_vm0, %v5296_v0  ;;  %273 = vst.msk [vmem:[#allocation2 + $0x34] sm:$0xf] (!%p188_p2), %vm258_vm0, %v5296_v0  ;;  %4781 = vmatprep.subr.bf16.mxu0 (!%p188_p2), %v5152_v39  ;;  %v5153_v50 = vld [vmem:[%s7481_s1 + $0x8] sm:$0xff] (!%p188_p2)   ;;  %s5298_s8 = smov (!%p188_p2), 32  }
   0xd   : > { %274 = vst.msk [vmem:[#allocation2 + $0x38] sm:$0x1] %vm261_vm1, %v5296_v0  ;;  %277 = vst.msk [vmem:[#allocation2 + $0x44] sm:$0x1] %vm261_vm1, %v5296_v0  ;;  %s7493_s19 = smov (!%p215_p3, %s4496_s19), 1  ;;  %v5127_v5 = vld [vmem:[#allocation2] sm:$0xff]  }
   0xe   : > { %275 = vst.msk [vmem:[#allocation2 + $0x3c] sm:$0xf] %vm258_vm0, %v5296_v0  ;;  %276 = vst.msk [vmem:[#allocation2 + $0x40] sm:$0xf] %vm258_vm0, %v5296_v0  ;;  %s4713_s20 = sshll.u32 %s7493_s19, 7  ;;  %v1163_v12 = vrot.slane %v5127_v5, 1 }
   0xf   : > { %278 = vst.msk [vmem:[#allocation2 + $0x48] sm:$0xf] %vm258_vm0, %v5296_v0  ;;  %279 = vst.msk [vmem:[#allocation2 + $0x4c] sm:$0xf] %vm258_vm0, %v5296_v0  ;;  %s5566_s23 = scalar_lea.vmem %s7480_s0, %s4713_s20  ;;  %v939_v14 = vshrl.u32 %v5127_v5, 16  ;;  %v941_v15 = vshll.u32 %v5127_v5, 16  ;;  %4782 = vmatpush3.bf16.msra.mxu0 %v5153_v50  ;;  %s7317_s10 = scalar_lea.vmem %s7485_s5, %s4713_s20 }
  0x10   : > { %280 = vst.msk [vmem:[#allocation2 + $0x50] sm:$0x1] %vm261_vm1, %v5296_v0  ;;  %283 = vst.msk [vmem:[#allocation2 + $0x5c] sm:$0x1] %vm261_vm1, %v5296_v0  ;;  %v230_v2 = vld [vmem:[%s5566_s23 + $0x10] sm:$0xf] }
  0x11   : > { %281 = vst.msk [vmem:[#allocation2 + $0x54] sm:$0xf] %vm258_vm0, %v5296_v0  ;;  %282 = vst.msk [vmem:[#allocation2 + $0x58] sm:$0xf] %vm258_vm0, %v5296_v0  ;;  %v231_v3 = vld [vmem:[%s5566_s23 + $0x14] sm:$0xf] }
  0x12   : > { %284 = vst.msk [vmem:[#allocation2 + $0x60] sm:$0xf] %vm258_vm0, %v5296_v0  ;;  %285 = vst.msk [vmem:[#allocation2 + $0x64] sm:$0xf] %vm258_vm0, %v5296_v0  ;;  %v228_v4 = vld [vmem:[%s5566_s23 + $0x8] sm:$0xf] }
  0x13   : > { %286 = vst.msk [vmem:[#allocation2 + $0x68] sm:$0x1] %vm261_vm1, %v5296_v0  ;;  %289 = vst.msk [vmem:[#allocation2 + $0x74] sm:$0x1] %vm261_vm1, %v5296_v0  ;;  %v352_v7 = vshrl.u32 %v230_v2, 16  ;;  %v355_v8 = vshll.u32 %v230_v2, 16 }
  0x14   : > { %287 = vst.msk [vmem:[#allocation2 + $0x6c] sm:$0xf] %vm258_vm0, %v5296_v0  ;;  %288 = vst.msk [vmem:[#allocation2 + $0x70] sm:$0xf] %vm258_vm0, %v5296_v0  ;;  %v360_v9 = vshrl.u32 %v231_v3, 16  ;;  %v363_v10 = vshll.u32 %v231_v3, 16 }
  0x15   : > { %290 = vst.msk [vmem:[#allocation2 + $0x78] sm:$0xf] %vm258_vm0, %v5296_v0  ;;  %291 = vst.msk [vmem:[#allocation2 + $0x7c] sm:$0xf] %vm258_vm0, %v5296_v0  ;;  %v229_v11 = vld [vmem:[%s5566_s23 + $0xc] sm:$0xf] }
  0x16   : > { %292 = vst.msk [vmem:[#allocation2 + $0x80] sm:$0x1] %vm261_vm1, %v5296_v0  ;;  %295 = vst.msk [vmem:[#allocation2 + $0x8c] sm:$0x1] %vm261_vm1, %v5296_v0  ;;  %v354_v18 = vrot.slane %v352_v7, 7  ;;  %v5581_v19 = vrot.slane %v360_v9, 7 }
  0x17   : > { %293 = vst.msk [vmem:[#allocation2 + $0x84] sm:$0xf] %vm258_vm0, %v5296_v0  ;;  %294 = vst.msk [vmem:[#allocation2 + $0x88] sm:$0xf] %vm258_vm0, %v5296_v0  ;;  %v657_v20 = vld [vmem:[#allocation2 + $0x24] sm:$0xf] }
  0x18   : > { %296 = vst.msk [vmem:[#allocation2 + $0x90] sm:$0xf] %vm258_vm0, %v5296_v0  ;;  %297 = vst.msk [vmem:[#allocation2 + $0x94] sm:$0xf] %vm258_vm0, %v5296_v0  ;;  %v335_v21 = vshrl.u32 %v228_v4, 16  ;;  %v943_v23 = vrot.slane %v941_v15, 1  ;;  %v357_v30 = vor.u32 %v355_v8, %v354_v18  ;;  %v365_v32 = vor.u32 %v363_v10, %v5581_v19 }
  0x19   : > { %298 = vst.msk [vmem:[#allocation2 + $0x98] sm:$0x1] %vm261_vm1, %v5296_v0  ;;  %301 = vst.msk [vmem:[#allocation2 + $0xa4] sm:$0x1] %vm261_vm1, %v5296_v0  ;;  %v338_v25 = vshll.u32 %v228_v4, 16  ;;  %v343_v26 = vshrl.u32 %v229_v11, 16 }
  0x1a   : > { %299 = vst.msk [vmem:[#allocation2 + $0x9c] sm:$0xf] %vm258_vm0, %v5296_v0  ;;  %300 = vst.msk [vmem:[#allocation2 + $0xa0] sm:$0xf] %vm258_vm0, %v5296_v0  ;;  %v232_v27 = vld [vmem:[%s5566_s23 + $0x18] sm:$0xf]  ;;  %v944_v34 = vor.u32 %v943_v23, %v939_v14 }
  0x1b   : > { %302 = vst.msk [vmem:[#allocation2 + $0xa8] sm:$0xf] %vm258_vm0, %v5296_v0  ;;  %303 = vst.msk [vmem:[#allocation2 + $0xac] sm:$0xf] %vm258_vm0, %v5296_v0  ;;  %v358_v31 = vrot.slane %v354_v18, 4  ;;  %v337_v35 = vrot.slane %v335_v21, 7 }
  0x1c   : > { %304 = vst.msk [vmem:[#allocation2 + $0xb0] sm:$0x1] %vm261_vm1, %v5296_v0  ;;  %307 = vst.msk [vmem:[#allocation2 + $0xbc] sm:$0x1] %vm261_vm1, %v5296_v0  ;;  %v233_v33 = vld [vmem:[%s5566_s23 + $0x1c] sm:$0xf] }
  0x1d   : > { %305 = vst.msk [vmem:[#allocation2 + $0xb4] sm:$0xf] %vm258_vm0, %v5296_v0  ;;  %306 = vst.msk [vmem:[#allocation2 + $0xb8] sm:$0xf] %vm258_vm0, %v5296_v0  ;;  %v345_v36 = vrot.slane %v343_v26, 7  ;;  %v346_v37 = vshll.u32 %v229_v11, 16  ;;  %v340_v47 = vor.u32 %v338_v25, %v337_v35 }
  0x1e   : > { %308 = vst.msk [vmem:[#allocation2 + $0xc0] sm:$0xf] %vm258_vm0, %v5296_v0  ;;  %309 = vst.msk [vmem:[#allocation2 + $0xc4] sm:$0xf] %vm258_vm0, %v5296_v0  ;;  %v226_v38 = vld [vmem:[%s5566_s23] sm:$0xf] }
  0x1f   : > { %310 = vst.msk [vmem:[#allocation2 + $0xc8] sm:$0x1] %vm261_vm1, %v5296_v0  ;;  %313 = vst.msk [vmem:[#allocation2 + $0xd4] sm:$0x1] %vm261_vm1, %v5296_v0  ;;  %v650_v42 = vld [vmem:[#allocation2 + $0x18] sm:$0xf]  ;;  %v348_v49 = vor.u32 %v346_v37, %v345_v36 }
  0x20   : > { %311 = vst.msk [vmem:[#allocation2 + $0xcc] sm:$0xf] %vm258_vm0, %v5296_v0  ;;  %312 = vst.msk [vmem:[#allocation2 + $0xd0] sm:$0xf] %vm258_vm0, %v5296_v0  ;;  %v369_v43 = vshrl.u32 %v232_v27, 16  ;;  %v372_v44 = vshll.u32 %v232_v27, 16 }
  0x21   : > { %2213 = vst.msk [vmem:[#allocation3] sm:$0xf] %vm258_vm0, %v5296_v0  ;;  %2214 = vst.msk [vmem:[#allocation3 + $0x4] sm:$0xf] %vm258_vm0, %v5296_v0  ;;  %v227_v45 = vld [vmem:[%s5566_s23 + $0x4] sm:$0xf] }
  0x22   : > { %2215 = vst.msk [vmem:[#allocation3 + $0x8] sm:$0x1] %vm261_vm1, %v5296_v0  ;;  %2218 = vst.msk [vmem:[#allocation3 + $0x14] sm:$0x1] %vm261_vm1, %v5296_v0  ;;  %v341_v48 = vrot.slane %v337_v35, 4  ;;  %v371_v51 = vrot.slane %v369_v43, 7 }
  0x23   : > { %2216 = vst.msk [vmem:[#allocation3 + $0xc] sm:$0xf] %vm258_vm0, %v5296_v0  ;;  %2217 = vst.msk [vmem:[#allocation3 + $0x10] sm:$0xf] %vm258_vm0, %v5296_v0  ;;  %v377_v52 = vshrl.u32 %v233_v33, 16  ;;  %v380_v53 = vshll.u32 %v233_v33, 16 }
  0x24   : > { %2219 = vst.msk [vmem:[#allocation3 + $0x18] sm:$0xf] %vm258_vm0, %v5296_v0  ;;  %2220 = vst.msk [vmem:[#allocation3 + $0x1c] sm:$0xf] %vm258_vm0, %v5296_v0  ;;  %v318_v54 = vshrl.u32 %v226_v38, 16  ;;  %v321_v58 = vshll.u32 %v226_v38, 16  ;;  %v374_v61 = vor.u32 %v372_v44, %v371_v51 }
  0x25   : > { %2221 = vst.msk [vmem:[#allocation3 + $0x20] sm:$0x1] %vm261_vm1, %v5296_v0  ;;  %2224 = vst.msk [vmem:[#allocation3 + $0x2c] sm:$0x1] %vm261_vm1, %v5296_v0  ;;  %v664_v57 = vld [vmem:[#allocation2 + $0x30] sm:$0xf] }
  0x26   : > { %2222 = vst.msk [vmem:[#allocation3 + $0x24] sm:$0xf] %vm258_vm0, %v5296_v0  ;;  %2223 = vst.msk [vmem:[#allocation3 + $0x28] sm:$0xf] %vm258_vm0, %v5296_v0  ;;  %v326_v59 = vshrl.u32 %v227_v45, 16  ;;  %v375_v62 = vrot.slane %v371_v51, 4 }
  0x27   : > { %2225 = vst.msk [vmem:[#allocation3 + $0x30] sm:$0xf] %vm258_vm0, %v5296_v0  ;;  %2226 = vst.msk [vmem:[#allocation3 + $0x34] sm:$0xf] %vm258_vm0, %v5296_v0  ;;  %v654_v60 = vld [vmem:[#allocation2 + $0x20] sm:$0x1] }
  0x28   : > { %2227 = vst.msk [vmem:[#allocation3 + $0x38] sm:$0x1] %vm261_vm1, %v5296_v0  ;;  %2230 = vst.msk [vmem:[#allocation3 + $0x44] sm:$0x1] %vm261_vm1, %v5296_v0  ;;  %v379_v63 = vrot.slane %v377_v52, 7  ;;  %v5155_v2 = vld [vmem:[%s7481_s1 + $0x50] sm:$0xff]  }
  0x29   : > { %2228 = vst.msk [vmem:[#allocation3 + $0x3c] sm:$0xf] %vm258_vm0, %v5296_v0  ;;  %2229 = vst.msk [vmem:[#allocation3 + $0x40] sm:$0xf] %vm258_vm0, %v5296_v0  ;;  %v661_v1 = vld [vmem:[#allocation2 + $0x2c] sm:$0x1]  ;;  %4783 = vmatprep.subr.bf16.mxu0 %v5155_v2 }
  0x2a   : > { %2231 = vst.msk [vmem:[#allocation3 + $0x48] sm:$0xf] %vm258_vm0, %v5296_v0  ;;  %2232 = vst.msk [vmem:[#allocation3 + $0x4c] sm:$0xf] %vm258_vm0, %v5296_v0  ;;  %v328_v3 = vrot.slane %v326_v59, 7  ;;  %v329_v4 = vshll.u32 %v227_v45, 16  ;;  %v382_v9 = vor.u32 %v380_v53, %v379_v63 }
  0x2b   : > { %2233 = vst.msk [vmem:[#allocation3 + $0x50] sm:$0x1] %vm261_vm1, %v5296_v0  ;;  %2236 = vst.msk [vmem:[#allocation3 + $0x5c] sm:$0x1] %vm261_vm1, %v5296_v0  ;;  %v641_v5 = vld [vmem:[#allocation2 + $0xc] sm:$0xf] }
  0x2c   : > { %2234 = vst.msk [vmem:[#allocation3 + $0x54] sm:$0xf] %vm258_vm0, %v5296_v0  ;;  %2235 = vst.msk [vmem:[#allocation3 + $0x58] sm:$0xf] %vm258_vm0, %v5296_v0  ;;  %v350_v7 = vrot.slane %v345_v36, 4  ;;  %v367_v8 = vrot.slane %v5581_v19, 4 }
  0x2d   : > { %2237 = vst.msk [vmem:[#allocation3 + $0x60] sm:$0xf] %vm258_vm0, %v5296_v0  ;;  %2238 = vst.msk [vmem:[#allocation3 + $0x64] sm:$0xf] %vm258_vm0, %v5296_v0  ;;  %v234_v14 = vld [vmem:[%s5566_s23 + $0x20] sm:$0xf] }
  0x2e   : > { %2239 = vst.msk [vmem:[#allocation3 + $0x68] sm:$0x1] %vm261_vm1, %v5296_v0  ;;  %2242 = vst.msk [vmem:[#allocation3 + $0x74] sm:$0x1] %vm261_vm1, %v5296_v0  ;;  %v5156_v15 = vld [vmem:[%s7481_s1 + $0x10] sm:$0xff]   ;;  %v333_v18 = vrot.slane %v328_v3, 4 }
  0x2f   : > { %2240 = vst.msk [vmem:[#allocation3 + $0x6c] sm:$0xf] %vm258_vm0, %v5296_v0  ;;  %2241 = vst.msk [vmem:[#allocation3 + $0x70] sm:$0xf] %vm258_vm0, %v5296_v0  ;;  %v668_v21 = vld [vmem:[#allocation2 + $0x38] sm:$0x1]  ;;  %4784 = vmatpush3.bf16.msra.mxu0 %v5156_v15 }
  0x30   : > { %2243 = vst.msk [vmem:[#allocation3 + $0x78] sm:$0xf] %vm258_vm0, %v5296_v0  ;;  %2244 = vst.msk [vmem:[#allocation3 + $0x7c] sm:$0xf] %vm258_vm0, %v5296_v0  ;;  %v384_v27 = vrot.slane %v379_v63, 4  ;;  %v5158_v35 = vld [vmem:[%s7481_s1 + $0x18] sm:$0xff]  }
  0x31   : > { %2245 = vst.msk [vmem:[#allocation3 + $0x80] sm:$0x1] %vm261_vm1, %v5296_v0  ;;  %2248 = vst.msk [vmem:[#allocation3 + $0x8c] sm:$0x1] %vm261_vm1, %v5296_v0  ;;  %v675_v45 = vld [vmem:[#allocation2 + $0x44] sm:$0x1] }
  0x32   : > { %2246 = vst.msk [vmem:[#allocation3 + $0x84] sm:$0xf] %vm258_vm0, %v5296_v0  ;;  %2247 = vst.msk [vmem:[#allocation3 + $0x88] sm:$0xf] %vm258_vm0, %v5296_v0  ;;  %v5161_v50 = vld [vmem:[%s7481_s1 + $0x20] sm:$0xff]   ;;  %s5299_s25 = smov 96  }
  0x33   : > { %2249 = vst.msk [vmem:[#allocation3 + $0x90] sm:$0xf] %vm258_vm0, %v5296_v0  ;;  %2250 = vst.msk [vmem:[#allocation3 + $0x94] sm:$0xf] %vm258_vm0, %v5296_v0  ;;  %vm1417_vm10 = vcmask 261120   ;;  %vm1450_vm11 = vcmask 523264  }
  0x34   : > { %2251 = vst.msk [vmem:[#allocation3 + $0x98] sm:$0x1] %vm261_vm1, %v5296_v0  ;;  %2254 = vst.msk [vmem:[#allocation3 + $0xa4] sm:$0x1] %vm261_vm1, %v5296_v0  ;;  %vm1483_vm12 = vcmask 785408  }
  0x35   : > { %2252 = vst.msk [vmem:[#allocation3 + $0x9c] sm:$0xf] %vm258_vm0, %v5296_v0  ;;  %2253 = vst.msk [vmem:[#allocation3 + $0xa0] sm:$0xf] %vm258_vm0, %v5296_v0 }
  0x36   : > { %2255 = vst.msk [vmem:[#allocation3 + $0xa8] sm:$0xf] %vm258_vm0, %v5296_v0  ;;  %2256 = vst.msk [vmem:[#allocation3 + $0xac] sm:$0xf] %vm258_vm0, %v5296_v0 }
  0x37   : > { %2257 = vst.msk [vmem:[#allocation3 + $0xb0] sm:$0x1] %vm261_vm1, %v5296_v0  ;;  %2260 = vst.msk [vmem:[#allocation3 + $0xbc] sm:$0x1] %vm261_vm1, %v5296_v0 }
  0x38   : > { %2258 = vst.msk [vmem:[#allocation3 + $0xb4] sm:$0xf] %vm258_vm0, %v5296_v0  ;;  %2259 = vst.msk [vmem:[#allocation3 + $0xb8] sm:$0xf] %vm258_vm0, %v5296_v0 }
  0x39   : > { %2261 = vst.msk [vmem:[#allocation3 + $0xc0] sm:$0xf] %vm258_vm0, %v5296_v0  ;;  %2262 = vst.msk [vmem:[#allocation3 + $0xc4] sm:$0xf] %vm258_vm0, %v5296_v0 }
  0x3a   : > { %2263 = vst.msk [vmem:[#allocation3 + $0xc8] sm:$0x1] %vm261_vm1, %v5296_v0  ;;  %2266 = vst.msk [vmem:[#allocation3 + $0xd4] sm:$0x1] %vm261_vm1, %v5296_v0 }
  0x3b   : > { %2264 = vst.msk [vmem:[#allocation3 + $0xcc] sm:$0xf] %vm258_vm0, %v5296_v0  ;;  %2265 = vst.msk [vmem:[#allocation3 + $0xd0] sm:$0xf] %vm258_vm0, %v5296_v0  ;;  %v320_v0 = vrot.slane %v318_v54, 7 }
  0x3c   : > { %v5128_v6 = vld [vmem:[#allocation2 + $0x8] ss:$0 sps:$4 sm:$0x11]   ;;  %vm5577_vm7 = vmor %vm314_vm2, %vm315_vm3 }
  0x3d   : > { %v1164_v13 = vrot.slane %v5128_v6, 1  ;;  %v946_v16 = vshll.u32 %v5128_v6, 16  ;;  %vm5586_vm8 = vmand %vm258_vm0, %vm639_vm4  ;;  %v366_v40 = vsel %vm5577_vm7, %v358_v31, %v365_v32  ;;  %v349_v55 = vsel %vm5577_vm7, %v341_v48, %v348_v49 }
  0x3e   : > { %v658_v41 = vsel %vm5586_vm8, %v357_v30, %v657_v20  ;;  %660 = vst.msk [vmem:[#allocation2 + $0x28] sm:$0xf] %vm258_vm0, %v366_v40  ;;  %v651_v56 = vsel %vm5586_vm8, %v340_v47, %v650_v42  ;;  %653 = vst.msk [vmem:[#allocation2 + $0x1c] sm:$0xf] %vm258_vm0, %v349_v55  ;;  %v665_v10 = vsel %vm5586_vm8, %v374_v61, %v664_v57  ;;  %v235_v30 = vld [vmem:[%s5566_s23 + $0x24] sm:$0xf] }
  0x3f   : > { %v1165_v22 = vsel %vm1162_vm6, %v1163_v12, %v1164_v13  ;;  %v948_v29 = vrot.slane %v946_v16, 1  ;;  %659 = vst [vmem:[#allocation2 + $0x24] sm:$0xf] %v658_v41  ;;  %652 = vst [vmem:[#allocation2 + $0x18] sm:$0xf] %v651_v56  ;;  %v323_v11 = vor.u32 %v321_v58, %v320_v0  ;;  %v324_v12 = vrot.slane %v320_v0, 4 }
  0x40   : > { %1211 = vrot.lane.b32.xlu1 %v1165_v22, %s5297_s28  ;;  %vm5622_vm9 = vmand %vm261_vm1, %vm314_vm2  ;;  %v647_v13 = vld [vmem:[#allocation2 + $0x14] sm:$0x1]  ;;  %666 = vst [vmem:[#allocation2 + $0x30] sm:$0xf] %v665_v10  ;;  %v331_v16 = vor.u32 %v329_v4, %v328_v3  ;;  %v5157_v22 = vld [vmem:[%s7481_s1 + $0x58] sm:$0xff]   ;;  %v383_v25 = vsel %vm5577_vm7, %v375_v62, %v382_v9  ;;  %v386_v31 = vshrl.u32 %v234_v14, 16 }
  0x41   : > { %v949_v46 = vsel %vm937_vm5, %v944_v34, %v948_v29  ;;  %v655_v19 = vsel %vm5622_vm9, %v350_v7, %v654_v60  ;;  %v662_v20 = vsel %vm5622_vm9, %v367_v8, %v661_v1  ;;  %v642_v26 = vsel %vm5586_vm8, %v323_v11, %v641_v5  ;;  %667 = vst.msk [vmem:[#allocation2 + $0x34] sm:$0xf] %vm258_vm0, %v383_v25  ;;  %v5658_v34 = vld [vmem:[%s5566_s23 + $0x28] sm:$0xf]  ;;  %v671_v40 = vld [vmem:[#allocation2 + $0x3c] sm:$0xf] }
  0x42   : > { %1130 = vrot.lane.b32.xlu0 %v949_v46, %s5298_s8  ;;  %656 = vst [vmem:[#allocation2 + $0x20] sm:$0x1] %v655_v19  ;;  %663 = vst [vmem:[#allocation2 + $0x2c] sm:$0x1] %v662_v20  ;;  %v332_v28 = vsel %vm5577_vm7, %v324_v12, %v331_v16  ;;  %v648_v29 = vsel %vm5622_vm9, %v333_v18, %v647_v13  ;;  %v389_v32 = vshll.u32 %v234_v14, 16  ;;  %4785 = vmatprep.subr.bf16.mxu0 %v5157_v22  ;;  %v5160_v46 = vld [vmem:[%s7481_s1 + $0x60] sm:$0xff]  }
  0x43   : > { %643 = vst [vmem:[#allocation2 + $0xc] sm:$0xf] %v642_v26  ;;  %644 = vst.msk [vmem:[#allocation2 + $0x10] sm:$0xf] %vm258_vm0, %v332_v28  ;;  %v669_v33 = vsel %vm5622_vm9, %v384_v27, %v668_v21  ;;  %v388_v37 = vrot.slane %v386_v31, 7  ;;  %v394_v38 = vshrl.u32 %v235_v30, 16  ;;  %4786 = vmatpush3.bf16.msra.mxu0 %v5158_v35 }
  0x44   : > { %649 = vst [vmem:[#allocation2 + $0x14] sm:$0x1] %v648_v29  ;;  %670 = vst [vmem:[#allocation2 + $0x38] sm:$0x1] %v669_v33  ;;  %v397_v39 = vshll.u32 %v235_v30, 16  ;;  %v403_v49 = vshrl.u32 %v5658_v34, 16  ;;  %4787 = vmatprep.subr.bf16.mxu0 %v5160_v46 }
  0x45   : > { %v391_v44 = vor.u32 %v389_v32, %v388_v37  ;;  %v392_v47 = vrot.slane %v388_v37, 4  ;;  %v396_v48 = vrot.slane %v394_v38, 7  ;;  %v237_v14 = vld [vmem:[%s5566_s23 + $0x2c] sm:$0xf]  ;;  %v406_v22 = vshll.u32 %v5658_v34, 16 }
  0x46   : > { %v5640_v23 = vld [vmem:[#allocation2 + $0x24] sm:$0xff]   ;;  %v5130_v36 = vld [vmem:[#allocation2 + $0x18] sm:$0xff]   ;;  %v5687_v9 = vrot.slane %v403_v49, 7  ;;  %v238_v25 = vld [vmem:[%s5566_s23 + $0x30] sm:$0xf]  ;;  %v411_v35 = vshrl.u32 %v237_v14, 16 }
  0x47   : > { %1337 = vrot.lane.b32.xlu0 %v5640_v23, %s5297_s28  ;;  %1335 = vrot.lane.b32.xlu1 %v5130_v36, %s5297_s28  ;;  %v965_v41 = vshll.u32 %v5130_v36, 16  ;;  %v975_v42 = vshrl.u32 %v5640_v23, 16  ;;  %v977_v43 = vshll.u32 %v5640_v23, 16  ;;  %v963_v52 = vshrl.u32 %v5130_v36, 16  ;;  %v678_v30 = vld [vmem:[#allocation2 + $0x48] sm:$0xf] }
  0x48   : > { %v672_v53 = vsel %vm5586_vm8, %v391_v44, %v671_v40  ;;  %v5675_v54 = vld [vmem:[#allocation2 + $0x30] sm:$0xff]   ;;  %v399_v55 = vor.u32 %v397_v39, %v396_v48  ;;  %v401_v56 = vrot.slane %v396_v48, 4  ;;  %4788 = vmatpush3.bf16.msra.mxu0 %v5161_v50  ;;  %v1169_v0 = vrot.slane %v5130_v36, 1  ;;  %v5163_v46 = vld [vmem:[%s7481_s1 + $0x68] sm:$0xff]  }
  0x49   : > { %v5134_v51 = vld [vmem:[#allocation2 + $0x20] ss:$0 sps:$4 sm:$0x11]   ;;  %673 = vst [vmem:[#allocation2 + $0x3c] sm:$0xf] %v672_v53  ;;  %v967_v58 = vrot.slane %v965_v41, 1  ;;  %v408_v33 = vor.u32 %v406_v22, %v5687_v9  ;;  %4789 = vmatprep.subr.bf16.mxu0 %v5163_v46 }
  0x4a   : > { %v5132_v57 = vld [vmem:[#allocation2 + $0xc] sm:$0xff]   ;;  %v970_v60 = vshll.u32 %v5134_v51, 16  ;;  %v400_v61 = vsel %vm5577_vm7, %v392_v47, %v399_v55  ;;  %v676_v62 = vsel %vm5622_vm9, %v401_v56, %v675_v45  ;;  %v1170_v1 = vrot.slane %v5134_v51, 1  ;;  %v239_v38 = vld [vmem:[%s5566_s23 + $0x34] sm:$0xf] }
  0x4b   : > { %1339 = vrot.lane.b32.xlu0 %v5675_v54, %s5297_s28  ;;  %v5133_v59 = vld [vmem:[#allocation2 + $0x14] ss:$0 sps:$4 sm:$0x11]   ;;  %1248 = vrot.lane.b32.xlu1 %v5132_v57, %s5299_s25  ;;  %v1166_v63 = vrot.slane %v5132_v57, 1  ;;  %v953_v2 = vshll.u32 %v5132_v57, 16  ;;  %v979_v7 = vrot.slane %v977_v43, 1  ;;  %v968_v11 = vor.u32 %v967_v58, %v963_v52 }
  0x4c   : > { %674 = vst.msk [vmem:[#allocation2 + $0x40] sm:$0xf] %vm258_vm0, %v400_v61  ;;  %677 = vst [vmem:[#allocation2 + $0x44] sm:$0x1] %v676_v62  ;;  %v1167_v3 = vrot.slane %v5133_v59, 1  ;;  %v958_v5 = vshll.u32 %v5133_v59, 16  ;;  %v5695_v19 = vsel %vm1162_vm6, %v1169_v0, %v1170_v1  ;;  %v679_v50 = vsel %vm5586_vm8, %v408_v33, %v678_v30 }
  0x4d   : > { %v5135_v4 = vld [vmem:[#allocation2 + $0x2c] ss:$0 sps:$4 sm:$0x11]   ;;  %v5685_v8 = vld [vmem:[#allocation2 + $0x38] ss:$0 sps:$4 sm:$0x11]   ;;  %v980_v27 = vor.u32 %v979_v7, %v975_v42  ;;  %5043 = vmatprep.mubr.msk.bf16.mxu1 %vm1417_vm10, %v5695_v19 }
  0x4e   : > { %v1168_v10 = vsel %vm1162_vm6, %v1166_v63, %v1167_v3  ;;  %v972_v12 = vrot.slane %v970_v60, 1  ;;  %v989_v13 = vshll.u32 %v5675_v54, 16  ;;  %v951_v15 = vshrl.u32 %v5132_v57, 16  ;;  %v682_v44 = vld [vmem:[#allocation2 + $0x50] sm:$0x1]  ;;  %v5164_v52 = vld [vmem:[%s7481_s1 + $0x28] sm:$0xff]  }
  0x4f   : > { %1250 = vrot.lane.b32.xlu1 %v5130_v36, %s5299_s25  ;;  %1298 = vrot.lane.b32.xlu0 %v1168_v10, %s5298_s8  ;;  %v955_v16 = vrot.slane %v953_v2, 1  ;;  %v982_v18 = vshll.u32 %v5135_v4, 16  ;;  %v1172_v20 = vrot.slane %v5640_v23, 1  ;;  %v1173_v21 = vrot.slane %v5135_v4, 1  ;;  %v685_v51 = vld [vmem:[#allocation2 + $0x54] sm:$0xf] }
  0x50   : > { %v960_v26 = vrot.slane %v958_v5, 1  ;;  %v987_v28 = vshrl.u32 %v5675_v54, 16  ;;  %v994_v29 = vshll.u32 %v5685_v8, 16  ;;  %v5703_v31 = vsel %vm937_vm5, %v968_v11, %v972_v12  ;;  %680 = vst [vmem:[#allocation2 + $0x48] sm:$0xf] %v679_v50  ;;  %4790 = vmatpush3.bf16.msra.mxu0 %v5164_v52 }
  0x51   : > { %v991_v32 = vrot.slane %v989_v13, 1  ;;  %v956_v34 = vor.u32 %v955_v16, %v951_v15  ;;  %v984_v36 = vrot.slane %v982_v18, 1  ;;  %v414_v37 = vshll.u32 %v237_v14, 16  ;;  %v240_v58 = vld [vmem:[%s5566_s23 + $0x38] sm:$0xf] }
  0x52   : > { %v420_v39 = vshrl.u32 %v238_v25, 16  ;;  %v5711_v40 = vsel %vm1162_vm6, %v1172_v20, %v1173_v21  ;;  %v1175_v41 = vrot.slane %v5675_v54, 1  ;;  %v1176_v42 = vrot.slane %v5685_v8, 1  ;;  %v689_v63 = vld [vmem:[#allocation2 + $0x5c] sm:$0x1]  ;;  %v5165_v21 = vld [vmem:[%s7481_s1 + $0x70] sm:$0xff]  }
  0x53   : > { %1213 = vrot.lane.b32.xlu1 %v1168_v10, %s5297_s28  ;;  %1300 = vrot.lane.b32.xlu0 %v5695_v19, %s5298_s8  ;;  %v5715_v43 = vld [vmem:[#allocation2 + $0x3c] sm:$0xff]   ;;  %v423_v45 = vshll.u32 %v238_v25, 16  ;;  %v996_v47 = vrot.slane %v994_v29, 1  ;;  %v409_v48 = vrot.slane %v5687_v9, 4  ;;  %v413_v49 = vrot.slane %v411_v35, 7 }
  0x54   : > { %v992_v53 = vor.u32 %v991_v32, %v987_v28  ;;  %v422_v55 = vrot.slane %v420_v39, 7  ;;  %v428_v56 = vshrl.u32 %v239_v38, 16  ;;  %v431_v57 = vshll.u32 %v239_v38, 16  ;;  %v241_v0 = vld [vmem:[%s5566_s23 + $0x3c] sm:$0xf]  ;;  %4791 = vmatprep.subr.bf16.mxu0 %v5165_v21 }
  0x55   : > { %v5732_v59 = vsel %vm937_vm5, %v956_v34, %v960_v26  ;;  %v5735_v60 = vsel %vm937_vm5, %v980_v27, %v984_v36  ;;  %v416_v61 = vor.u32 %v414_v37, %v413_v49  ;;  %v418_v62 = vrot.slane %v413_v49, 4  ;;  %v242_v5 = vld [vmem:[%s5566_s23 + $0x40] sm:$0xf]  ;;  %v243_v12 = vld [vmem:[%s5566_s23 + $0x44] sm:$0xf]  ;;  %v5170_v21 = vld [vmem:[%s7481_s1 + $0x38] sm:$0xff]  }
  0x56   : > { %v1001_v1 = vshll.u32 %v5715_v43, 16  ;;  %v425_v2 = vor.u32 %v423_v45, %v422_v55  ;;  %v426_v3 = vrot.slane %v422_v55, 4  ;;  %v430_v4 = vrot.slane %v428_v56, 7  ;;  %v244_v13 = vld [vmem:[%s5566_s23 + $0x48] sm:$0xf]  ;;  %v5166_v45 = vld [vmem:[%s7481_s1 + $0x30] sm:$0xff]  }
  0x57   : > { %1215 = vrot.lane.b32.xlu1 %v5695_v19, %s5297_s28  ;;  %1302 = vrot.lane.b32.xlu0 %v5711_v40, %s5298_s8  ;;  %v417_v7 = vsel %vm5577_vm7, %v409_v48, %v416_v61  ;;  %v683_v9 = vsel %vm5622_vm9, %v418_v62, %v682_v44  ;;  %v437_v10 = vshrl.u32 %v240_v58, 16  ;;  %v440_v11 = vshll.u32 %v240_v58, 16  ;;  %v692_v20 = vld [vmem:[#allocation2 + $0x60] sm:$0xf]  ;;  %v696_v30 = vld [vmem:[#allocation2 + $0x68] sm:$0x1] }
  0x58   : > { %v5747_v14 = vsel %vm937_vm5, %v992_v53, %v996_v47  ;;  %681 = vst.msk [vmem:[#allocation2 + $0x4c] sm:$0xf] %vm258_vm0, %v417_v7  ;;  %684 = vst [vmem:[#allocation2 + $0x50] sm:$0x1] %v683_v9  ;;  %v433_v15 = vor.u32 %v431_v57, %v430_v4  ;;  %v686_v16 = vsel %vm5586_vm8, %v425_v2, %v685_v51  ;;  %v435_v18 = vrot.slane %v430_v4, 4 }
  0x59   : > { %687 = vst [vmem:[#allocation2 + $0x54] sm:$0xf] %v686_v16  ;;  %v439_v22 = vrot.slane %v437_v10, 7  ;;  %v445_v25 = vshrl.u32 %v241_v0, 16  ;;  %v448_v26 = vshll.u32 %v241_v0, 16  ;;  %v454_v27 = vshrl.u32 %v242_v5, 16  ;;  %4792 = vmatpush3.bf16.msra.mxu0 %v5166_v45 }
  0x5a   : > { %v434_v28 = vsel %vm5577_vm7, %v426_v3, %v433_v15  ;;  %v690_v29 = vsel %vm5622_vm9, %v435_v18, %v689_v63  ;;  %v457_v32 = vshll.u32 %v242_v5, 16  ;;  %v462_v33 = vshrl.u32 %v243_v12, 16  ;;  %v699_v35 = vld [vmem:[#allocation2 + $0x6c] sm:$0xf]  ;;  %v703_v55 = vld [vmem:[#allocation2 + $0x74] sm:$0x1] }
  0x5b   : > { %1382 = vrot.lane.b32.xlu0 %v5703_v31, %s5299_s25  ;;  %1132 = vrot.lane.b32.xlu1 %v5732_v59, %s5298_s8  ;;  %v5764_v34 = vld [vmem:[%s5566_s23 + $0x4c] sm:$0xf]  ;;  %v5766_v36 = vld [vmem:[#allocation2 + $0x44] ss:$0 sps:$4 sm:$0x11]   ;;  %v442_v37 = vor.u32 %v440_v11, %v439_v22  ;;  %v443_v38 = vrot.slane %v439_v22, 4  ;;  %v5802_v10 = vsel %vm1162_vm6, %v1175_v41, %v1176_v42 }
  0x5c   : > { %688 = vst.msk [vmem:[#allocation2 + $0x58] sm:$0xf] %vm258_vm0, %v434_v28  ;;  %691 = vst [vmem:[#allocation2 + $0x5c] sm:$0x1] %v690_v29  ;;  %v447_v39 = vrot.slane %v445_v25, 7  ;;  %v456_v44 = vrot.slane %v454_v27, 7 }
  0x5d   : > { %v464_v46 = vrot.slane %v462_v33, 7  ;;  %v465_v47 = vshll.u32 %v243_v12, 16  ;;  %v471_v48 = vshrl.u32 %v244_v13, 16  ;;  %v474_v49 = vshll.u32 %v244_v13, 16  ;;  %v706_v62 = vld [vmem:[#allocation2 + $0x78] sm:$0xf] }
  0x5e   : > { %v450_v50 = vor.u32 %v448_v26, %v447_v39  ;;  %v693_v51 = vsel %vm5586_vm8, %v442_v37, %v692_v20  ;;  %v452_v52 = vrot.slane %v447_v39, 4  ;;  %v459_v53 = vor.u32 %v457_v32, %v456_v44  ;;  %v5167_v63 = vld [vmem:[%s7481_s1 + $0x80] sm:$0xff]   ;;  %v246_v41 = vld [vmem:[%s5566_s23 + $0x50] sm:$0xf]  ;;  %v5169_v18 = vld [vmem:[%s7481_s1 + $0x78] sm:$0xff]  }
  0x5f   : > { %1384 = vrot.lane.b32.xlu0 %v5735_v60, %s5299_s25  ;;  %1134 = vrot.lane.b32.xlu1 %v5703_v31, %s5298_s8  ;;  %694 = vst [vmem:[#allocation2 + $0x60] sm:$0xf] %v693_v51  ;;  %v460_v56 = vrot.slane %v456_v44, 4  ;;  %v467_v57 = vor.u32 %v465_v47, %v464_v46  ;;  %v469_v58 = vrot.slane %v464_v46, 4  ;;  %v473_v61 = vrot.slane %v471_v48, 7  ;;  %v5820_v20 = vld [vmem:[#allocation2 + $0x48] sm:$0xff]  }
  0x60   : > { %v451_v0 = vsel %vm5577_vm7, %v443_v38, %v450_v50  ;;  %v697_v2 = vsel %vm5622_vm9, %v452_v52, %v696_v30  ;;  %v700_v3 = vsel %vm5586_vm8, %v459_v53, %v699_v35  ;;  %v479_v4 = vshrl.u32 %v5764_v34, 16  ;;  %5039 = vmatprep.subr.bf16.mxu1 %v5167_v63  ;;  %v710_v16 = vld [vmem:[#allocation2 + $0x80] sm:$0x1]  ;;  %4793 = vmatprep.subr.bf16.mxu0 %v5169_v18  ;;  %v5171_v28 = vld [vmem:[%s7481_s1 + $0x88] sm:$0xff]   ;;  %v247_v38 = vld [vmem:[%s5566_s23 + $0x54] sm:$0xf] }
  0x61   : > { %695 = vst.msk [vmem:[#allocation2 + $0x64] sm:$0xf] %vm258_vm0, %v451_v0  ;;  %698 = vst [vmem:[#allocation2 + $0x68] sm:$0x1] %v697_v2  ;;  %v468_v5 = vsel %vm5577_vm7, %v460_v56, %v467_v57  ;;  %v704_v7 = vsel %vm5622_vm9, %v469_v58, %v703_v55  ;;  %v476_v9 = vor.u32 %v474_v49, %v473_v61  ;;  %v999_v11 = vshrl.u32 %v5715_v43, 16 }
  0x62   : > { %701 = vst [vmem:[#allocation2 + $0x6c] sm:$0xf] %v700_v3  ;;  %v1006_v12 = vshll.u32 %v5766_v36, 16  ;;  %702 = vst.msk [vmem:[#allocation2 + $0x70] sm:$0xf] %vm258_vm0, %v468_v5  ;;  %v1003_v13 = vrot.slane %v1001_v1, 1  ;;  %5040 = vmatpush3.bf16.msra.mxu1 %v5167_v63  ;;  %4794 = vmatpush3.bf16.msra.mxu0 %v5170_v21 }
  0x63   : > { %1386 = vrot.lane.b32.xlu0 %v5747_v14, %s5299_s25  ;;  %1252 = vrot.lane.b32.xlu1 %v5640_v23, %s5299_s25  ;;  %705 = vst [vmem:[#allocation2 + $0x74] sm:$0x1] %v704_v7  ;;  %v481_v15 = vrot.slane %v479_v4, 7  ;;  %v482_v23 = vshll.u32 %v5764_v34, 16  ;;  %v707_v8 = vsel %vm5586_vm8, %v476_v9, %v706_v62  ;;  %v477_v42 = vrot.slane %v473_v61, 4  ;;  %v5857_v55 = vld [vmem:[#allocation2 + $0x54] sm:$0xff]  }
  0x64   : > { %708 = vst [vmem:[#allocation2 + $0x78] sm:$0xf] %v707_v8  ;;  %v1008_v1 = vrot.slane %v1006_v12, 1  ;;  %v1004_v22 = vor.u32 %v1003_v13, %v999_v11  ;;  %v488_v27 = vshrl.u32 %v246_v41, 16  ;;  %v1178_v29 = vrot.slane %v5715_v43, 1  ;;  %5041 = vmatprep.subr.bf16.mxu1 %v5171_v28 }
  0x65   : > { %v484_v25 = vor.u32 %v482_v23, %v481_v15  ;;  %v486_v26 = vrot.slane %v481_v15, 4  ;;  %v1179_v30 = vrot.slane %v5766_v36, 1  ;;  %v5838_v35 = vld [vmem:[#allocation2 + $0x50] ss:$0 sps:$4 sm:$0x11]   ;;  %v1013_v34 = vshll.u32 %v5820_v20, 16 }
  0x66   : > { %v5843_v36 = vsel %vm937_vm5, %v1004_v22, %v1008_v1  ;;  %v490_v37 = vrot.slane %v488_v27, 7  ;;  %5042 = vmatpush3.bf16.msra.mxu1 %v5171_v28  ;;  %v713_v39 = vld [vmem:[#allocation2 + $0x84] sm:$0xf]  ;;  %v491_v44 = vshll.u32 %v246_v41, 16  ;;  %v248_v45 = vld [vmem:[%s5566_s23 + $0x58] sm:$0xf] }
  0x67   : > { %1304 = vrot.lane.b32.xlu0 %v5802_v10, %s5298_s8  ;;  %1136 = vrot.lane.b32.xlu1 %v5735_v60, %s5298_s8  ;;  %v485_v32 = vsel %vm5577_vm7, %v477_v42, %v484_v25  ;;  %v711_v33 = vsel %vm5622_vm9, %v486_v26, %v710_v16  ;;  %v249_v46 = vld [vmem:[%s5566_s23 + $0x5c] sm:$0xf]  ;;  %v5853_v47 = vsel %vm1162_vm6, %v1178_v29, %v1179_v30  ;;  %v1011_v48 = vshrl.u32 %v5820_v20, 16  ;;  %v717_v62 = vld [vmem:[#allocation2 + $0x8c] sm:$0x1] }
  0x68   : > { %709 = vst.msk [vmem:[#allocation2 + $0x7c] sm:$0xf] %vm258_vm0, %v485_v32  ;;  %712 = vst [vmem:[#allocation2 + $0x80] sm:$0x1] %v711_v33  ;;  %v1015_v49 = vrot.slane %v1013_v34, 1  ;;  %v1018_v50 = vshll.u32 %v5838_v35, 16  ;;  %v493_v51 = vor.u32 %v491_v44, %v490_v37 }
  0x69   : > { %v496_v52 = vshrl.u32 %v247_v38, 16  ;;  %v499_v53 = vshll.u32 %v247_v38, 16  ;;  %v5859_v56 = vld [vmem:[#allocation2 + $0x5c] ss:$0 sps:$4 sm:$0x11]   ;;  %5044 = vmatmul.mubr.msk.bf16.vlgmr.msra.gmra.mrb[0].mxu1 %vm1417_vm10, %v5711_v40  ;;  %v1181_v61 = vrot.slane %v5820_v20, 1 }
  0x6a   : > { %v714_v58 = vsel %vm5586_vm8, %v493_v51, %v713_v39  ;;  %v505_v63 = vshrl.u32 %v248_v45, 16  ;;  %v508_v19 = vshll.u32 %v248_v45, 16  ;;  %v513_v0 = vshrl.u32 %v249_v46, 16  ;;  %v720_v7 = vld [vmem:[#allocation2 + $0x90] sm:$0xf]  ;;  %5047 = vmatprep.mubr.msk.bf16.mxu1 %vm1417_vm10, %v5802_v10 }
  0x6b   : > { %1341 = vrot.lane.b32.xlu0 %v5715_v43, %s5297_s28  ;;  %1217 = vrot.lane.b32.xlu1 %v5711_v40, %s5297_s28  ;;  %v498_v57 = vrot.slane %v496_v52, 7  ;;  %715 = vst [vmem:[#allocation2 + $0x84] sm:$0xf] %v714_v58  ;;  %v1016_v2 = vor.u32 %v1015_v49, %v1011_v48  ;;  %v1020_v3 = vrot.slane %v1018_v50, 1  ;;  %v1182_v4 = vrot.slane %v5838_v35, 1 }
  0x6c   : > { %v1023_v40 = vshrl.u32 %v5857_v55, 16  ;;  %v1025_v9 = vshll.u32 %v5857_v55, 16  ;;  %v507_v12 = vrot.slane %v505_v63, 7  ;;  %v1030_v13 = vshll.u32 %v5859_v56, 16  ;;  %v724_v16 = vld [vmem:[#allocation2 + $0x98] sm:$0x1] }
  0x6d   : > { %v501_v5 = vor.u32 %v499_v53, %v498_v57  ;;  %v503_v11 = vrot.slane %v498_v57, 4  ;;  %v515_v23 = vrot.slane %v513_v0, 7  ;;  %v516_v8 = vshll.u32 %v249_v46, 16  ;;  %v250_v26 = vld [vmem:[%s5566_s23 + $0x60] sm:$0xf]  ;;  %v5927_v63 = vld [vmem:[#allocation2 + $0x6c] sm:$0xff]  }
  0x6e   : > { %v510_v42 = vor.u32 %v508_v19, %v507_v12  ;;  %v5888_v18 = vsel %vm937_vm5, %v1016_v2, %v1020_v3  ;;  %v511_v1 = vrot.slane %v507_v12, 4  ;;  %v5891_v25 = vsel %vm1162_vm6, %v1181_v61, %v1182_v4  ;;  %v251_v30 = vld [vmem:[%s5566_s23 + $0x64] sm:$0xf]  ;;  %v5144_v35 = vld [vmem:[#allocation2 + $0x68] ss:$0 sps:$4 sm:$0x11]  }
  0x6f   : > { %1388 = vrot.lane.b32.xlu0 %v5843_v36, %s5299_s25  ;;  %1254 = vrot.lane.b32.xlu1 %v5675_v54, %s5299_s25  ;;  %v494_v54 = vrot.slane %v490_v37, 4  ;;  %v718_v41 = vsel %vm5622_vm9, %v503_v11, %v717_v62  ;;  %v518_v21 = vor.u32 %v516_v8, %v515_v23  ;;  %v520_v22 = vrot.slane %v515_v23, 4  ;;  %v727_v39 = vld [vmem:[#allocation2 + $0x9c] sm:$0xf]  ;;  %v5912_v46 = vld [vmem:[#allocation2 + $0x60] sm:$0xff]  }
  0x70   : > { %719 = vst [vmem:[#allocation2 + $0x8c] sm:$0x1] %v718_v41  ;;  %v1184_v27 = vrot.slane %v5857_v55, 1  ;;  %v522_v32 = vshrl.u32 %v250_v26, 16  ;;  %v1185_v33 = vrot.slane %v5859_v56, 1  ;;  %v525_v34 = vshll.u32 %v250_v26, 16 }
  0x71   : > { %v502_v15 = vsel %vm5577_vm7, %v494_v54, %v501_v5  ;;  %v519_v28 = vsel %vm5577_vm7, %v511_v1, %v518_v21  ;;  %v725_v29 = vsel %vm5622_vm9, %v520_v22, %v724_v16  ;;  %5048 = vmatmul.mubr.msk.bf16.gmra.mrb[4].mxu1 %vm1417_vm10, %v5853_v47  ;;  %v530_v37 = vshrl.u32 %v251_v30, 16  ;;  %v5919_v57 = vld [vmem:[#allocation2 + $0x74] ss:$0 sps:$4 sm:$0x11]   ;;  %v731_v0 = vld [vmem:[#allocation2 + $0xa4] sm:$0x1] }
  0x72   : > { %716 = vst.msk [vmem:[#allocation2 + $0x88] sm:$0xf] %vm258_vm0, %v502_v15  ;;  %723 = vst.msk [vmem:[#allocation2 + $0x94] sm:$0xf] %vm258_vm0, %v519_v28  ;;  %v533_v38 = vshll.u32 %v251_v30, 16  ;;  %v1027_v44 = vrot.slane %v1025_v9, 1  ;;  %5051 = vmatprep.mubr.msk.bf16.mxu1 %vm1417_vm10, %v5891_v25  ;;  %v5924_v61 = vsel %vm1162_vm6, %v1184_v27, %v1185_v33 }
  0x73   : > { %1306 = vrot.lane.b32.xlu0 %v5853_v47, %s5298_s8  ;;  %1138 = vrot.lane.b32.xlu1 %v5747_v14, %s5298_s8  ;;  %726 = vst [vmem:[#allocation2 + $0x98] sm:$0x1] %v725_v29  ;;  %v524_v45 = vrot.slane %v522_v32, 7  ;;  %v532_v48 = vrot.slane %v530_v37, 7  ;;  %v1187_v50 = vrot.slane %v5912_v46, 1  ;;  %v1188_v51 = vrot.slane %v5144_v35, 1 }
  0x74   : > { %v1028_v56 = vor.u32 %v1027_v44, %v1023_v40  ;;  %v1032_v54 = vrot.slane %v1030_v13, 1  ;;  %v1037_v62 = vshll.u32 %v5912_v46, 16  ;;  %v1035_v2 = vshrl.u32 %v5912_v46, 16  ;;  %v252_v9 = vld [vmem:[%s5566_s23 + $0x68] sm:$0xf]  ;;  %v5950_v12 = vld [vmem:[#allocation2 + $0x78] sm:$0xff]  }
  0x75   : > { %v527_v49 = vor.u32 %v525_v34, %v524_v45  ;;  %v535_v52 = vor.u32 %v533_v38, %v532_v48  ;;  %v537_v53 = vrot.slane %v532_v48, 4  ;;  %v1042_v4 = vshll.u32 %v5144_v35, 16  ;;  %v5952_v13 = vld [vmem:[#allocation2 + $0x80] ss:$0 sps:$4 sm:$0x11]  }
  0x76   : > { %v5942_v5 = vsel %vm1162_vm6, %v1187_v50, %v1188_v51  ;;  %v1191_v40 = vrot.slane %v5919_v57, 1  ;;  %v5948_v11 = vsel %vm937_vm5, %v1028_v56, %v1032_v54  ;;  %v253_v15 = vld [vmem:[%s5566_s23 + $0x6c] sm:$0xf]  ;;  %v1047_v23 = vshrl.u32 %v5927_v63, 16  ;;  %v734_v22 = vld [vmem:[#allocation2 + $0xa8] sm:$0xf] }
  0x77   : > { %1343 = vrot.lane.b32.xlu0 %v5820_v20, %s5297_s28  ;;  %1219 = vrot.lane.b32.xlu1 %v5802_v10, %s5297_s28  ;;  %v721_v10 = vsel %vm5586_vm8, %v510_v42, %v720_v7  ;;  %v728_v58 = vsel %vm5586_vm8, %v527_v49, %v727_v39  ;;  %v732_v3 = vsel %vm5622_vm9, %v537_v53, %v731_v0  ;;  %v1190_v7 = vrot.slane %v5927_v63, 1  ;;  %v254_v27 = vld [vmem:[%s5566_s23 + $0x70] sm:$0xf]  ;;  %v255_v28 = vld [vmem:[%s5566_s23 + $0x74] sm:$0xf] }
  0x78   : > { %722 = vst [vmem:[#allocation2 + $0x90] sm:$0xf] %v721_v10  ;;  %729 = vst [vmem:[#allocation2 + $0x9c] sm:$0xf] %v728_v58  ;;  %v539_v8 = vshrl.u32 %v252_v9, 16  ;;  %v542_v41 = vshll.u32 %v252_v9, 16 }
  0x79   : > { %5052 = vmatmul.mubr.msk.bf16.gmra.mrb[8].mxu1 %vm1417_vm10, %v5924_v61  ;;  %733 = vst [vmem:[#allocation2 + $0xa4] sm:$0x1] %v732_v3  ;;  %v1193_v42 = vrot.slane %v5950_v12, 1  ;;  %v1194_v16 = vrot.slane %v5952_v13, 1  ;;  %v547_v1 = vshrl.u32 %v253_v15, 16  ;;  %v550_v21 = vshll.u32 %v253_v15, 16 }
  0x7a   : > { %5055 = vmatprep.mubr.msk.bf16.mxu1 %vm1417_vm10, %v5942_v5  ;;  %v1049_v10 = vshll.u32 %v5927_v63, 16  ;;  %v541_v26 = vrot.slane %v539_v8, 7  ;;  %v1044_v29 = vrot.slane %v1042_v4, 1  ;;  %v5968_v30 = vsel %vm1162_vm6, %v1190_v7, %v1191_v40  ;;  %v738_v33 = vld [vmem:[#allocation2 + $0xb0] sm:$0x1]  ;;  %v5970_v35 = vld [vmem:[#allocation2 + $0x84] sm:$0xff]  }
  0x7b   : > { %1390 = vrot.lane.b32.xlu0 %v5888_v18, %s5299_s25  ;;  %1256 = vrot.lane.b32.xlu1 %v5715_v43, %s5299_s25  ;;  %v528_v43 = vrot.slane %v524_v45, 4  ;;  %v549_v32 = vrot.slane %v547_v1, 7  ;;  %v556_v38 = vshrl.u32 %v254_v27, 16  ;;  %v564_v39 = vshrl.u32 %v255_v28, 16  ;;  %v257_v3 = vld [vmem:[%s5566_s23 + $0x7c] sm:$0xf] }
  0x7c   : > { %v544_v34 = vor.u32 %v542_v41, %v541_v26  ;;  %v545_v37 = vrot.slane %v541_v26, 4  ;;  %v5981_v49 = vld [vmem:[#allocation2 + $0x8c] ss:$0 sps:$4 sm:$0x11]   ;;  %v559_v51 = vshll.u32 %v254_v27, 16 }
  0x7d   : > { %v536_v19 = vsel %vm5577_vm7, %v528_v43, %v535_v52  ;;  %v552_v45 = vor.u32 %v550_v21, %v549_v32  ;;  %v554_v48 = vrot.slane %v549_v32, 4  ;;  %v1196_v43 = vrot.slane %v5970_v35, 1  ;;  %v5988_v56 = vld [vmem:[#allocation2 + $0x98] ss:$0 sps:$4 sm:$0x11]  }
  0x7e   : > { %730 = vst.msk [vmem:[#allocation2 + $0xa0] sm:$0xf] %vm258_vm0, %v536_v19  ;;  %v735_v50 = vsel %vm5586_vm8, %v544_v34, %v734_v22  ;;  %v567_v52 = vshll.u32 %v255_v28, 16  ;;  %v1197_v19 = vrot.slane %v5981_v49, 1  ;;  %v558_v0 = vrot.slane %v556_v38, 7 }
  0x7f   : > { %1308 = vrot.lane.b32.xlu0 %v5891_v25, %s5298_s8  ;;  %1140 = vrot.lane.b32.xlu1 %v5843_v36, %s5298_s8  ;;  %v5986_v53 = vld [vmem:[#allocation2 + $0x90] sm:$0xff]   ;;  %v553_v54 = vsel %vm5577_vm7, %v545_v37, %v552_v45  ;;  %736 = vst [vmem:[#allocation2 + $0xa8] sm:$0xf] %v735_v50  ;;  %v739_v58 = vsel %vm5622_vm9, %v554_v48, %v738_v33  ;;  %v1200_v8 = vrot.slane %v5988_v56, 1  ;;  %v745_v1 = vld [vmem:[#allocation2 + $0xbc] sm:$0x1] }
  0x80   : > { %737 = vst.msk [vmem:[#allocation2 + $0xac] sm:$0xf] %vm258_vm0, %v553_v54  ;;  %740 = vst [vmem:[#allocation2 + $0xb0] sm:$0x1] %v739_v58  ;;  %v1199_v40 = vrot.slane %v5986_v53, 1  ;;  %v561_v41 = vor.u32 %v559_v51, %v558_v0  ;;  %v584_v28 = vshll.u32 %v257_v3, 16 }
  0x81   : > { %5056 = vmatmul.mubr.msk.bf16.gmra.mrb[12].mxu1 %vm1417_vm10, %v5968_v30  ;;  %v741_v9 = vld [vmem:[#allocation2 + $0xb4] sm:$0xf]  ;;  %v6009_v21 = vld [vmem:[#allocation2 + $0xa4] ss:$0 sps:$4 sm:$0x11]   ;;  %v1051_v48 = vrot.slane %v1049_v10, 1 }
  0x82   : > { %v748_v33 = vld [vmem:[#allocation2 + $0xc0] sm:$0xf]  ;;  %v752_v34 = vld [vmem:[#allocation2 + $0xc8] sm:$0x1]  ;;  %v6033_v50 = vsel %vm1162_vm6, %v1199_v40, %v1200_v8  ;;  %v1203_v54 = vrot.slane %v6009_v21, 1 }
  0x83   : > { %1345 = vrot.lane.b32.xlu0 %v5857_v55, %s5297_s28  ;;  %1221 = vrot.lane.b32.xlu1 %v5853_v47, %s5297_s28  ;;  %v1039_v47 = vrot.slane %v1037_v62, 1  ;;  %v256_v62 = vld [vmem:[%s5566_s23 + $0x78] sm:$0xf] }
  0x84   : > { %v573_v4 = vshrl.u32 %v256_v62, 16  ;;  %v576_v15 = vshll.u32 %v256_v62, 16 }
  0x85   : > { %v1040_v44 = vor.u32 %v1039_v47, %v1035_v2  ;;  %v566_v2 = vrot.slane %v564_v39, 7  ;;  %v581_v47 = vshrl.u32 %v257_v3, 16  ;;  %v6018_v37 = vld [vmem:[#allocation2 + $0x9c] sm:$0xff]  }
  0x86   : > { %v575_v26 = vrot.slane %v573_v4, 7 }
  0x87   : > { %1392 = vrot.lane.b32.xlu0 %v5948_v11, %s5299_s25  ;;  %1258 = vrot.lane.b32.xlu1 %v5820_v20, %s5299_s25  ;;  %v5973_v20 = vsel %vm1162_vm6, %v1193_v42, %v1194_v16  ;;  %v6001_v7 = vsel %vm937_vm5, %v1040_v44, %v1044_v29  ;;  %v562_v42 = vrot.slane %v558_v0, 4  ;;  %v569_v16 = vor.u32 %v567_v52, %v566_v2  ;;  %v6043_v10 = vld [vmem:[#allocation2 + $0xa8] sm:$0xff]  }
  0x88   : > { %5059 = vmatprep.mubr.msk.bf16.mxu1 %vm1417_vm10, %v5973_v20  ;;  %v571_v22 = vrot.slane %v566_v2, 4  ;;  %v583_v27 = vrot.slane %v581_v47, 7  ;;  %v6012_v29 = vsel %vm1162_vm6, %v1196_v43, %v1197_v19  ;;  %v578_v39 = vor.u32 %v576_v15, %v575_v26 }
  0x89   : > { %v570_v32 = vsel %vm5577_vm7, %v562_v42, %v569_v16  ;;  %v579_v44 = vrot.slane %v575_v26, 4  ;;  %5060 = vmatmul.mubr.msk.bf16.gmra.mrb[16].mxu1 %vm1417_vm10, %v6012_v29  ;;  %v1054_v43 = vshll.u32 %v5919_v57, 16  ;;  %v1202_v52 = vrot.slane %v6018_v37, 1  ;;  %v6045_v57 = vld [vmem:[#allocation2 + $0xb0] ss:$0 sps:$4 sm:$0x11]  }
  0x8a   : > { %744 = vst.msk [vmem:[#allocation2 + $0xb8] sm:$0xf] %vm258_vm0, %v570_v32  ;;  %v746_v38 = vsel %vm5622_vm9, %v571_v22, %v745_v1  ;;  %v586_v45 = vor.u32 %v584_v28, %v583_v27  ;;  %v588_v51 = vrot.slane %v583_v27, 4  ;;  %5063 = vmatprep.mubr.msk.bf16.mxu1 %vm1417_vm10, %v6033_v50  ;;  %v1205_v19 = vrot.slane %v6043_v10, 1 }
  0x8b   : > { %1310 = vrot.lane.b32.xlu0 %v5924_v61, %s5298_s8  ;;  %1142 = vrot.lane.b32.xlu1 %v5888_v18, %s5298_s8  ;;  %747 = vst [vmem:[#allocation2 + $0xbc] sm:$0x1] %v746_v38  ;;  %v1206_v0 = vrot.slane %v6045_v57, 1  ;;  %v1052_v2 = vor.u32 %v1051_v48, %v1047_v23  ;;  %v1056_v3 = vrot.slane %v1054_v43, 1  ;;  %v6059_v4 = vsel %vm1162_vm6, %v1202_v52, %v1203_v54 }
  0x8c   : > { %v587_v58 = vsel %vm5577_vm7, %v579_v44, %v586_v45  ;;  %v753_v62 = vsel %vm5622_vm9, %v588_v51, %v752_v34  ;;  %v1061_v47 = vshll.u32 %v5950_v12, 16  ;;  %v1059_v1 = vshrl.u32 %v5950_v12, 16 }
  0x8d   : > { %751 = vst.msk [vmem:[#allocation2 + $0xc4] sm:$0xf] %vm258_vm0, %v587_v58  ;;  %754 = vst [vmem:[#allocation2 + $0xc8] sm:$0x1] %v753_v62  ;;  %v6075_v23 = vsel %vm937_vm5, %v1052_v2, %v1056_v3  ;;  %v1071_v38 = vshrl.u32 %v5970_v35, 16  ;;  %v1078_v44 = vshll.u32 %v5981_v49, 16 }
  0x8e   : > { %v1063_v26 = vrot.slane %v1061_v47, 1  ;;  %v1085_v49 = vshll.u32 %v5986_v53, 16  ;;  %v1083_v58 = vshrl.u32 %v5986_v53, 16  ;;  %v1090_v62 = vshll.u32 %v5988_v56, 16 }
  0x8f   : > { %1347 = vrot.lane.b32.xlu0 %v5912_v46, %s5297_s28  ;;  %1223 = vrot.lane.b32.xlu1 %v5891_v25, %s5297_s28  ;;  %v742_v25 = vsel %vm5586_vm8, %v561_v41, %v741_v9  ;;  %v6070_v9 = vsel %vm1162_vm6, %v1205_v19, %v1206_v0  ;;  %v1080_v48 = vrot.slane %v1078_v44, 1  ;;  %v1097_v56 = vshll.u32 %v6018_v37, 16 }
  0x90   : > { %743 = vst [vmem:[#allocation2 + $0xb4] sm:$0xf] %v742_v25  ;;  %v1092_v0 = vrot.slane %v1090_v62, 1  ;;  %v1109_v44 = vshll.u32 %v6043_v10, 16  ;;  %v1114_v62 = vshll.u32 %v6045_v57, 16 }
  0x91   : > { %5064 = vmatmul.mubr.msk.bf16.gmra.mrb[20].mxu1 %vm1417_vm10, %v6059_v4 }
  0x92   : > { %v6072_v15 = vld [vmem:[#allocation2 + $0xbc] ss:$0 sps:$4 sm:$0x11]   ;;  %5067 = vmatprep.mubr.msk.bf16.mxu1 %vm1417_vm10, %v6070_v9 }
  0x93   : > { %1394 = vrot.lane.b32.xlu0 %v6001_v7, %s5299_s25  ;;  %1260 = vrot.lane.b32.xlu1 %v5857_v55, %s5299_s25  ;;  %v749_v55 = vsel %vm5586_vm8, %v578_v39, %v748_v33  ;;  %v1209_v41 = vrot.slane %v6072_v15, 1  ;;  %v1064_v33 = vor.u32 %v1063_v26, %v1059_v1  ;;  %v1102_v1 = vshll.u32 %v6009_v21, 16 }
  0x94   : > { %750 = vst [vmem:[#allocation2 + $0xc0] sm:$0xf] %v749_v55  ;;  %v6085_v16 = vld [vmem:[#allocation2 + $0xc8] ss:$0 sps:$4 sm:$0x11]   ;;  %v1087_v55 = vrot.slane %v1085_v49, 1 }
  0x95   : > { %v1296_v27 = vrot.slane %v6085_v16, 1 }
  0x96   : > { %v1088_v19 = vor.u32 %v1087_v55, %v1083_v58  ;;  %v1107_v55 = vshrl.u32 %v6043_v10, 16 }
  0x97   : > { %1312 = vrot.lane.b32.xlu0 %v5942_v5, %s5298_s8  ;;  %1144 = vrot.lane.b32.xlu1 %v5948_v11, %s5298_s8  ;;  %v6061_v40 = vld [vmem:[#allocation2 + $0xb4] sm:$0xff]  }
  0x98   : > { %v1208_v8 = vrot.slane %v6061_v40, 1  ;;  %v6151_v3 = vsel %vm937_vm5, %v1088_v19, %v1092_v0 }
  0x9a   : > { %v6095_v28 = vsel %vm1162_vm6, %v1208_v8, %v1209_v41  ;;  %v1095_v41 = vshrl.u32 %v6018_v37, 16 }
  0x9b   : > { %1349 = vrot.lane.b32.xlu0 %v5927_v63, %s5297_s28  ;;  %1225 = vrot.lane.b32.xlu1 %v5924_v61, %s5297_s28  ;;  %v6082_v42 = vld [vmem:[#allocation2 + $0xc0] sm:$0xff]   ;;  %v1066_v61 = vshll.u32 %v5952_v13, 16  ;;  %v1073_v13 = vshll.u32 %v5970_v35, 16 }
  0x9c   : > { %v1295_v22 = vrot.slane %v6082_v42, 1  ;;  %5068 = vmatmul.mubr.msk.bf16.gmra.mrb[24].mxu1 %vm1417_vm10, %v6095_v28 }
  0x9d   : > { %v1068_v32 = vrot.slane %v1066_v61, 1  ;;  %v1075_v39 = vrot.slane %v1073_v13, 1  ;;  %v1099_v61 = vrot.slane %v1097_v56, 1 }
  0x9e   : > { %v6105_v25 = vsel %vm1162_vm6, %v1295_v22, %v1296_v27  ;;  %v1104_v27 = vrot.slane %v1102_v1, 1 }
  0x9f   : > { %1396 = vrot.lane.b32.xlu0 %v6075_v23, %s5299_s25  ;;  %1262 = vrot.lane.b32.xlu1 %v5912_v46, %s5299_s25  ;;  %v6114_v34 = vsel %vm937_vm5, %v1064_v33, %v1068_v32  ;;  %v1076_v45 = vor.u32 %v1075_v39, %v1071_v38  ;;  %v1100_v26 = vor.u32 %v1099_v61, %v1095_v41  ;;  %v5235_v38 = vld [vmem:[#allocation2] sm:$0xff]   ;;  %v1116_v61 = vrot.slane %v1114_v62, 1 }
  0xa0   : > { %5071 = vmatprep.mubr.msk.bf16.mxu1 %vm1417_vm10, %v6105_v25 }
  0xa1   : > { %v6131_v51 = vsel %vm937_vm5, %v1076_v45, %v1080_v48  ;;  %v6172_v21 = vsel %vm937_vm5, %v1100_v26, %v1104_v27  ;;  %v1121_v27 = vshll.u32 %v6061_v40, 16 }
  0xa3   : > { %1314 = vrot.lane.b32.xlu0 %v5968_v30, %s5298_s8  ;;  %1146 = vrot.lane.b32.xlu1 %v6001_v7, %s5298_s8 }
  0xa7   : > { %1351 = vrot.lane.b32.xlu0 %v5950_v12, %s5297_s28  ;;  %1227 = vrot.lane.b32.xlu1 %v5942_v5, %s5297_s28 }
  0xab   : > { %1398 = vrot.lane.b32.xlu0 %v6114_v34, %s5299_s25  ;;  %1264 = vrot.lane.b32.xlu1 %v5927_v63, %s5299_s25 }
  0xaf   : > { %1316 = vrot.lane.b32.xlu0 %v5973_v20, %s5298_s8  ;;  %1148 = vrot.lane.b32.xlu1 %v6075_v23, %s5298_s8 }
  0xb2   : > { %v1212_v43 = vpop.permute.xlu1 %1211 }
  0xb3   : > { %1353 = vrot.lane.b32.xlu0 %v5970_v35, %s5297_s28  ;;  %1229 = vrot.lane.b32.xlu1 %v5968_v30, %s5297_s28 }
  0xb4   : > { %v1131_v5 = vpop.permute.xlu0 %1130 }
  0xb5   : > { %v1419_v39 = vsel %vm1417_vm10, %v5235_v38, %v1131_v5  ;;  %v5237_v38 = vld [vmem:[#allocation2 + $0x18] sm:$0xff]  }
  0xb6   : > { %v1452_v58 = vsel %vm1450_vm11, %v1419_v39, %v1212_v43  ;;  %v1123_v39 = vrot.slane %v1121_v27, 1 }
  0xb7   : > { %1400 = vrot.lane.b32.xlu0 %v6131_v51, %s5299_s25  ;;  %1266 = vrot.lane.b32.xlu1 %v5950_v12, %s5299_s25 }
  0xb9   : > { %v1338_v52 = vpop.permute.xlu0 %1337  ;;  %v1336_v54 = vpop.permute.xlu1 %1335 }
  0xbb   : > { %1318 = vrot.lane.b32.xlu0 %v6012_v29, %s5298_s8  ;;  %1150 = vrot.lane.b32.xlu1 %v6114_v34, %s5298_s8 }
  0xbd   : > { %v6144_v30 = vpop.permute.xlu0 %1339  ;;  %v1249_v2 = vpop.permute.xlu1 %1248 }
  0xbf   : > { %1355 = vrot.lane.b32.xlu0 %v5986_v53, %s5297_s28  ;;  %1231 = vrot.lane.b32.xlu1 %v5973_v20, %s5297_s28 }
  0xc1   : > { %v1251_v47 = vpop.permute.xlu1 %1250  ;;  %v1299_v8 = vpop.permute.xlu0 %1298 }
  0xc2   : > { %v1534_v33 = vsel %vm1417_vm10, %v5732_v59, %v1299_v8 }
  0xc3   : > { %1402 = vrot.lane.b32.xlu0 %v6151_v3, %s5299_s25  ;;  %1268 = vrot.lane.b32.xlu1 %v5970_v35, %s5299_s25  ;;  %v1581_v59 = vsel %vm1450_vm11, %v1534_v33, %v1336_v54  ;;  %v1111_v54 = vrot.slane %v1109_v44, 1  ;;  %v1126_v44 = vshll.u32 %v6072_v15, 16 }
  0xc5   : > { %v1214_v22 = vpop.permute.xlu1 %1213  ;;  %v1301_v20 = vpop.permute.xlu0 %1300  ;;  %v1112_v41 = vor.u32 %v1111_v54, %v1107_v55  ;;  %v1128_v15 = vrot.slane %v1126_v44, 1 }
  0xc6   : > { %v1537_v5 = vsel %vm1417_vm10, %v5703_v31, %v1301_v20  ;;  %v5236_v31 = vld [vmem:[#allocation2 + $0xc] sm:$0xff]  }
  0xc7   : > { %1320 = vrot.lane.b32.xlu0 %v6033_v50, %s5298_s8  ;;  %1152 = vrot.lane.b32.xlu1 %v6131_v51, %s5298_s8  ;;  %v1583_v56 = vsel %vm1450_vm11, %v1537_v5, %v1338_v52  ;;  %v5238_v5 = vld [vmem:[#allocation2 + $0x24] sm:$0xff]  }
  0xc9   : > { %v1216_v32 = vpop.permute.xlu1 %1215  ;;  %v1303_v13 = vpop.permute.xlu0 %1302 }
  0xcb   : > { %1357 = vrot.lane.b32.xlu0 %v6018_v37, %s5297_s28  ;;  %1233 = vrot.lane.b32.xlu1 %v6012_v29, %s5297_s28  ;;  %v1485_v29 = vsel %vm1483_vm12, %v1452_v58, %v1249_v2  ;;  %v1540_v2 = vsel %vm1417_vm10, %v5735_v60, %v1303_v13 }
  0xcc   : > { %v1585_v26 = vsel %vm1450_vm11, %v1540_v2, %v6144_v30  ;;  %v1119_v30 = vshrl.u32 %v6061_v40, 16  ;;  %v5179_v2 = vld [vmem:[#allocation2 + $0xcc] sm:$0xff]  }
  0xcd   : > { %v1383_v45 = vpop.permute.xlu0 %1382  ;;  %v1133_v48 = vpop.permute.xlu1 %1132 }
  0xce   : > { %v1613_v49 = vsel %vm1483_vm12, %v1581_v59, %v1383_v45  ;;  %v1421_v19 = vsel %vm1417_vm10, %v5236_v31, %v1133_v48 }
  0xcf   : > { %1404 = vrot.lane.b32.xlu0 %v6172_v21, %s5299_s25  ;;  %1891 = vmatprep.mubr.bf16.mxu0 %v1613_v49  ;;  %v1454_v57 = vsel %vm1450_vm11, %v1421_v19, %v1214_v22  ;;  %v6206_v22 = vsel %vm937_vm5, %v1112_v41, %v1116_v61  ;;  %v1286_v19 = vshll.u32 %v6082_v42, 16 }
  0xd0   : > { %1270 = vrot.lane.b32.xlu1 %v5986_v53, %s5299_s25  ;;  %1892 = vmatmul.mubr.bf16.vlgmr.msra.gmra.mrb[0].mxu0 %v1485_v29  ;;  %v1488_v52 = vsel %vm1483_vm12, %v1454_v57, %v1251_v47  ;;  %v1124_v29 = vor.u32 %v1123_v39, %v1119_v30  ;;  %v5180_v57 = vld [vmem:[#allocation2 + $0xd4] ss:$0 sps:$4 sm:$0x11]  }
  0xd1   : > { %v1385_v0 = vpop.permute.xlu0 %1384  ;;  %v1135_v43 = vpop.permute.xlu1 %1134  ;;  %v1415_v27 = vrot.slane %v5180_v57, 1 }
  0xd2   : > { %v1616_v8 = vsel %vm1483_vm12, %v1583_v56, %v1385_v0  ;;  %v1423_v47 = vsel %vm1417_vm10, %v5237_v38, %v1135_v43  ;;  %v6233_v31 = vsel %vm937_vm5, %v1124_v29, %v1128_v15  ;;  %v1378_v29 = vshll.u32 %v5180_v57, 16 }
  0xd3   : > { %1322 = vrot.lane.b32.xlu0 %v6059_v4, %s5298_s8  ;;  %1899 = vmatprep.mubr.bf16.mxu0 %v1616_v8  ;;  %v1456_v59 = vsel %vm1450_vm11, %v1423_v47, %v1216_v32  ;;  %v1284_v8 = vshrl.u32 %v6082_v42, 16 }
  0xd4   : > { %1154 = vrot.lane.b32.xlu1 %v6151_v3, %s5298_s8 }
  0xd5   : > { %v1387_v1 = vpop.permute.xlu0 %1386  ;;  %v1253_v20 = vpop.permute.xlu1 %1252 }
  0xd6   : > { %v1619_v60 = vsel %vm1483_vm12, %v1585_v26, %v1387_v1  ;;  %v1288_v1 = vrot.slane %v1286_v19, 1 }
  0xd7   : > { %1359 = vrot.lane.b32.xlu0 %v6043_v10, %s5297_s28 }
  0xd8   : > { %1235 = vrot.lane.b32.xlu1 %v6033_v50, %s5297_s28  ;;  %1900 = vmatmul.mubr.bf16.gmra.mrb[4].mxu0 %v1488_v52  ;;  %v1289_v38 = vor.u32 %v1288_v1, %v1284_v8 }
  0xd9   : > { %v1305_v13 = vpop.permute.xlu0 %1304  ;;  %1907 = vmatprep.mubr.bf16.mxu0 %v1619_v60  ;;  %v1137_v33 = vpop.permute.xlu1 %1136  ;;  %v1414_v60 = vrot.slane %v5179_v2, 1 }
  0xda   : > { %v1543_v50 = vsel %vm1417_vm10, %v5747_v14, %v1305_v13  ;;  %v1425_v49 = vsel %vm1417_vm10, %v5238_v5, %v1137_v33  ;;  %v1491_v14 = vsel %vm1483_vm12, %v1456_v59, %v1253_v20  ;;  %v1291_v20 = vshll.u32 %v6085_v16, 16 }
  0xdb   : > { %1406 = vrot.lane.b32.xlu0 %v6206_v22, %s5299_s25  ;;  %v1371_v5 = vshrl.u32 %v5179_v2, 16 }
  0xdc   : > { %1272 = vrot.lane.b32.xlu1 %v6018_v37, %s5299_s25  ;;  %v1293_v47 = vrot.slane %v1291_v20, 1 }
  0xdd   : > { %v1342_v45 = vpop.permute.xlu0 %1341  ;;  %v1218_v48 = vpop.permute.xlu1 %1217 }
  0xde   : > { %v1587_v58 = vsel %vm1450_vm11, %v1543_v50, %v1342_v45  ;;  %v1458_v32 = vsel %vm1450_vm11, %v1425_v49, %v1218_v48  ;;  %v6261_v44 = vsel %vm937_vm5, %v1289_v38, %v1293_v47  ;;  %v1373_v45 = vshll.u32 %v5179_v2, 16 }
  0xdf   : > { %1324 = vrot.lane.b32.xlu0 %v6070_v9, %s5298_s8 }
  0xe0   : > { %1156 = vrot.lane.b32.xlu1 %v6172_v21, %s5298_s8  ;;  %1908 = vmatmul.mubr.bf16.gmra.mrb[8].mxu0 %v1491_v14 }
  0xe1   : > { %v1389_v55 = vpop.permute.xlu0 %1388  ;;  %v1255_v54 = vpop.permute.xlu1 %1254 }
  0xe2   : > { %v1622_v62 = vsel %vm1483_vm12, %v1587_v58, %v1389_v55  ;;  %v1494_v56 = vsel %vm1483_vm12, %v1458_v32, %v1255_v54  ;;  %v5240_v58 = vld [vmem:[#allocation2 + $0x3c] sm:$0xff]  }
  0xe3   : > { %1361 = vrot.lane.b32.xlu0 %v6061_v40, %s5297_s28  ;;  %1915 = vmatprep.mubr.bf16.mxu0 %v1622_v62  ;;  %v1380_v62 = vrot.slane %v1378_v29, 1 }
  0xe4   : > { %1237 = vrot.lane.b32.xlu1 %v6059_v4, %s5297_s28  ;;  %v5239_v4 = vld [vmem:[#allocation2 + $0x30] sm:$0xff]  }
  0xe5   : > { %v1307_v0 = vpop.permute.xlu0 %1306  ;;  %v1139_v43 = vpop.permute.xlu1 %1138 }
  0xe6   : > { %v1546_v41 = vsel %vm1417_vm10, %v5843_v36, %v1307_v0  ;;  %v1427_v61 = vsel %vm1417_vm10, %v5239_v4, %v1139_v43  ;;  %v1416_v36 = vsel %vm1162_vm6, %v1414_v60, %v1415_v27  ;;  %v5241_v4 = vld [vmem:[#allocation2 + $0x48] sm:$0xff]  }
  0xe7   : > { %1408 = vrot.lane.b32.xlu0 %v6233_v31, %s5299_s25  ;;  %5072 = vmatmul.mubr.msk.bf16.gmra.mrb[28].mxu1 %vm1417_vm10, %v1416_v36 }
  0xe8   : > { %1274 = vrot.lane.b32.xlu1 %v6043_v10, %s5299_s25  ;;  %1916 = vmatmul.mubr.bf16.gmra.mrb[12].mxu0 %v1494_v56 }
  0xe9   : > { %v1344_v52 = vpop.permute.xlu0 %1343  ;;  %v1220_v26 = vpop.permute.xlu1 %1219 }
  0xea   : > { %v1589_v13 = vsel %vm1450_vm11, %v1546_v41, %v1344_v52  ;;  %v1460_v33 = vsel %vm1450_vm11, %v1427_v61, %v1220_v26 }
  0xeb   : > { %1326 = vrot.lane.b32.xlu0 %v6095_v28, %s5298_s8 }
  0xec   : > { %1158 = vrot.lane.b32.xlu1 %v6206_v22, %s5298_s8 }
  0xed   : > { %v1391_v16 = vpop.permute.xlu0 %1390  ;;  %v1257_v50 = vpop.permute.xlu1 %1256 }
  0xee   : > { %v1625_v30 = vsel %vm1483_vm12, %v1589_v13, %v1391_v16  ;;  %v1497_v39 = vsel %vm1483_vm12, %v1460_v33, %v1257_v50 }
  0xef   : > { %1363 = vrot.lane.b32.xlu0 %v6082_v42, %s5297_s28  ;;  %1923 = vmatprep.mubr.bf16.mxu0 %v1625_v30 }
  0xf0   : > { %1239 = vrot.lane.b32.xlu1 %v6070_v9, %s5297_s28  ;;  %1924 = vmatmul.mubr.bf16.gmra.mrb[16].mxu0 %v1497_v39  ;;  %v1375_v9 = vrot.slane %v1373_v45, 1 }
  0xf1   : > { %v1309_v48 = vpop.permute.xlu0 %1308  ;;  %v1141_v59 = vpop.permute.xlu1 %1140 }
  0xf2   : > { %v1549_v49 = vsel %vm1417_vm10, %v5888_v18, %v1309_v48  ;;  %v1429_v14 = vsel %vm1417_vm10, %v5240_v58, %v1141_v59  ;;  %v1376_v18 = vor.u32 %v1375_v9, %v1371_v5 }
  0xf3   : > { %1410 = vrot.lane.b32.xlu0 %v6261_v44, %s5299_s25 }
  0xf4   : > { %1276 = vrot.lane.b32.xlu1 %v6061_v40, %s5299_s25 }
  0xf5   : > { %v1346_v15 = vpop.permute.xlu0 %1345  ;;  %v1222_v55 = vpop.permute.xlu1 %1221 }
  0xf6   : > { %v1591_v54 = vsel %vm1450_vm11, %v1549_v49, %v1346_v15  ;;  %v1462_v32 = vsel %vm1450_vm11, %v1429_v14, %v1222_v55 }
  0xf7   : > { %1328 = vrot.lane.b32.xlu0 %v6105_v25, %s5298_s8  ;;  %v1381_v25 = vsel %vm937_vm5, %v1376_v18, %v1380_v62 }
  0xf8   : > { %1160 = vrot.lane.b32.xlu1 %v6233_v31, %s5298_s8 }
  0xf9   : > { %v1393_v19 = vpop.permute.xlu0 %1392  ;;  %v1259_v0 = vpop.permute.xlu1 %1258 }
  0xfa   : > { %v1628_v43 = vsel %vm1483_vm12, %v1591_v54, %v1393_v19  ;;  %v1500_v56 = vsel %vm1483_vm12, %v1462_v32, %v1259_v0 }
  0xfb   : > { %1365 = vrot.lane.b32.xlu0 %v5179_v2, %s5297_s28  ;;  %1931 = vmatprep.mubr.bf16.mxu0 %v1628_v43 }
  0xfc   : > { %1241 = vrot.lane.b32.xlu1 %v6095_v28, %s5297_s28  ;;  %1932 = vmatmul.mubr.bf16.gmra.mrb[20].mxu0 %v1500_v56 }
  0xfd   : > { %v1311_v8 = vpop.permute.xlu0 %1310  ;;  %v1143_v57 = vpop.permute.xlu1 %1142 }
  0xfe   : > { %v1552_v41 = vsel %vm1417_vm10, %v5948_v11, %v1311_v8  ;;  %v1431_v61 = vsel %vm1417_vm10, %v5241_v4, %v1143_v57 }
  0xff   : > { %1412 = vrot.lane.b32.xlu0 %v1381_v25, %s5299_s25 }
 0x100   : > { %1278 = vrot.lane.b32.xlu1 %v6082_v42, %s5299_s25  ;;  %v5242_v42 = vld [vmem:[#allocation2 + $0x54] sm:$0xff]  }
 0x101   : > { %v1348_v2 = vpop.permute.xlu0 %1347  ;;  %v1224_v1 = vpop.permute.xlu1 %1223 }
 0x102   : > { %v1593_v28 = vsel %vm1450_vm11, %v1552_v41, %v1348_v2  ;;  %v1464_v20 = vsel %vm1450_vm11, %v1431_v61, %v1224_v1 }
 0x105   : > { %v1395_v52 = vpop.permute.xlu0 %1394  ;;  %v1261_v26 = vpop.permute.xlu1 %1260 }
 0x106   : > { %v1631_v60 = vsel %vm1483_vm12, %v1593_v28, %v1395_v52  ;;  %v1503_v27 = vsel %vm1483_vm12, %v1464_v20, %v1261_v26  ;;  %v5181_v28 = vld [vmem:[#allocation3] sm:$0xff]   ;;  %v5182_v26 = vld [vmem:[#allocation3 + $0x8] ss:$0 sps:$4 sm:$0x11]  }
 0x107   : > { %1939 = vmatprep.mubr.bf16.mxu0 %v1631_v60  ;;  %v2981_v60 = vshll.u32 %v5181_v28, 16 }
 0x108   : > { %1940 = vmatmul.mubr.bf16.gmra.mrb[24].mxu0 %v1503_v27 }
 0x109   : > { %v1313_v11 = vpop.permute.xlu0 %1312  ;;  %v1145_v13 = vpop.permute.xlu1 %1144 }
 0x10a   : > { %v1555_v33 = vsel %vm1417_vm10, %v6001_v7, %v1313_v11  ;;  %v1433_v36 = vsel %vm1417_vm10, %v5242_v42, %v1145_v13  ;;  %v2979_v42 = vshrl.u32 %v5181_v28, 16 }
 0x10d   : > { %v1350_v38 = vpop.permute.xlu0 %1349  ;;  %v1226_v47 = vpop.permute.xlu1 %1225 }
 0x10e   : > { %v1595_v16 = vsel %vm1450_vm11, %v1555_v33, %v1350_v38  ;;  %v1466_v50 = vsel %vm1450_vm11, %v1433_v36, %v1226_v47  ;;  %v2986_v36 = vshll.u32 %v5182_v26, 16 }
 0x111   : > { %v1397_v30 = vpop.permute.xlu0 %1396  ;;  %v1263_v39 = vpop.permute.xlu1 %1262 }
 0x112   : > { %v1634_v45 = vsel %vm1483_vm12, %v1595_v16, %v1397_v30  ;;  %v1506_v48 = vsel %vm1483_vm12, %v1466_v50, %v1263_v39  ;;  %v2988_v16 = vrot.slane %v2986_v36, 1  ;;  %v3202_v39 = vrot.slane %v5181_v28, 1 }
 0x113   : > { %1947 = vmatprep.mubr.bf16.mxu0 %v1634_v45  ;;  %v3203_v45 = vrot.slane %v5182_v26, 1 }
 0x114   : > { %1948 = vmatmul.mubr.bf16.gmra.mrb[28].mxu0 %v1506_v48 }
 0x115   : > { %v1315_v59 = vpop.permute.xlu0 %1314  ;;  %v1147_v5 = vpop.permute.xlu1 %1146 }
 0x116   : > { %v1558_v7 = vsel %vm1417_vm10, %v6075_v23, %v1315_v59  ;;  %v1435_v49 = vsel %vm1417_vm10, %v5912_v46, %v1147_v5 }
 0x119   : > { %v1352_v58 = vpop.permute.xlu0 %1351  ;;  %v1228_v14 = vpop.permute.xlu1 %1227 }
 0x11a   : > { %v1597_v9 = vsel %vm1450_vm11, %v1558_v7, %v1352_v58  ;;  %v1468_v29 = vsel %vm1450_vm11, %v1435_v49, %v1228_v14  ;;  %v3204_v7 = vsel %vm1162_vm6, %v3202_v39, %v3203_v45 }
 0x11d   : > { %v1399_v15 = vpop.permute.xlu0 %1398  ;;  %v1265_v55 = vpop.permute.xlu1 %1264 }
 0x11e   : > { %v1637_v54 = vsel %vm1483_vm12, %v1597_v9, %v1399_v15  ;;  %v1509_v32 = vsel %vm1483_vm12, %v1468_v29, %v1265_v55 }
 0x11f   : > { %1955 = vmatprep.mubr.bf16.mxu0 %v1637_v54 }
 0x120   : > { %1956 = vmatmul.mubr.bf16.gmra.mrb[32].mxu0 %v1509_v32 }
 0x121   : > { %v1317_v18 = vpop.permute.xlu0 %1316  ;;  %v1149_v62 = vpop.permute.xlu1 %1148 }
 0x122   : > { %v1561_v23 = vsel %vm1417_vm10, %v6114_v34, %v1317_v18  ;;  %v1437_v46 = vsel %vm1417_vm10, %v5927_v63, %v1149_v62 }
 0x125   : > { %v1354_v19 = vpop.permute.xlu0 %1353  ;;  %v1230_v0 = vpop.permute.xlu1 %1229 }
 0x126   : > { %v1599_v43 = vsel %vm1450_vm11, %v1561_v23, %v1354_v19  ;;  %v1470_v56 = vsel %vm1450_vm11, %v1437_v46, %v1230_v0 }
 0x129   : > { %v1401_v25 = vpop.permute.xlu0 %1400  ;;  %v1267_v8 = vpop.permute.xlu1 %1266 }
 0x12a   : > { %v1640_v57 = vsel %vm1483_vm12, %v1599_v43, %v1401_v25  ;;  %v1512_v41 = vsel %vm1483_vm12, %v1470_v56, %v1267_v8 }
 0x12b   : > { %1963 = vmatprep.mubr.bf16.mxu0 %v1640_v57 }
 0x12c   : > { %1964 = vmatmul.mubr.bf16.gmra.mrb[36].mxu0 %v1512_v41 }
 0x12d   : > { %v1319_v4 = vpop.permute.xlu0 %1318  ;;  %v1151_v61 = vpop.permute.xlu1 %1150 }
 0x12e   : > { %v1564_v34 = vsel %vm1417_vm10, %v6131_v51, %v1319_v4  ;;  %v1439_v63 = vsel %vm1417_vm10, %v5950_v12, %v1151_v61  ;;  %v2983_v51 = vrot.slane %v2981_v60, 1 }
 0x130   : > { %v2984_v12 = vor.u32 %v2983_v51, %v2979_v42 }
 0x131   : > { %v1356_v2 = vpop.permute.xlu0 %1355  ;;  %v1232_v1 = vpop.permute.xlu1 %1231 }
 0x132   : > { %v1601_v20 = vsel %vm1450_vm11, %v1564_v34, %v1356_v2  ;;  %v1472_v52 = vsel %vm1450_vm11, %v1439_v63, %v1232_v1  ;;  %v2989_v50 = vsel %vm937_vm5, %v2984_v12, %v2988_v16  ;;  %v5188_v2 = vld [vmem:[%s7483_s3 + $0x88] sm:$0xff]  }
 0x133   : > { %3170 = vrot.lane.b32.xlu1 %v2989_v50, %s5298_s8 }
 0x135   : > { %v1403_v27 = vpop.permute.xlu0 %1402  ;;  %v1269_v11 = vpop.permute.xlu1 %1268 }
 0x136   : > { %v1643_v13 = vsel %vm1483_vm12, %v1601_v20, %v1403_v27  ;;  %v1515_v33 = vsel %vm1483_vm12, %v1472_v52, %v1269_v11 }
 0x137   : > { %1971 = vmatprep.mubr.bf16.mxu0 %v1643_v13  ;;  %3250 = vrot.lane.b32.xlu1 %v3204_v7, %s5297_s28 }
 0x138   : > { %1972 = vmatmul.mubr.bf16.gmra.mrb[40].mxu0 %v1515_v33 }
 0x139   : > { %v1321_v38 = vpop.permute.xlu0 %1320  ;;  %v1153_v47 = vpop.permute.xlu1 %1152 }
 0x13a   : > { %v1567_v30 = vsel %vm1417_vm10, %v6151_v3, %v1321_v38  ;;  %v1441_v48 = vsel %vm1417_vm10, %v5970_v35, %v1153_v47 }
 0x13c   : > { %v6335_v35 = vpop.f32.mrb[0].mxu1 }
 0x13d   : > { %v1358_v59 = vpop.permute.xlu0 %1357  ;;  %v1234_v5 = vpop.permute.xlu1 %1233 }
 0x13e   : > { %v1603_v49 = vsel %vm1450_vm11, %v1567_v30, %v1358_v59  ;;  %v1474_v58 = vsel %vm1450_vm11, %v1441_v48, %v1234_v5  ;;  %v6337_v54 = vpop.f32.mrb[1].mxu1 }
 0x13f   : > { %v6339_v32 = vpop.f32.mrb[2].mxu1 }
 0x140   : > { %v6343_v62 = vpop.f32.mrb[3].mxu1 }
 0x141   : > { %v1405_v14 = vpop.permute.xlu0 %1404 }
 0x142   : > { %v1271_v9 = vpop.permute.xlu1 %1270  ;;  %v1646_v3 = vsel %vm1483_vm12, %v1603_v49, %v1405_v14 }
 0x143   : > { %1979 = vmatprep.mubr.bf16.mxu0 %v1646_v3  ;;  %v1518_v29 = vsel %vm1483_vm12, %v1474_v58, %v1271_v9 }
 0x144   : > { %1980 = vmatmul.mubr.bf16.gmra.mrb[44].mxu0 %v1518_v29  ;;  %v6349_v25 = vpop.f32.mrb[4].mxu1 }
 0x145   : > { %v1323_v15 = vpop.permute.xlu0 %1322  ;;  %v6352_v41 = vpop.f32.mrb[5].mxu1 }
 0x146   : > { %v1155_v55 = vpop.permute.xlu1 %1154  ;;  %v1570_v18 = vsel %vm1417_vm10, %v6172_v21, %v1323_v15  ;;  %v6355_v4 = vpop.f32.mrb[6].mxu1 }
 0x147   : > { %v1443_v23 = vsel %vm1417_vm10, %v5986_v53, %v1155_v55  ;;  %v6360_v53 = vld [vmem:[%s7483_s3 + $0x80] sm:$0xff]   ;;  %v6362_v61 = vpop.f32.mrb[7].mxu1 }
 0x148   : > { %5075 = vmatprep.subr.bf16.mxu0 %v6360_v53 }
 0x149   : > { %v1360_v46 = vpop.permute.xlu0 %1359  ;;  %5076 = vmatpush3.bf16.msra.mxu0 %v6360_v53 }
 0x14a   : > { %v1236_v19 = vpop.permute.xlu1 %1235  ;;  %v1605_v0 = vsel %vm1450_vm11, %v1570_v18, %v1360_v46  ;;  %5077 = vmatprep.subr.bf16.mxu0 %v5188_v2 }
 0x14b   : > { %v1476_v43 = vsel %vm1450_vm11, %v1443_v23, %v1236_v19 }
 0x14c   : > { %v6373_v52 = vpop.f32.mrb[8].mxu1 }
 0x14d   : > { %v1407_v56 = vpop.permute.xlu0 %1406  ;;  %v6375_v60 = vpop.f32.mrb[9].mxu1  ;;  %5078 = vmatpush3.bf16.msra.mxu0 %v5188_v2 }
 0x14e   : > { %v1273_v8 = vpop.permute.xlu1 %1272  ;;  %v1649_v57 = vsel %vm1483_vm12, %v1605_v0, %v1407_v56  ;;  %v6378_v11 = vpop.f32.mrb[10].mxu1 }
 0x14f   : > { %1987 = vmatprep.mubr.bf16.mxu0 %v1649_v57  ;;  %v1521_v21 = vsel %vm1483_vm12, %v1476_v43, %v1273_v8  ;;  %v6381_v33 = vpop.f32.mrb[11].mxu1 }
 0x150   : > { %1988 = vmatmul.mubr.bf16.gmra.mrb[48].mxu0 %v1521_v21 }
 0x151   : > { %v1325_v34 = vpop.permute.xlu0 %1324 }
 0x152   : > { %v1157_v63 = vpop.permute.xlu1 %1156  ;;  %v1573_v1 = vsel %vm1417_vm10, %v6206_v22, %v1325_v34 }
 0x153   : > { %v1445_v28 = vsel %vm1417_vm10, %v6018_v37, %v1157_v63 }
 0x154   : > { %v6391_v45 = vpop.f32.mrb[12].mxu1 }
 0x155   : > { %v1362_v20 = vpop.permute.xlu0 %1361  ;;  %v6393_v59 = vpop.f32.mrb[13].mxu1 }
 0x156   : > { %v1238_v26 = vpop.permute.xlu1 %1237  ;;  %v1607_v27 = vsel %vm1450_vm11, %v1573_v1, %v1362_v20  ;;  %v6397_v49 = vpop.f32.mrb[14].mxu1  ;;  %v6428_v1 = vld [vmem:[%s7482_s2] ss:$0 sm:$0xff] }
 0x157   : > { %v1478_v13 = vsel %vm1450_vm11, %v1445_v28, %v1238_v26  ;;  %v6399_v58 = vpop.f32.mrb[15].mxu1 }
 0x159   : > { %v1409_v22 = vpop.permute.xlu0 %1408 }
 0x15a   : > { %v1275_v42 = vpop.permute.xlu1 %1274  ;;  %v1652_v37 = vsel %vm1483_vm12, %v1607_v27, %v1409_v22 }
 0x15b   : > { %1995 = vmatprep.mubr.bf16.mxu0 %v1652_v37  ;;  %v1524_v51 = vsel %vm1483_vm12, %v1478_v13, %v1275_v42 }
 0x15c   : > { %1996 = vmatmul.mubr.bf16.gmra.mrb[52].mxu0 %v1524_v51  ;;  %v6409_v43 = vpop.f32.mrb[16].mxu1 }
 0x15d   : > { %v1327_v36 = vpop.permute.xlu0 %1326 }
 0x15e   : > { %v1159_v12 = vpop.permute.xlu1 %1158  ;;  %v1576_v38 = vsel %vm1417_vm10, %v6233_v31, %v1327_v36 }
 0x15f   : > { %v1447_v47 = vsel %vm1417_vm10, %v6043_v10, %v1159_v12  ;;  %v5205_v12 = vld [vmem:[%s7483_s3 + $0x40] sm:$0xff]  }
 0x160   : > { %4909 = vmatprep.subr.bf16.mxu1 %v5205_v12 }
 0x161   : > { %v1364_v16 = vpop.permute.xlu0 %1363 }
 0x162   : > { %v1240_v50 = vpop.permute.xlu1 %1239  ;;  %v1609_v30 = vsel %vm1450_vm11, %v1576_v38, %v1364_v16  ;;  %v5206_v16 = vld [vmem:[%s7483_s3] sm:$0xff]  }
 0x163   : > { %v1480_v39 = vsel %vm1450_vm11, %v1447_v47, %v1240_v50  ;;  %4910 = vmatpush3.bf16.msra.mxu1 %v5206_v16 }
 0x165   : > { %v1411_v48 = vpop.permute.xlu0 %1410 }
 0x166   : > { %v1277_v5 = vpop.permute.xlu1 %1276  ;;  %v1655_v7 = vsel %vm1483_vm12, %v1609_v30, %v1411_v48 }
 0x167   : > { %2003 = vmatprep.mubr.bf16.mxu0 %v1655_v7  ;;  %v1527_v31 = vsel %vm1483_vm12, %v1480_v39, %v1277_v5 }
 0x168   : > { %2004 = vmatmul.mubr.bf16.gmra.mrb[56].mxu0 %v1527_v31 }
 0x169   : > { %v1329_v10 = vpop.permute.xlu0 %1328 }
 0x16a   : > { %v1161_v14 = vpop.permute.xlu1 %1160  ;;  %v1579_v9 = vsel %vm1417_vm10, %v6261_v44, %v1329_v10  ;;  %v6411_v44 = vpop.f32.mrb[17].mxu1  ;;  %v5207_v10 = vld [vmem:[%s7483_s3 + $0x48] sm:$0xff]  }
 0x16b   : > { %v1449_v3 = vsel %vm1417_vm10, %v6061_v40, %v1161_v14  ;;  %v6413_v56 = vpop.f32.mrb[18].mxu1  ;;  %4911 = vmatprep.subr.bf16.mxu1 %v5207_v10  ;;  %v5214_v10 = vld [vmem:[%s7483_s3 + $0x18] sm:$0xff]  }
 0x16c   : > { %v6415_v40 = vpop.f32.mrb[19].mxu1 }
 0x16d   : > { %v1366_v29 = vpop.permute.xlu0 %1365  ;;  %v6417_v8 = vpop.f32.mrb[20].mxu1 }
 0x16e   : > { %v1242_v15 = vpop.permute.xlu1 %1241  ;;  %v1611_v55 = vsel %vm1450_vm11, %v1579_v9, %v1366_v29  ;;  %v6419_v57 = vpop.f32.mrb[21].mxu1 }
 0x16f   : > { %v1482_v18 = vsel %vm1450_vm11, %v1449_v3, %v1242_v15  ;;  %v6421_v21 = vpop.f32.mrb[22].mxu1  ;;  %v5208_v3 = vld [vmem:[%s7483_s3 + $0x8] sm:$0xff]  }
 0x170   : > { %v6423_v34 = vpop.f32.mrb[23].mxu1  ;;  %4912 = vmatpush3.bf16.msra.mxu1 %v5208_v3 }
 0x171   : > { %v1413_v23 = vpop.permute.xlu0 %1412  ;;  %v6437_v47 = vpop.f32.mrb[24].mxu1 }
 0x172   : > { %v1279_v46 = vpop.permute.xlu1 %1278  ;;  %v1658_v19 = vsel %vm1483_vm12, %v1611_v55, %v1413_v23  ;;  %v6442_v48 = vpop.f32.mrb[25].mxu1 }
 0x173   : > { %2011 = vmatprep.mubr.bf16.mxu0 %v1658_v19  ;;  %v1530_v0 = vsel %vm1483_vm12, %v1482_v18, %v1279_v46  ;;  %v6448_v9 = vpop.f32.mrb[26].mxu1  ;;  %v2684_v46 = vld [vmem:[#allocation3 + $0xc] sm:$0xf] }
 0x174   : > { %2012 = vmatmul.mubr.bf16.gmra.mrb[60].mxu0 %v1530_v0  ;;  %v6454_v23 = vpop.f32.mrb[27].mxu1 }
 0x1a3   : > { %v4795_v63 = vpop.f32.mrb[0].mxu0 }
 0x1a4   : > { %v4796_v2 = vpop.f32.mrb[1].mxu0 }
 0x1a5   : > { %v4797_v28 = vadd.f32 %v4796_v2, %v4795_v63  ;;  %v4798_v20 = vpop.f32.mrb[2].mxu0 }
 0x1a6   : > { %v4799_v26 = vpop.f32.mrb[3].mxu0 }
 0x1a7   : > { %v4800_v27 = vadd.f32 %v4799_v26, %v4798_v20  ;;  %v1894_v13 = vadd.f32 %v4797_v28, %v6428_v1  ;;  %v5211_v26 = vld [vmem:[%s7483_s3 + $0x50] sm:$0xff]  }
 0x1a8   : > { %4913 = vmatprep.subr.bf16.mxu1 %v5211_v26 }
 0x1a9   : > { %v2055_v22 = vadd.f32 %v6337_v54, %v1894_v13  ;;  %v1897_v42 = vadd.f32 %v4800_v27, %v6428_v1  ;;  %v2688_v13 = vld [vmem:[#allocation3 + $0x14] sm:$0x1] }
 0x1ab   : > { %v2181_v37 = vmax.f32 %v2055_v22, 0.0  ;;  %v2058_v51 = vadd.f32 %v6343_v62, %v1897_v42  ;;  %v4801_v36 = vpop.f32.mrb[4].mxu0  ;;  %v5212_v42 = vld [vmem:[%s7483_s3 + $0x10] sm:$0xff]  }
 0x1ac   : > { %v4802_v38 = vpop.f32.mrb[5].mxu0  ;;  %4914 = vmatpush3.bf16.msra.mxu1 %v5212_v42 }
 0x1ad   : > { %v4715_v50 = vpack.c.bf16 %v2181_v37, %v2181_v37  ;;  %v2182_v30 = vmax.f32 %v2058_v51, 0.0  ;;  %v4803_v54 = vadd.f32 %v4802_v38, %v4801_v36  ;;  %v4804_v39 = vpop.f32.mrb[6].mxu0 }
 0x1ae   : > { %v4805_v62 = vpop.f32.mrb[7].mxu0 }
 0x1af   : > { %v2364_v5 = vshrl.u32 %v4715_v50, 16  ;;  %v4716_v7 = vpack.c.bf16 %v2182_v30, %v2182_v30  ;;  %v1902_v31 = vadd.f32 %v4803_v54, %v6428_v1  ;;  %v4806_v14 = vadd.f32 %v4805_v62, %v4804_v39  ;;  %v5213_v62 = vld [vmem:[%s7483_s3 + $0x58] sm:$0xff]  }
 0x1b0   : > { %v2367_v15 = vshll.u32 %v4715_v50, 16  ;;  %4915 = vmatprep.subr.bf16.mxu1 %v5213_v62  ;;  %v5219_v62 = vld [vmem:[%s7483_s3 + $0x68] sm:$0xff]  }
 0x1b1   : > { %v2366_v29 = vrot.slane %v2364_v5, 7  ;;  %v2372_v55 = vshrl.u32 %v4716_v7, 16  ;;  %v2063_v18 = vadd.f32 %v6335_v35, %v1902_v31  ;;  %v1905_v19 = vadd.f32 %v4806_v14, %v6428_v1  ;;  %4916 = vmatpush3.bf16.msra.mxu1 %v5214_v10 }
 0x1b2   : > { %v2375_v2 = vshll.u32 %v4716_v7, 16 }
 0x1b3   : > { %v2369_v0 = vor.u32 %v2367_v15, %v2366_v29  ;;  %v2374_v63 = vrot.slane %v2372_v55, 7  ;;  %v2183_v28 = vmax.f32 %v2063_v18, 0.0  ;;  %v4807_v20 = vpop.f32.mrb[8].mxu0  ;;  %v2370_v27 = vrot.slane %v2366_v29, 4  ;;  %v2691_v29 = vld [vmem:[#allocation3 + $0x18] sm:$0xf] }
 0x1b4   : > { %v2066_v35 = vadd.f32 %v6339_v32, %v1905_v19  ;;  %v4808_v22 = vpop.f32.mrb[9].mxu0 }
 0x1b5   : > { %v2685_v37 = vsel %vm5586_vm8, %v2369_v0, %v2684_v46  ;;  %v2377_v51 = vor.u32 %v2375_v2, %v2374_v63  ;;  %v2379_v36 = vrot.slane %v2374_v63, 4  ;;  %v4717_v12 = vpack.c.bf16 %v2183_v28, %v2183_v28  ;;  %v4810_v38 = vpop.f32.mrb[10].mxu0  ;;  %v5215_v0 = vld [vmem:[%s7483_s3 + $0x60] sm:$0xff]  }
 0x1b6   : > { %2686 = vst [vmem:[#allocation3 + $0xc] sm:$0xf] %v2685_v37  ;;  %v2184_v16 = vmax.f32 %v2066_v35, 0.0  ;;  %v4809_v50 = vadd.f32 %v4808_v22, %v4807_v20  ;;  %v4811_v30 = vpop.f32.mrb[11].mxu0  ;;  %v2695_v35 = vld [vmem:[#allocation3 + $0x20] sm:$0x1]  ;;  %4917 = vmatprep.subr.bf16.mxu1 %v5215_v0 }
 0x1b7   : > { %v2378_v32 = vsel %vm5577_vm7, %v2370_v27, %v2377_v51  ;;  %v2689_v54 = vsel %vm5622_vm9, %v2379_v36, %v2688_v13  ;;  %v2381_v39 = vshrl.u32 %v4717_v12, 16  ;;  %v4812_v7 = vadd.f32 %v4811_v30, %v4810_v38  ;;  %v5216_v27 = vld [vmem:[%s7483_s3 + $0x20] sm:$0xff]  }
 0x1b8   : > { %2687 = vst.msk [vmem:[#allocation3 + $0x10] sm:$0xf] %vm258_vm0, %v2378_v32  ;;  %2690 = vst [vmem:[#allocation3 + $0x14] sm:$0x1] %v2689_v54  ;;  %v4718_v5 = vpack.c.bf16 %v2184_v16, %v2184_v16  ;;  %v1910_v31 = vadd.f32 %v4809_v50, %v6428_v1  ;;  %v2384_v3 = vshll.u32 %v4717_v12, 16  ;;  %4918 = vmatpush3.bf16.msra.mxu1 %v5216_v27 }
 0x1b9   : > { %v2383_v14 = vrot.slane %v2381_v39, 7  ;;  %v1913_v18 = vadd.f32 %v4812_v7, %v6428_v1  ;;  %4919 = vmatprep.subr.bf16.mxu1 %v5219_v62 }
 0x1ba   : > { %v2389_v15 = vshrl.u32 %v4718_v5, 16  ;;  %v2071_v55 = vadd.f32 %v6352_v41, %v1910_v31  ;;  %v2392_v2 = vshll.u32 %v4718_v5, 16 }
 0x1bb   : > { %v2386_v46 = vor.u32 %v2384_v3, %v2383_v14  ;;  %v4813_v19 = vpop.f32.mrb[12].mxu0  ;;  %v2074_v20 = vadd.f32 %v6362_v61, %v1913_v18  ;;  %v2387_v41 = vrot.slane %v2383_v14, 4  ;;  %v5220_v14 = vld [vmem:[%s7483_s3 + $0x28] sm:$0xff]  }
 0x1bc   : > { %v2391_v63 = vrot.slane %v2389_v15, 7  ;;  %v2185_v28 = vmax.f32 %v2071_v55, 0.0  ;;  %v4814_v26 = vpop.f32.mrb[13].mxu0  ;;  %v2698_v15 = vld [vmem:[#allocation3 + $0x24] sm:$0xf]  ;;  %4920 = vmatpush3.bf16.msra.mxu1 %v5220_v14 }
 0x1bd   : > { %v2692_v13 = vsel %vm5586_vm8, %v2386_v46, %v2691_v29  ;;  %v4815_v22 = vadd.f32 %v4814_v26, %v4813_v19  ;;  %v4816_v42 = vpop.f32.mrb[14].mxu0  ;;  %v2186_v12 = vmax.f32 %v2074_v20, 0.0 }
 0x1be   : > { %2693 = vst [vmem:[#allocation3 + $0x18] sm:$0xf] %v2692_v13  ;;  %v2394_v37 = vor.u32 %v2392_v2, %v2391_v63  ;;  %v2396_v51 = vrot.slane %v2391_v63, 4  ;;  %v4719_v36 = vpack.c.bf16 %v2185_v28, %v2185_v28  ;;  %v4817_v38 = vpop.f32.mrb[15].mxu0  ;;  %v5221_v2 = vld [vmem:[%s7483_s3 + $0x70] sm:$0xff]   ;;  %v6509_v13 = vpop.f32.mrb[28].mxu1 }
 0x1bf   : > { %v1918_v61 = vadd.f32 %v4815_v22, %v6428_v1  ;;  %v4818_v16 = vadd.f32 %v4817_v38, %v4816_v42  ;;  %v5183_v50 = vld [vmem:[#allocation3 + $0xc] sm:$0xff]   ;;  %v5184_v39 = vld [vmem:[#allocation3 + $0x14] ss:$0 sps:$4 sm:$0x11]   ;;  %v4720_v5 = vpack.c.bf16 %v2186_v12, %v2186_v12  ;;  %4921 = vmatprep.subr.bf16.mxu1 %v5221_v2 }
 0x1c0   : > { %v2395_v30 = vsel %vm5577_vm7, %v2387_v41, %v2394_v37  ;;  %v2696_v32 = vsel %vm5622_vm9, %v2396_v51, %v2695_v35  ;;  %v2398_v54 = vshrl.u32 %v4719_v36, 16  ;;  %3287 = vrot.lane.b32.xlu1 %v5183_v50, %s5299_s25  ;;  %v3205_v10 = vrot.slane %v5183_v50, 1  ;;  %v6513_v51 = vpop.f32.mrb[29].mxu1  ;;  %v2702_v38 = vld [vmem:[#allocation3 + $0x2c] sm:$0x1] }
 0x1c1   : > { %2694 = vst.msk [vmem:[#allocation3 + $0x1c] sm:$0xf] %vm258_vm0, %v2395_v30  ;;  %2697 = vst [vmem:[#allocation3 + $0x20] sm:$0x1] %v2696_v32  ;;  %v2079_v7 = vadd.f32 %v6349_v25, %v1918_v61  ;;  %v1921_v31 = vadd.f32 %v4818_v16, %v6428_v1  ;;  %v2401_v29 = vshll.u32 %v4719_v36, 16  ;;  %v3206_v55 = vrot.slane %v5184_v39, 1 }
 0x1c2   : > { %v2400_v3 = vrot.slane %v2398_v54, 7  ;;  %v2993_v18 = vshll.u32 %v5183_v50, 16  ;;  %v2406_v46 = vshrl.u32 %v4720_v5, 16  ;;  %v2991_v63 = vshrl.u32 %v5183_v50, 16  ;;  %v5222_v30 = vld [vmem:[%s7483_s3 + $0x30] sm:$0xff]  }
 0x1c3   : > { %v2187_v19 = vmax.f32 %v2079_v7, 0.0  ;;  %v2082_v0 = vadd.f32 %v6355_v4, %v1921_v31  ;;  %v4819_v25 = vpop.f32.mrb[16].mxu0  ;;  %v2409_v20 = vshll.u32 %v4720_v5, 16  ;;  %v3207_v27 = vsel %vm1162_vm6, %v3205_v10, %v3206_v55  ;;  %v5223_v7 = vld [vmem:[%s7483_s3 + $0x78] sm:$0xff]   ;;  %4922 = vmatpush3.bf16.msra.mxu1 %v5222_v30 }
 0x1c4   : > { %v2403_v28 = vor.u32 %v2401_v29, %v2400_v3  ;;  %v4820_v26 = vpop.f32.mrb[17].mxu0  ;;  %v2995_v41 = vrot.slane %v2993_v18, 1  ;;  %v2408_v35 = vrot.slane %v2406_v46, 7  ;;  %3337 = vrot.lane.b32.xlu0 %v3207_v27, %s5298_s8  ;;  %3252 = vrot.lane.b32.xlu1 %v3207_v27, %s5297_s28  ;;  %v2404_v36 = vrot.slane %v2400_v3, 4  ;;  %v6528_v46 = vpop.f32.mrb[30].mxu1 }
 0x1c5   : > { %v4721_v22 = vpack.c.bf16 %v2187_v19, %v2187_v19  ;;  %v2188_v42 = vmax.f32 %v2082_v0, 0.0  ;;  %v4821_v37 = vadd.f32 %v4820_v26, %v4819_v25  ;;  %v4822_v4 = vpop.f32.mrb[18].mxu0  ;;  %v2998_v50 = vshll.u32 %v5184_v39, 16  ;;  %4923 = vmatprep.subr.bf16.mxu1 %v5223_v7  ;;  %v5224_v19 = vld [vmem:[%s7483_s3 + $0x38] sm:$0xff]   ;;  %v2705_v0 = vld [vmem:[#allocation3 + $0x30] sm:$0xf] }
 0x1c6   : > { %v2699_v12 = vsel %vm5586_vm8, %v2403_v28, %v2698_v15  ;;  %v4823_v61 = vpop.f32.mrb[19].mxu0  ;;  %v2996_v16 = vor.u32 %v2995_v41, %v2991_v63  ;;  %v2411_v32 = vor.u32 %v2409_v20, %v2408_v35  ;;  %v2413_v54 = vrot.slane %v2408_v35, 4  ;;  %v6537_v28 = vpop.f32.mrb[31].mxu1 }
 0x1c7   : > { %2700 = vst [vmem:[#allocation3 + $0x24] sm:$0xf] %v2699_v12  ;;  %v2415_v62 = vshrl.u32 %v4721_v22, 16  ;;  %v2418_v5 = vshll.u32 %v4721_v22, 16  ;;  %v4722_v31 = vpack.c.bf16 %v2188_v42, %v2188_v42  ;;  %v4824_v10 = vadd.f32 %v4823_v61, %v4822_v4  ;;  %4924 = vmatpush3.bf16.msra.mxu1 %v5224_v19 }
 0x1c8   : > { %v1926_v14 = vadd.f32 %v4821_v37, %v6428_v1  ;;  %v5185_v3 = vld [vmem:[#allocation3 + $0x18] sm:$0xff]   ;;  %v3000_v39 = vrot.slane %v2998_v50, 1  ;;  %v2412_v29 = vsel %vm5577_vm7, %v2404_v36, %v2411_v32  ;;  %v2703_v15 = vsel %vm5622_vm9, %v2413_v54, %v2702_v38  ;;  %v5187_v18 = vld [vmem:[#allocation3 + $0x20] ss:$0 sps:$4 sm:$0x11]   ;;  %5111 = vmatprep.subr.bf16.mxu1 %v6360_v53 }
 0x1c9   : > { %v2417_v55 = vrot.slane %v2415_v62, 7  ;;  %2701 = vst.msk [vmem:[#allocation3 + $0x28] sm:$0xf] %vm258_vm0, %v2412_v29  ;;  %2704 = vst [vmem:[#allocation3 + $0x2c] sm:$0x1] %v2703_v15  ;;  %v2423_v25 = vshrl.u32 %v4722_v31, 16  ;;  %v1929_v2 = vadd.f32 %v4824_v10, %v6428_v1  ;;  %3374 = vrot.lane.b32.xlu0 %v5185_v3, %s5297_s28 }
 0x1ca   : > { %v2087_v63 = vadd.f32 %v6375_v60, %v1926_v14  ;;  %v2426_v26 = vshll.u32 %v4722_v31, 16  ;;  %v6540_v27 = vsel %vm937_vm5, %v2996_v16, %v3000_v39  ;;  %v3208_v41 = vrot.slane %v5185_v3, 1  ;;  %v2709_v36 = vld [vmem:[#allocation3 + $0x38] sm:$0x1] }
 0x1cb   : > { %v2420_v20 = vor.u32 %v2418_v5, %v2417_v55  ;;  %v2425_v35 = vrot.slane %v2423_v25, 7  ;;  %v2090_v42 = vadd.f32 %v6381_v33, %v1929_v2  ;;  %3172 = vrot.lane.b32.xlu1 %v6540_v27, %s5298_s8  ;;  %v3209_v60 = vrot.slane %v5187_v18, 1 }
 0x1cc   : > { %v2189_v22 = vmax.f32 %v2087_v63, 0.0  ;;  %v2421_v37 = vrot.slane %v2417_v55, 4  ;;  %v3005_v12 = vshll.u32 %v5185_v3, 16  ;;  %v3010_v38 = vshll.u32 %v5187_v18, 16  ;;  %v2712_v63 = vld [vmem:[#allocation3 + $0x3c] sm:$0xf] }
 0x1cd   : > { %v2706_v4 = vsel %vm5586_vm8, %v2420_v20, %v2705_v0  ;;  %v2428_v61 = vor.u32 %v2426_v26, %v2425_v35  ;;  %v2430_v16 = vrot.slane %v2425_v35, 4  ;;  %v2190_v30 = vmax.f32 %v2090_v42, 0.0 }
 0x1ce   : > { %2707 = vst [vmem:[#allocation3 + $0x30] sm:$0xf] %v2706_v4  ;;  %v4723_v50 = vpack.c.bf16 %v2189_v22, %v2189_v22  ;;  %v3210_v33 = vsel %vm1162_vm6, %v3208_v41, %v3209_v60  ;;  %v3003_v54 = vshrl.u32 %v5185_v3, 16  ;;  %v3007_v62 = vrot.slane %v3005_v12, 1 }
 0x1cf   : > { %v4825_v32 = vpop.f32.mrb[20].mxu0  ;;  %v2429_v5 = vsel %vm5577_vm7, %v2421_v37, %v2428_v61  ;;  %v2710_v7 = vsel %vm5622_vm9, %v2430_v16, %v2709_v36  ;;  %5079 = vmatprep.mubr.msk.bf16.mxu0 %vm1417_vm10, %v3210_v33  ;;  %3339 = vrot.lane.b32.xlu0 %v3210_v33, %s5298_s8  ;;  %v4724_v14 = vpack.c.bf16 %v2190_v30, %v2190_v30  ;;  %v3012_v0 = vrot.slane %v3010_v38, 1  ;;  %v2716_v38 = vld [vmem:[#allocation3 + $0x44] sm:$0x1] }
 0x1d0   : > { %v2432_v31 = vshrl.u32 %v4723_v50, 16  ;;  %v2435_v10 = vshll.u32 %v4723_v50, 16  ;;  %v4826_v53 = vpop.f32.mrb[21].mxu0  ;;  %2708 = vst.msk [vmem:[#allocation3 + $0x34] sm:$0xf] %vm258_vm0, %v2429_v5  ;;  %3289 = vrot.lane.b32.xlu1 %v5185_v3, %s5299_s25  ;;  %v3008_v15 = vor.u32 %v3007_v62, %v3003_v54  ;;  %v5189_v55 = vld [vmem:[#allocation3 + $0x24] sm:$0xff]  }
 0x1d1   : > { %2711 = vst [vmem:[#allocation3 + $0x38] sm:$0x1] %v2710_v7  ;;  %v4827_v39 = vadd.f32 %v4826_v53, %v4825_v32  ;;  %v4828_v29 = vpop.f32.mrb[22].mxu0  ;;  %v5190_v25 = vld [vmem:[#allocation3 + $0x2c] ss:$0 sps:$4 sm:$0x11]  }
 0x1d2   : > { %v2434_v18 = vrot.slane %v2432_v31, 7  ;;  %v4829_v19 = vpop.f32.mrb[23].mxu0  ;;  %v2440_v2 = vshrl.u32 %v4724_v14, 16  ;;  %v2443_v20 = vshll.u32 %v4724_v14, 16  ;;  %v6559_v42 = vsel %vm937_vm5, %v3008_v15, %v3012_v0 }
 0x1d3   : > { %v1934_v26 = vadd.f32 %v4827_v39, %v6428_v1  ;;  %v4830_v41 = vadd.f32 %v4829_v19, %v4828_v29  ;;  %v3211_v3 = vrot.slane %v5189_v55, 1  ;;  %3421 = vrot.lane.b32.xlu0 %v6559_v42, %s5299_s25  ;;  %v3212_v36 = vrot.slane %v5190_v25, 1 }
 0x1d4   : > { %v2437_v35 = vor.u32 %v2435_v10, %v2434_v18  ;;  %v2438_v22 = vrot.slane %v2434_v18, 4  ;;  %v2442_v60 = vrot.slane %v2440_v2, 7  ;;  %3254 = vrot.lane.b32.xlu1 %v3210_v33, %s5297_s28  ;;  %v3017_v61 = vshll.u32 %v5189_v55, 16 }
 0x1d5   : > { %v2095_v37 = vadd.f32 %v6373_v52, %v1934_v26  ;;  %v1937_v4 = vadd.f32 %v4830_v41, %v6428_v1  ;;  %v3213_v52 = vsel %vm1162_vm6, %v3211_v3, %v3212_v36  ;;  %v3015_v53 = vshrl.u32 %v5189_v55, 16 }
 0x1d6   : > { %v2713_v12 = vsel %vm5586_vm8, %v2437_v35, %v2712_v63  ;;  %v2445_v16 = vor.u32 %v2443_v20, %v2442_v60  ;;  %v2447_v50 = vrot.slane %v2442_v60, 4  ;;  %v3019_v62 = vrot.slane %v3017_v61, 1  ;;  %5080 = vmatmul.mubr.msk.bf16.vlgmr.msra.gmra.mrb[64].mxu0 %vm1417_vm10, %v3213_v52  ;;  %v2719_v35 = vld [vmem:[#allocation3 + $0x48] sm:$0xf] }
 0x1d7   : > { %2714 = vst [vmem:[#allocation3 + $0x3c] sm:$0xf] %v2713_v12  ;;  %v2191_v30 = vmax.f32 %v2095_v37, 0.0  ;;  %v2098_v32 = vadd.f32 %v6378_v11, %v1937_v4  ;;  %v6570_v54 = vld [vmem:[#allocation3 + $0x30] sm:$0xff]   ;;  %3376 = vrot.lane.b32.xlu0 %v5189_v55, %s5297_s28  ;;  %v3022_v14 = vshll.u32 %v5190_v25, 16 }
 0x1d8   : > { %v2446_v33 = vsel %vm5577_vm7, %v2438_v22, %v2445_v16  ;;  %v2717_v5 = vsel %vm5622_vm9, %v2447_v50, %v2716_v38  ;;  %v6578_v10 = vld [vmem:[#allocation3 + $0x38] ss:$0 sps:$4 sm:$0x11]   ;;  %3174 = vrot.lane.b32.xlu1 %v6559_v42, %s5298_s8  ;;  %v3214_v11 = vrot.slane %v6570_v54, 1  ;;  %v3020_v0 = vor.u32 %v3019_v62, %v3015_v53  ;;  %v2723_v38 = vld [vmem:[#allocation3 + $0x50] sm:$0x1] }
 0x1d9   : > { %v4725_v7 = vpack.c.bf16 %v2191_v30, %v2191_v30  ;;  %v2192_v31 = vmax.f32 %v2098_v32, 0.0  ;;  %2715 = vst.msk [vmem:[#allocation3 + $0x40] sm:$0xf] %vm258_vm0, %v2446_v33  ;;  %2718 = vst [vmem:[#allocation3 + $0x44] sm:$0x1] %v2717_v5  ;;  %v3215_v18 = vrot.slane %v6578_v10, 1 }
 0x1da   : > { %v3024_v3 = vrot.slane %v3022_v14, 1 }
 0x1db   : > { %v2449_v39 = vshrl.u32 %v4725_v7, 16  ;;  %v4726_v29 = vpack.c.bf16 %v2192_v31, %v2192_v31  ;;  %v4831_v15 = vpop.f32.mrb[24].mxu0  ;;  %v2452_v2 = vshll.u32 %v4725_v7, 16  ;;  %3341 = vrot.lane.b32.xlu0 %v3213_v52, %s5298_s8  ;;  %v6588_v22 = vsel %vm1162_vm6, %v3214_v11, %v3215_v18 }
 0x1dc   : > { %v4832_v19 = vpop.f32.mrb[25].mxu0  ;;  %3291 = vrot.lane.b32.xlu1 %v5189_v55, %s5299_s25  ;;  %5083 = vmatprep.mubr.msk.bf16.mxu0 %vm1417_vm10, %v6588_v22  ;;  %v6593_v61 = vsel %vm937_vm5, %v3020_v0, %v3024_v3  ;;  %v3029_v55 = vshll.u32 %v6570_v54, 16 }
 0x1dd   : > { %v2451_v63 = vrot.slane %v2449_v39, 7  ;;  %v2457_v20 = vshrl.u32 %v4726_v29, 16  ;;  %v4833_v26 = vadd.f32 %v4832_v19, %v4831_v15  ;;  %v4834_v41 = vpop.f32.mrb[26].mxu0  ;;  %v2460_v4 = vshll.u32 %v4726_v29, 16 }
 0x1de   : > { %v4835_v25 = vpop.f32.mrb[27].mxu0  ;;  %v3031_v29 = vrot.slane %v3029_v55, 1  ;;  %v3034_v19 = vshll.u32 %v6578_v10, 16 }
 0x1df   : > { %v2454_v60 = vor.u32 %v2452_v2, %v2451_v63  ;;  %v2459_v37 = vrot.slane %v2457_v20, 7  ;;  %v4836_v36 = vadd.f32 %v4835_v25, %v4834_v41  ;;  %v2455_v12 = vrot.slane %v2451_v63, 4  ;;  %3423 = vrot.lane.b32.xlu0 %v6593_v61, %s5299_s25 }
 0x1e0   : > { %v1942_v16 = vadd.f32 %v4833_v26, %v6428_v1  ;;  %v6602_v33 = vld [vmem:[#allocation3 + $0x3c] sm:$0xff]   ;;  %3256 = vrot.lane.b32.xlu1 %v3213_v52, %s5297_s28  ;;  %v6606_v7 = vld [vmem:[#allocation3 + $0x44] ss:$0 sps:$4 sm:$0x11]  }
 0x1e1   : > { %v2720_v50 = vsel %vm5586_vm8, %v2454_v60, %v2719_v35  ;;  %v2462_v30 = vor.u32 %v2460_v4, %v2459_v37  ;;  %v2464_v32 = vrot.slane %v2459_v37, 4  ;;  %v1945_v62 = vadd.f32 %v4836_v36, %v6428_v1  ;;  %v2726_v35 = vld [vmem:[#allocation3 + $0x54] sm:$0xf]  ;;  %v2730_v36 = vld [vmem:[#allocation3 + $0x5c] sm:$0x1] }
 0x1e2   : > { %2721 = vst [vmem:[#allocation3 + $0x48] sm:$0xf] %v2720_v50  ;;  %v2103_v5 = vadd.f32 %v6393_v59, %v1942_v16  ;;  %v3217_v14 = vrot.slane %v6602_v33, 1  ;;  %v3218_v52 = vrot.slane %v6606_v7, 1 }
 0x1e3   : > { %v2463_v31 = vsel %vm5577_vm7, %v2455_v12, %v2462_v30  ;;  %v2724_v11 = vsel %vm5622_vm9, %v2464_v32, %v2723_v38  ;;  %v2106_v53 = vadd.f32 %v6399_v58, %v1945_v62  ;;  %3378 = vrot.lane.b32.xlu0 %v6570_v54, %s5297_s28  ;;  %v3027_v58 = vshrl.u32 %v6570_v54, 16 }
 0x1e4   : > { %2722 = vst.msk [vmem:[#allocation3 + $0x4c] sm:$0xf] %vm258_vm0, %v2463_v31  ;;  %2725 = vst [vmem:[#allocation3 + $0x50] sm:$0x1] %v2724_v11  ;;  %v2193_v39 = vmax.f32 %v2103_v5, 0.0  ;;  %3176 = vrot.lane.b32.xlu1 %v6593_v61, %s5298_s8  ;;  %v6621_v18 = vsel %vm1162_vm6, %v3217_v14, %v3218_v52  ;;  %v3036_v12 = vrot.slane %v3034_v19, 1 }
 0x1e5   : > { %v2194_v59 = vmax.f32 %v2106_v53, 0.0  ;;  %5084 = vmatmul.mubr.msk.bf16.gmra.mrb[68].mxu0 %vm1417_vm10, %v6621_v18  ;;  %v3032_v41 = vor.u32 %v3031_v29, %v3027_v58  ;;  %v3041_v31 = vshll.u32 %v6602_v33, 16 }
 0x1e6   : > { %v4727_v15 = vpack.c.bf16 %v2193_v39, %v2193_v39 }
 0x1e7   : > { %v4728_v0 = vpack.c.bf16 %v2194_v59, %v2194_v59  ;;  %v4837_v63 = vpop.f32.mrb[28].mxu0  ;;  %3343 = vrot.lane.b32.xlu0 %v6588_v22, %s5298_s8  ;;  %v6635_v62 = vsel %vm937_vm5, %v3032_v41, %v3036_v12  ;;  %v2737_v12 = vld [vmem:[#allocation3 + $0x68] sm:$0x1] }
 0x1e8   : > { %v2466_v2 = vshrl.u32 %v4727_v15, 16  ;;  %v2469_v20 = vshll.u32 %v4727_v15, 16  ;;  %v4838_v26 = vpop.f32.mrb[29].mxu0  ;;  %3293 = vrot.lane.b32.xlu1 %v6570_v54, %s5299_s25 }
 0x1e9   : > { %v2474_v25 = vshrl.u32 %v4728_v0, 16  ;;  %v2477_v3 = vshll.u32 %v4728_v0, 16  ;;  %v4839_v60 = vadd.f32 %v4838_v26, %v4837_v63  ;;  %v4840_v37 = vpop.f32.mrb[30].mxu0  ;;  %v3043_v0 = vrot.slane %v3041_v31, 1 }
 0x1ea   : > { %v2468_v4 = vrot.slane %v2466_v2, 7  ;;  %v4841_v10 = vpop.f32.mrb[31].mxu0  ;;  %v3046_v63 = vshll.u32 %v6606_v7, 16  ;;  %v2733_v7 = vld [vmem:[#allocation3 + $0x60] sm:$0xf] }
 0x1eb   : > { %v2476_v38 = vrot.slane %v2474_v25, 7  ;;  %v1950_v16 = vadd.f32 %v4839_v60, %v6428_v1  ;;  %v4842_v55 = vadd.f32 %v4841_v10, %v4840_v37  ;;  %v6632_v50 = vld [vmem:[#allocation3 + $0x48] sm:$0xff]   ;;  %v6637_v5 = vld [vmem:[#allocation3 + $0x50] ss:$0 sps:$4 sm:$0x11]   ;;  %3425 = vrot.lane.b32.xlu0 %v6635_v62, %s5299_s25 }
 0x1ec   : > { %v2471_v30 = vor.u32 %v2469_v20, %v2468_v4  ;;  %v2472_v32 = vrot.slane %v2468_v4, 4  ;;  %3258 = vrot.lane.b32.xlu1 %v6588_v22, %s5297_s28  ;;  %v3220_v52 = vrot.slane %v6632_v50, 1  ;;  %v3221_v29 = vrot.slane %v6637_v5, 1 }
 0x1ed   : > { %v2479_v11 = vor.u32 %v2477_v3, %v2476_v38  ;;  %v2481_v53 = vrot.slane %v2476_v38, 4  ;;  %v2111_v54 = vadd.f32 %v6391_v45, %v1950_v16  ;;  %v1953_v14 = vadd.f32 %v4842_v55, %v6428_v1 }
 0x1ee   : > { %v2727_v39 = vsel %vm5586_vm8, %v2471_v30, %v2726_v35  ;;  %v6657_v19 = vsel %vm1162_vm6, %v3220_v52, %v3221_v29  ;;  %v3039_v22 = vshrl.u32 %v6602_v33, 16  ;;  %v3048_v3 = vrot.slane %v3046_v63, 1 }
 0x1ef   : > { %2728 = vst [vmem:[#allocation3 + $0x54] sm:$0xf] %v2727_v39  ;;  %v2480_v59 = vsel %vm5577_vm7, %v2472_v32, %v2479_v11  ;;  %v2731_v45 = vsel %vm5622_vm9, %v2481_v53, %v2730_v36  ;;  %v2195_v15 = vmax.f32 %v2111_v54, 0.0  ;;  %v2114_v58 = vadd.f32 %v6397_v49, %v1953_v14  ;;  %3380 = vrot.lane.b32.xlu0 %v6602_v33, %s5297_s28 }
 0x1f0   : > { %2729 = vst.msk [vmem:[#allocation3 + $0x58] sm:$0xf] %vm258_vm0, %v2480_v59  ;;  %2732 = vst [vmem:[#allocation3 + $0x5c] sm:$0x1] %v2731_v45  ;;  %5087 = vmatprep.mubr.msk.bf16.mxu0 %vm1417_vm10, %v6657_v19  ;;  %3178 = vrot.lane.b32.xlu1 %v6635_v62, %s5298_s8  ;;  %v3044_v25 = vor.u32 %v3043_v0, %v3039_v22  ;;  %v3053_v39 = vshll.u32 %v6632_v50, 16 }
 0x1f1   : > { %v4729_v2 = vpack.c.bf16 %v2195_v15, %v2195_v15  ;;  %v2196_v20 = vmax.f32 %v2114_v58, 0.0 }
 0x1f2   : > { %v6672_v11 = vsel %vm937_vm5, %v3044_v25, %v3048_v3 }
 0x1f3   : > { %v2483_v49 = vshrl.u32 %v4729_v2, 16  ;;  %v4730_v26 = vpack.c.bf16 %v2196_v20, %v2196_v20  ;;  %v4843_v41 = vpop.f32.mrb[32].mxu0  ;;  %v2486_v37 = vshll.u32 %v4729_v2, 16  ;;  %3345 = vrot.lane.b32.xlu0 %v6621_v18, %s5298_s8 }
 0x1f4   : > { %v4844_v35 = vpop.f32.mrb[33].mxu0  ;;  %3295 = vrot.lane.b32.xlu1 %v6602_v33, %s5299_s25 }
 0x1f5   : > { %v2485_v60 = vrot.slane %v2483_v49, 7  ;;  %v2491_v4 = vshrl.u32 %v4730_v26, 16  ;;  %v4845_v36 = vadd.f32 %v4844_v35, %v4843_v41  ;;  %v4846_v10 = vpop.f32.mrb[34].mxu0  ;;  %v2494_v30 = vshll.u32 %v4730_v26, 16 }
 0x1f6   : > { %v4847_v38 = vpop.f32.mrb[35].mxu0  ;;  %v3058_v26 = vshll.u32 %v6637_v5, 16 }
 0x1f7   : > { %v2488_v16 = vor.u32 %v2486_v37, %v2485_v60  ;;  %v2493_v55 = vrot.slane %v2491_v4, 7  ;;  %v4848_v32 = vadd.f32 %v4847_v38, %v4846_v10  ;;  %v2489_v31 = vrot.slane %v2485_v60, 4  ;;  %v6675_v54 = vld [vmem:[#allocation3 + $0x54] sm:$0xff]   ;;  %v6677_v14 = vld [vmem:[#allocation3 + $0x5c] ss:$0 sps:$4 sm:$0x11]   ;;  %3427 = vrot.lane.b32.xlu0 %v6672_v11, %s5299_s25 }
 0x1f8   : > { %v1958_v53 = vadd.f32 %v4845_v36, %v6428_v1  ;;  %3260 = vrot.lane.b32.xlu1 %v6621_v18, %s5297_s28  ;;  %v3223_v15 = vrot.slane %v6675_v54, 1  ;;  %v3224_v58 = vrot.slane %v6677_v14, 1 }
 0x1f9   : > { %v2734_v33 = vsel %vm5586_vm8, %v2488_v16, %v2733_v7  ;;  %v2496_v52 = vor.u32 %v2494_v30, %v2493_v55  ;;  %v2498_v29 = vrot.slane %v2493_v55, 4  ;;  %v1961_v59 = vadd.f32 %v4848_v32, %v6428_v1  ;;  %v2740_v7 = vld [vmem:[#allocation3 + $0x6c] sm:$0xf]  ;;  %v2744_v16 = vld [vmem:[#allocation3 + $0x74] sm:$0x1] }
 0x1fa   : > { %2735 = vst [vmem:[#allocation3 + $0x60] sm:$0xf] %v2734_v33  ;;  %v2119_v45 = vadd.f32 %v6411_v44, %v1958_v53  ;;  %v6697_v18 = vsel %vm1162_vm6, %v3223_v15, %v3224_v58  ;;  %v3055_v44 = vrot.slane %v3053_v39, 1  ;;  %v3060_v55 = vrot.slane %v3058_v26, 1 }
 0x1fb   : > { %v2497_v22 = vsel %vm5577_vm7, %v2489_v31, %v2496_v52  ;;  %v2738_v0 = vsel %vm5622_vm9, %v2498_v29, %v2737_v12  ;;  %v2122_v63 = vadd.f32 %v6415_v40, %v1961_v59  ;;  %3382 = vrot.lane.b32.xlu0 %v6632_v50, %s5297_s28  ;;  %5088 = vmatmul.mubr.msk.bf16.gmra.mrb[72].mxu0 %vm1417_vm10, %v6697_v18  ;;  %v3051_v40 = vshrl.u32 %v6632_v50, 16 }
 0x1fc   : > { %2736 = vst.msk [vmem:[#allocation3 + $0x64] sm:$0xf] %vm258_vm0, %v2497_v22  ;;  %2739 = vst [vmem:[#allocation3 + $0x68] sm:$0x1] %v2738_v0  ;;  %v2197_v2 = vmax.f32 %v2119_v45, 0.0  ;;  %3180 = vrot.lane.b32.xlu1 %v6672_v11, %s5298_s8  ;;  %v3065_v59 = vshll.u32 %v6675_v54, 16 }
 0x1fd   : > { %v2198_v20 = vmax.f32 %v2122_v63, 0.0  ;;  %v3056_v37 = vor.u32 %v3055_v44, %v3051_v40  ;;  %v3070_v40 = vshll.u32 %v6677_v14, 16  ;;  %v2747_v14 = vld [vmem:[#allocation3 + $0x78] sm:$0xf] }
 0x1fe   : > { %v4731_v49 = vpack.c.bf16 %v2197_v2, %v2197_v2 }
 0x1ff   : > { %v4732_v41 = vpack.c.bf16 %v2198_v20, %v2198_v20  ;;  %v4849_v35 = vpop.f32.mrb[36].mxu0  ;;  %3347 = vrot.lane.b32.xlu0 %v6657_v19, %s5298_s8  ;;  %v6715_v52 = vsel %vm937_vm5, %v3056_v37, %v3060_v55  ;;  %v3072_v37 = vrot.slane %v3070_v40, 1 }
 0x200   : > { %v2500_v25 = vshrl.u32 %v4731_v49, 16  ;;  %v2503_v3 = vshll.u32 %v4731_v49, 16  ;;  %v4850_v60 = vpop.f32.mrb[37].mxu0  ;;  %3297 = vrot.lane.b32.xlu1 %v6632_v50, %s5299_s25  ;;  %v3067_v49 = vrot.slane %v3065_v59, 1 }
 0x201   : > { %v2508_v4 = vshrl.u32 %v4732_v41, 16  ;;  %v2511_v36 = vshll.u32 %v4732_v41, 16  ;;  %v4851_v10 = vadd.f32 %v4850_v60, %v4849_v35  ;;  %v4852_v12 = vpop.f32.mrb[38].mxu0 }
 0x202   : > { %v2502_v38 = vrot.slane %v2500_v25, 7  ;;  %v4853_v5 = vpop.f32.mrb[39].mxu0 }
 0x203   : > { %v2510_v30 = vrot.slane %v2508_v4, 7  ;;  %v1966_v32 = vadd.f32 %v4851_v10, %v6428_v1  ;;  %v4854_v31 = vadd.f32 %v4853_v5, %v4852_v12  ;;  %v6712_v53 = vld [vmem:[#allocation3 + $0x60] sm:$0xff]   ;;  %v6717_v29 = vld [vmem:[#allocation3 + $0x68] ss:$0 sps:$4 sm:$0x11]   ;;  %3429 = vrot.lane.b32.xlu0 %v6715_v52, %s5299_s25 }
 0x204   : > { %v2505_v39 = vor.u32 %v2503_v3, %v2502_v38  ;;  %v2506_v33 = vrot.slane %v2502_v38, 4  ;;  %3262 = vrot.lane.b32.xlu1 %v6657_v19, %s5297_s28  ;;  %v3226_v0 = vrot.slane %v6712_v53, 1  ;;  %v3227_v63 = vrot.slane %v6717_v29, 1  ;;  %v2751_v38 = vld [vmem:[#allocation3 + $0x80] sm:$0x1] }
 0x205   : > { %v2513_v45 = vor.u32 %v2511_v36, %v2510_v30  ;;  %v2515_v15 = vrot.slane %v2510_v30, 4  ;;  %v2127_v50 = vadd.f32 %v6409_v43, %v1966_v32  ;;  %v1969_v58 = vadd.f32 %v4854_v31, %v6428_v1 }
 0x206   : > { %v2741_v22 = vsel %vm5586_vm8, %v2505_v39, %v2740_v7  ;;  %v6737_v20 = vsel %vm1162_vm6, %v3226_v0, %v3227_v63  ;;  %v3063_v19 = vshrl.u32 %v6675_v54, 16 }
 0x207   : > { %2742 = vst [vmem:[#allocation3 + $0x6c] sm:$0xf] %v2741_v22  ;;  %v2514_v2 = vsel %vm5577_vm7, %v2506_v33, %v2513_v45  ;;  %v2745_v43 = vsel %vm5622_vm9, %v2515_v15, %v2744_v16  ;;  %v2199_v1 = vmax.f32 %v2127_v50, 0.0  ;;  %v2130_v44 = vadd.f32 %v6413_v56, %v1969_v58  ;;  %3384 = vrot.lane.b32.xlu0 %v6675_v54, %s5297_s28  ;;  %v6757_v33 = vld [vmem:[%s7482_s2] ss:$0 sm:$0xff] }
 0x208   : > { %2743 = vst.msk [vmem:[#allocation3 + $0x70] sm:$0xf] %vm258_vm0, %v2514_v2  ;;  %2746 = vst [vmem:[#allocation3 + $0x74] sm:$0x1] %v2745_v43  ;;  %5091 = vmatprep.mubr.msk.bf16.mxu0 %vm1417_vm10, %v6737_v20  ;;  %3182 = vrot.lane.b32.xlu1 %v6715_v52, %s5298_s8  ;;  %v3068_v60 = vor.u32 %v3067_v49, %v3063_v19 }
 0x209   : > { %v4733_v26 = vpack.c.bf16 %v2199_v1, %v2199_v1  ;;  %v2200_v41 = vmax.f32 %v2130_v44, 0.0 }
 0x20a   : > { %v6752_v39 = vsel %vm937_vm5, %v3068_v60, %v3072_v37 }
 0x20b   : > { %v2517_v56 = vshrl.u32 %v4733_v26, 16  ;;  %v4734_v35 = vpack.c.bf16 %v2200_v41, %v2200_v41  ;;  %v4855_v25 = vpop.f32.mrb[40].mxu0  ;;  %v2520_v4 = vshll.u32 %v4733_v26, 16  ;;  %3349 = vrot.lane.b32.xlu0 %v6697_v18, %s5298_s8  ;;  %v3082_v41 = vshll.u32 %v6717_v29, 16 }
 0x20c   : > { %v4856_v3 = vpop.f32.mrb[41].mxu0  ;;  %3299 = vrot.lane.b32.xlu1 %v6675_v54, %s5299_s25  ;;  %v3077_v54 = vshll.u32 %v6712_v53, 16 }
 0x20d   : > { %v2519_v7 = vrot.slane %v2517_v56, 7  ;;  %v2525_v36 = vshrl.u32 %v4734_v35, 16  ;;  %v4857_v10 = vadd.f32 %v4856_v3, %v4855_v25  ;;  %v4858_v12 = vpop.f32.mrb[42].mxu0  ;;  %v2528_v30 = vshll.u32 %v4734_v35, 16 }
 0x20e   : > { %v4859_v16 = vpop.f32.mrb[43].mxu0 }
 0x20f   : > { %v2522_v5 = vor.u32 %v2520_v4, %v2519_v7  ;;  %v2527_v55 = vrot.slane %v2525_v36, 7  ;;  %v4860_v32 = vadd.f32 %v4859_v16, %v4858_v12  ;;  %v2523_v31 = vrot.slane %v2519_v7, 4  ;;  %v6760_v45 = vld [vmem:[#allocation3 + $0x6c] sm:$0xff]   ;;  %v6762_v15 = vld [vmem:[#allocation3 + $0x74] ss:$0 sps:$4 sm:$0x11]   ;;  %3431 = vrot.lane.b32.xlu0 %v6752_v39, %s5299_s25 }
 0x210   : > { %v1974_v59 = vadd.f32 %v6757_v33, %v4857_v10  ;;  %3264 = vrot.lane.b32.xlu1 %v6697_v18, %s5297_s28  ;;  %v3229_v2 = vrot.slane %v6760_v45, 1  ;;  %v3230_v43 = vrot.slane %v6762_v15, 1  ;;  %v2754_v7 = vld [vmem:[#allocation3 + $0x84] sm:$0xf]  ;;  %v3084_v16 = vrot.slane %v3082_v41, 1 }
 0x211   : > { %v2748_v50 = vsel %vm5586_vm8, %v2522_v5, %v2747_v14  ;;  %v2530_v58 = vor.u32 %v2528_v30, %v2527_v55  ;;  %v2532_v22 = vrot.slane %v2527_v55, 4  ;;  %v1977_v0 = vadd.f32 %v6757_v33, %v4860_v32 }
 0x212   : > { %2749 = vst [vmem:[#allocation3 + $0x78] sm:$0xf] %v2748_v50  ;;  %v2135_v63 = vadd.f32 %v6419_v57, %v1974_v59  ;;  %v6782_v18 = vsel %vm1162_vm6, %v3229_v2, %v3230_v43  ;;  %v3079_v57 = vrot.slane %v3077_v54, 1 }
 0x213   : > { %v2531_v1 = vsel %vm5577_vm7, %v2523_v31, %v2530_v58  ;;  %v2752_v44 = vsel %vm5622_vm9, %v2532_v22, %v2751_v38  ;;  %v2138_v19 = vadd.f32 %v6423_v34, %v1977_v0  ;;  %3386 = vrot.lane.b32.xlu0 %v6712_v53, %s5297_s28  ;;  %5092 = vmatmul.mubr.msk.bf16.gmra.mrb[76].mxu0 %vm1417_vm10, %v6782_v18  ;;  %v3075_v34 = vshrl.u32 %v6712_v53, 16  ;;  %v2758_v38 = vld [vmem:[#allocation3 + $0x8c] sm:$0x1] }
 0x214   : > { %2750 = vst.msk [vmem:[#allocation3 + $0x7c] sm:$0xf] %vm258_vm0, %v2531_v1  ;;  %2753 = vst [vmem:[#allocation3 + $0x80] sm:$0x1] %v2752_v44  ;;  %v2201_v49 = vmax.f32 %v2135_v63, 0.0  ;;  %3184 = vrot.lane.b32.xlu1 %v6752_v39, %s5298_s8  ;;  %v3089_v58 = vshll.u32 %v6760_v45, 16 }
 0x215   : > { %v2202_v40 = vmax.f32 %v2138_v19, 0.0  ;;  %v3080_v37 = vor.u32 %v3079_v57, %v3075_v34 }
 0x216   : > { %v4735_v26 = vpack.c.bf16 %v2201_v49, %v2201_v49 }
 0x217   : > { %v4736_v56 = vpack.c.bf16 %v2202_v40, %v2202_v40  ;;  %v4861_v35 = vpop.f32.mrb[44].mxu0  ;;  %3351 = vrot.lane.b32.xlu0 %v6737_v20, %s5298_s8  ;;  %v6800_v54 = vsel %vm937_vm5, %v3080_v37, %v3084_v16  ;;  %v3091_v40 = vrot.slane %v3089_v58, 1 }
 0x218   : > { %v2534_v25 = vshrl.u32 %v4735_v26, 16  ;;  %v2537_v3 = vshll.u32 %v4735_v26, 16  ;;  %v4862_v60 = vpop.f32.mrb[45].mxu0  ;;  %3301 = vrot.lane.b32.xlu1 %v6712_v53, %s5299_s25  ;;  %v3094_v26 = vshll.u32 %v6762_v15, 16  ;;  %v2761_v15 = vld [vmem:[#allocation3 + $0x90] sm:$0xf] }
 0x219   : > { %v2542_v4 = vshrl.u32 %v4736_v56, 16  ;;  %v2545_v14 = vshll.u32 %v4736_v56, 16  ;;  %v4863_v36 = vadd.f32 %v4862_v60, %v4861_v35  ;;  %v4864_v10 = vpop.f32.mrb[46].mxu0 }
 0x21a   : > { %v2536_v12 = vrot.slane %v2534_v25, 7  ;;  %v4865_v29 = vpop.f32.mrb[47].mxu0  ;;  %v3096_v60 = vrot.slane %v3094_v26, 1 }
 0x21b   : > { %v2544_v5 = vrot.slane %v2542_v4, 7  ;;  %v1982_v55 = vadd.f32 %v6757_v33, %v4863_v36  ;;  %v4866_v30 = vadd.f32 %v4865_v29, %v4864_v10  ;;  %v6797_v32 = vld [vmem:[#allocation3 + $0x78] sm:$0xff]   ;;  %v6802_v50 = vld [vmem:[#allocation3 + $0x80] ss:$0 sps:$4 sm:$0x11]   ;;  %3433 = vrot.lane.b32.xlu0 %v6800_v54, %s5299_s25 }
 0x21c   : > { %v2539_v31 = vor.u32 %v2537_v3, %v2536_v12  ;;  %v2540_v59 = vrot.slane %v2536_v12, 4  ;;  %3266 = vrot.lane.b32.xlu1 %v6737_v20, %s5297_s28  ;;  %v3232_v43 = vrot.slane %v6797_v32, 1  ;;  %v3233_v1 = vrot.slane %v6802_v50, 1  ;;  %v2765_v10 = vld [vmem:[#allocation3 + $0x98] sm:$0x1] }
 0x21d   : > { %v2547_v22 = vor.u32 %v2545_v14, %v2544_v5  ;;  %v2549_v0 = vrot.slane %v2544_v5, 4  ;;  %v2143_v53 = vadd.f32 %v6417_v8, %v1982_v55  ;;  %v1985_v63 = vadd.f32 %v6757_v33, %v4866_v30  ;;  %v6836_v55 = vpop.permute.xlu1 %3170 }
 0x21e   : > { %v2755_v2 = vsel %vm5586_vm8, %v2539_v31, %v2754_v7  ;;  %v6822_v57 = vsel %vm1162_vm6, %v3232_v43, %v3233_v1  ;;  %v3087_v20 = vshrl.u32 %v6760_v45, 16 }
 0x21f   : > { %2756 = vst [vmem:[#allocation3 + $0x84] sm:$0xf] %v2755_v2  ;;  %v2548_v44 = vsel %vm5577_vm7, %v2540_v59, %v2547_v22  ;;  %v2759_v8 = vsel %vm5622_vm9, %v2549_v0, %v2758_v38  ;;  %v2203_v19 = vmax.f32 %v2143_v53, 0.0  ;;  %v2146_v49 = vadd.f32 %v6421_v21, %v1985_v63  ;;  %3388 = vrot.lane.b32.xlu0 %v6760_v45, %s5297_s28 }
 0x220   : > { %2757 = vst.msk [vmem:[#allocation3 + $0x88] sm:$0xf] %vm258_vm0, %v2548_v44  ;;  %2760 = vst [vmem:[#allocation3 + $0x8c] sm:$0x1] %v2759_v8  ;;  %5095 = vmatprep.mubr.msk.bf16.mxu0 %vm1417_vm10, %v6822_v57  ;;  %3186 = vrot.lane.b32.xlu1 %v6800_v54, %s5298_s8  ;;  %v3092_v3 = vor.u32 %v3091_v40, %v3087_v20  ;;  %v3101_v0 = vshll.u32 %v6797_v32, 16 }
 0x221   : > { %v4737_v34 = vpack.c.bf16 %v2203_v19, %v2203_v19  ;;  %v2204_v41 = vmax.f32 %v2146_v49, 0.0  ;;  %v6870_v26 = vpop.permute.xlu1 %3250 }
 0x222   : > { %v6839_v31 = vsel %vm937_vm5, %v3092_v3, %v3096_v60 }
 0x223   : > { %v2551_v21 = vshrl.u32 %v4737_v34, 16  ;;  %v4738_v56 = vpack.c.bf16 %v2204_v41, %v2204_v41  ;;  %v4867_v35 = vpop.f32.mrb[48].mxu0  ;;  %v2554_v7 = vshll.u32 %v4737_v34, 16  ;;  %3353 = vrot.lane.b32.xlu0 %v6782_v18, %s5298_s8  ;;  %v3106_v41 = vshll.u32 %v6802_v50, 16 }
 0x224   : > { %v4868_v25 = vpop.f32.mrb[49].mxu0  ;;  %3303 = vrot.lane.b32.xlu1 %v6760_v45, %s5299_s25 }
 0x225   : > { %v2553_v37 = vrot.slane %v2551_v21, 7  ;;  %v2559_v4 = vshrl.u32 %v4738_v56, 16  ;;  %v4869_v14 = vadd.f32 %v4868_v25, %v4867_v35  ;;  %v4870_v36 = vpop.f32.mrb[50].mxu0  ;;  %v2562_v16 = vshll.u32 %v4738_v56, 16 }
 0x226   : > { %v4871_v12 = vpop.f32.mrb[51].mxu0 }
 0x227   : > { %v2556_v38 = vor.u32 %v2554_v7, %v2553_v37  ;;  %v2561_v29 = vrot.slane %v2559_v4, 7  ;;  %v4872_v5 = vadd.f32 %v4871_v12, %v4870_v36  ;;  %v2557_v30 = vrot.slane %v2553_v37, 4  ;;  %v6842_v58 = vld [vmem:[#allocation3 + $0x84] sm:$0xff]   ;;  %v6844_v22 = vld [vmem:[#allocation3 + $0x8c] ss:$0 sps:$4 sm:$0x11]   ;;  %3435 = vrot.lane.b32.xlu0 %v6839_v31, %s5299_s25 }
 0x228   : > { %v1990_v59 = vadd.f32 %v6757_v33, %v4869_v14  ;;  %3268 = vrot.lane.b32.xlu1 %v6782_v18, %s5297_s28  ;;  %v3235_v1 = vrot.slane %v6842_v58, 1  ;;  %v3236_v44 = vrot.slane %v6844_v22, 1  ;;  %v2768_v37 = vld [vmem:[#allocation3 + $0x9c] sm:$0xf]  ;;  %v3108_v12 = vrot.slane %v3106_v41, 1 }
 0x229   : > { %v2762_v45 = vsel %vm5586_vm8, %v2556_v38, %v2761_v15  ;;  %v2564_v53 = vor.u32 %v2562_v16, %v2561_v29  ;;  %v2566_v63 = vrot.slane %v2561_v29, 4  ;;  %v1993_v2 = vadd.f32 %v6757_v33, %v4872_v5 }
 0x22a   : > { %2763 = vst [vmem:[#allocation3 + $0x90] sm:$0xf] %v2762_v45  ;;  %v2151_v43 = vadd.f32 %v6442_v48, %v1990_v59  ;;  %v6864_v18 = vsel %vm1162_vm6, %v3235_v1, %v3236_v44  ;;  %v3103_v48 = vrot.slane %v3101_v0, 1  ;;  %v3111_v41 = vshrl.u32 %v6842_v58, 16 }
 0x22b   : > { %v2565_v8 = vsel %vm5577_vm7, %v2557_v30, %v2564_v53  ;;  %v2766_v19 = vsel %vm5622_vm9, %v2566_v63, %v2765_v10  ;;  %v2154_v49 = vadd.f32 %v6454_v23, %v1993_v2  ;;  %3390 = vrot.lane.b32.xlu0 %v6797_v32, %s5297_s28  ;;  %5096 = vmatmul.mubr.msk.bf16.gmra.mrb[80].mxu0 %vm1417_vm10, %v6864_v18  ;;  %v3099_v23 = vshrl.u32 %v6797_v32, 16  ;;  %v2772_v10 = vld [vmem:[#allocation3 + $0xa4] sm:$0x1] }
 0x22c   : > { %2764 = vst.msk [vmem:[#allocation3 + $0x94] sm:$0xf] %vm258_vm0, %v2565_v8  ;;  %2767 = vst [vmem:[#allocation3 + $0x98] sm:$0x1] %v2766_v19  ;;  %v2205_v20 = vmax.f32 %v2151_v43, 0.0  ;;  %3188 = vrot.lane.b32.xlu1 %v6839_v31, %s5298_s8  ;;  %v3113_v63 = vshll.u32 %v6842_v58, 16 }
 0x22d   : > { %v2206_v40 = vmax.f32 %v2154_v49, 0.0  ;;  %v3104_v60 = vor.u32 %v3103_v48, %v3099_v23 }
 0x22e   : > { %v4739_v34 = vpack.c.bf16 %v2205_v20, %v2205_v20 }
 0x22f   : > { %v4740_v21 = vpack.c.bf16 %v2206_v40, %v2206_v40  ;;  %v4873_v56 = vpop.f32.mrb[52].mxu0  ;;  %3355 = vrot.lane.b32.xlu0 %v6822_v57, %s5298_s8  ;;  %v6886_v45 = vsel %vm937_vm5, %v3104_v60, %v3108_v12  ;;  %v2775_v12 = vld [vmem:[#allocation3 + $0xa8] sm:$0xf] }
 0x230   : > { %v2568_v35 = vshrl.u32 %v4739_v34, 16  ;;  %v2571_v25 = vshll.u32 %v4739_v34, 16  ;;  %v4874_v3 = vpop.f32.mrb[53].mxu0  ;;  %3305 = vrot.lane.b32.xlu1 %v6797_v32, %s5299_s25 }
 0x231   : > { %v2576_v7 = vshrl.u32 %v4740_v21, 16  ;;  %v2579_v15 = vshll.u32 %v4740_v21, 16  ;;  %v4875_v4 = vadd.f32 %v4874_v3, %v4873_v56  ;;  %v4876_v14 = vpop.f32.mrb[54].mxu0  ;;  %v3115_v21 = vrot.slane %v3113_v63, 1 }
 0x232   : > { %v2570_v36 = vrot.slane %v2568_v35, 7  ;;  %v4877_v50 = vpop.f32.mrb[55].mxu0  ;;  %v6881_v5 = vpop.permute.xlu1 %3287  ;;  %v3118_v56 = vshll.u32 %v6844_v22, 16 }
 0x233   : > { %v2578_v38 = vrot.slane %v2576_v7, 7  ;;  %v1998_v29 = vadd.f32 %v6757_v33, %v4875_v4  ;;  %v4878_v16 = vadd.f32 %v4877_v50, %v4876_v14  ;;  %v6883_v30 = vld [vmem:[#allocation3 + $0x90] sm:$0xff]   ;;  %v6888_v53 = vld [vmem:[#allocation3 + $0x98] ss:$0 sps:$4 sm:$0x11]   ;;  %3437 = vrot.lane.b32.xlu0 %v6886_v45, %s5299_s25 }
 0x234   : > { %v2573_v59 = vor.u32 %v2571_v25, %v2570_v36  ;;  %v2574_v0 = vrot.slane %v2570_v36, 4  ;;  %3270 = vrot.lane.b32.xlu1 %v6822_v57, %s5297_s28  ;;  %v3238_v19 = vrot.slane %v6883_v30, 1  ;;  %v3239_v49 = vrot.slane %v6888_v53, 1 }
 0x235   : > { %v2581_v2 = vor.u32 %v2579_v15, %v2578_v38  ;;  %v2583_v43 = vrot.slane %v2578_v38, 4  ;;  %v2159_v1 = vadd.f32 %v6437_v47, %v1998_v29  ;;  %v2001_v44 = vadd.f32 %v6757_v33, %v4878_v16 }
 0x236   : > { %v2769_v8 = vsel %vm5586_vm8, %v2573_v59, %v2768_v37  ;;  %v6906_v34 = vpop.permute.xlu0 %3337  ;;  %v6909_v57 = vpop.permute.xlu1 %3252  ;;  %v6912_v23 = vsel %vm1162_vm6, %v3238_v19, %v3239_v49  ;;  %v3116_v15 = vor.u32 %v3115_v21, %v3111_v41  ;;  %v3120_v4 = vrot.slane %v3118_v56, 1 }
 0x237   : > { %2770 = vst [vmem:[#allocation3 + $0x9c] sm:$0xf] %v2769_v8  ;;  %v2582_v20 = vsel %vm5577_vm7, %v2574_v0, %v2581_v2  ;;  %v2773_v47 = vsel %vm5622_vm9, %v2583_v43, %v2772_v10  ;;  %v2207_v48 = vmax.f32 %v2159_v1, 0.0  ;;  %v2162_v40 = vadd.f32 %v6448_v9, %v2001_v44  ;;  %3392 = vrot.lane.b32.xlu0 %v6842_v58, %s5297_s28  ;;  %v2779_v2 = vld [vmem:[#allocation3 + $0xb0] sm:$0x1] }
 0x238   : > { %2771 = vst.msk [vmem:[#allocation3 + $0xa0] sm:$0xf] %vm258_vm0, %v2582_v20  ;;  %2774 = vst [vmem:[#allocation3 + $0xa4] sm:$0x1] %v2773_v47  ;;  %5099 = vmatprep.mubr.msk.bf16.mxu0 %vm1417_vm10, %v6912_v23  ;;  %3190 = vrot.lane.b32.xlu1 %v6886_v45, %s5298_s8  ;;  %v3125_v16 = vshll.u32 %v6883_v30, 16  ;;  %v6930_v1 = vsel %vm937_vm5, %v3116_v15, %v3120_v4 }
 0x239   : > { %v4741_v35 = vpack.c.bf16 %v2207_v48, %v2207_v48  ;;  %v2208_v25 = vmax.f32 %v2162_v40, 0.0 }
 0x23b   : > { %v2585_v9 = vshrl.u32 %v4741_v35, 16  ;;  %v4742_v3 = vpack.c.bf16 %v2208_v25, %v2208_v25  ;;  %v4879_v60 = vpop.f32.mrb[56].mxu0  ;;  %v3375_v7 = vpop.permute.xlu0 %3374  ;;  %v2588_v22 = vshll.u32 %v4741_v35, 16  ;;  %3357 = vrot.lane.b32.xlu0 %v6864_v18, %s5298_s8  ;;  %v5244_v25 = vld [vmem:[#allocation3] sm:$0xff]  }
 0x23c   : > { %v4880_v37 = vpop.f32.mrb[57].mxu0  ;;  %3307 = vrot.lane.b32.xlu1 %v6842_v58, %s5299_s25 }
 0x23d   : > { %v2587_v14 = vrot.slane %v2585_v9, 7  ;;  %v2593_v36 = vshrl.u32 %v4742_v3, 16  ;;  %v4881_v10 = vadd.f32 %v4880_v37, %v4879_v60  ;;  %v4882_v50 = vpop.f32.mrb[58].mxu0  ;;  %v6926_v38 = vpop.permute.xlu1 %3172  ;;  %v2596_v63 = vshll.u32 %v4742_v3, 16 }
 0x23e   : > { %v4883_v29 = vpop.f32.mrb[59].mxu0  ;;  %v3457_v9 = vsel %vm1417_vm10, %v5244_v25, %v6836_v55  ;;  %v3123_v55 = vshrl.u32 %v6883_v30, 16 }
 0x23f   : > { %v2590_v59 = vor.u32 %v2588_v22, %v2587_v14  ;;  %v2595_v0 = vrot.slane %v2593_v36, 7  ;;  %v4884_v43 = vadd.f32 %v4883_v29, %v4882_v50  ;;  %v2006_v44 = vadd.f32 %v6757_v33, %v4881_v10  ;;  %v6933_v8 = vld [vmem:[#allocation3 + $0x9c] sm:$0xff]   ;;  %v6935_v19 = vld [vmem:[#allocation3 + $0xa4] ss:$0 sps:$4 sm:$0x11]   ;;  %3439 = vrot.lane.b32.xlu0 %v6930_v1, %s5299_s25 }
 0x240   : > { %v2591_v49 = vrot.slane %v2587_v14, 4  ;;  %3272 = vrot.lane.b32.xlu1 %v6864_v18, %s5297_s28  ;;  %v3241_v56 = vrot.slane %v6933_v8, 1  ;;  %v3242_v35 = vrot.slane %v6935_v19, 1  ;;  %v3130_v14 = vshll.u32 %v6888_v53, 16 }
 0x241   : > { %v2776_v20 = vsel %vm5586_vm8, %v2590_v59, %v2775_v12  ;;  %v2598_v47 = vor.u32 %v2596_v63, %v2595_v0  ;;  %v2600_v48 = vrot.slane %v2595_v0, 4  ;;  %v2167_v40 = vadd.f32 %v6513_v51, %v2006_v44  ;;  %v6944_v41 = vpop.permute.xlu0 %3339  ;;  %v2782_v44 = vld [vmem:[#allocation3 + $0xb4] sm:$0xf] }
 0x242   : > { %2777 = vst [vmem:[#allocation3 + $0xa8] sm:$0xf] %v2776_v20  ;;  %v2009_v21 = vadd.f32 %v6757_v33, %v4884_v43  ;;  %v6955_v60 = vpop.permute.xlu1 %3289  ;;  %v3127_v51 = vrot.slane %v3125_v16, 1  ;;  %v6960_v4 = vsel %vm1162_vm6, %v3241_v56, %v3242_v35  ;;  %v3489_v22 = vsel %vm1450_vm11, %v3457_v9, %v6870_v26  ;;  %v5245_v35 = vld [vmem:[%s7483_s3 + $0x80] sm:$0xff]  }
 0x243   : > { %v2599_v3 = vsel %vm5577_vm7, %v2591_v49, %v2598_v47  ;;  %v2780_v18 = vsel %vm5622_vm9, %v2600_v48, %v2779_v2  ;;  %v2209_v37 = vmax.f32 %v2167_v40, 0.0  ;;  %3394 = vrot.lane.b32.xlu0 %v6883_v30, %s5297_s28  ;;  %5100 = vmatmul.mubr.msk.bf16.gmra.mrb[84].mxu0 %vm1417_vm10, %v6960_v4  ;;  %v3132_v2 = vrot.slane %v3130_v14, 1 }
 0x244   : > { %2778 = vst.msk [vmem:[#allocation3 + $0xac] sm:$0xf] %vm258_vm0, %v2599_v3  ;;  %2781 = vst [vmem:[#allocation3 + $0xb0] sm:$0x1] %v2780_v18  ;;  %v2170_v15 = vadd.f32 %v6537_v28, %v2009_v21  ;;  %v3570_v28 = vsel %vm1417_vm10, %v6540_v27, %v6906_v34  ;;  %3192 = vrot.lane.b32.xlu1 %v6930_v1, %s5298_s8  ;;  %v3128_v16 = vor.u32 %v3127_v51, %v3123_v55  ;;  %v5247_v55 = vld [vmem:[#allocation3 + $0xc] sm:$0xff]  }
 0x245   : > { %v4743_v36 = vpack.c.bf16 %v2209_v37, %v2209_v37  ;;  %v3617_v50 = vsel %vm1450_vm11, %v3570_v28, %v3375_v7  ;;  %v3422_v12 = vpop.permute.xlu0 %3421  ;;  %v3521_v27 = vsel %vm1483_vm12, %v3489_v22, %v6881_v5  ;;  %v3137_v7 = vshll.u32 %v6933_v8, 16  ;;  %v2786_v22 = vld [vmem:[#allocation3 + $0xbc] sm:$0x1] }
 0x246   : > { %v2210_v10 = vmax.f32 %v2170_v15, 0.0  ;;  %v6976_v29 = vpop.permute.xlu1 %3254  ;;  %v3649_v26 = vsel %vm1483_vm12, %v3617_v50, %v3422_v12  ;;  %v6987_v21 = vsel %vm937_vm5, %v3128_v16, %v3132_v2  ;;  %v5246_v15 = vld [vmem:[%s7483_s3 + $0x88] sm:$0xff]   ;;  %v3459_v14 = vsel %vm1417_vm10, %v5247_v55, %v6926_v38 }
 0x247   : > { %v2602_v59 = vshrl.u32 %v4743_v36, 16  ;;  %v2605_v53 = vshll.u32 %v4743_v36, 16  ;;  %v4885_v63 = vpop.f32.mrb[60].mxu0  ;;  %3359 = vrot.lane.b32.xlu0 %v6912_v23, %s5298_s8  ;;  %3927 = vmatprep.mubr.bf16.mxu1 %v3649_v26  ;;  %v3142_v26 = vshll.u32 %v6935_v19, 16  ;;  %v3573_v2 = vsel %vm1417_vm10, %v6559_v42, %v6944_v41 }
 0x248   : > { %v4744_v0 = vpack.c.bf16 %v2210_v10, %v2210_v10  ;;  %v4886_v34 = vpop.f32.mrb[61].mxu0  ;;  %3309 = vrot.lane.b32.xlu1 %v6883_v30, %s5299_s25  ;;  %3928 = vmatmul.mubr.bf16.vlgmr.msra.gmra.mrb[32].mxu1 %v3521_v27 }
 0x249   : > { %v2604_v43 = vrot.slane %v2602_v59, 7  ;;  %v4887_v47 = vadd.f32 %v4886_v34, %v4885_v63  ;;  %v4888_v48 = vpop.f32.mrb[62].mxu0  ;;  %v3377_v40 = vpop.permute.xlu0 %3376  ;;  %5113 = vmatpush3.bf16.msra.mxu1 %v5245_v35  ;;  %v3139_v34 = vrot.slane %v3137_v7, 1  ;;  %v3144_v41 = vrot.slane %v3142_v26, 1 }
 0x24a   : > { %v2610_v49 = vshrl.u32 %v4744_v0, 16  ;;  %v2613_v20 = vshll.u32 %v4744_v0, 16  ;;  %v4889_v5 = vpop.f32.mrb[63].mxu0  ;;  %v6995_v51 = vpop.permute.xlu1 %3174  ;;  %5112 = vmatprep.subr.bf16.mxu1 %v5246_v15  ;;  %v3135_v0 = vshrl.u32 %v6933_v8, 16  ;;  %v3619_v7 = vsel %vm1450_vm11, %v3573_v2, %v3377_v40 }
 0x24b   : > { %v6989_v56 = vld [vmem:[#allocation3 + $0xa8] sm:$0xff]   ;;  %v2607_v25 = vor.u32 %v2605_v53, %v2604_v43  ;;  %v2608_v9 = vrot.slane %v2604_v43, 4  ;;  %v2014_v18 = vadd.f32 %v6757_v33, %v4887_v47  ;;  %v6997_v37 = vld [vmem:[#allocation3 + $0xb0] ss:$0 sps:$4 sm:$0x11]   ;;  %v4890_v28 = vadd.f32 %v4889_v5, %v4888_v48  ;;  %3441 = vrot.lane.b32.xlu0 %v6987_v21, %s5299_s25 }
 0x24c   : > { %v2612_v3 = vrot.slane %v2610_v49, 7  ;;  %v3244_v36 = vrot.slane %v6989_v56, 1  ;;  %3274 = vrot.lane.b32.xlu1 %v6912_v23, %s5297_s28  ;;  %v3245_v53 = vrot.slane %v6997_v37, 1  ;;  %v3491_v49 = vsel %vm1450_vm11, %v3459_v14, %v6909_v57  ;;  %v2789_v57 = vld [vmem:[#allocation3 + $0xc0] sm:$0xf] }
 0x24d   : > { %v2783_v10 = vsel %vm5586_vm8, %v2607_v25, %v2782_v44  ;;  %v2175_v16 = vadd.f32 %v6509_v13, %v2014_v18  ;;  %v2017_v38 = vadd.f32 %v6757_v33, %v4890_v28  ;;  %v7013_v59 = vpop.permute.xlu0 %3341  ;;  %5114 = vmatpush3.bf16.msra.mxu1 %v5246_v15  ;;  %v3140_v42 = vor.u32 %v3139_v34, %v3135_v0 }
 0x24e   : > { %v2615_v50 = vor.u32 %v2613_v20, %v2612_v3  ;;  %v2617_v12 = vrot.slane %v2612_v3, 4  ;;  %2784 = vst [vmem:[#allocation3 + $0xb4] sm:$0xf] %v2783_v10  ;;  %v7022_v23 = vpop.permute.xlu1 %3291  ;;  %v7029_v19 = vsel %vm1162_vm6, %v3244_v36, %v3245_v53  ;;  %v3524_v40 = vsel %vm1483_vm12, %v3491_v49, %v6955_v60 }
 0x24f   : > { %v2211_v27 = vmax.f32 %v2175_v16, 0.0  ;;  %v2178_v33 = vadd.f32 %v6528_v46, %v2017_v38  ;;  %3396 = vrot.lane.b32.xlu0 %v6933_v8, %s5297_s28  ;;  %5103 = vmatprep.mubr.msk.bf16.mxu0 %vm1417_vm10, %v7029_v19  ;;  %v7051_v55 = vsel %vm937_vm5, %v3140_v42, %v3144_v41  ;;  %v3576_v2 = vsel %vm1417_vm10, %v6593_v61, %v7013_v59 }
 0x250   : > { %v2616_v63 = vsel %vm5577_vm7, %v2608_v9, %v2615_v50  ;;  %v2787_v13 = vsel %vm5622_vm9, %v2617_v12, %v2786_v22  ;;  %3194 = vrot.lane.b32.xlu1 %v6987_v21, %s5298_s8  ;;  %v3149_v22 = vshll.u32 %v6989_v56, 16  ;;  %v2793_v50 = vld [vmem:[#allocation3 + $0xc8] sm:$0x1]  ;;  %v3147_v17 = vshrl.u32 %v6989_v56, 16 }
 0x251   : > { %2785 = vst.msk [vmem:[#allocation3 + $0xb8] sm:$0xf] %vm258_vm0, %v2616_v63  ;;  %2788 = vst [vmem:[#allocation3 + $0xbc] sm:$0x1] %v2787_v13  ;;  %v4745_v43 = vpack.c.bf16 %v2211_v27, %v2211_v27  ;;  %v2212_v46 = vmax.f32 %v2178_v33, 0.0  ;;  %v3424_v44 = vpop.permute.xlu0 %3423  ;;  %v5248_v27 = vld [vmem:[#allocation3 + $0x18] sm:$0xff]  }
 0x252   : > { %v7041_v47 = vpop.permute.xlu1 %3256  ;;  %v3652_v48 = vsel %vm1483_vm12, %v3619_v7, %v3424_v44  ;;  %v3151_v13 = vrot.slane %v3149_v22, 1  ;;  %v3461_v34 = vsel %vm1417_vm10, %v5248_v27, %v6995_v51  ;;  %v3154_v6 = vshll.u32 %v6997_v37, 16 }
 0x253   : > { %v2619_v20 = vshrl.u32 %v4745_v43, 16  ;;  %v4746_v5 = vpack.c.bf16 %v2212_v46, %v2212_v46  ;;  %3361 = vrot.lane.b32.xlu0 %v6960_v4, %s5298_s8  ;;  %3935 = vmatprep.mubr.bf16.mxu1 %v3652_v48  ;;  %v2622_v25 = vshll.u32 %v4745_v43, 16  ;;  %v3493_v61 = vsel %vm1450_vm11, %v3461_v34, %v6976_v29 }
 0x254   : > { %3311 = vrot.lane.b32.xlu1 %v6933_v8, %s5299_s25  ;;  %3936 = vmatmul.mubr.bf16.gmra.mrb[36].mxu1 %v3524_v40  ;;  %v3152_v59 = vor.u32 %v3151_v13, %v3147_v17  ;;  %v3527_v44 = vsel %vm1483_vm12, %v3493_v61, %v7022_v23  ;;  %v3156_v37 = vrot.slane %v3154_v6, 1  ;;  %v5250_v13 = vld [vmem:[#allocation3 + $0x30] sm:$0xff]  }
 0x255   : > { %v2621_v35 = vrot.slane %v2619_v20, 7  ;;  %v2627_v9 = vshrl.u32 %v4746_v5, 16  ;;  %v3379_v3 = vpop.permute.xlu0 %3378  ;;  %v2630_v60 = vshll.u32 %v4746_v5, 16 }
 0x256   : > { %v3177_v15 = vpop.permute.xlu1 %3176  ;;  %v3621_v51 = vsel %vm1450_vm11, %v3576_v2, %v3379_v3  ;;  %v7097_v48 = vsel %vm937_vm5, %v3152_v59, %v3156_v37  ;;  %v7138_v2 = vld [vmem:[#allocation3 + $0xd4] ss:$0 sps:$4 sm:$0x11]  }
 0x257   : > { %v2624_v18 = vor.u32 %v2622_v25, %v2621_v35  ;;  %v2629_v28 = vrot.slane %v2627_v9, 7  ;;  %3443 = vrot.lane.b32.xlu0 %v7051_v55, %s5299_s25  ;;  %v2625_v16 = vrot.slane %v2621_v35, 4  ;;  %v5249_v35 = vld [vmem:[#allocation3 + $0x24] sm:$0xff]  }
 0x258   : > { %v7053_v14 = vld [vmem:[#allocation3 + $0xb4] sm:$0xff]   ;;  %v5230_v36 = vld [vmem:[#allocation3 + $0xbc] ss:$0 sps:$4 sm:$0x11]   ;;  %3276 = vrot.lane.b32.xlu1 %v6960_v4, %s5297_s28  ;;  %v3463_v25 = vsel %vm1417_vm10, %v5249_v35, %v3177_v15 }
 0x259   : > { %v2790_v10 = vsel %vm5586_vm8, %v2624_v18, %v2789_v57  ;;  %v3247_v12 = vrot.slane %v7053_v14, 1  ;;  %v2632_v38 = vor.u32 %v2630_v60, %v2629_v28  ;;  %v2634_v53 = vrot.slane %v2629_v28, 4  ;;  %v3344_v0 = vpop.permute.xlu0 %3343  ;;  %v5251_v35 = vld [vmem:[#allocation3 + $0x3c] sm:$0xff]  }
 0x25a   : > { %2791 = vst [vmem:[#allocation3 + $0xc0] sm:$0xf] %v2790_v10  ;;  %v3248_v26 = vrot.slane %v5230_v36, 1  ;;  %v3294_v63 = vpop.permute.xlu1 %3293  ;;  %v3161_v29 = vshll.u32 %v7053_v14, 16  ;;  %v3159_v41 = vshrl.u32 %v7053_v14, 16  ;;  %v3166_v40 = vshll.u32 %v5230_v36, 16 }
 0x25b   : > { %v2633_v24 = vsel %vm5577_vm7, %v2625_v16, %v2632_v38  ;;  %v2794_v4 = vsel %vm5622_vm9, %v2634_v53, %v2793_v50  ;;  %3398 = vrot.lane.b32.xlu0 %v6989_v56, %s5297_s28  ;;  %v3579_v57 = vsel %vm1417_vm10, %v6635_v62, %v3344_v0  ;;  %v3495_v22 = vsel %vm1450_vm11, %v3463_v25, %v7041_v47  ;;  %v7130_v16 = vld [vmem:[#allocation3 + $0xcc] sm:$0xff]  }
 0x25c   : > { %v7072_v33 = vsel %vm1162_vm6, %v3247_v12, %v3248_v26  ;;  %2792 = vst.msk [vmem:[#allocation3 + $0xc4] sm:$0xf] %vm258_vm0, %v2633_v24  ;;  %2795 = vst [vmem:[#allocation3 + $0xc8] sm:$0x1] %v2794_v4  ;;  %3196 = vrot.lane.b32.xlu1 %v7051_v55, %s5298_s8  ;;  %v3163_v5 = vrot.slane %v3161_v29, 1  ;;  %v3168_v28 = vrot.slane %v3166_v40, 1  ;;  %v3530_v62 = vsel %vm1483_vm12, %v3495_v22, %v3294_v63 }
 0x25d   : > { %5104 = vmatmul.mubr.msk.bf16.gmra.mrb[88].mxu0 %vm1417_vm10, %v7072_v33  ;;  %v3426_v43 = vpop.permute.xlu0 %3425  ;;  %v3412_v17 = vshll.u32 %v7130_v16, 16  ;;  %v3410_v37 = vshrl.u32 %v7130_v16, 16 }
 0x25e   : > { %v7085_v7 = vpop.permute.xlu1 %3258  ;;  %v3655_v46 = vsel %vm1483_vm12, %v3621_v51, %v3426_v43  ;;  %v3164_v15 = vor.u32 %v3163_v5, %v3159_v41 }
 0x25f   : > { %3363 = vrot.lane.b32.xlu0 %v7029_v19, %s5298_s8  ;;  %3943 = vmatprep.mubr.bf16.mxu1 %v3655_v46 }
 0x260   : > { %3313 = vrot.lane.b32.xlu1 %v6989_v56, %s5299_s25  ;;  %3944 = vmatmul.mubr.bf16.gmra.mrb[40].mxu1 %v3527_v44  ;;  %v7124_v50 = vsel %vm937_vm5, %v3164_v15, %v3168_v28 }
 0x261   : > { %v3381_v49 = vpop.permute.xlu0 %3380 }
 0x262   : > { %v3179_v20 = vpop.permute.xlu1 %3178 }
 0x263   : > { %3445 = vrot.lane.b32.xlu0 %v7097_v48, %s5299_s25  ;;  %v5231_v60 = vld [vmem:[#allocation3 + $0xc0] sm:$0xff]   ;;  %v5232_v12 = vld [vmem:[#allocation3 + $0xc8] ss:$0 sps:$4 sm:$0x11]   ;;  %v3465_v27 = vsel %vm1417_vm10, %v5250_v13, %v3179_v20  ;;  %v3417_v20 = vshll.u32 %v7138_v2, 16 }
 0x264   : > { %3278 = vrot.lane.b32.xlu1 %v7029_v19, %s5297_s28  ;;  %v3623_v19 = vsel %vm1450_vm11, %v3579_v57, %v3381_v49  ;;  %v3325_v47 = vshll.u32 %v5231_v60, 16  ;;  %v3334_v0 = vrot.slane %v5231_v60, 1  ;;  %v3335_v26 = vrot.slane %v5232_v12, 1 }
 0x265   : > { %v3346_v42 = vpop.permute.xlu0 %3345  ;;  %v3323_v24 = vshrl.u32 %v5231_v60, 16  ;;  %v3330_v4 = vshll.u32 %v5232_v12, 16  ;;  %v3414_v49 = vrot.slane %v3412_v17, 1  ;;  %v3419_v5 = vrot.slane %v3417_v20, 1  ;;  %v5252_v12 = vld [vmem:[#allocation3 + $0x48] sm:$0xff]   ;;  %v5253_v17 = vld [vmem:[#allocation3 + $0x54] sm:$0xff]  }
 0x266   : > { %v3296_v23 = vpop.permute.xlu1 %3295  ;;  %v3327_v63 = vrot.slane %v3325_v47, 1  ;;  %v3582_v34 = vsel %vm1417_vm10, %v6672_v11, %v3346_v42  ;;  %v7143_v46 = vsel %vm1162_vm6, %v3334_v0, %v3335_v26  ;;  %v3497_v11 = vsel %vm1450_vm11, %v3465_v27, %v7085_v7 }
 0x267   : > { %3400 = vrot.lane.b32.xlu0 %v7053_v14, %s5297_s28  ;;  %v3332_v44 = vrot.slane %v3330_v4, 1  ;;  %v3415_v41 = vor.u32 %v3414_v49, %v3410_v37 }
 0x268   : > { %3198 = vrot.lane.b32.xlu1 %v7097_v48, %s5298_s8  ;;  %v3328_v59 = vor.u32 %v3327_v63, %v3323_v24 }
 0x269   : > { %v3428_v9 = vpop.permute.xlu0 %3427 }
 0x26a   : > { %v7113_v3 = vpop.permute.xlu1 %3260  ;;  %v3658_v18 = vsel %vm1483_vm12, %v3623_v19, %v3428_v9  ;;  %v7155_v7 = vsel %vm937_vm5, %v3328_v59, %v3332_v44  ;;  %v3420_v19 = vsel %vm937_vm5, %v3415_v41, %v3419_v5 }
 0x26b   : > { %3365 = vrot.lane.b32.xlu0 %v7072_v33, %s5298_s8  ;;  %3951 = vmatprep.mubr.bf16.mxu1 %v3658_v18 }
 0x26c   : > { %3315 = vrot.lane.b32.xlu1 %v7053_v14, %s5299_s25  ;;  %3952 = vmatmul.mubr.bf16.gmra.mrb[44].mxu1 %v3530_v62 }
 0x26d   : > { %v3383_v36 = vpop.permute.xlu0 %3382 }
 0x26e   : > { %v3181_v10 = vpop.permute.xlu1 %3180  ;;  %v3625_v6 = vsel %vm1450_vm11, %v3582_v34, %v3383_v36 }
 0x26f   : > { %3447 = vrot.lane.b32.xlu0 %v7124_v50, %s5299_s25  ;;  %v3467_v25 = vsel %vm1417_vm10, %v5251_v35, %v3181_v10 }
 0x270   : > { %3200 = vrot.lane.b32.xlu1 %v7124_v50, %s5298_s8  ;;  %v3499_v28 = vsel %vm1450_vm11, %v3467_v25, %v7113_v3 }
 0x271   : > { %v3348_v38 = vpop.permute.xlu0 %3347 }
 0x272   : > { %v3298_v53 = vpop.permute.xlu1 %3297  ;;  %v3585_v57 = vsel %vm1417_vm10, %v6715_v52, %v3348_v38 }
 0x273   : > { %3402 = vrot.lane.b32.xlu0 %v5231_v60, %s5297_s28 }
 0x274   : > { %3280 = vrot.lane.b32.xlu1 %v7072_v33, %s5297_s28  ;;  %v3533_v33 = vsel %vm1483_vm12, %v3497_v11, %v3296_v23 }
 0x275   : > { %v3430_v51 = vpop.permute.xlu0 %3429 }
 0x276   : > { %v3263_v43 = vpop.permute.xlu1 %3262  ;;  %v3661_v61 = vsel %vm1483_vm12, %v3625_v6, %v3430_v51 }
 0x277   : > { %3367 = vrot.lane.b32.xlu0 %v7143_v46, %s5298_s8  ;;  %3959 = vmatprep.mubr.bf16.mxu1 %v3661_v61 }
 0x278   : > { %3317 = vrot.lane.b32.xlu1 %v5231_v60, %s5299_s25  ;;  %3960 = vmatmul.mubr.bf16.gmra.mrb[48].mxu1 %v3533_v33  ;;  %v3536_v60 = vsel %vm1483_vm12, %v3499_v28, %v3298_v53 }
 0x279   : > { %v3385_v29 = vpop.permute.xlu0 %3384 }
 0x27a   : > { %v3183_v42 = vpop.permute.xlu1 %3182  ;;  %v3627_v9 = vsel %vm1450_vm11, %v3585_v57, %v3385_v29  ;;  %v5254_v29 = vld [vmem:[#allocation3 + $0x60] sm:$0xff]  }
 0x27b   : > { %3449 = vrot.lane.b32.xlu0 %v7155_v7, %s5299_s25  ;;  %v3469_v47 = vsel %vm1417_vm10, %v5252_v12, %v3183_v42 }
 0x27c   : > { %v3501_v13 = vsel %vm1450_vm11, %v3469_v47, %v3263_v43 }
 0x27d   : > { %v3350_v23 = vpop.permute.xlu0 %3349 }
 0x27e   : > { %v3300_v40 = vpop.permute.xlu1 %3299  ;;  %v3588_v38 = vsel %vm1417_vm10, %v6752_v39, %v3350_v23 }
 0x27f   : > { %3404 = vrot.lane.b32.xlu0 %v7130_v16, %s5297_s28  ;;  %v3539_v53 = vsel %vm1483_vm12, %v3501_v13, %v3300_v40 }
 0x281   : > { %v3432_v18 = vpop.permute.xlu0 %3431 }
 0x282   : > { %v3265_v22 = vpop.permute.xlu1 %3264  ;;  %v3664_v15 = vsel %vm1483_vm12, %v3627_v9, %v3432_v18 }
 0x283   : > { %3451 = vrot.lane.b32.xlu0 %v3420_v19, %s5299_s25  ;;  %3967 = vmatprep.mubr.bf16.mxu1 %v3664_v15 }
 0x284   : > { %3968 = vmatmul.mubr.bf16.gmra.mrb[52].mxu1 %v3536_v60  ;;  %v5255_v60 = vld [vmem:[#allocation3 + $0x6c] sm:$0xff]  }
 0x285   : > { %v3387_v62 = vpop.permute.xlu0 %3386 }
 0x286   : > { %v3185_v36 = vpop.permute.xlu1 %3184  ;;  %v3629_v0 = vsel %vm1450_vm11, %v3588_v38, %v3387_v62 }
 0x287   : > { %v3471_v6 = vsel %vm1417_vm10, %v5253_v17, %v3185_v36 }
 0x288   : > { %v3503_v59 = vsel %vm1450_vm11, %v3471_v6, %v3265_v22 }
 0x289   : > { %v3352_v52 = vpop.permute.xlu0 %3351 }
 0x28a   : > { %v3302_v10 = vpop.permute.xlu1 %3301  ;;  %v3591_v39 = vsel %vm1417_vm10, %v6800_v54, %v3352_v52 }
 0x28b   : > { %v3542_v33 = vsel %vm1483_vm12, %v3503_v59, %v3302_v10 }
 0x28d   : > { %v3434_v26 = vpop.permute.xlu0 %3433 }
 0x28e   : > { %v3267_v3 = vpop.permute.xlu1 %3266  ;;  %v3667_v63 = vsel %vm1483_vm12, %v3629_v0, %v3434_v26 }
 0x28f   : > { %3975 = vmatprep.mubr.bf16.mxu1 %v3667_v63 }
 0x290   : > { %3976 = vmatmul.mubr.bf16.gmra.mrb[56].mxu1 %v3539_v53 }
 0x291   : > { %v3389_v27 = vpop.permute.xlu0 %3388 }
 0x292   : > { %v3187_v34 = vpop.permute.xlu1 %3186  ;;  %v3631_v51 = vsel %vm1450_vm11, %v3591_v39, %v3389_v27 }
 0x293   : > { %v3473_v42 = vsel %vm1417_vm10, %v5254_v29, %v3187_v34 }
 0x294   : > { %v3505_v35 = vsel %vm1450_vm11, %v3473_v42, %v3267_v3 }
 0x295   : > { %v3354_v24 = vpop.permute.xlu0 %3353 }
 0x296   : > { %v3304_v4 = vpop.permute.xlu1 %3303  ;;  %v3594_v54 = vsel %vm1417_vm10, %v6839_v31, %v3354_v24 }
 0x297   : > { %v3545_v25 = vsel %vm1483_vm12, %v3505_v35, %v3304_v4 }
 0x299   : > { %v3436_v61 = vpop.permute.xlu0 %3435 }
 0x29a   : > { %v3269_v11 = vpop.permute.xlu1 %3268  ;;  %v3670_v43 = vsel %vm1483_vm12, %v3631_v51, %v3436_v61 }
 0x29b   : > { %3983 = vmatprep.mubr.bf16.mxu1 %v3670_v43 }
 0x29c   : > { %3984 = vmatmul.mubr.bf16.gmra.mrb[60].mxu1 %v3542_v33 }
 0x29d   : > { %v3391_v44 = vpop.permute.xlu0 %3390 }
 0x29e   : > { %v3189_v37 = vpop.permute.xlu1 %3188  ;;  %v3633_v41 = vsel %vm1450_vm11, %v3594_v54, %v3391_v44 }
 0x29f   : > { %v3475_v62 = vsel %vm1417_vm10, %v5255_v60, %v3189_v37 }
 0x2a0   : > { %v3507_v38 = vsel %vm1450_vm11, %v3475_v62, %v3269_v11 }
 0x2a1   : > { %v3356_v49 = vpop.permute.xlu0 %3355 }
 0x2a2   : > { %v3306_v20 = vpop.permute.xlu1 %3305  ;;  %v3597_v36 = vsel %vm1417_vm10, %v6886_v45, %v3356_v49 }
 0x2a3   : > { %v3548_v0 = vsel %vm1483_vm12, %v3507_v38, %v3306_v20 }
 0x2a5   : > { %v3438_v5 = vpop.permute.xlu0 %3437 }
 0x2a6   : > { %v3271_v23 = vpop.permute.xlu1 %3270  ;;  %v3673_v40 = vsel %vm1483_vm12, %v3633_v41, %v3438_v5 }
 0x2a7   : > { %3991 = vmatprep.mubr.bf16.mxu1 %v3673_v40 }
 0x2a8   : > { %3992 = vmatmul.mubr.bf16.gmra.mrb[64].mxu1 %v3545_v25 }
 0x2a9   : > { %v3393_v57 = vpop.permute.xlu0 %3392  ;;  %v7192_v19 = vpop.f32.mrb[64].mxu0 }
 0x2aa   : > { %v3191_v9 = vpop.permute.xlu1 %3190  ;;  %v7194_v18 = vpop.f32.mrb[65].mxu0  ;;  %v3635_v52 = vsel %vm1450_vm11, %v3597_v36, %v3393_v57 }
 0x2ab   : > { %v7196_v22 = vpop.f32.mrb[66].mxu0  ;;  %v3477_v34 = vsel %vm1417_vm10, %v6797_v32, %v3191_v9 }
 0x2ac   : > { %v7198_v31 = vpop.f32.mrb[67].mxu0  ;;  %v3509_v61 = vsel %vm1450_vm11, %v3477_v34, %v3271_v23 }
 0x2ad   : > { %v3358_v15 = vpop.permute.xlu0 %3357 }
 0x2ae   : > { %v3308_v28 = vpop.permute.xlu1 %3307  ;;  %v3600_v4 = vsel %vm1417_vm10, %v6930_v1, %v3358_v15 }
 0x2af   : > { %v3551_v11 = vsel %vm1483_vm12, %v3509_v61, %v3308_v28 }
 0x2b1   : > { %v3440_v10 = vpop.permute.xlu0 %3439 }
 0x2b2   : > { %v3273_v12 = vpop.permute.xlu1 %3272  ;;  %v3676_v47 = vsel %vm1483_vm12, %v3635_v52, %v3440_v10 }
 0x2b3   : > { %3999 = vmatprep.mubr.bf16.mxu1 %v3676_v47 }
 0x2b4   : > { %4000 = vmatmul.mubr.bf16.gmra.mrb[68].mxu1 %v3548_v0 }
 0x2b5   : > { %v3395_v26 = vpop.permute.xlu0 %3394 }
 0x2b6   : > { %v3193_v3 = vpop.permute.xlu1 %3192  ;;  %v3637_v17 = vsel %vm1450_vm11, %v3600_v4, %v3395_v26 }
 0x2b7   : > { %v3479_v44 = vsel %vm1417_vm10, %v6842_v58, %v3193_v3 }
 0x2b8   : > { %v7207_v63 = vpop.f32.mrb[68].mxu0  ;;  %v3511_v42 = vsel %vm1450_vm11, %v3479_v44, %v3273_v12 }
 0x2b9   : > { %v3360_v13 = vpop.permute.xlu0 %3359  ;;  %v7209_v53 = vpop.f32.mrb[69].mxu0 }
 0x2ba   : > { %v3310_v45 = vpop.permute.xlu1 %3309  ;;  %v7211_v27 = vpop.f32.mrb[70].mxu0  ;;  %v3603_v1 = vsel %vm1417_vm10, %v6987_v21, %v3360_v13 }
 0x2bb   : > { %v7215_v24 = vpop.f32.mrb[71].mxu0  ;;  %v3554_v54 = vsel %vm1483_vm12, %v3511_v42, %v3310_v45 }
 0x2bd   : > { %v3442_v6 = vpop.permute.xlu0 %3441 }
 0x2be   : > { %v3275_v39 = vpop.permute.xlu1 %3274  ;;  %v3679_v51 = vsel %vm1483_vm12, %v3637_v17, %v3442_v6 }
 0x2bf   : > { %4007 = vmatprep.mubr.bf16.mxu1 %v3679_v51 }
 0x2c0   : > { %4008 = vmatmul.mubr.bf16.gmra.mrb[72].mxu1 %v3551_v11 }
 0x2c1   : > { %v3397_v43 = vpop.permute.xlu0 %3396 }
 0x2c2   : > { %v3195_v59 = vpop.permute.xlu1 %3194  ;;  %v3639_v37 = vsel %vm1450_vm11, %v3603_v1, %v3397_v43 }
 0x2c3   : > { %v3481_v57 = vsel %vm1417_vm10, %v6883_v30, %v3195_v59 }
 0x2c4   : > { %v3513_v36 = vsel %vm1450_vm11, %v3481_v57, %v3275_v39 }
 0x2c5   : > { %v3362_v32 = vpop.permute.xlu0 %3361 }
 0x2c6   : > { %v3312_v33 = vpop.permute.xlu1 %3311  ;;  %v3606_v9 = vsel %vm1417_vm10, %v7051_v55, %v3362_v32 }
 0x2c7   : > { %v3557_v52 = vsel %vm1483_vm12, %v3513_v36, %v3312_v33 }
 0x2c9   : > { %v3444_v49 = vpop.permute.xlu0 %3443 }
 0x2ca   : > { %v3277_v20 = vpop.permute.xlu1 %3276  ;;  %v3682_v29 = vsel %vm1483_vm12, %v3639_v37, %v3444_v49 }
 0x2cb   : > { %4015 = vmatprep.mubr.bf16.mxu1 %v3682_v29 }
 0x2cc   : > { %4016 = vmatmul.mubr.bf16.gmra.mrb[76].mxu1 %v3554_v54 }
 0x2cd   : > { %v3399_v41 = vpop.permute.xlu0 %3398 }
 0x2ce   : > { %v3197_v5 = vpop.permute.xlu1 %3196  ;;  %v7231_v23 = vpop.f32.mrb[72].mxu0  ;;  %v3641_v15 = vsel %vm1450_vm11, %v3606_v9, %v3399_v41  ;;  %v3454_v41 = vrot.slane %v7138_v2, 1 }
 0x2cf   : > { %v7233_v58 = vpop.f32.mrb[73].mxu0  ;;  %v3483_v30 = vsel %vm1417_vm10, %v6933_v8, %v3197_v5 }
 0x2d0   : > { %v7235_v40 = vpop.f32.mrb[74].mxu0  ;;  %v3515_v13 = vsel %vm1450_vm11, %v3483_v30, %v3277_v20 }
 0x2d1   : > { %v3364_v21 = vpop.permute.xlu0 %3363  ;;  %v7237_v35 = vpop.f32.mrb[75].mxu0 }
 0x2d2   : > { %v3314_v25 = vpop.permute.xlu1 %3313  ;;  %v3609_v55 = vsel %vm1417_vm10, %v7097_v48, %v3364_v21 }
 0x2d3   : > { %v3560_v45 = vsel %vm1483_vm12, %v3515_v13, %v3314_v25 }
 0x2d5   : > { %v3446_v28 = vpop.permute.xlu0 %3445 }
 0x2d6   : > { %v3279_v60 = vpop.permute.xlu1 %3278  ;;  %v3685_v62 = vsel %vm1483_vm12, %v3641_v15, %v3446_v28  ;;  %v7304_v28 = vld [vmem:[%s7484_s4] ss:$0 sm:$0xff] }
 0x2d7   : > { %4023 = vmatprep.mubr.bf16.mxu1 %v3685_v62 }
 0x2d8   : > { %4024 = vmatmul.mubr.bf16.gmra.mrb[80].mxu1 %v3557_v52 }
 0x2d9   : > { %v3401_v10 = vpop.permute.xlu0 %3400 }
 0x2da   : > { %v3199_v12 = vpop.permute.xlu1 %3198  ;;  %v3643_v38 = vsel %vm1450_vm11, %v3609_v55, %v3401_v10 }
 0x2db   : > { %v3485_v51 = vsel %vm1417_vm10, %v6989_v56, %v3199_v12  ;;  %v5256_v12 = vld [vmem:[%s5566_s23] sm:$0xf] }
 0x2dc   : > { %v3517_v33 = vsel %vm1450_vm11, %v3485_v51, %v3279_v60 }
 0x2dd   : > { %v3366_v47 = vpop.permute.xlu0 %3365 }
 0x2de   : > { %v3316_v26 = vpop.permute.xlu1 %3315  ;;  %v3612_v61 = vsel %vm1417_vm10, %v7124_v50, %v3366_v47  ;;  %v4217_v47 = vunpack.c.l.bf16 %v5256_v12 }
 0x2df   : > { %v3563_v44 = vsel %vm1483_vm12, %v3517_v33, %v3316_v26 }
 0x2e1   : > { %v3448_v0 = vpop.permute.xlu0 %3447 }
 0x2e2   : > { %v3688_v3 = vsel %vm1483_vm12, %v3643_v38, %v3448_v0  ;;  %v3201_v8 = vpop.permute.xlu1 %3200  ;;  %v5257_v0 = vld [vmem:[%s5566_s23 + $0x4] sm:$0xf] }
 0x2e3   : > { %4031 = vmatprep.mubr.bf16.mxu1 %v3688_v3  ;;  %v3487_v50 = vsel %vm1417_vm10, %v7053_v14, %v3201_v8  ;;  %v4218_v26 = vunpack.c.l.bf16 %v5257_v0 }
 0x2e4   : > { %4032 = vmatmul.mubr.bf16.gmra.mrb[84].mxu1 %v3560_v45 }
 0x2e5   : > { %v3403_v34 = vpop.permute.xlu0 %3402 }
 0x2e6   : > { %v7255_v4 = vpop.f32.mrb[76].mxu0  ;;  %v3645_v11 = vsel %vm1450_vm11, %v3612_v61, %v3403_v34  ;;  %v3281_v59 = vpop.permute.xlu1 %3280 }
 0x2e7   : > { %v7257_v17 = vpop.f32.mrb[77].mxu0  ;;  %v3519_v29 = vsel %vm1450_vm11, %v3487_v50, %v3281_v59 }
 0x2e8   : > { %v7259_v6 = vpop.f32.mrb[78].mxu0 }
 0x2e9   : > { %v3368_v48 = vpop.permute.xlu0 %3367  ;;  %v7261_v39 = vpop.f32.mrb[79].mxu0 }
 0x2ea   : > { %v3615_v37 = vsel %vm1417_vm10, %v7155_v7, %v3368_v48  ;;  %v3318_v56 = vpop.permute.xlu1 %3317  ;;  %v3453_v7 = vrot.slane %v7130_v16, 1 }
 0x2eb   : > { %v3566_v54 = vsel %vm1483_vm12, %v3519_v29, %v3318_v56 }
 0x2ec   : > { %v3455_v14 = vsel %vm1162_vm6, %v3453_v7, %v3454_v41 }
 0x2ed   : > { %v3450_v43 = vpop.permute.xlu0 %3449 }
 0x2ee   : > { %v3691_v32 = vsel %vm1483_vm12, %v3645_v11, %v3450_v43  ;;  %v5258_v43 = vld [vmem:[%s5566_s23 + $0x8] sm:$0xf] }
 0x2ef   : > { %4039 = vmatprep.mubr.bf16.mxu1 %v3691_v32  ;;  %v4219_v59 = vunpack.c.l.bf16 %v5258_v43  ;;  %v5263_v43 = vld [vmem:[%s5566_s23 + $0x1c] sm:$0xf] }
 0x2f0   : > { %4040 = vmatmul.mubr.bf16.gmra.mrb[88].mxu1 %v3563_v44 }
 0x2f1   : > { %v3405_v1 = vpop.permute.xlu0 %3404 }
 0x2f2   : > { %v3647_v49 = vsel %vm1450_vm11, %v3615_v37, %v3405_v1  ;;  %v5259_v1 = vld [vmem:[%s5566_s23 + $0xc] sm:$0xf] }
 0x2f3   : > { %v4220_v37 = vunpack.c.l.bf16 %v5259_v1 }
 0x2f5   : > { %v3452_v20 = vpop.permute.xlu0 %3451 }
 0x2f6   : > { %v3694_v42 = vsel %vm1483_vm12, %v3647_v49, %v3452_v20 }
 0x2f7   : > { %4047 = vmatprep.mubr.bf16.mxu1 %v3694_v42 }
 0x2f8   : > { %4048 = vmatmul.mubr.bf16.gmra.mrb[92].mxu1 %v3566_v54 }
 0x2f9   : > { %5107 = vmatprep.mubr.msk.bf16.mxu1 %vm1417_vm10, %v7143_v46 }
 0x2fe   : > { %v7284_v5 = vpop.f32.mrb[80].mxu0 }
 0x2ff   : > { %v7286_v21 = vpop.f32.mrb[81].mxu0 }
 0x300   : > { %5108 = vmatmul.mubr.msk.bf16.vlgmr.msra.gmra.mrb[96].mxu1 %vm1417_vm10, %v3455_v14  ;;  %v7289_v25 = vpop.f32.mrb[82].mxu0 }
 0x301   : > { %v7291_v57 = vpop.f32.mrb[83].mxu0 }
 0x316   : > { %v7293_v9 = vpop.f32.mrb[84].mxu0 }
 0x317   : > { %v7295_v2 = vpop.f32.mrb[85].mxu0 }
 0x318   : > { %v7297_v46 = vpop.f32.mrb[86].mxu0 }
 0x319   : > { %v7299_v16 = vpop.f32.mrb[87].mxu0 }
 0x31b   : > { %v4925_v15 = vpop.f32.mrb[32].mxu1 }
 0x31c   : > { %v4926_v60 = vpop.f32.mrb[33].mxu1 }
 0x31d   : > { %v4927_v62 = vadd.f32 %v4926_v60, %v4925_v15  ;;  %v4928_v36 = vpop.f32.mrb[34].mxu1 }
 0x31e   : > { %v4929_v52 = vpop.f32.mrb[35].mxu1 }
 0x31f   : > { %v3930_v10 = vadd.f32 %v4927_v62, %v7304_v28  ;;  %v4930_v30 = vadd.f32 %v4929_v52, %v4928_v36  ;;  %v5260_v36 = vld [vmem:[%s5566_s23 + $0x10] sm:$0xf] }
 0x320   : > { %v4221_v52 = vunpack.c.l.bf16 %v5260_v36 }
 0x321   : > { %v4091_v55 = vadd.f32 %v7194_v18, %v3930_v10  ;;  %v3933_v38 = vadd.f32 %v4930_v30, %v7304_v28  ;;  %v5261_v30 = vld [vmem:[%s5566_s23 + $0x14] sm:$0xf] }
 0x323   : > { %v4249_v3 = vadd.f32 %v4217_v47, %v4091_v55  ;;  %v4094_v13 = vadd.f32 %v7198_v31, %v3933_v38  ;;  %v4222_v55 = vunpack.c.l.bf16 %v5261_v30 }
 0x325   : > { %v4747_v45 = vpack.c.bf16 %v4249_v3, %v4249_v3  ;;  %v4250_v34 = vadd.f32 %v4218_v26, %v4094_v13 }
 0x327   : > { %4409 = vst.msk [vmem:[%s7317_s10] sm:$0xf] %vm258_vm0, %v4747_v45  ;;  %v4748_v18 = vpack.c.bf16 %v4250_v34, %v4250_v34  ;;  %v4931_v8 = vpop.f32.mrb[36].mxu1 }
 0x328   : > { %v4932_v48 = vpop.f32.mrb[37].mxu1 }
 0x329   : > { %4410 = vst.msk [vmem:[%s7317_s10 + $0x4] sm:$0xf] %vm258_vm0, %v4748_v18  ;;  %v4933_v51 = vadd.f32 %v4932_v48, %v4931_v8  ;;  %v4934_v31 = vpop.f32.mrb[38].mxu1 }
 0x32a   : > { %v4935_v61 = vpop.f32.mrb[39].mxu1 }
 0x32b   : > { %v3938_v11 = vadd.f32 %v4933_v51, %v7304_v28  ;;  %v4936_v32 = vadd.f32 %v4935_v61, %v4934_v31  ;;  %v5262_v51 = vld [vmem:[%s5566_s23 + $0x18] sm:$0xf] }
 0x32c   : > { %v4223_v31 = vunpack.c.l.bf16 %v5262_v51 }
 0x32d   : > { %v4099_v33 = vadd.f32 %v7192_v19, %v3938_v11  ;;  %v3941_v44 = vadd.f32 %v4936_v32, %v7304_v28 }
 0x32f   : > { %v4251_v56 = vadd.f32 %v4219_v59, %v4099_v33  ;;  %v4102_v50 = vadd.f32 %v7196_v22, %v3941_v44  ;;  %v4224_v59 = vunpack.c.l.bf16 %v5263_v43 }
 0x330   : > { %v7329_v49 = vpop.f32.mrb[88].mxu0 }
 0x331   : > { %v7331_v20 = vpop.f32.mrb[89].mxu0  ;;  %v4749_v29 = vpack.c.bf16 %v4251_v56, %v4251_v56  ;;  %v4252_v42 = vadd.f32 %v4220_v37, %v4102_v50 }
 0x332   : > { %v7333_v54 = vpop.f32.mrb[90].mxu0 }
 0x333   : > { %v7335_v41 = vpop.f32.mrb[91].mxu0  ;;  %4411 = vst.msk [vmem:[%s7317_s10 + $0x8] sm:$0xf] %vm258_vm0, %v4749_v29  ;;  %v4750_v19 = vpack.c.bf16 %v4252_v42, %v4252_v42  ;;  %v4937_v7 = vpop.f32.mrb[40].mxu1 }
 0x334   : > { %v4938_v14 = vpop.f32.mrb[41].mxu1 }
 0x335   : > { %4412 = vst.msk [vmem:[%s7317_s10 + $0xc] sm:$0xf] %vm258_vm0, %v4750_v19  ;;  %v4939_v22 = vadd.f32 %v4938_v14, %v4937_v7  ;;  %v4940_v15 = vpop.f32.mrb[42].mxu1  ;;  %v5264_v7 = vld [vmem:[%s5566_s23 + $0x20] sm:$0xf] }
 0x336   : > { %v4941_v60 = vpop.f32.mrb[43].mxu1  ;;  %v4225_v14 = vunpack.c.l.bf16 %v5264_v7 }
 0x337   : > { %v3946_v62 = vadd.f32 %v4939_v22, %v7304_v28  ;;  %v4942_v10 = vadd.f32 %v4941_v60, %v4940_v15  ;;  %v5265_v60 = vld [vmem:[%s5566_s23 + $0x24] sm:$0xf] }
 0x339   : > { %v4107_v12 = vadd.f32 %v7209_v53, %v3946_v62  ;;  %v3949_v47 = vadd.f32 %v4942_v10, %v7304_v28  ;;  %v4226_v62 = vunpack.c.l.bf16 %v5265_v60 }
 0x33b   : > { %v4253_v38 = vadd.f32 %v4221_v52, %v4107_v12  ;;  %v4110_v0 = vadd.f32 %v7215_v24, %v3949_v47 }
 0x33d   : > { %v4751_v26 = vpack.c.bf16 %v4253_v38, %v4253_v38  ;;  %v4254_v3 = vadd.f32 %v4222_v55, %v4110_v0 }
 0x33f   : > { %4413 = vst.msk [vmem:[%s7317_s10 + $0x10] sm:$0xf] %vm258_vm0, %v4751_v26  ;;  %v4752_v13 = vpack.c.bf16 %v4254_v3, %v4254_v3  ;;  %v4943_v45 = vpop.f32.mrb[44].mxu1  ;;  %v5266_v3 = vld [vmem:[%s5566_s23 + $0x28] sm:$0xf] }
 0x340   : > { %v4944_v34 = vpop.f32.mrb[45].mxu1 }
 0x341   : > { %4414 = vst.msk [vmem:[%s7317_s10 + $0x14] sm:$0xf] %vm258_vm0, %v4752_v13  ;;  %v4945_v53 = vadd.f32 %v4944_v34, %v4943_v45  ;;  %v4946_v18 = vpop.f32.mrb[46].mxu1  ;;  %v4227_v13 = vunpack.c.l.bf16 %v5266_v3 }
 0x342   : > { %v4947_v8 = vpop.f32.mrb[47].mxu1 }
 0x343   : > { %v3954_v48 = vadd.f32 %v4945_v53, %v7304_v28  ;;  %v4948_v24 = vadd.f32 %v4947_v8, %v4946_v18  ;;  %v5267_v53 = vld [vmem:[%s5566_s23 + $0x2c] sm:$0xf] }
 0x344   : > { %v4228_v18 = vunpack.c.l.bf16 %v5267_v53 }
 0x345   : > { %v4115_v61 = vadd.f32 %v7207_v63, %v3954_v48  ;;  %v3957_v11 = vadd.f32 %v4948_v24, %v7304_v28 }
 0x347   : > { %v4255_v32 = vadd.f32 %v4223_v31, %v4115_v61  ;;  %v4118_v33 = vadd.f32 %v7211_v27, %v3957_v11 }
 0x349   : > { %v4753_v44 = vpack.c.bf16 %v4255_v32, %v4255_v32  ;;  %v4256_v1 = vadd.f32 %v4224_v59, %v4118_v33  ;;  %v5268_v33 = vld [vmem:[%s5566_s23 + $0x30] sm:$0xf] }
 0x34b   : > { %4415 = vst.msk [vmem:[%s7317_s10 + $0x18] sm:$0xf] %vm258_vm0, %v4753_v44  ;;  %v4754_v37 = vpack.c.bf16 %v4256_v1, %v4256_v1  ;;  %v4949_v56 = vpop.f32.mrb[48].mxu1  ;;  %v4229_v44 = vunpack.c.l.bf16 %v5268_v33 }
 0x34c   : > { %v4950_v50 = vpop.f32.mrb[49].mxu1 }
 0x34d   : > { %4416 = vst.msk [vmem:[%s7317_s10 + $0x1c] sm:$0xf] %vm258_vm0, %v4754_v37  ;;  %v4951_v63 = vadd.f32 %v4950_v50, %v4949_v56  ;;  %v4952_v29 = vpop.f32.mrb[50].mxu1  ;;  %v5269_v56 = vld [vmem:[%s5566_s23 + $0x34] sm:$0xf] }
 0x34e   : > { %v4953_v42 = vpop.f32.mrb[51].mxu1  ;;  %v4230_v50 = vunpack.c.l.bf16 %v5269_v56 }
 0x34f   : > { %v3962_v19 = vadd.f32 %v4951_v63, %v7304_v28  ;;  %v4954_v27 = vadd.f32 %v4953_v42, %v4952_v29 }
 0x351   : > { %v4123_v22 = vadd.f32 %v7233_v58, %v3962_v19  ;;  %v3965_v15 = vadd.f32 %v4954_v27, %v7304_v28 }
 0x353   : > { %v4257_v36 = vadd.f32 %v4225_v14, %v4123_v22  ;;  %v4126_v52 = vadd.f32 %v7237_v35, %v3965_v15 }
 0x355   : > { %v4755_v10 = vpack.c.bf16 %v4257_v36, %v4257_v36  ;;  %v4258_v12 = vadd.f32 %v4226_v62, %v4126_v52  ;;  %v5270_v62 = vld [vmem:[%s5566_s23 + $0x38] sm:$0xf] }
 0x356   : > { %v4231_v36 = vunpack.c.l.bf16 %v5270_v62  ;;  %v5276_v62 = vld [vmem:[%s5566_s23 + $0x50] sm:$0xf] }
 0x357   : > { %4417 = vst.msk [vmem:[%s7317_s10 + $0x20] sm:$0xf] %vm258_vm0, %v4755_v10  ;;  %v4756_v47 = vpack.c.bf16 %v4258_v12, %v4258_v12  ;;  %v4955_v30 = vpop.f32.mrb[52].mxu1  ;;  %v5271_v12 = vld [vmem:[%s5566_s23 + $0x3c] sm:$0xf] }
 0x358   : > { %v4956_v55 = vpop.f32.mrb[53].mxu1 }
 0x359   : > { %4418 = vst.msk [vmem:[%s7317_s10 + $0x24] sm:$0xf] %vm258_vm0, %v4756_v47  ;;  %v4957_v58 = vadd.f32 %v4956_v55, %v4955_v30  ;;  %v4958_v38 = vpop.f32.mrb[54].mxu1  ;;  %v4232_v47 = vunpack.c.l.bf16 %v5271_v12 }
 0x35a   : > { %v4959_v0 = vpop.f32.mrb[55].mxu1 }
 0x35b   : > { %v3970_v26 = vadd.f32 %v4957_v58, %v7304_v28  ;;  %v4960_v35 = vadd.f32 %v4959_v0, %v4958_v38 }
 0x35d   : > { %v4131_v45 = vadd.f32 %v7231_v23, %v3970_v26  ;;  %v3973_v34 = vadd.f32 %v4960_v35, %v7304_v28 }
 0x35f   : > { %v4259_v8 = vadd.f32 %v4227_v13, %v4131_v45  ;;  %v4134_v48 = vadd.f32 %v7235_v40, %v3973_v34  ;;  %v5272_v34 = vld [vmem:[%s5566_s23 + $0x40] sm:$0xf] }
 0x360   : > { %v4233_v53 = vunpack.c.l.bf16 %v5272_v34 }
 0x361   : > { %v4757_v51 = vpack.c.bf16 %v4259_v8, %v4259_v8  ;;  %v4260_v31 = vadd.f32 %v4228_v18, %v4134_v48  ;;  %v5273_v48 = vld [vmem:[%s5566_s23 + $0x44] sm:$0xf] }
 0x363   : > { %4419 = vst.msk [vmem:[%s7317_s10 + $0x28] sm:$0xf] %vm258_vm0, %v4757_v51  ;;  %v4758_v24 = vpack.c.bf16 %v4260_v31, %v4260_v31  ;;  %v4961_v61 = vpop.f32.mrb[56].mxu1  ;;  %v4234_v51 = vunpack.c.l.bf16 %v5273_v48 }
 0x364   : > { %v4962_v11 = vpop.f32.mrb[57].mxu1 }
 0x365   : > { %4420 = vst.msk [vmem:[%s7317_s10 + $0x2c] sm:$0xf] %vm258_vm0, %v4758_v24  ;;  %v4963_v23 = vadd.f32 %v4962_v11, %v4961_v61  ;;  %v4964_v43 = vpop.f32.mrb[58].mxu1 }
 0x366   : > { %v4965_v59 = vpop.f32.mrb[59].mxu1 }
 0x367   : > { %v3978_v32 = vadd.f32 %v4963_v23, %v7304_v28  ;;  %v4966_v40 = vadd.f32 %v4965_v59, %v4964_v43 }
 0x369   : > { %v4139_v1 = vadd.f32 %v7257_v17, %v3978_v32  ;;  %v3981_v37 = vadd.f32 %v4966_v40, %v7304_v28  ;;  %v5274_v40 = vld [vmem:[%s5566_s23 + $0x48] sm:$0xf] }
 0x36b   : > { %v4261_v63 = vadd.f32 %v4229_v44, %v4139_v1  ;;  %v4142_v29 = vadd.f32 %v7261_v39, %v3981_v37  ;;  %v4235_v1 = vunpack.c.l.bf16 %v5274_v40  ;;  %v5281_v40 = vld [vmem:[%s5566_s23 + $0x64] sm:$0xf] }
 0x36d   : > { %v4759_v42 = vpack.c.bf16 %v4261_v63, %v4261_v63  ;;  %v4262_v19 = vadd.f32 %v4230_v50, %v4142_v29  ;;  %v5275_v50 = vld [vmem:[%s5566_s23 + $0x4c] sm:$0xf] }
 0x36e   : > { %v4236_v63 = vunpack.c.l.bf16 %v5275_v50 }
 0x36f   : > { %4421 = vst.msk [vmem:[%s7317_s10 + $0x30] sm:$0xf] %vm258_vm0, %v4759_v42  ;;  %v4760_v7 = vpack.c.bf16 %v4262_v19, %v4262_v19  ;;  %v4967_v14 = vpop.f32.mrb[60].mxu1 }
 0x370   : > { %v4968_v27 = vpop.f32.mrb[61].mxu1 }
 0x371   : > { %4422 = vst.msk [vmem:[%s7317_s10 + $0x34] sm:$0xf] %vm258_vm0, %v4760_v7  ;;  %v4969_v17 = vadd.f32 %v4968_v27, %v4967_v14  ;;  %v4970_v22 = vpop.f32.mrb[62].mxu1 }
 0x372   : > { %v4971_v15 = vpop.f32.mrb[63].mxu1 }
 0x373   : > { %v3986_v60 = vadd.f32 %v4969_v17, %v7304_v28  ;;  %v4972_v39 = vadd.f32 %v4971_v15, %v4970_v22 }
 0x375   : > { %v4147_v52 = vadd.f32 %v7255_v4, %v3986_v60  ;;  %v3989_v10 = vadd.f32 %v4972_v39, %v7304_v28 }
 0x377   : > { %v4263_v30 = vadd.f32 %v4231_v36, %v4147_v52  ;;  %v4150_v55 = vadd.f32 %v7259_v6, %v3989_v10  ;;  %v4237_v36 = vunpack.c.l.bf16 %v5276_v62  ;;  %v5277_v10 = vld [vmem:[%s5566_s23 + $0x54] sm:$0xf] }
 0x378   : > { %v4238_v12 = vunpack.c.l.bf16 %v5277_v10 }
 0x379   : > { %v4761_v58 = vpack.c.bf16 %v4263_v30, %v4263_v30  ;;  %v4264_v38 = vadd.f32 %v4232_v47, %v4150_v55 }
 0x37b   : > { %4423 = vst.msk [vmem:[%s7317_s10 + $0x38] sm:$0xf] %vm258_vm0, %v4761_v58  ;;  %v4762_v0 = vpack.c.bf16 %v4264_v38, %v4264_v38  ;;  %v4973_v26 = vpop.f32.mrb[64].mxu1 }
 0x37c   : > { %v4974_v3 = vpop.f32.mrb[65].mxu1 }
 0x37d   : > { %4424 = vst.msk [vmem:[%s7317_s10 + $0x3c] sm:$0xf] %vm258_vm0, %v4762_v0  ;;  %v4975_v4 = vadd.f32 %v4974_v3, %v4973_v26  ;;  %v4976_v13 = vpop.f32.mrb[66].mxu1 }
 0x37e   : > { %v4977_v35 = vpop.f32.mrb[67].mxu1 }
 0x37f   : > { %v3994_v45 = vadd.f32 %v4975_v4, %v7304_v28  ;;  %v4978_v6 = vadd.f32 %v4977_v35, %v4976_v13  ;;  %v5278_v35 = vld [vmem:[%s5566_s23 + $0x58] sm:$0xf] }
 0x381   : > { %v4155_v18 = vadd.f32 %v7286_v21, %v3994_v45  ;;  %v3997_v8 = vadd.f32 %v4978_v6, %v7304_v28  ;;  %v4239_v45 = vunpack.c.l.bf16 %v5278_v35  ;;  %v5279_v6 = vld [vmem:[%s5566_s23 + $0x5c] sm:$0xf] }
 0x383   : > { %v4265_v31 = vadd.f32 %v4233_v53, %v4155_v18  ;;  %v4158_v24 = vadd.f32 %v7291_v57, %v3997_v8  ;;  %v4240_v18 = vunpack.c.l.bf16 %v5279_v6 }
 0x385   : > { %v4763_v61 = vpack.c.bf16 %v4265_v31, %v4265_v31  ;;  %v4266_v11 = vadd.f32 %v4234_v51, %v4158_v24 }
 0x387   : > { %4425 = vst.msk [vmem:[%s7317_s10 + $0x40] sm:$0xf] %vm258_vm0, %v4763_v61  ;;  %v4764_v23 = vpack.c.bf16 %v4266_v11, %v4266_v11  ;;  %v4979_v43 = vpop.f32.mrb[68].mxu1 }
 0x388   : > { %v4980_v59 = vpop.f32.mrb[69].mxu1 }
 0x389   : > { %4426 = vst.msk [vmem:[%s7317_s10 + $0x44] sm:$0xf] %vm258_vm0, %v4764_v23  ;;  %v4981_v21 = vadd.f32 %v4980_v59, %v4979_v43  ;;  %v4982_v32 = vpop.f32.mrb[70].mxu1 }
 0x38a   : > { %v4983_v33 = vpop.f32.mrb[71].mxu1 }
 0x38b   : > { %v4002_v44 = vadd.f32 %v4981_v21, %v7304_v28  ;;  %v4984_v57 = vadd.f32 %v4983_v33, %v4982_v32  ;;  %v5280_v21 = vld [vmem:[%s5566_s23 + $0x60] sm:$0xf] }
 0x38c   : > { %v4241_v32 = vunpack.c.l.bf16 %v5280_v21 }
 0x38d   : > { %v4163_v37 = vadd.f32 %v7284_v5, %v4002_v44  ;;  %v4005_v56 = vadd.f32 %v4984_v57, %v7304_v28 }
 0x38f   : > { %v4267_v29 = vadd.f32 %v4235_v1, %v4163_v37  ;;  %v4166_v42 = vadd.f32 %v7289_v25, %v4005_v56  ;;  %v4242_v1 = vunpack.c.l.bf16 %v5281_v40 }
 0x391   : > { %v4765_v19 = vpack.c.bf16 %v4267_v29, %v4267_v29  ;;  %v4268_v7 = vadd.f32 %v4236_v63, %v4166_v42 }
 0x393   : > { %4427 = vst.msk [vmem:[%s7317_s10 + $0x48] sm:$0xf] %vm258_vm0, %v4765_v19  ;;  %v4766_v14 = vpack.c.bf16 %v4268_v7, %v4268_v7  ;;  %v4985_v27 = vpop.f32.mrb[72].mxu1 }
 0x394   : > { %v4986_v17 = vpop.f32.mrb[73].mxu1 }
 0x395   : > { %4428 = vst.msk [vmem:[%s7317_s10 + $0x4c] sm:$0xf] %vm258_vm0, %v4766_v14  ;;  %v4987_v5 = vadd.f32 %v4986_v17, %v4985_v27  ;;  %v4988_v22 = vpop.f32.mrb[74].mxu1  ;;  %v5282_v27 = vld [vmem:[%s5566_s23 + $0x68] sm:$0xf] }
 0x396   : > { %v4989_v15 = vpop.f32.mrb[75].mxu1  ;;  %v4243_v17 = vunpack.c.l.bf16 %v5282_v27 }
 0x397   : > { %v4010_v60 = vadd.f32 %v4987_v5, %v7304_v28  ;;  %v4990_v25 = vadd.f32 %v4989_v15, %v4988_v22  ;;  %v5283_v15 = vld [vmem:[%s5566_s23 + $0x6c] sm:$0xf] }
 0x399   : > { %v4171_v39 = vadd.f32 %v7295_v2, %v4010_v60  ;;  %v4013_v52 = vadd.f32 %v4990_v25, %v7304_v28  ;;  %v4244_v60 = vunpack.c.l.bf16 %v5283_v15 }
 0x39b   : > { %v4269_v47 = vadd.f32 %v4237_v36, %v4171_v39  ;;  %v4174_v30 = vadd.f32 %v7299_v16, %v4013_v52 }
 0x39d   : > { %v4767_v55 = vpack.c.bf16 %v4269_v47, %v4269_v47  ;;  %v4270_v58 = vadd.f32 %v4238_v12, %v4174_v30 }
 0x39f   : > { %4429 = vst.msk [vmem:[%s7317_s10 + $0x50] sm:$0xf] %vm258_vm0, %v4767_v55  ;;  %v4768_v38 = vpack.c.bf16 %v4270_v58, %v4270_v58  ;;  %v4991_v0 = vpop.f32.mrb[76].mxu1 }
 0x3a0   : > { %v4992_v26 = vpop.f32.mrb[77].mxu1 }
 0x3a1   : > { %4430 = vst.msk [vmem:[%s7317_s10 + $0x54] sm:$0xf] %vm258_vm0, %v4768_v38  ;;  %v4993_v2 = vadd.f32 %v4992_v26, %v4991_v0  ;;  %v4994_v3 = vpop.f32.mrb[78].mxu1 }
 0x3a2   : > { %v4995_v4 = vpop.f32.mrb[79].mxu1 }
 0x3a3   : > { %v4018_v13 = vadd.f32 %v4993_v2, %v7304_v28  ;;  %v4996_v16 = vadd.f32 %v4995_v4, %v4994_v3  ;;  %v5284_v4 = vld [vmem:[%s5566_s23 + $0x78] sm:$0xf] }
 0x3a5   : > { %v4179_v34 = vadd.f32 %v7293_v9, %v4018_v13  ;;  %v4021_v53 = vadd.f32 %v4996_v16, %v7304_v28  ;;  %v4247_v13 = vunpack.c.l.bf16 %v5284_v4  ;;  %v5285_v16 = vld [vmem:[%s5566_s23 + $0x70] sm:$0xf] }
 0x3a7   : > { %v4271_v8 = vadd.f32 %v4239_v45, %v4179_v34  ;;  %v4182_v48 = vadd.f32 %v7297_v46, %v4021_v53  ;;  %v4245_v34 = vunpack.c.l.bf16 %v5285_v16 }
 0x3a9   : > { %v4769_v51 = vpack.c.bf16 %v4271_v8, %v4271_v8  ;;  %v4272_v31 = vadd.f32 %v4240_v18, %v4182_v48  ;;  %v5286_v8 = vld [vmem:[%s5566_s23 + $0x7c] sm:$0xf] }
 0x3aa   : > { %v4248_v48 = vunpack.c.l.bf16 %v5286_v8 }
 0x3ab   : > { %4431 = vst.msk [vmem:[%s7317_s10 + $0x58] sm:$0xf] %vm258_vm0, %v4769_v51  ;;  %v4770_v24 = vpack.c.bf16 %v4272_v31, %v4272_v31  ;;  %v4997_v61 = vpop.f32.mrb[80].mxu1 }
 0x3ac   : > { %v4998_v11 = vpop.f32.mrb[81].mxu1 }
 0x3ad   : > { %4432 = vst.msk [vmem:[%s7317_s10 + $0x5c] sm:$0xf] %vm258_vm0, %v4770_v24  ;;  %v4999_v9 = vadd.f32 %v4998_v11, %v4997_v61  ;;  %v5000_v23 = vpop.f32.mrb[82].mxu1  ;;  %v5287_v61 = vld [vmem:[%s5566_s23 + $0x74] sm:$0xf] }
 0x3ae   : > { %v5001_v43 = vpop.f32.mrb[83].mxu1  ;;  %v4246_v11 = vunpack.c.l.bf16 %v5287_v61 }
 0x3af   : > { %v4026_v59 = vadd.f32 %v4999_v9, %v7304_v28  ;;  %v5002_v46 = vadd.f32 %v5001_v43, %v5000_v23 }
 0x3b1   : > { %v4187_v33 = vadd.f32 %v7331_v20, %v4026_v59  ;;  %v4029_v44 = vadd.f32 %v5002_v46, %v7304_v28 }
 0x3b3   : > { %v4273_v57 = vadd.f32 %v4241_v32, %v4187_v33  ;;  %v4190_v37 = vadd.f32 %v7335_v41, %v4029_v44 }
 0x3b5   : > { %v4771_v56 = vpack.c.bf16 %v4273_v57, %v4273_v57  ;;  %v4274_v50 = vadd.f32 %v4242_v1, %v4190_v37 }
 0x3b7   : > { %4433 = vst.msk [vmem:[%s7317_s10 + $0x60] sm:$0xf] %vm258_vm0, %v4771_v56  ;;  %v4772_v63 = vpack.c.bf16 %v4274_v50, %v4274_v50  ;;  %v5003_v29 = vpop.f32.mrb[84].mxu1 }
 0x3b8   : > { %v5004_v42 = vpop.f32.mrb[85].mxu1 }
 0x3b9   : > { %4434 = vst.msk [vmem:[%s7317_s10 + $0x64] sm:$0xf] %vm258_vm0, %v4772_v63  ;;  %v5005_v20 = vadd.f32 %v5004_v42, %v5003_v29  ;;  %v5006_v19 = vpop.f32.mrb[86].mxu1 }
 0x3ba   : > { %v5007_v7 = vpop.f32.mrb[87].mxu1 }
 0x3bb   : > { %v4034_v14 = vadd.f32 %v5005_v20, %v7304_v28  ;;  %v5008_v41 = vadd.f32 %v5007_v7, %v5006_v19 }
 0x3bd   : > { %v4195_v5 = vadd.f32 %v7329_v49, %v4034_v14  ;;  %v4037_v22 = vadd.f32 %v5008_v41, %v7304_v28 }
 0x3bf   : > { %v4275_v62 = vadd.f32 %v4243_v17, %v4195_v5  ;;  %v4198_v36 = vadd.f32 %v7333_v54, %v4037_v22 }
 0x3c1   : > { %v4773_v25 = vpack.c.bf16 %v4275_v62, %v4275_v62  ;;  %v4276_v39 = vadd.f32 %v4244_v60, %v4198_v36 }
 0x3c3   : > { %4435 = vst.msk [vmem:[%s7317_s10 + $0x68] sm:$0xf] %vm258_vm0, %v4773_v25  ;;  %v4774_v52 = vpack.c.bf16 %v4276_v39, %v4276_v39  ;;  %v5009_v10 = vpop.f32.mrb[88].mxu1 }
 0x3c4   : > { %v5010_v12 = vpop.f32.mrb[89].mxu1 }
 0x3c5   : > { %4436 = vst.msk [vmem:[%s7317_s10 + $0x6c] sm:$0xf] %vm258_vm0, %v4774_v52  ;;  %v5011_v47 = vadd.f32 %v5010_v12, %v5009_v10  ;;  %v5012_v49 = vpop.f32.mrb[90].mxu1 }
 0x3c6   : > { %v5013_v30 = vpop.f32.mrb[91].mxu1 }
 0x3c7   : > { %v5014_v55 = vadd.f32 %v5013_v30, %v5012_v49  ;;  %v4042_v45 = vadd.f32 %v5011_v47, %v7304_v28 }
 0x3c9   : > { %v4045_v24 = vadd.f32 %v5014_v55, %v7304_v28 }
 0x3cb   : > { %v5015_v58 = vpop.f32.mrb[92].mxu1 }
 0x3cc   : > { %v5016_v38 = vpop.f32.mrb[93].mxu1 }
 0x3cd   : > { %v5017_v0 = vadd.f32 %v5016_v38, %v5015_v58  ;;  %v5018_v54 = vpop.f32.mrb[94].mxu1 }
 0x3ce   : > { %v5019_v26 = vpop.f32.mrb[95].mxu1 }
 0x3cf   : > { %v5020_v2 = vadd.f32 %v5019_v26, %v5018_v54  ;;  %v4050_v3 = vadd.f32 %v5017_v0, %v7304_v28 }
 0x3d1   : > { %v4053_v18 = vadd.f32 %v5020_v2, %v7304_v28 }
 0x3d3   : > { %v5109_v35 = vpop.f32.mrb[96].mxu1 }
 0x3d4   : > { %v4211_v53 = vadd.f32 %v5109_v35, %v4050_v3  ;;  %v4202_v6 = vpop.f32.mrb[97].mxu1 }
 0x3d5   : > { %v4203_v51 = vadd.f32 %v4202_v6, %v4042_v45  ;;  %v5110_v31 = vpop.f32.mrb[98].mxu1 }
 0x3d6   : > { %v4279_v9 = vadd.f32 %v4247_v13, %v4211_v53  ;;  %v4214_v23 = vadd.f32 %v5110_v31, %v4053_v18  ;;  %v4205_v43 = vpop.f32.mrb[99].mxu1 }
 0x3d7   : > { %v4277_v59 = vadd.f32 %v4245_v34, %v4203_v51  ;;  %v4206_v21 = vadd.f32 %v4205_v43, %v4045_v24 }
 0x3d8   : > { %v4777_v32 = vpack.c.bf16 %v4279_v9, %v4279_v9  ;;  %v4280_v46 = vadd.f32 %v4248_v48, %v4214_v23 }
 0x3d9   : > { %v4775_v33 = vpack.c.bf16 %v4277_v59, %v4277_v59  ;;  %v4278_v44 = vadd.f32 %v4246_v11, %v4206_v21 }
 0x3da   : > { %4439 = vst.msk [vmem:[%s7317_s10 + $0x78] sm:$0xf] %vm258_vm0, %v4777_v32  ;;  %v4778_v40 = vpack.c.bf16 %v4280_v46, %v4280_v46 }
 0x3db   : > { %4437 = vst.msk [vmem:[%s7317_s10 + $0x70] sm:$0xf] %vm258_vm0, %v4775_v33  ;;  %v4776_v1 = vpack.c.bf16 %v4278_v44, %v4278_v44 }
 0x3dc   : > { %4440 = vst.msk [vmem:[%s7317_s10 + $0x7c] sm:$0xf] %vm258_vm0, %v4778_v40 }
 0x3dd   : > { %4438 = vst.msk [vmem:[%s7317_s10 + $0x74] sm:$0xf] %vm258_vm0, %v4776_v1 }
 0x3de PF: > { %s15_s18 = sadd.s32 1, %s5294_s18  }
 0x3df   : > { %p12_p4 = scmp.ge.s32.totalorder %s15_s18, 4  }
 0x3e1   :  { %14 = sbr.rel (!%p12_p4) target bundleno = 1 (0x1), region = 72 }

</bundles_post_ra>
